<compile_context>
chip_gen: v5e
topology: v5e:2x2
jax: 0.10.0
libtpu: 0.0.40
codegen_flags: <defaults>
</compile_context>

<pallas_src>
import numpy as np
import jax
import jax.numpy as jnp
from jax import lax
from jax.experimental import pallas as pl
from jax.experimental.pallas import tpu as pltpu

# ----------------------------------------------------------------------------
# Fixed LeNet geometry (32x32 input is required by the 16*5*5 flatten).
# ----------------------------------------------------------------------------
IMG = 32
KS = 5
C_IN, C1, C2 = 3, 6, 16
HW0 = IMG * IMG                          # 1024 pixels per channel
XPAD = 1152                              # padded row so width-896 reads fit
CW1 = 896                                # conv1 computed width (valid = 892)
Q1 = 2 * 13 * IMG + 2 * 13 + 1           # 859: un-compacted pool1 width
CW2 = 2 * (9 * IMG + 9) + 1              # 595: un-compacted conv2 width
Q2 = 4 * (4 * IMG + 4) + 1               # 529: un-compacted pool2 width
P2 = 5
N2 = P2 * P2                             # 25 features per channel after pool2
FC1, FC2 = 120, 84
OUT_PAD = 128                            # lane-dense logits store


# ----------------------------------------------------------------------------
# Fused kernel: one grid step == one block of `bt` images.
# ----------------------------------------------------------------------------
def _lenet_kernel(x_ref, w1_ref, b1_ref, w2_ref, b2_ref, s2_ref,
                  fc1w_ref, fc1b_ref, fc2w_ref, fc2b_ref, fc3w_ref, fc3b_ref,
                  o_ref, a1_ref, m1_ref, a2_ref, feat_ref):
    f32 = jnp.float32
    bt = o_ref.shape[0]                  # images in this block (static)

    # ---------------- per-image conv/pool pipeline (all in VMEM) -------------
    def conv_body(b, carry):
        # conv1 + bias + ReLU: (3, 32x32) -> (6, 896) on the 32-pitch grid.
        acc1 = jnp.zeros((C1, CW1), f32)
        for di in range(KS):
            for dj in range(KS):
                xs = x_ref[b, :, pl.ds(di * IMG + dj, CW1)]          # (3, 896)
                acc1 = acc1 + jnp.dot(w1_ref[di * KS + dj], xs,
                                      preferred_element_type=f32)
        a1_ref[...] = jnp.maximum(acc1 + b1_ref[...], 0.0)

        # maxpool1 (2x2/2) kept on the stride-2 sites of the 32-pitch grid
        # (NO compaction matmul; valid outputs live at even indices 2*(r*32+s)).
        m1_ref[...] = jnp.maximum(
            jnp.maximum(a1_ref[:, pl.ds(0, Q1)], a1_ref[:, pl.ds(1, Q1)]),
            jnp.maximum(a1_ref[:, pl.ds(IMG, Q1)],
                        a1_ref[:, pl.ds(IMG + 1, Q1)]))

        # conv2 + bias + ReLU directly on the un-compacted stride-2 grid:
        # shift offsets are 2*(di*32+dj); valid outputs sit at 2*(i*32+j).
        acc2 = jnp.zeros((C2, CW2), f32)
        for di in range(KS):
            for dj in range(KS):
                ms = m1_ref[:, pl.ds(2 * (di * IMG + dj), CW2)]      # (6, 595)
                acc2 = acc2 + jnp.dot(w2_ref[di * KS + dj], ms,
                                      preferred_element_type=f32)
        a2_ref[...] = jnp.maximum(acc2 + b2_ref[...], 0.0)

        # maxpool2 on the stride-4 sites + tiny (529,25) gather-matmul
        # compaction -> (16, 25) in torch's (c, h, w) flatten order.
        m2 = jnp.maximum(
            jnp.maximum(a2_ref[:, pl.ds(0, Q2)], a2_ref[:, pl.ds(2, Q2)]),
            jnp.maximum(a2_ref[:, pl.ds(2 * IMG, Q2)],
                        a2_ref[:, pl.ds(2 * IMG + 2, Q2)]))
        row = pl.multiple_of(b * C2, C2)
        feat_ref[pl.ds(row, C2), :] = jnp.dot(m2, s2_ref[...],
                                              preferred_element_type=f32)
        return carry

    lax.fori_loop(0, bt, conv_body, 0)

    # ---------------- FC stack, batched over the whole block (M = bt) --------
    h = jnp.zeros((bt, FC1), f32)
    for c in range(C2):
        # rows c, c+16, ... of the image-major feature slab = channel c for
        # every image in the block -> one (bt, 25) @ (25, 120) matmul.
        lhs_c = feat_ref[pl.ds(c, bt, stride=C2), :]
        h = h + jnp.dot(lhs_c, fc1w_ref[c], preferred_element_type=f32)
    h = jnp.maximum(h + fc1b_ref[...], 0.0)
    h = jnp.maximum(jnp.dot(h, fc2w_ref[...], preferred_element_type=f32)
                    + fc2b_ref[...], 0.0)
    o_ref[...] = (jnp.dot(h, fc3w_ref[...], preferred_element_type=f32)
                  + fc3b_ref[...])


# ----------------------------------------------------------------------------
# Host-side helpers (one-time parameter preparation, wrapper, reference)
# ----------------------------------------------------------------------------
def _pool2_select_matrix():
    """S2[q, h*5+w] = 1 iff q == 4*(h*32 + w): stride-4 compaction as matmul."""
    s = np.zeros((Q2, N2), np.float32)
    for h in range(P2):
        for w in range(P2):
            s[4 * (h * IMG + w), h * P2 + w] = 1.0
    return jnp.asarray(s)


def init_lenet_params(key, num_classes=10):
    ks = jax.random.split(key, 10)
    s = 0.1
    return {
        "conv1_w": s * jax.random.normal(ks[0], (C1, C_IN, KS, KS), jnp.float32),
        "conv1_b": s * jax.random.normal(ks[1], (C1,), jnp.float32),
        "conv2_w": s * jax.random.normal(ks[2], (C2, C1, KS, KS), jnp.float32),
        "conv2_b": s * jax.random.normal(ks[3], (C2,), jnp.float32),
        "fc1_w": s * jax.random.normal(ks[4], (FC1, C2 * N2), jnp.float32),
        "fc1_b": s * jax.random.normal(ks[5], (FC1,), jnp.float32),
        "fc2_w": s * jax.random.normal(ks[6], (FC2, FC1), jnp.float32),
        "fc2_b": s * jax.random.normal(ks[7], (FC2,), jnp.float32),
        "fc3_w": s * jax.random.normal(ks[8], (num_classes, FC2), jnp.float32),
        "fc3_b": s * jax.random.normal(ks[9], (num_classes,), jnp.float32),
    }


def prepare_params(params):
    """One-time conversion of torch-layout params to kernel-friendly layout."""
    nc = params["fc3_w"].shape[0]
    assert nc <= OUT_PAD
    fc3w = jnp.zeros((FC2, OUT_PAD), jnp.float32).at[:, :nc].set(params["fc3_w"].T)
    fc3b = jnp.zeros((1, OUT_PAD), jnp.float32).at[0, :nc].set(params["fc3_b"])
    return {
        "w1": jnp.transpose(params["conv1_w"], (2, 3, 0, 1)).reshape(KS * KS, C1, C_IN),
        "b1": params["conv1_b"].reshape(C1, 1),
        "w2": jnp.transpose(params["conv2_w"], (2, 3, 0, 1)).reshape(KS * KS, C2, C1),
        "b2": params["conv2_b"].reshape(C2, 1),
        "S2": _pool2_select_matrix(),
        "fc1w": params["fc1_w"].T.reshape(C2, N2, FC1),   # [c, k, f]
        "fc1b": params["fc1_b"].reshape(1, FC1),
        "fc2w": params["fc2_w"].T,
        "fc2b": params["fc2_b"].reshape(1, FC2),
        "fc3w": fc3w,
        "fc3b": fc3b,
    }


def lenet_forward(prep, x, num_classes=10, block_b=64):
    """x: (B, 3, 32, 32) float32 -> logits (B, num_classes)."""
    B = x.shape[0]
    assert x.shape[1:] == (C_IN, IMG, IMG)
    assert block_b % 8 == 0
    bt = B if B <= block_b else block_b          # images per grid step
    n_blk = -(-B // bt)
    b_pad = n_blk * bt

    xf = x.reshape(B, C_IN, HW0).astype(jnp.float32)
    xf = jnp.pad(xf, ((0, b_pad - B), (0, 0), (0, XPAD - HW0)))

    out = pl.pallas_call(
        _lenet_kernel,
        out_shape=jax.ShapeDtypeStruct((b_pad, OUT_PAD), jnp.float32),
        grid=(n_blk,),
        in_specs=[
            pl.BlockSpec((bt, C_IN, XPAD), lambda i: (i, 0, 0)),       # x block
            pl.BlockSpec((KS * KS, C1, C_IN), lambda i: (0, 0, 0)),    # w1
            pl.BlockSpec((C1, 1), lambda i: (0, 0)),                   # b1
            pl.BlockSpec((KS * KS, C2, C1), lambda i: (0, 0, 0)),      # w2
            pl.BlockSpec((C2, 1), lambda i: (0, 0)),                   # b2
            pl.BlockSpec((Q2, N2), lambda i: (0, 0)),                  # S2
            pl.BlockSpec((C2, N2, FC1), lambda i: (0, 0, 0)),          # fc1w
            pl.BlockSpec((1, FC1), lambda i: (0, 0)),                  # fc1b
            pl.BlockSpec((FC1, FC2), lambda i: (0, 0)),                # fc2w
            pl.BlockSpec((1, FC2), lambda i: (0, 0)),                  # fc2b
            pl.BlockSpec((FC2, OUT_PAD), lambda i: (0, 0)),            # fc3w
            pl.BlockSpec((1, OUT_PAD), lambda i: (0, 0)),              # fc3b
        ],
        out_specs=pl.BlockSpec((bt, OUT_PAD), lambda i: (i, 0)),
        scratch_shapes=[
            pltpu.VMEM((C1, CW1), jnp.float32),        # a1: conv1 activation
            pltpu.VMEM((C1, Q1), jnp.float32),         # m1: un-compacted pool1
            pltpu.VMEM((C2, CW2), jnp.float32),        # a2: un-compacted conv2
            pltpu.VMEM((bt * C2, N2), jnp.float32),    # feat: (b*16 + c, 25)
        ],
        compiler_params=pltpu.CompilerParams(
            dimension_semantics=("parallel",)),
    )(xf, prep["w1"], prep["b1"], prep["w2"], prep["b2"], prep["S2"],
      prep["fc1w"], prep["fc1b"], prep["fc2w"], prep["fc2b"],
      prep["fc3w"], prep["fc3b"])
    return out[:B, :num_classes]


def lenet_reference(params, x):
    """Pure-JAX (XLA) reference matching the PyTorch module."""
    prec = jax.lax.Precision.HIGHEST
    dn = ("NCHW", "OIHW", "NCHW")
    y = jax.lax.conv_general_dilated(x, params["conv1_w"], (1, 1), "VALID",
                                     dimension_numbers=dn, precision=prec)
    y = jax.nn.relu(y + params["conv1_b"][None, :, None, None])
    y = jax.lax.reduce_window(y, -jnp.inf, jax.lax.max,
                              (1, 1, 2, 2), (1, 1, 2, 2), "VALID")
    y = jax.lax.conv_general_dilated(y, params["conv2_w"], (1, 1), "VALID",
                                     dimension_numbers=dn, precision=prec)
    y = jax.nn.relu(y + params["conv2_b"][None, :, None, None])
    y = jax.lax.reduce_window(y, -jnp.inf, jax.lax.max,
                              (1, 1, 2, 2), (1, 1, 2, 2), "VALID")
    y = y.reshape(y.shape[0], -1)
    y = jax.nn.relu(jnp.dot(y, params["fc1_w"].T, precision=prec) + params["fc1_b"])
    y = jax.nn.relu(jnp.dot(y, params["fc2_w"].T, precision=prec) + params["fc2_b"])
    return jnp.dot(y, params["fc3_w"].T, precision=prec) + params["fc3_b"]


if __name__ == "__main__":
    key = jax.random.PRNGKey(0)
    pkey, xkey = jax.random.split(key)
    params = init_lenet_params(pkey, num_classes=10)
    prep = prepare_params(params)

    # LeNet's FC stack requires 32x32 spatial input (-> 16*5*5 = 400 features).
    x = jax.random.normal(xkey, (2, C_IN, IMG, IMG), jnp.float32)

    fwd = jax.jit(lambda p, xx: lenet_forward(p, xx, num_classes=10))
    out = jax.block_until_ready(fwd(prep, x))
    assert out.shape == (2, 10), out.shape
    assert bool(jnp.all(jnp.isfinite(out)))

    ref = lenet_reference(params, x)
    np.testing.assert_allclose(np.asarray(out), np.asarray(ref),
                               rtol=1e-2, atol=1e-3)

    print("KERNEL_OK")
</pallas_src>

<mosaic_0001>
module attributes {stable_mosaic.version = 11 : i64} {
  func.func @_lenet_kernel(%arg0: i32, %arg1: memref<2x3x1152xf32, #tpu.memory_space<vmem>>, %arg2: memref<25x6x3xf32, #tpu.memory_space<vmem>>, %arg3: memref<6x1xf32, #tpu.memory_space<vmem>>, %arg4: memref<25x16x6xf32, #tpu.memory_space<vmem>>, %arg5: memref<16x1xf32, #tpu.memory_space<vmem>>, %arg6: memref<529x25xf32, #tpu.memory_space<vmem>>, %arg7: memref<16x25x120xf32, #tpu.memory_space<vmem>>, %arg8: memref<1x120xf32, #tpu.memory_space<vmem>>, %arg9: memref<120x84xf32, #tpu.memory_space<vmem>>, %arg10: memref<1x84xf32, #tpu.memory_space<vmem>>, %arg11: memref<84x128xf32, #tpu.memory_space<vmem>>, %arg12: memref<1x128xf32, #tpu.memory_space<vmem>>, %arg13: memref<2x128xf32, #tpu.memory_space<vmem>>, %arg14: memref<6x896xf32, #tpu.memory_space<vmem>>, %arg15: memref<6x859xf32, #tpu.memory_space<vmem>>, %arg16: memref<16x595xf32, #tpu.memory_space<vmem>>, %arg17: memref<32x25xf32, #tpu.memory_space<vmem>>) attributes {dimension_semantics = [#tpu.dimension_semantics<parallel>], iteration_bounds = array<i64: 1>, scalar_prefetch = 0 : i64, scratch_operands = 4 : i64, tpu.core_type = #tpu.core_type<tc>, window_params = [{transform_indices = @transform_0, window_bounds = array<i64: 2, 3, 1152>}, {pipeline_mode = #tpu.pipeline_mode<synchronous>, transform_indices = @transform_1, window_bounds = array<i64: 25, 6, 3>}, {pipeline_mode = #tpu.pipeline_mode<synchronous>, transform_indices = @transform_2, window_bounds = array<i64: 6, 1>}, {pipeline_mode = #tpu.pipeline_mode<synchronous>, transform_indices = @transform_3, window_bounds = array<i64: 25, 16, 6>}, {pipeline_mode = #tpu.pipeline_mode<synchronous>, transform_indices = @transform_4, window_bounds = array<i64: 16, 1>}, {pipeline_mode = #tpu.pipeline_mode<synchronous>, transform_indices = @transform_5, window_bounds = array<i64: 529, 25>}, {pipeline_mode = #tpu.pipeline_mode<synchronous>, transform_indices = @transform_6, window_bounds = array<i64: 16, 25, 120>}, {pipeline_mode = #tpu.pipeline_mode<synchronous>, transform_indices = @transform_7, window_bounds = array<i64: 1, 120>}, {pipeline_mode = #tpu.pipeline_mode<synchronous>, transform_indices = @transform_8, window_bounds = array<i64: 120, 84>}, {pipeline_mode = #tpu.pipeline_mode<synchronous>, transform_indices = @transform_9, window_bounds = array<i64: 1, 84>}, {pipeline_mode = #tpu.pipeline_mode<synchronous>, transform_indices = @transform_10, window_bounds = array<i64: 84, 128>}, {pipeline_mode = #tpu.pipeline_mode<synchronous>, transform_indices = @transform_11, window_bounds = array<i64: 1, 128>}, {transform_indices = @transform_12, window_bounds = array<i64: 2, 128>}]} {
    %c0_i32 = arith.constant 0 : i32
    %c2_i32 = arith.constant 2 : i32
    %0 = arith.addi %c0_i32, %c2_i32 : i32
    %c1_i32 = arith.constant 1 : i32
    scf.for %arg18 = %c0_i32 to %0 step %c1_i32  : i32 {
      %cst_97 = arith.constant 0.000000e+00 : f32
      %100 = vector.broadcast %cst_97 : f32 to vector<6x896xf32>
      %101 = arith.index_cast %arg18 : i32 to index
      %c0_98 = arith.constant 0 : index
      %c0_99 = arith.constant 0 : index
      %102 = vector.load %arg1[%101, %c0_98, %c0_99] : memref<2x3x1152xf32, #tpu.memory_space<vmem>>, vector<1x3x896xf32>
      %103 = vector.shape_cast %102 : vector<1x3x896xf32> to vector<3x896xf32>
      %c0_100 = arith.constant 0 : index
      %c0_101 = arith.constant 0 : index
      %c0_102 = arith.constant 0 : index
      %104 = vector.load %arg2[%c0_100, %c0_101, %c0_102] : memref<25x6x3xf32, #tpu.memory_space<vmem>>, vector<1x6x3xf32>
      %105 = vector.shape_cast %104 : vector<1x6x3xf32> to vector<6x3xf32>
      %cst_103 = arith.constant dense<0.000000e+00> : vector<6x896xf32>
      %106 = tpu.matmul %105, %103, %cst_103 {dimension_numbers = #tpu.dot_dimension_numbers<[1], [0], [0], [1], [0, 0, 1, 1], [], []>} : vector<6x3xf32>, vector<3x896xf32>, vector<6x896xf32> -> vector<6x896xf32>
      %107 = arith.addf %100, %106 : vector<6x896xf32>
      %108 = arith.index_cast %arg18 : i32 to index
      %c0_104 = arith.constant 0 : index
      %c1_105 = arith.constant 1 : index
      %109 = vector.load %arg1[%108, %c0_104, %c1_105] : memref<2x3x1152xf32, #tpu.memory_space<vmem>>, vector<1x3x896xf32>
      %110 = vector.shape_cast %109 : vector<1x3x896xf32> to vector<3x896xf32>
      %c1_106 = arith.constant 1 : index
      %c0_107 = arith.constant 0 : index
      %c0_108 = arith.constant 0 : index
      %111 = vector.load %arg2[%c1_106, %c0_107, %c0_108] : memref<25x6x3xf32, #tpu.memory_space<vmem>>, vector<1x6x3xf32>
      %112 = vector.shape_cast %111 : vector<1x6x3xf32> to vector<6x3xf32>
      %cst_109 = arith.constant dense<0.000000e+00> : vector<6x896xf32>
      %113 = tpu.matmul %112, %110, %cst_109 {dimension_numbers = #tpu.dot_dimension_numbers<[1], [0], [0], [1], [0, 0, 1, 1], [], []>} : vector<6x3xf32>, vector<3x896xf32>, vector<6x896xf32> -> vector<6x896xf32>
      %114 = arith.addf %107, %113 : vector<6x896xf32>
      %115 = arith.index_cast %arg18 : i32 to index
      %c0_110 = arith.constant 0 : index
      %c2_111 = arith.constant 2 : index
      %116 = vector.load %arg1[%115, %c0_110, %c2_111] : memref<2x3x1152xf32, #tpu.memory_space<vmem>>, vector<1x3x896xf32>
      %117 = vector.shape_cast %116 : vector<1x3x896xf32> to vector<3x896xf32>
      %c2_112 = arith.constant 2 : index
      %c0_113 = arith.constant 0 : index
      %c0_114 = arith.constant 0 : index
      %118 = vector.load %arg2[%c2_112, %c0_113, %c0_114] : memref<25x6x3xf32, #tpu.memory_space<vmem>>, vector<1x6x3xf32>
      %119 = vector.shape_cast %118 : vector<1x6x3xf32> to vector<6x3xf32>
      %cst_115 = arith.constant dense<0.000000e+00> : vector<6x896xf32>
      %120 = tpu.matmul %119, %117, %cst_115 {dimension_numbers = #tpu.dot_dimension_numbers<[1], [0], [0], [1], [0, 0, 1, 1], [], []>} : vector<6x3xf32>, vector<3x896xf32>, vector<6x896xf32> -> vector<6x896xf32>
      %121 = arith.addf %114, %120 : vector<6x896xf32>
      %122 = arith.index_cast %arg18 : i32 to index
      %c0_116 = arith.constant 0 : index
      %c3_117 = arith.constant 3 : index
      %123 = vector.load %arg1[%122, %c0_116, %c3_117] : memref<2x3x1152xf32, #tpu.memory_space<vmem>>, vector<1x3x896xf32>
      %124 = vector.shape_cast %123 : vector<1x3x896xf32> to vector<3x896xf32>
      %c3_118 = arith.constant 3 : index
      %c0_119 = arith.constant 0 : index
      %c0_120 = arith.constant 0 : index
      %125 = vector.load %arg2[%c3_118, %c0_119, %c0_120] : memref<25x6x3xf32, #tpu.memory_space<vmem>>, vector<1x6x3xf32>
      %126 = vector.shape_cast %125 : vector<1x6x3xf32> to vector<6x3xf32>
      %cst_121 = arith.constant dense<0.000000e+00> : vector<6x896xf32>
      %127 = tpu.matmul %126, %124, %cst_121 {dimension_numbers = #tpu.dot_dimension_numbers<[1], [0], [0], [1], [0, 0, 1, 1], [], []>} : vector<6x3xf32>, vector<3x896xf32>, vector<6x896xf32> -> vector<6x896xf32>
      %128 = arith.addf %121, %127 : vector<6x896xf32>
      %129 = arith.index_cast %arg18 : i32 to index
      %c0_122 = arith.constant 0 : index
      %c4_123 = arith.constant 4 : index
      %130 = vector.load %arg1[%129, %c0_122, %c4_123] : memref<2x3x1152xf32, #tpu.memory_space<vmem>>, vector<1x3x896xf32>
      %131 = vector.shape_cast %130 : vector<1x3x896xf32> to vector<3x896xf32>
      %c4_124 = arith.constant 4 : index
      %c0_125 = arith.constant 0 : index
      %c0_126 = arith.constant 0 : index
      %132 = vector.load %arg2[%c4_124, %c0_125, %c0_126] : memref<25x6x3xf32, #tpu.memory_space<vmem>>, vector<1x6x3xf32>
      %133 = vector.shape_cast %132 : vector<1x6x3xf32> to vector<6x3xf32>
      %cst_127 = arith.constant dense<0.000000e+00> : vector<6x896xf32>
      %134 = tpu.matmul %133, %131, %cst_127 {dimension_numbers = #tpu.dot_dimension_numbers<[1], [0], [0], [1], [0, 0, 1, 1], [], []>} : vector<6x3xf32>, vector<3x896xf32>, vector<6x896xf32> -> vector<6x896xf32>
      %135 = arith.addf %128, %134 : vector<6x896xf32>
      %136 = arith.index_cast %arg18 : i32 to index
      %c0_128 = arith.constant 0 : index
      %c32 = arith.constant 32 : index
      %137 = vector.load %arg1[%136, %c0_128, %c32] : memref<2x3x1152xf32, #tpu.memory_space<vmem>>, vector<1x3x896xf32>
      %138 = vector.shape_cast %137 : vector<1x3x896xf32> to vector<3x896xf32>
      %c5_129 = arith.constant 5 : index
      %c0_130 = arith.constant 0 : index
      %c0_131 = arith.constant 0 : index
      %139 = vector.load %arg2[%c5_129, %c0_130, %c0_131] : memref<25x6x3xf32, #tpu.memory_space<vmem>>, vector<1x6x3xf32>
      %140 = vector.shape_cast %139 : vector<1x6x3xf32> to vector<6x3xf32>
      %cst_132 = arith.constant dense<0.000000e+00> : vector<6x896xf32>
      %141 = tpu.matmul %140, %138, %cst_132 {dimension_numbers = #tpu.dot_dimension_numbers<[1], [0], [0], [1], [0, 0, 1, 1], [], []>} : vector<6x3xf32>, vector<3x896xf32>, vector<6x896xf32> -> vector<6x896xf32>
      %142 = arith.addf %135, %141 : vector<6x896xf32>
      %143 = arith.index_cast %arg18 : i32 to index
      %c0_133 = arith.constant 0 : index
      %c33 = arith.constant 33 : index
      %144 = vector.load %arg1[%143, %c0_133, %c33] : memref<2x3x1152xf32, #tpu.memory_space<vmem>>, vector<1x3x896xf32>
      %145 = vector.shape_cast %144 : vector<1x3x896xf32> to vector<3x896xf32>
      %c6_134 = arith.constant 6 : index
      %c0_135 = arith.constant 0 : index
      %c0_136 = arith.constant 0 : index
      %146 = vector.load %arg2[%c6_134, %c0_135, %c0_136] : memref<25x6x3xf32, #tpu.memory_space<vmem>>, vector<1x6x3xf32>
      %147 = vector.shape_cast %146 : vector<1x6x3xf32> to vector<6x3xf32>
      %cst_137 = arith.constant dense<0.000000e+00> : vector<6x896xf32>
      %148 = tpu.matmul %147, %145, %cst_137 {dimension_numbers = #tpu.dot_dimension_numbers<[1], [0], [0], [1], [0, 0, 1, 1], [], []>} : vector<6x3xf32>, vector<3x896xf32>, vector<6x896xf32> -> vector<6x896xf32>
      %149 = arith.addf %142, %148 : vector<6x896xf32>
      %150 = arith.index_cast %arg18 : i32 to index
      %c0_138 = arith.constant 0 : index
      %c34 = arith.constant 34 : index
      %151 = vector.load %arg1[%150, %c0_138, %c34] : memref<2x3x1152xf32, #tpu.memory_space<vmem>>, vector<1x3x896xf32>
      %152 = vector.shape_cast %151 : vector<1x3x896xf32> to vector<3x896xf32>
      %c7_139 = arith.constant 7 : index
      %c0_140 = arith.constant 0 : index
      %c0_141 = arith.constant 0 : index
      %153 = vector.load %arg2[%c7_139, %c0_140, %c0_141] : memref<25x6x3xf32, #tpu.memory_space<vmem>>, vector<1x6x3xf32>
      %154 = vector.shape_cast %153 : vector<1x6x3xf32> to vector<6x3xf32>
      %cst_142 = arith.constant dense<0.000000e+00> : vector<6x896xf32>
      %155 = tpu.matmul %154, %152, %cst_142 {dimension_numbers = #tpu.dot_dimension_numbers<[1], [0], [0], [1], [0, 0, 1, 1], [], []>} : vector<6x3xf32>, vector<3x896xf32>, vector<6x896xf32> -> vector<6x896xf32>
      %156 = arith.addf %149, %155 : vector<6x896xf32>
      %157 = arith.index_cast %arg18 : i32 to index
      %c0_143 = arith.constant 0 : index
      %c35 = arith.constant 35 : index
      %158 = vector.load %arg1[%157, %c0_143, %c35] : memref<2x3x1152xf32, #tpu.memory_space<vmem>>, vector<1x3x896xf32>
      %159 = vector.shape_cast %158 : vector<1x3x896xf32> to vector<3x896xf32>
      %c8_144 = arith.constant 8 : index
      %c0_145 = arith.constant 0 : index
      %c0_146 = arith.constant 0 : index
      %160 = vector.load %arg2[%c8_144, %c0_145, %c0_146] : memref<25x6x3xf32, #tpu.memory_space<vmem>>, vector<1x6x3xf32>
      %161 = vector.shape_cast %160 : vector<1x6x3xf32> to vector<6x3xf32>
      %cst_147 = arith.constant dense<0.000000e+00> : vector<6x896xf32>
      %162 = tpu.matmul %161, %159, %cst_147 {dimension_numbers = #tpu.dot_dimension_numbers<[1], [0], [0], [1], [0, 0, 1, 1], [], []>} : vector<6x3xf32>, vector<3x896xf32>, vector<6x896xf32> -> vector<6x896xf32>
      %163 = arith.addf %156, %162 : vector<6x896xf32>
      %164 = arith.index_cast %arg18 : i32 to index
      %c0_148 = arith.constant 0 : index
      %c36 = arith.constant 36 : index
      %165 = vector.load %arg1[%164, %c0_148, %c36] : memref<2x3x1152xf32, #tpu.memory_space<vmem>>, vector<1x3x896xf32>
      %166 = vector.shape_cast %165 : vector<1x3x896xf32> to vector<3x896xf32>
      %c9_149 = arith.constant 9 : index
      %c0_150 = arith.constant 0 : index
      %c0_151 = arith.constant 0 : index
      %167 = vector.load %arg2[%c9_149, %c0_150, %c0_151] : memref<25x6x3xf32, #tpu.memory_space<vmem>>, vector<1x6x3xf32>
      %168 = vector.shape_cast %167 : vector<1x6x3xf32> to vector<6x3xf32>
      %cst_152 = arith.constant dense<0.000000e+00> : vector<6x896xf32>
      %169 = tpu.matmul %168, %166, %cst_152 {dimension_numbers = #tpu.dot_dimension_numbers<[1], [0], [0], [1], [0, 0, 1, 1], [], []>} : vector<6x3xf32>, vector<3x896xf32>, vector<6x896xf32> -> vector<6x896xf32>
      %170 = arith.addf %163, %169 : vector<6x896xf32>
      %171 = arith.index_cast %arg18 : i32 to index
      %c0_153 = arith.constant 0 : index
      %c64 = arith.constant 64 : index
      %172 = vector.load %arg1[%171, %c0_153, %c64] : memref<2x3x1152xf32, #tpu.memory_space<vmem>>, vector<1x3x896xf32>
      %173 = vector.shape_cast %172 : vector<1x3x896xf32> to vector<3x896xf32>
      %c10_154 = arith.constant 10 : index
      %c0_155 = arith.constant 0 : index
      %c0_156 = arith.constant 0 : index
      %174 = vector.load %arg2[%c10_154, %c0_155, %c0_156] : memref<25x6x3xf32, #tpu.memory_space<vmem>>, vector<1x6x3xf32>
      %175 = vector.shape_cast %174 : vector<1x6x3xf32> to vector<6x3xf32>
      %cst_157 = arith.constant dense<0.000000e+00> : vector<6x896xf32>
      %176 = tpu.matmul %175, %173, %cst_157 {dimension_numbers = #tpu.dot_dimension_numbers<[1], [0], [0], [1], [0, 0, 1, 1], [], []>} : vector<6x3xf32>, vector<3x896xf32>, vector<6x896xf32> -> vector<6x896xf32>
      %177 = arith.addf %170, %176 : vector<6x896xf32>
      %178 = arith.index_cast %arg18 : i32 to index
      %c0_158 = arith.constant 0 : index
      %c65 = arith.constant 65 : index
      %179 = vector.load %arg1[%178, %c0_158, %c65] : memref<2x3x1152xf32, #tpu.memory_space<vmem>>, vector<1x3x896xf32>
      %180 = vector.shape_cast %179 : vector<1x3x896xf32> to vector<3x896xf32>
      %c11_159 = arith.constant 11 : index
      %c0_160 = arith.constant 0 : index
      %c0_161 = arith.constant 0 : index
      %181 = vector.load %arg2[%c11_159, %c0_160, %c0_161] : memref<25x6x3xf32, #tpu.memory_space<vmem>>, vector<1x6x3xf32>
      %182 = vector.shape_cast %181 : vector<1x6x3xf32> to vector<6x3xf32>
      %cst_162 = arith.constant dense<0.000000e+00> : vector<6x896xf32>
      %183 = tpu.matmul %182, %180, %cst_162 {dimension_numbers = #tpu.dot_dimension_numbers<[1], [0], [0], [1], [0, 0, 1, 1], [], []>} : vector<6x3xf32>, vector<3x896xf32>, vector<6x896xf32> -> vector<6x896xf32>
      %184 = arith.addf %177, %183 : vector<6x896xf32>
      %185 = arith.index_cast %arg18 : i32 to index
      %c0_163 = arith.constant 0 : index
      %c66 = arith.constant 66 : index
      %186 = vector.load %arg1[%185, %c0_163, %c66] : memref<2x3x1152xf32, #tpu.memory_space<vmem>>, vector<1x3x896xf32>
      %187 = vector.shape_cast %186 : vector<1x3x896xf32> to vector<3x896xf32>
      %c12_164 = arith.constant 12 : index
      %c0_165 = arith.constant 0 : index
      %c0_166 = arith.constant 0 : index
      %188 = vector.load %arg2[%c12_164, %c0_165, %c0_166] : memref<25x6x3xf32, #tpu.memory_space<vmem>>, vector<1x6x3xf32>
      %189 = vector.shape_cast %188 : vector<1x6x3xf32> to vector<6x3xf32>
      %cst_167 = arith.constant dense<0.000000e+00> : vector<6x896xf32>
      %190 = tpu.matmul %189, %187, %cst_167 {dimension_numbers = #tpu.dot_dimension_numbers<[1], [0], [0], [1], [0, 0, 1, 1], [], []>} : vector<6x3xf32>, vector<3x896xf32>, vector<6x896xf32> -> vector<6x896xf32>
      %191 = arith.addf %184, %190 : vector<6x896xf32>
      %192 = arith.index_cast %arg18 : i32 to index
      %c0_168 = arith.constant 0 : index
      %c67 = arith.constant 67 : index
      %193 = vector.load %arg1[%192, %c0_168, %c67] : memref<2x3x1152xf32, #tpu.memory_space<vmem>>, vector<1x3x896xf32>
      %194 = vector.shape_cast %193 : vector<1x3x896xf32> to vector<3x896xf32>
      %c13_169 = arith.constant 13 : index
      %c0_170 = arith.constant 0 : index
      %c0_171 = arith.constant 0 : index
      %195 = vector.load %arg2[%c13_169, %c0_170, %c0_171] : memref<25x6x3xf32, #tpu.memory_space<vmem>>, vector<1x6x3xf32>
      %196 = vector.shape_cast %195 : vector<1x6x3xf32> to vector<6x3xf32>
      %cst_172 = arith.constant dense<0.000000e+00> : vector<6x896xf32>
      %197 = tpu.matmul %196, %194, %cst_172 {dimension_numbers = #tpu.dot_dimension_numbers<[1], [0], [0], [1], [0, 0, 1, 1], [], []>} : vector<6x3xf32>, vector<3x896xf32>, vector<6x896xf32> -> vector<6x896xf32>
      %198 = arith.addf %191, %197 : vector<6x896xf32>
      %199 = arith.index_cast %arg18 : i32 to index
      %c0_173 = arith.constant 0 : index
      %c68 = arith.constant 68 : index
      %200 = vector.load %arg1[%199, %c0_173, %c68] : memref<2x3x1152xf32, #tpu.memory_space<vmem>>, vector<1x3x896xf32>
      %201 = vector.shape_cast %200 : vector<1x3x896xf32> to vector<3x896xf32>
      %c14_174 = arith.constant 14 : index
      %c0_175 = arith.constant 0 : index
      %c0_176 = arith.constant 0 : index
      %202 = vector.load %arg2[%c14_174, %c0_175, %c0_176] : memref<25x6x3xf32, #tpu.memory_space<vmem>>, vector<1x6x3xf32>
      %203 = vector.shape_cast %202 : vector<1x6x3xf32> to vector<6x3xf32>
      %cst_177 = arith.constant dense<0.000000e+00> : vector<6x896xf32>
      %204 = tpu.matmul %203, %201, %cst_177 {dimension_numbers = #tpu.dot_dimension_numbers<[1], [0], [0], [1], [0, 0, 1, 1], [], []>} : vector<6x3xf32>, vector<3x896xf32>, vector<6x896xf32> -> vector<6x896xf32>
      %205 = arith.addf %198, %204 : vector<6x896xf32>
      %206 = arith.index_cast %arg18 : i32 to index
      %c0_178 = arith.constant 0 : index
      %c96 = arith.constant 96 : index
      %207 = vector.load %arg1[%206, %c0_178, %c96] : memref<2x3x1152xf32, #tpu.memory_space<vmem>>, vector<1x3x896xf32>
      %208 = vector.shape_cast %207 : vector<1x3x896xf32> to vector<3x896xf32>
      %c15_179 = arith.constant 15 : index
      %c0_180 = arith.constant 0 : index
      %c0_181 = arith.constant 0 : index
      %209 = vector.load %arg2[%c15_179, %c0_180, %c0_181] : memref<25x6x3xf32, #tpu.memory_space<vmem>>, vector<1x6x3xf32>
      %210 = vector.shape_cast %209 : vector<1x6x3xf32> to vector<6x3xf32>
      %cst_182 = arith.constant dense<0.000000e+00> : vector<6x896xf32>
      %211 = tpu.matmul %210, %208, %cst_182 {dimension_numbers = #tpu.dot_dimension_numbers<[1], [0], [0], [1], [0, 0, 1, 1], [], []>} : vector<6x3xf32>, vector<3x896xf32>, vector<6x896xf32> -> vector<6x896xf32>
      %212 = arith.addf %205, %211 : vector<6x896xf32>
      %213 = arith.index_cast %arg18 : i32 to index
      %c0_183 = arith.constant 0 : index
      %c97 = arith.constant 97 : index
      %214 = vector.load %arg1[%213, %c0_183, %c97] : memref<2x3x1152xf32, #tpu.memory_space<vmem>>, vector<1x3x896xf32>
      %215 = vector.shape_cast %214 : vector<1x3x896xf32> to vector<3x896xf32>
      %c16 = arith.constant 16 : index
      %c0_184 = arith.constant 0 : index
      %c0_185 = arith.constant 0 : index
      %216 = vector.load %arg2[%c16, %c0_184, %c0_185] : memref<25x6x3xf32, #tpu.memory_space<vmem>>, vector<1x6x3xf32>
      %217 = vector.shape_cast %216 : vector<1x6x3xf32> to vector<6x3xf32>
      %cst_186 = arith.constant dense<0.000000e+00> : vector<6x896xf32>
      %218 = tpu.matmul %217, %215, %cst_186 {dimension_numbers = #tpu.dot_dimension_numbers<[1], [0], [0], [1], [0, 0, 1, 1], [], []>} : vector<6x3xf32>, vector<3x896xf32>, vector<6x896xf32> -> vector<6x896xf32>
      %219 = arith.addf %212, %218 : vector<6x896xf32>
      %220 = arith.index_cast %arg18 : i32 to index
      %c0_187 = arith.constant 0 : index
      %c98 = arith.constant 98 : index
      %221 = vector.load %arg1[%220, %c0_187, %c98] : memref<2x3x1152xf32, #tpu.memory_space<vmem>>, vector<1x3x896xf32>
      %222 = vector.shape_cast %221 : vector<1x3x896xf32> to vector<3x896xf32>
      %c17 = arith.constant 17 : index
      %c0_188 = arith.constant 0 : index
      %c0_189 = arith.constant 0 : index
      %223 = vector.load %arg2[%c17, %c0_188, %c0_189] : memref<25x6x3xf32, #tpu.memory_space<vmem>>, vector<1x6x3xf32>
      %224 = vector.shape_cast %223 : vector<1x6x3xf32> to vector<6x3xf32>
      %cst_190 = arith.constant dense<0.000000e+00> : vector<6x896xf32>
      %225 = tpu.matmul %224, %222, %cst_190 {dimension_numbers = #tpu.dot_dimension_numbers<[1], [0], [0], [1], [0, 0, 1, 1], [], []>} : vector<6x3xf32>, vector<3x896xf32>, vector<6x896xf32> -> vector<6x896xf32>
      %226 = arith.addf %219, %225 : vector<6x896xf32>
      %227 = arith.index_cast %arg18 : i32 to index
      %c0_191 = arith.constant 0 : index
      %c99 = arith.constant 99 : index
      %228 = vector.load %arg1[%227, %c0_191, %c99] : memref<2x3x1152xf32, #tpu.memory_space<vmem>>, vector<1x3x896xf32>
      %229 = vector.shape_cast %228 : vector<1x3x896xf32> to vector<3x896xf32>
      %c18 = arith.constant 18 : index
      %c0_192 = arith.constant 0 : index
      %c0_193 = arith.constant 0 : index
      %230 = vector.load %arg2[%c18, %c0_192, %c0_193] : memref<25x6x3xf32, #tpu.memory_space<vmem>>, vector<1x6x3xf32>
      %231 = vector.shape_cast %230 : vector<1x6x3xf32> to vector<6x3xf32>
      %cst_194 = arith.constant dense<0.000000e+00> : vector<6x896xf32>
      %232 = tpu.matmul %231, %229, %cst_194 {dimension_numbers = #tpu.dot_dimension_numbers<[1], [0], [0], [1], [0, 0, 1, 1], [], []>} : vector<6x3xf32>, vector<3x896xf32>, vector<6x896xf32> -> vector<6x896xf32>
      %233 = arith.addf %226, %232 : vector<6x896xf32>
      %234 = arith.index_cast %arg18 : i32 to index
      %c0_195 = arith.constant 0 : index
      %c100 = arith.constant 100 : index
      %235 = vector.load %arg1[%234, %c0_195, %c100] : memref<2x3x1152xf32, #tpu.memory_space<vmem>>, vector<1x3x896xf32>
      %236 = vector.shape_cast %235 : vector<1x3x896xf32> to vector<3x896xf32>
      %c19 = arith.constant 19 : index
      %c0_196 = arith.constant 0 : index
      %c0_197 = arith.constant 0 : index
      %237 = vector.load %arg2[%c19, %c0_196, %c0_197] : memref<25x6x3xf32, #tpu.memory_space<vmem>>, vector<1x6x3xf32>
      %238 = vector.shape_cast %237 : vector<1x6x3xf32> to vector<6x3xf32>
      %cst_198 = arith.constant dense<0.000000e+00> : vector<6x896xf32>
      %239 = tpu.matmul %238, %236, %cst_198 {dimension_numbers = #tpu.dot_dimension_numbers<[1], [0], [0], [1], [0, 0, 1, 1], [], []>} : vector<6x3xf32>, vector<3x896xf32>, vector<6x896xf32> -> vector<6x896xf32>
      %240 = arith.addf %233, %239 : vector<6x896xf32>
      %241 = arith.index_cast %arg18 : i32 to index
      %c0_199 = arith.constant 0 : index
      %c128 = arith.constant 128 : index
      %242 = vector.load %arg1[%241, %c0_199, %c128] : memref<2x3x1152xf32, #tpu.memory_space<vmem>>, vector<1x3x896xf32>
      %243 = vector.shape_cast %242 : vector<1x3x896xf32> to vector<3x896xf32>
      %c20 = arith.constant 20 : index
      %c0_200 = arith.constant 0 : index
      %c0_201 = arith.constant 0 : index
      %244 = vector.load %arg2[%c20, %c0_200, %c0_201] : memref<25x6x3xf32, #tpu.memory_space<vmem>>, vector<1x6x3xf32>
      %245 = vector.shape_cast %244 : vector<1x6x3xf32> to vector<6x3xf32>
      %cst_202 = arith.constant dense<0.000000e+00> : vector<6x896xf32>
      %246 = tpu.matmul %245, %243, %cst_202 {dimension_numbers = #tpu.dot_dimension_numbers<[1], [0], [0], [1], [0, 0, 1, 1], [], []>} : vector<6x3xf32>, vector<3x896xf32>, vector<6x896xf32> -> vector<6x896xf32>
      %247 = arith.addf %240, %246 : vector<6x896xf32>
      %248 = arith.index_cast %arg18 : i32 to index
      %c0_203 = arith.constant 0 : index
      %c129 = arith.constant 129 : index
      %249 = vector.load %arg1[%248, %c0_203, %c129] : memref<2x3x1152xf32, #tpu.memory_space<vmem>>, vector<1x3x896xf32>
      %250 = vector.shape_cast %249 : vector<1x3x896xf32> to vector<3x896xf32>
      %c21 = arith.constant 21 : index
      %c0_204 = arith.constant 0 : index
      %c0_205 = arith.constant 0 : index
      %251 = vector.load %arg2[%c21, %c0_204, %c0_205] : memref<25x6x3xf32, #tpu.memory_space<vmem>>, vector<1x6x3xf32>
      %252 = vector.shape_cast %251 : vector<1x6x3xf32> to vector<6x3xf32>
      %cst_206 = arith.constant dense<0.000000e+00> : vector<6x896xf32>
      %253 = tpu.matmul %252, %250, %cst_206 {dimension_numbers = #tpu.dot_dimension_numbers<[1], [0], [0], [1], [0, 0, 1, 1], [], []>} : vector<6x3xf32>, vector<3x896xf32>, vector<6x896xf32> -> vector<6x896xf32>
      %254 = arith.addf %247, %253 : vector<6x896xf32>
      %255 = arith.index_cast %arg18 : i32 to index
      %c0_207 = arith.constant 0 : index
      %c130 = arith.constant 130 : index
      %256 = vector.load %arg1[%255, %c0_207, %c130] : memref<2x3x1152xf32, #tpu.memory_space<vmem>>, vector<1x3x896xf32>
      %257 = vector.shape_cast %256 : vector<1x3x896xf32> to vector<3x896xf32>
      %c22 = arith.constant 22 : index
      %c0_208 = arith.constant 0 : index
      %c0_209 = arith.constant 0 : index
      %258 = vector.load %arg2[%c22, %c0_208, %c0_209] : memref<25x6x3xf32, #tpu.memory_space<vmem>>, vector<1x6x3xf32>
      %259 = vector.shape_cast %258 : vector<1x6x3xf32> to vector<6x3xf32>
      %cst_210 = arith.constant dense<0.000000e+00> : vector<6x896xf32>
      %260 = tpu.matmul %259, %257, %cst_210 {dimension_numbers = #tpu.dot_dimension_numbers<[1], [0], [0], [1], [0, 0, 1, 1], [], []>} : vector<6x3xf32>, vector<3x896xf32>, vector<6x896xf32> -> vector<6x896xf32>
      %261 = arith.addf %254, %260 : vector<6x896xf32>
      %262 = arith.index_cast %arg18 : i32 to index
      %c0_211 = arith.constant 0 : index
      %c131 = arith.constant 131 : index
      %263 = vector.load %arg1[%262, %c0_211, %c131] : memref<2x3x1152xf32, #tpu.memory_space<vmem>>, vector<1x3x896xf32>
      %264 = vector.shape_cast %263 : vector<1x3x896xf32> to vector<3x896xf32>
      %c23 = arith.constant 23 : index
      %c0_212 = arith.constant 0 : index
      %c0_213 = arith.constant 0 : index
      %265 = vector.load %arg2[%c23, %c0_212, %c0_213] : memref<25x6x3xf32, #tpu.memory_space<vmem>>, vector<1x6x3xf32>
      %266 = vector.shape_cast %265 : vector<1x6x3xf32> to vector<6x3xf32>
      %cst_214 = arith.constant dense<0.000000e+00> : vector<6x896xf32>
      %267 = tpu.matmul %266, %264, %cst_214 {dimension_numbers = #tpu.dot_dimension_numbers<[1], [0], [0], [1], [0, 0, 1, 1], [], []>} : vector<6x3xf32>, vector<3x896xf32>, vector<6x896xf32> -> vector<6x896xf32>
      %268 = arith.addf %261, %267 : vector<6x896xf32>
      %269 = arith.index_cast %arg18 : i32 to index
      %c0_215 = arith.constant 0 : index
      %c132 = arith.constant 132 : index
      %270 = vector.load %arg1[%269, %c0_215, %c132] : memref<2x3x1152xf32, #tpu.memory_space<vmem>>, vector<1x3x896xf32>
      %271 = vector.shape_cast %270 : vector<1x3x896xf32> to vector<3x896xf32>
      %c24 = arith.constant 24 : index
      %c0_216 = arith.constant 0 : index
      %c0_217 = arith.constant 0 : index
      %272 = vector.load %arg2[%c24, %c0_216, %c0_217] : memref<25x6x3xf32, #tpu.memory_space<vmem>>, vector<1x6x3xf32>
      %273 = vector.shape_cast %272 : vector<1x6x3xf32> to vector<6x3xf32>
      %cst_218 = arith.constant dense<0.000000e+00> : vector<6x896xf32>
      %274 = tpu.matmul %273, %271, %cst_218 {dimension_numbers = #tpu.dot_dimension_numbers<[1], [0], [0], [1], [0, 0, 1, 1], [], []>} : vector<6x3xf32>, vector<3x896xf32>, vector<6x896xf32> -> vector<6x896xf32>
      %275 = arith.addf %268, %274 : vector<6x896xf32>
      %c0_219 = arith.constant 0 : index
      %c0_220 = arith.constant 0 : index
      %276 = vector.load %arg3[%c0_219, %c0_220] : memref<6x1xf32, #tpu.memory_space<vmem>>, vector<6x1xf32>
      %277 = vector.broadcast %276 : vector<6x1xf32> to vector<6x896xf32>
      %278 = arith.addf %275, %277 : vector<6x896xf32>
      %cst_221 = arith.constant 0.000000e+00 : f32
      %279 = vector.broadcast %cst_221 : f32 to vector<6x896xf32>
      %280 = arith.maximumf %278, %279 : vector<6x896xf32>
      %c0_222 = arith.constant 0 : index
      %c0_223 = arith.constant 0 : index
      %281 = vector.load %arg14[%c0_222, %c0_223] : memref<6x896xf32, #tpu.memory_space<vmem>>, vector<6x896xf32>
      tpu.vector_store %arg14[%c0_222, %c0_223], %280 {strides = array<i32>} : memref<6x896xf32, #tpu.memory_space<vmem>>, vector<6x896xf32>,
      %c0_224 = arith.constant 0 : index
      %c0_225 = arith.constant 0 : index
      %282 = vector.load %arg14[%c0_224, %c0_225] : memref<6x896xf32, #tpu.memory_space<vmem>>, vector<6x859xf32>
      %c0_226 = arith.constant 0 : index
      %c1_227 = arith.constant 1 : index
      %283 = vector.load %arg14[%c0_226, %c1_227] : memref<6x896xf32, #tpu.memory_space<vmem>>, vector<6x859xf32>
      %284 = arith.maximumf %282, %283 : vector<6x859xf32>
      %c0_228 = arith.constant 0 : index
      %c32_229 = arith.constant 32 : index
      %285 = vector.load %arg14[%c0_228, %c32_229] : memref<6x896xf32, #tpu.memory_space<vmem>>, vector<6x859xf32>
      %c0_230 = arith.constant 0 : index
      %c33_231 = arith.constant 33 : index
      %286 = vector.load %arg14[%c0_230, %c33_231] : memref<6x896xf32, #tpu.memory_space<vmem>>, vector<6x859xf32>
      %287 = arith.maximumf %285, %286 : vector<6x859xf32>
      %288 = arith.maximumf %284, %287 : vector<6x859xf32>
      %c0_232 = arith.constant 0 : index
      %c0_233 = arith.constant 0 : index
      %289 = vector.load %arg15[%c0_232, %c0_233] : memref<6x859xf32, #tpu.memory_space<vmem>>, vector<6x859xf32>
      tpu.vector_store %arg15[%c0_232, %c0_233], %288 {strides = array<i32>} : memref<6x859xf32, #tpu.memory_space<vmem>>, vector<6x859xf32>,
      %cst_234 = arith.constant 0.000000e+00 : f32
      %290 = vector.broadcast %cst_234 : f32 to vector<16x595xf32>
      %c0_235 = arith.constant 0 : index
      %c0_236 = arith.constant 0 : index
      %291 = vector.load %arg15[%c0_235, %c0_236] : memref<6x859xf32, #tpu.memory_space<vmem>>, vector<6x595xf32>
      %c0_237 = arith.constant 0 : index
      %c0_238 = arith.constant 0 : index
      %c0_239 = arith.constant 0 : index
      %292 = vector.load %arg4[%c0_237, %c0_238, %c0_239] : memref<25x16x6xf32, #tpu.memory_space<vmem>>, vector<1x16x6xf32>
      %293 = vector.shape_cast %292 : vector<1x16x6xf32> to vector<16x6xf32>
      %cst_240 = arith.constant dense<0.000000e+00> : vector<16x595xf32>
      %294 = tpu.matmul %293, %291, %cst_240 {dimension_numbers = #tpu.dot_dimension_numbers<[1], [0], [0], [1], [0, 0, 1, 1], [], []>} : vector<16x6xf32>, vector<6x595xf32>, vector<16x595xf32> -> vector<16x595xf32>
      %295 = arith.addf %290, %294 : vector<16x595xf32>
      %c0_241 = arith.constant 0 : index
      %c2_242 = arith.constant 2 : index
      %296 = vector.load %arg15[%c0_241, %c2_242] : memref<6x859xf32, #tpu.memory_space<vmem>>, vector<6x595xf32>
      %c1_243 = arith.constant 1 : index
      %c0_244 = arith.constant 0 : index
      %c0_245 = arith.constant 0 : index
      %297 = vector.load %arg4[%c1_243, %c0_244, %c0_245] : memref<25x16x6xf32, #tpu.memory_space<vmem>>, vector<1x16x6xf32>
      %298 = vector.shape_cast %297 : vector<1x16x6xf32> to vector<16x6xf32>
      %cst_246 = arith.constant dense<0.000000e+00> : vector<16x595xf32>
      %299 = tpu.matmul %298, %296, %cst_246 {dimension_numbers = #tpu.dot_dimension_numbers<[1], [0], [0], [1], [0, 0, 1, 1], [], []>} : vector<16x6xf32>, vector<6x595xf32>, vector<16x595xf32> -> vector<16x595xf32>
      %300 = arith.addf %295, %299 : vector<16x595xf32>
      %c0_247 = arith.constant 0 : index
      %c4_248 = arith.constant 4 : index
      %301 = vector.load %arg15[%c0_247, %c4_248] : memref<6x859xf32, #tpu.memory_space<vmem>>, vector<6x595xf32>
      %c2_249 = arith.constant 2 : index
      %c0_250 = arith.constant 0 : index
      %c0_251 = arith.constant 0 : index
      %302 = vector.load %arg4[%c2_249, %c0_250, %c0_251] : memref<25x16x6xf32, #tpu.memory_space<vmem>>, vector<1x16x6xf32>
      %303 = vector.shape_cast %302 : vector<1x16x6xf32> to vector<16x6xf32>
      %cst_252 = arith.constant dense<0.000000e+00> : vector<16x595xf32>
      %304 = tpu.matmul %303, %301, %cst_252 {dimension_numbers = #tpu.dot_dimension_numbers<[1], [0], [0], [1], [0, 0, 1, 1], [], []>} : vector<16x6xf32>, vector<6x595xf32>, vector<16x595xf32> -> vector<16x595xf32>
      %305 = arith.addf %300, %304 : vector<16x595xf32>
      %c0_253 = arith.constant 0 : index
      %c6_254 = arith.constant 6 : index
      %306 = vector.load %arg15[%c0_253, %c6_254] : memref<6x859xf32, #tpu.memory_space<vmem>>, vector<6x595xf32>
      %c3_255 = arith.constant 3 : index
      %c0_256 = arith.constant 0 : index
      %c0_257 = arith.constant 0 : index
      %307 = vector.load %arg4[%c3_255, %c0_256, %c0_257] : memref<25x16x6xf32, #tpu.memory_space<vmem>>, vector<1x16x6xf32>
      %308 = vector.shape_cast %307 : vector<1x16x6xf32> to vector<16x6xf32>
      %cst_258 = arith.constant dense<0.000000e+00> : vector<16x595xf32>
      %309 = tpu.matmul %308, %306, %cst_258 {dimension_numbers = #tpu.dot_dimension_numbers<[1], [0], [0], [1], [0, 0, 1, 1], [], []>} : vector<16x6xf32>, vector<6x595xf32>, vector<16x595xf32> -> vector<16x595xf32>
      %310 = arith.addf %305, %309 : vector<16x595xf32>
      %c0_259 = arith.constant 0 : index
      %c8_260 = arith.constant 8 : index
      %311 = vector.load %arg15[%c0_259, %c8_260] : memref<6x859xf32, #tpu.memory_space<vmem>>, vector<6x595xf32>
      %c4_261 = arith.constant 4 : index
      %c0_262 = arith.constant 0 : index
      %c0_263 = arith.constant 0 : index
      %312 = vector.load %arg4[%c4_261, %c0_262, %c0_263] : memref<25x16x6xf32, #tpu.memory_space<vmem>>, vector<1x16x6xf32>
      %313 = vector.shape_cast %312 : vector<1x16x6xf32> to vector<16x6xf32>
      %cst_264 = arith.constant dense<0.000000e+00> : vector<16x595xf32>
      %314 = tpu.matmul %313, %311, %cst_264 {dimension_numbers = #tpu.dot_dimension_numbers<[1], [0], [0], [1], [0, 0, 1, 1], [], []>} : vector<16x6xf32>, vector<6x595xf32>, vector<16x595xf32> -> vector<16x595xf32>
      %315 = arith.addf %310, %314 : vector<16x595xf32>
      %c0_265 = arith.constant 0 : index
      %c64_266 = arith.constant 64 : index
      %316 = vector.load %arg15[%c0_265, %c64_266] : memref<6x859xf32, #tpu.memory_space<vmem>>, vector<6x595xf32>
      %c5_267 = arith.constant 5 : index
      %c0_268 = arith.constant 0 : index
      %c0_269 = arith.constant 0 : index
      %317 = vector.load %arg4[%c5_267, %c0_268, %c0_269] : memref<25x16x6xf32, #tpu.memory_space<vmem>>, vector<1x16x6xf32>
      %318 = vector.shape_cast %317 : vector<1x16x6xf32> to vector<16x6xf32>
      %cst_270 = arith.constant dense<0.000000e+00> : vector<16x595xf32>
      %319 = tpu.matmul %318, %316, %cst_270 {dimension_numbers = #tpu.dot_dimension_numbers<[1], [0], [0], [1], [0, 0, 1, 1], [], []>} : vector<16x6xf32>, vector<6x595xf32>, vector<16x595xf32> -> vector<16x595xf32>
      %320 = arith.addf %315, %319 : vector<16x595xf32>
      %c0_271 = arith.constant 0 : index
      %c66_272 = arith.constant 66 : index
      %321 = vector.load %arg15[%c0_271, %c66_272] : memref<6x859xf32, #tpu.memory_space<vmem>>, vector<6x595xf32>
      %c6_273 = arith.constant 6 : index
      %c0_274 = arith.constant 0 : index
      %c0_275 = arith.constant 0 : index
      %322 = vector.load %arg4[%c6_273, %c0_274, %c0_275] : memref<25x16x6xf32, #tpu.memory_space<vmem>>, vector<1x16x6xf32>
      %323 = vector.shape_cast %322 : vector<1x16x6xf32> to vector<16x6xf32>
      %cst_276 = arith.constant dense<0.000000e+00> : vector<16x595xf32>
      %324 = tpu.matmul %323, %321, %cst_276 {dimension_numbers = #tpu.dot_dimension_numbers<[1], [0], [0], [1], [0, 0, 1, 1], [], []>} : vector<16x6xf32>, vector<6x595xf32>, vector<16x595xf32> -> vector<16x595xf32>
      %325 = arith.addf %320, %324 : vector<16x595xf32>
      %c0_277 = arith.constant 0 : index
      %c68_278 = arith.constant 68 : index
      %326 = vector.load %arg15[%c0_277, %c68_278] : memref<6x859xf32, #tpu.memory_space<vmem>>, vector<6x595xf32>
      %c7_279 = arith.constant 7 : index
      %c0_280 = arith.constant 0 : index
      %c0_281 = arith.constant 0 : index
      %327 = vector.load %arg4[%c7_279, %c0_280, %c0_281] : memref<25x16x6xf32, #tpu.memory_space<vmem>>, vector<1x16x6xf32>
      %328 = vector.shape_cast %327 : vector<1x16x6xf32> to vector<16x6xf32>
      %cst_282 = arith.constant dense<0.000000e+00> : vector<16x595xf32>
      %329 = tpu.matmul %328, %326, %cst_282 {dimension_numbers = #tpu.dot_dimension_numbers<[1], [0], [0], [1], [0, 0, 1, 1], [], []>} : vector<16x6xf32>, vector<6x595xf32>, vector<16x595xf32> -> vector<16x595xf32>
      %330 = arith.addf %325, %329 : vector<16x595xf32>
      %c0_283 = arith.constant 0 : index
      %c70 = arith.constant 70 : index
      %331 = vector.load %arg15[%c0_283, %c70] : memref<6x859xf32, #tpu.memory_space<vmem>>, vector<6x595xf32>
      %c8_284 = arith.constant 8 : index
      %c0_285 = arith.constant 0 : index
      %c0_286 = arith.constant 0 : index
      %332 = vector.load %arg4[%c8_284, %c0_285, %c0_286] : memref<25x16x6xf32, #tpu.memory_space<vmem>>, vector<1x16x6xf32>
      %333 = vector.shape_cast %332 : vector<1x16x6xf32> to vector<16x6xf32>
      %cst_287 = arith.constant dense<0.000000e+00> : vector<16x595xf32>
      %334 = tpu.matmul %333, %331, %cst_287 {dimension_numbers = #tpu.dot_dimension_numbers<[1], [0], [0], [1], [0, 0, 1, 1], [], []>} : vector<16x6xf32>, vector<6x595xf32>, vector<16x595xf32> -> vector<16x595xf32>
      %335 = arith.addf %330, %334 : vector<16x595xf32>
      %c0_288 = arith.constant 0 : index
      %c72 = arith.constant 72 : index
      %336 = vector.load %arg15[%c0_288, %c72] : memref<6x859xf32, #tpu.memory_space<vmem>>, vector<6x595xf32>
      %c9_289 = arith.constant 9 : index
      %c0_290 = arith.constant 0 : index
      %c0_291 = arith.constant 0 : index
      %337 = vector.load %arg4[%c9_289, %c0_290, %c0_291] : memref<25x16x6xf32, #tpu.memory_space<vmem>>, vector<1x16x6xf32>
      %338 = vector.shape_cast %337 : vector<1x16x6xf32> to vector<16x6xf32>
      %cst_292 = arith.constant dense<0.000000e+00> : vector<16x595xf32>
      %339 = tpu.matmul %338, %336, %cst_292 {dimension_numbers = #tpu.dot_dimension_numbers<[1], [0], [0], [1], [0, 0, 1, 1], [], []>} : vector<16x6xf32>, vector<6x595xf32>, vector<16x595xf32> -> vector<16x595xf32>
      %340 = arith.addf %335, %339 : vector<16x595xf32>
      %c0_293 = arith.constant 0 : index
      %c128_294 = arith.constant 128 : index
      %341 = vector.load %arg15[%c0_293, %c128_294] : memref<6x859xf32, #tpu.memory_space<vmem>>, vector<6x595xf32>
      %c10_295 = arith.constant 10 : index
      %c0_296 = arith.constant 0 : index
      %c0_297 = arith.constant 0 : index
      %342 = vector.load %arg4[%c10_295, %c0_296, %c0_297] : memref<25x16x6xf32, #tpu.memory_space<vmem>>, vector<1x16x6xf32>
      %343 = vector.shape_cast %342 : vector<1x16x6xf32> to vector<16x6xf32>
      %cst_298 = arith.constant dense<0.000000e+00> : vector<16x595xf32>
      %344 = tpu.matmul %343, %341, %cst_298 {dimension_numbers = #tpu.dot_dimension_numbers<[1], [0], [0], [1], [0, 0, 1, 1], [], []>} : vector<16x6xf32>, vector<6x595xf32>, vector<16x595xf32> -> vector<16x595xf32>
      %345 = arith.addf %340, %344 : vector<16x595xf32>
      %c0_299 = arith.constant 0 : index
      %c130_300 = arith.constant 130 : index
      %346 = vector.load %arg15[%c0_299, %c130_300] : memref<6x859xf32, #tpu.memory_space<vmem>>, vector<6x595xf32>
      %c11_301 = arith.constant 11 : index
      %c0_302 = arith.constant 0 : index
      %c0_303 = arith.constant 0 : index
      %347 = vector.load %arg4[%c11_301, %c0_302, %c0_303] : memref<25x16x6xf32, #tpu.memory_space<vmem>>, vector<1x16x6xf32>
      %348 = vector.shape_cast %347 : vector<1x16x6xf32> to vector<16x6xf32>
      %cst_304 = arith.constant dense<0.000000e+00> : vector<16x595xf32>
      %349 = tpu.matmul %348, %346, %cst_304 {dimension_numbers = #tpu.dot_dimension_numbers<[1], [0], [0], [1], [0, 0, 1, 1], [], []>} : vector<16x6xf32>, vector<6x595xf32>, vector<16x595xf32> -> vector<16x595xf32>
      %350 = arith.addf %345, %349 : vector<16x595xf32>
      %c0_305 = arith.constant 0 : index
      %c132_306 = arith.constant 132 : index
      %351 = vector.load %arg15[%c0_305, %c132_306] : memref<6x859xf32, #tpu.memory_space<vmem>>, vector<6x595xf32>
      %c12_307 = arith.constant 12 : index
      %c0_308 = arith.constant 0 : index
      %c0_309 = arith.constant 0 : index
      %352 = vector.load %arg4[%c12_307, %c0_308, %c0_309] : memref<25x16x6xf32, #tpu.memory_space<vmem>>, vector<1x16x6xf32>
      %353 = vector.shape_cast %352 : vector<1x16x6xf32> to vector<16x6xf32>
      %cst_310 = arith.constant dense<0.000000e+00> : vector<16x595xf32>
      %354 = tpu.matmul %353, %351, %cst_310 {dimension_numbers = #tpu.dot_dimension_numbers<[1], [0], [0], [1], [0, 0, 1, 1], [], []>} : vector<16x6xf32>, vector<6x595xf32>, vector<16x595xf32> -> vector<16x595xf32>
      %355 = arith.addf %350, %354 : vector<16x595xf32>
      %c0_311 = arith.constant 0 : index
      %c134 = arith.constant 134 : index
      %356 = vector.load %arg15[%c0_311, %c134] : memref<6x859xf32, #tpu.memory_space<vmem>>, vector<6x595xf32>
      %c13_312 = arith.constant 13 : index
      %c0_313 = arith.constant 0 : index
      %c0_314 = arith.constant 0 : index
      %357 = vector.load %arg4[%c13_312, %c0_313, %c0_314] : memref<25x16x6xf32, #tpu.memory_space<vmem>>, vector<1x16x6xf32>
      %358 = vector.shape_cast %357 : vector<1x16x6xf32> to vector<16x6xf32>
      %cst_315 = arith.constant dense<0.000000e+00> : vector<16x595xf32>
      %359 = tpu.matmul %358, %356, %cst_315 {dimension_numbers = #tpu.dot_dimension_numbers<[1], [0], [0], [1], [0, 0, 1, 1], [], []>} : vector<16x6xf32>, vector<6x595xf32>, vector<16x595xf32> -> vector<16x595xf32>
      %360 = arith.addf %355, %359 : vector<16x595xf32>
      %c0_316 = arith.constant 0 : index
      %c136 = arith.constant 136 : index
      %361 = vector.load %arg15[%c0_316, %c136] : memref<6x859xf32, #tpu.memory_space<vmem>>, vector<6x595xf32>
      %c14_317 = arith.constant 14 : index
      %c0_318 = arith.constant 0 : index
      %c0_319 = arith.constant 0 : index
      %362 = vector.load %arg4[%c14_317, %c0_318, %c0_319] : memref<25x16x6xf32, #tpu.memory_space<vmem>>, vector<1x16x6xf32>
      %363 = vector.shape_cast %362 : vector<1x16x6xf32> to vector<16x6xf32>
      %cst_320 = arith.constant dense<0.000000e+00> : vector<16x595xf32>
      %364 = tpu.matmul %363, %361, %cst_320 {dimension_numbers = #tpu.dot_dimension_numbers<[1], [0], [0], [1], [0, 0, 1, 1], [], []>} : vector<16x6xf32>, vector<6x595xf32>, vector<16x595xf32> -> vector<16x595xf32>
      %365 = arith.addf %360, %364 : vector<16x595xf32>
      %c0_321 = arith.constant 0 : index
      %c192 = arith.constant 192 : index
      %366 = vector.load %arg15[%c0_321, %c192] : memref<6x859xf32, #tpu.memory_space<vmem>>, vector<6x595xf32>
      %c15_322 = arith.constant 15 : index
      %c0_323 = arith.constant 0 : index
      %c0_324 = arith.constant 0 : index
      %367 = vector.load %arg4[%c15_322, %c0_323, %c0_324] : memref<25x16x6xf32, #tpu.memory_space<vmem>>, vector<1x16x6xf32>
      %368 = vector.shape_cast %367 : vector<1x16x6xf32> to vector<16x6xf32>
      %cst_325 = arith.constant dense<0.000000e+00> : vector<16x595xf32>
      %369 = tpu.matmul %368, %366, %cst_325 {dimension_numbers = #tpu.dot_dimension_numbers<[1], [0], [0], [1], [0, 0, 1, 1], [], []>} : vector<16x6xf32>, vector<6x595xf32>, vector<16x595xf32> -> vector<16x595xf32>
      %370 = arith.addf %365, %369 : vector<16x595xf32>
      %c0_326 = arith.constant 0 : index
      %c194 = arith.constant 194 : index
      %371 = vector.load %arg15[%c0_326, %c194] : memref<6x859xf32, #tpu.memory_space<vmem>>, vector<6x595xf32>
      %c16_327 = arith.constant 16 : index
      %c0_328 = arith.constant 0 : index
      %c0_329 = arith.constant 0 : index
      %372 = vector.load %arg4[%c16_327, %c0_328, %c0_329] : memref<25x16x6xf32, #tpu.memory_space<vmem>>, vector<1x16x6xf32>
      %373 = vector.shape_cast %372 : vector<1x16x6xf32> to vector<16x6xf32>
      %cst_330 = arith.constant dense<0.000000e+00> : vector<16x595xf32>
      %374 = tpu.matmul %373, %371, %cst_330 {dimension_numbers = #tpu.dot_dimension_numbers<[1], [0], [0], [1], [0, 0, 1, 1], [], []>} : vector<16x6xf32>, vector<6x595xf32>, vector<16x595xf32> -> vector<16x595xf32>
      %375 = arith.addf %370, %374 : vector<16x595xf32>
      %c0_331 = arith.constant 0 : index
      %c196 = arith.constant 196 : index
      %376 = vector.load %arg15[%c0_331, %c196] : memref<6x859xf32, #tpu.memory_space<vmem>>, vector<6x595xf32>
      %c17_332 = arith.constant 17 : index
      %c0_333 = arith.constant 0 : index
      %c0_334 = arith.constant 0 : index
      %377 = vector.load %arg4[%c17_332, %c0_333, %c0_334] : memref<25x16x6xf32, #tpu.memory_space<vmem>>, vector<1x16x6xf32>
      %378 = vector.shape_cast %377 : vector<1x16x6xf32> to vector<16x6xf32>
      %cst_335 = arith.constant dense<0.000000e+00> : vector<16x595xf32>
      %379 = tpu.matmul %378, %376, %cst_335 {dimension_numbers = #tpu.dot_dimension_numbers<[1], [0], [0], [1], [0, 0, 1, 1], [], []>} : vector<16x6xf32>, vector<6x595xf32>, vector<16x595xf32> -> vector<16x595xf32>
      %380 = arith.addf %375, %379 : vector<16x595xf32>
      %c0_336 = arith.constant 0 : index
      %c198 = arith.constant 198 : index
      %381 = vector.load %arg15[%c0_336, %c198] : memref<6x859xf32, #tpu.memory_space<vmem>>, vector<6x595xf32>
      %c18_337 = arith.constant 18 : index
      %c0_338 = arith.constant 0 : index
      %c0_339 = arith.constant 0 : index
      %382 = vector.load %arg4[%c18_337, %c0_338, %c0_339] : memref<25x16x6xf32, #tpu.memory_space<vmem>>, vector<1x16x6xf32>
      %383 = vector.shape_cast %382 : vector<1x16x6xf32> to vector<16x6xf32>
      %cst_340 = arith.constant dense<0.000000e+00> : vector<16x595xf32>
      %384 = tpu.matmul %383, %381, %cst_340 {dimension_numbers = #tpu.dot_dimension_numbers<[1], [0], [0], [1], [0, 0, 1, 1], [], []>} : vector<16x6xf32>, vector<6x595xf32>, vector<16x595xf32> -> vector<16x595xf32>
      %385 = arith.addf %380, %384 : vector<16x595xf32>
      %c0_341 = arith.constant 0 : index
      %c200 = arith.constant 200 : index
      %386 = vector.load %arg15[%c0_341, %c200] : memref<6x859xf32, #tpu.memory_space<vmem>>, vector<6x595xf32>
      %c19_342 = arith.constant 19 : index
      %c0_343 = arith.constant 0 : index
      %c0_344 = arith.constant 0 : index
      %387 = vector.load %arg4[%c19_342, %c0_343, %c0_344] : memref<25x16x6xf32, #tpu.memory_space<vmem>>, vector<1x16x6xf32>
      %388 = vector.shape_cast %387 : vector<1x16x6xf32> to vector<16x6xf32>
      %cst_345 = arith.constant dense<0.000000e+00> : vector<16x595xf32>
      %389 = tpu.matmul %388, %386, %cst_345 {dimension_numbers = #tpu.dot_dimension_numbers<[1], [0], [0], [1], [0, 0, 1, 1], [], []>} : vector<16x6xf32>, vector<6x595xf32>, vector<16x595xf32> -> vector<16x595xf32>
      %390 = arith.addf %385, %389 : vector<16x595xf32>
      %c0_346 = arith.constant 0 : index
      %c256 = arith.constant 256 : index
      %391 = vector.load %arg15[%c0_346, %c256] : memref<6x859xf32, #tpu.memory_space<vmem>>, vector<6x595xf32>
      %c20_347 = arith.constant 20 : index
      %c0_348 = arith.constant 0 : index
      %c0_349 = arith.constant 0 : index
      %392 = vector.load %arg4[%c20_347, %c0_348, %c0_349] : memref<25x16x6xf32, #tpu.memory_space<vmem>>, vector<1x16x6xf32>
      %393 = vector.shape_cast %392 : vector<1x16x6xf32> to vector<16x6xf32>
      %cst_350 = arith.constant dense<0.000000e+00> : vector<16x595xf32>
      %394 = tpu.matmul %393, %391, %cst_350 {dimension_numbers = #tpu.dot_dimension_numbers<[1], [0], [0], [1], [0, 0, 1, 1], [], []>} : vector<16x6xf32>, vector<6x595xf32>, vector<16x595xf32> -> vector<16x595xf32>
      %395 = arith.addf %390, %394 : vector<16x595xf32>
      %c0_351 = arith.constant 0 : index
      %c258 = arith.constant 258 : index
      %396 = vector.load %arg15[%c0_351, %c258] : memref<6x859xf32, #tpu.memory_space<vmem>>, vector<6x595xf32>
      %c21_352 = arith.constant 21 : index
      %c0_353 = arith.constant 0 : index
      %c0_354 = arith.constant 0 : index
      %397 = vector.load %arg4[%c21_352, %c0_353, %c0_354] : memref<25x16x6xf32, #tpu.memory_space<vmem>>, vector<1x16x6xf32>
      %398 = vector.shape_cast %397 : vector<1x16x6xf32> to vector<16x6xf32>
      %cst_355 = arith.constant dense<0.000000e+00> : vector<16x595xf32>
      %399 = tpu.matmul %398, %396, %cst_355 {dimension_numbers = #tpu.dot_dimension_numbers<[1], [0], [0], [1], [0, 0, 1, 1], [], []>} : vector<16x6xf32>, vector<6x595xf32>, vector<16x595xf32> -> vector<16x595xf32>
      %400 = arith.addf %395, %399 : vector<16x595xf32>
      %c0_356 = arith.constant 0 : index
      %c260 = arith.constant 260 : index
      %401 = vector.load %arg15[%c0_356, %c260] : memref<6x859xf32, #tpu.memory_space<vmem>>, vector<6x595xf32>
      %c22_357 = arith.constant 22 : index
      %c0_358 = arith.constant 0 : index
      %c0_359 = arith.constant 0 : index
      %402 = vector.load %arg4[%c22_357, %c0_358, %c0_359] : memref<25x16x6xf32, #tpu.memory_space<vmem>>, vector<1x16x6xf32>
      %403 = vector.shape_cast %402 : vector<1x16x6xf32> to vector<16x6xf32>
      %cst_360 = arith.constant dense<0.000000e+00> : vector<16x595xf32>
      %404 = tpu.matmul %403, %401, %cst_360 {dimension_numbers = #tpu.dot_dimension_numbers<[1], [0], [0], [1], [0, 0, 1, 1], [], []>} : vector<16x6xf32>, vector<6x595xf32>, vector<16x595xf32> -> vector<16x595xf32>
      %405 = arith.addf %400, %404 : vector<16x595xf32>
      %c0_361 = arith.constant 0 : index
      %c262 = arith.constant 262 : index
      %406 = vector.load %arg15[%c0_361, %c262] : memref<6x859xf32, #tpu.memory_space<vmem>>, vector<6x595xf32>
      %c23_362 = arith.constant 23 : index
      %c0_363 = arith.constant 0 : index
      %c0_364 = arith.constant 0 : index
      %407 = vector.load %arg4[%c23_362, %c0_363, %c0_364] : memref<25x16x6xf32, #tpu.memory_space<vmem>>, vector<1x16x6xf32>
      %408 = vector.shape_cast %407 : vector<1x16x6xf32> to vector<16x6xf32>
      %cst_365 = arith.constant dense<0.000000e+00> : vector<16x595xf32>
      %409 = tpu.matmul %408, %406, %cst_365 {dimension_numbers = #tpu.dot_dimension_numbers<[1], [0], [0], [1], [0, 0, 1, 1], [], []>} : vector<16x6xf32>, vector<6x595xf32>, vector<16x595xf32> -> vector<16x595xf32>
      %410 = arith.addf %405, %409 : vector<16x595xf32>
      %c0_366 = arith.constant 0 : index
      %c264 = arith.constant 264 : index
      %411 = vector.load %arg15[%c0_366, %c264] : memref<6x859xf32, #tpu.memory_space<vmem>>, vector<6x595xf32>
      %c24_367 = arith.constant 24 : index
      %c0_368 = arith.constant 0 : index
      %c0_369 = arith.constant 0 : index
      %412 = vector.load %arg4[%c24_367, %c0_368, %c0_369] : memref<25x16x6xf32, #tpu.memory_space<vmem>>, vector<1x16x6xf32>
      %413 = vector.shape_cast %412 : vector<1x16x6xf32> to vector<16x6xf32>
      %cst_370 = arith.constant dense<0.000000e+00> : vector<16x595xf32>
      %414 = tpu.matmul %413, %411, %cst_370 {dimension_numbers = #tpu.dot_dimension_numbers<[1], [0], [0], [1], [0, 0, 1, 1], [], []>} : vector<16x6xf32>, vector<6x595xf32>, vector<16x595xf32> -> vector<16x595xf32>
      %415 = arith.addf %410, %414 : vector<16x595xf32>
      %c0_371 = arith.constant 0 : index
      %c0_372 = arith.constant 0 : index
      %416 = vector.load %arg5[%c0_371, %c0_372] : memref<16x1xf32, #tpu.memory_space<vmem>>, vector<16x1xf32>
      %417 = vector.broadcast %416 : vector<16x1xf32> to vector<16x595xf32>
      %418 = arith.addf %415, %417 : vector<16x595xf32>
      %cst_373 = arith.constant 0.000000e+00 : f32
      %419 = vector.broadcast %cst_373 : f32 to vector<16x595xf32>
      %420 = arith.maximumf %418, %419 : vector<16x595xf32>
      %c0_374 = arith.constant 0 : index
      %c0_375 = arith.constant 0 : index
      %421 = vector.load %arg16[%c0_374, %c0_375] : memref<16x595xf32, #tpu.memory_space<vmem>>, vector<16x595xf32>
      tpu.vector_store %arg16[%c0_374, %c0_375], %420 {strides = array<i32>} : memref<16x595xf32, #tpu.memory_space<vmem>>, vector<16x595xf32>,
      %c0_376 = arith.constant 0 : index
      %c0_377 = arith.constant 0 : index
      %422 = vector.load %arg16[%c0_376, %c0_377] : memref<16x595xf32, #tpu.memory_space<vmem>>, vector<16x529xf32>
      %c0_378 = arith.constant 0 : index
      %c2_379 = arith.constant 2 : index
      %423 = vector.load %arg16[%c0_378, %c2_379] : memref<16x595xf32, #tpu.memory_space<vmem>>, vector<16x529xf32>
      %424 = arith.maximumf %422, %423 : vector<16x529xf32>
      %c0_380 = arith.constant 0 : index
      %c64_381 = arith.constant 64 : index
      %425 = vector.load %arg16[%c0_380, %c64_381] : memref<16x595xf32, #tpu.memory_space<vmem>>, vector<16x529xf32>
      %c0_382 = arith.constant 0 : index
      %c66_383 = arith.constant 66 : index
      %426 = vector.load %arg16[%c0_382, %c66_383] : memref<16x595xf32, #tpu.memory_space<vmem>>, vector<16x529xf32>
      %427 = arith.maximumf %425, %426 : vector<16x529xf32>
      %428 = arith.maximumf %424, %427 : vector<16x529xf32>
      %c16_i32 = arith.constant 16 : i32
      %429 = arith.muli %arg18, %c16_i32 : i32
      %430 = tpu.assume_multiple %429, 16 : i32
      %c0_384 = arith.constant 0 : index
      %c0_385 = arith.constant 0 : index
      %431 = vector.load %arg6[%c0_384, %c0_385] : memref<529x25xf32, #tpu.memory_space<vmem>>, vector<529x25xf32>
      %cst_386 = arith.constant dense<0.000000e+00> : vector<16x25xf32>
      %432 = tpu.matmul %428, %431, %cst_386 {dimension_numbers = #tpu.dot_dimension_numbers<[1], [0], [0], [1], [0, 0, 1, 1], [], []>} : vector<16x529xf32>, vector<529x25xf32>, vector<16x25xf32> -> vector<16x25xf32>
      %433 = arith.index_cast %430 : i32 to index
      %c0_387 = arith.constant 0 : index
      %434 = vector.load %arg17[%433, %c0_387] : memref<32x25xf32, #tpu.memory_space<vmem>>, vector<16x25xf32>
      tpu.vector_store %arg17[%433, %c0_387], %432 {strides = array<i32>} : memref<32x25xf32, #tpu.memory_space<vmem>>, vector<16x25xf32>,
    }
    %c2_i32_0 = arith.constant 2 : i32
    %cst = arith.constant 0.000000e+00 : f32
    %1 = vector.broadcast %cst : f32 to vector<2x120xf32>
    %c0 = arith.constant 0 : index
    %c0_1 = arith.constant 0 : index
    %2 = tpu.strided_load %arg17[%c0, %c0_1] {strides = array<i32: 16, 1>} : memref<32x25xf32, #tpu.memory_space<vmem>>, vector<2x25xf32>
    %c0_2 = arith.constant 0 : index
    %c0_3 = arith.constant 0 : index
    %c0_4 = arith.constant 0 : index
    %3 = vector.load %arg7[%c0_2, %c0_3, %c0_4] : memref<16x25x120xf32, #tpu.memory_space<vmem>>, vector<1x25x120xf32>
    %4 = vector.shape_cast %3 : vector<1x25x120xf32> to vector<25x120xf32>
    %cst_5 = arith.constant dense<0.000000e+00> : vector<2x120xf32>
    %5 = tpu.matmul %2, %4, %cst_5 {dimension_numbers = #tpu.dot_dimension_numbers<[1], [0], [0], [1], [0, 0, 1, 1], [], []>} : vector<2x25xf32>, vector<25x120xf32>, vector<2x120xf32> -> vector<2x120xf32>
    %6 = arith.addf %1, %5 : vector<2x120xf32>
    %c1 = arith.constant 1 : index
    %c0_6 = arith.constant 0 : index
    %7 = tpu.strided_load %arg17[%c1, %c0_6] {strides = array<i32: 16, 1>} : memref<32x25xf32, #tpu.memory_space<vmem>>, vector<2x25xf32>
    %c1_7 = arith.constant 1 : index
    %c0_8 = arith.constant 0 : index
    %c0_9 = arith.constant 0 : index
    %8 = vector.load %arg7[%c1_7, %c0_8, %c0_9] : memref<16x25x120xf32, #tpu.memory_space<vmem>>, vector<1x25x120xf32>
    %9 = vector.shape_cast %8 : vector<1x25x120xf32> to vector<25x120xf32>
    %cst_10 = arith.constant dense<0.000000e+00> : vector<2x120xf32>
    %10 = tpu.matmul %7, %9, %cst_10 {dimension_numbers = #tpu.dot_dimension_numbers<[1], [0], [0], [1], [0, 0, 1, 1], [], []>} : vector<2x25xf32>, vector<25x120xf32>, vector<2x120xf32> -> vector<2x120xf32>
    %11 = arith.addf %6, %10 : vector<2x120xf32>
    %c2 = arith.constant 2 : index
    %c0_11 = arith.constant 0 : index
    %12 = tpu.strided_load %arg17[%c2, %c0_11] {strides = array<i32: 16, 1>} : memref<32x25xf32, #tpu.memory_space<vmem>>, vector<2x25xf32>
    %c2_12 = arith.constant 2 : index
    %c0_13 = arith.constant 0 : index
    %c0_14 = arith.constant 0 : index
    %13 = vector.load %arg7[%c2_12, %c0_13, %c0_14] : memref<16x25x120xf32, #tpu.memory_space<vmem>>, vector<1x25x120xf32>
    %14 = vector.shape_cast %13 : vector<1x25x120xf32> to vector<25x120xf32>
    %cst_15 = arith.constant dense<0.000000e+00> : vector<2x120xf32>
    %15 = tpu.matmul %12, %14, %cst_15 {dimension_numbers = #tpu.dot_dimension_numbers<[1], [0], [0], [1], [0, 0, 1, 1], [], []>} : vector<2x25xf32>, vector<25x120xf32>, vector<2x120xf32> -> vector<2x120xf32>
    %16 = arith.addf %11, %15 : vector<2x120xf32>
    %c3 = arith.constant 3 : index
    %c0_16 = arith.constant 0 : index
    %17 = tpu.strided_load %arg17[%c3, %c0_16] {strides = array<i32: 16, 1>} : memref<32x25xf32, #tpu.memory_space<vmem>>, vector<2x25xf32>
    %c3_17 = arith.constant 3 : index
    %c0_18 = arith.constant 0 : index
    %c0_19 = arith.constant 0 : index
    %18 = vector.load %arg7[%c3_17, %c0_18, %c0_19] : memref<16x25x120xf32, #tpu.memory_space<vmem>>, vector<1x25x120xf32>
    %19 = vector.shape_cast %18 : vector<1x25x120xf32> to vector<25x120xf32>
    %cst_20 = arith.constant dense<0.000000e+00> : vector<2x120xf32>
    %20 = tpu.matmul %17, %19, %cst_20 {dimension_numbers = #tpu.dot_dimension_numbers<[1], [0], [0], [1], [0, 0, 1, 1], [], []>} : vector<2x25xf32>, vector<25x120xf32>, vector<2x120xf32> -> vector<2x120xf32>
    %21 = arith.addf %16, %20 : vector<2x120xf32>
    %c4 = arith.constant 4 : index
    %c0_21 = arith.constant 0 : index
    %22 = tpu.strided_load %arg17[%c4, %c0_21] {strides = array<i32: 16, 1>} : memref<32x25xf32, #tpu.memory_space<vmem>>, vector<2x25xf32>
    %c4_22 = arith.constant 4 : index
    %c0_23 = arith.constant 0 : index
    %c0_24 = arith.constant 0 : index
    %23 = vector.load %arg7[%c4_22, %c0_23, %c0_24] : memref<16x25x120xf32, #tpu.memory_space<vmem>>, vector<1x25x120xf32>
    %24 = vector.shape_cast %23 : vector<1x25x120xf32> to vector<25x120xf32>
    %cst_25 = arith.constant dense<0.000000e+00> : vector<2x120xf32>
    %25 = tpu.matmul %22, %24, %cst_25 {dimension_numbers = #tpu.dot_dimension_numbers<[1], [0], [0], [1], [0, 0, 1, 1], [], []>} : vector<2x25xf32>, vector<25x120xf32>, vector<2x120xf32> -> vector<2x120xf32>
    %26 = arith.addf %21, %25 : vector<2x120xf32>
    %c5 = arith.constant 5 : index
    %c0_26 = arith.constant 0 : index
    %27 = tpu.strided_load %arg17[%c5, %c0_26] {strides = array<i32: 16, 1>} : memref<32x25xf32, #tpu.memory_space<vmem>>, vector<2x25xf32>
    %c5_27 = arith.constant 5 : index
    %c0_28 = arith.constant 0 : index
    %c0_29 = arith.constant 0 : index
    %28 = vector.load %arg7[%c5_27, %c0_28, %c0_29] : memref<16x25x120xf32, #tpu.memory_space<vmem>>, vector<1x25x120xf32>
    %29 = vector.shape_cast %28 : vector<1x25x120xf32> to vector<25x120xf32>
    %cst_30 = arith.constant dense<0.000000e+00> : vector<2x120xf32>
    %30 = tpu.matmul %27, %29, %cst_30 {dimension_numbers = #tpu.dot_dimension_numbers<[1], [0], [0], [1], [0, 0, 1, 1], [], []>} : vector<2x25xf32>, vector<25x120xf32>, vector<2x120xf32> -> vector<2x120xf32>
    %31 = arith.addf %26, %30 : vector<2x120xf32>
    %c6 = arith.constant 6 : index
    %c0_31 = arith.constant 0 : index
    %32 = tpu.strided_load %arg17[%c6, %c0_31] {strides = array<i32: 16, 1>} : memref<32x25xf32, #tpu.memory_space<vmem>>, vector<2x25xf32>
    %c6_32 = arith.constant 6 : index
    %c0_33 = arith.constant 0 : index
    %c0_34 = arith.constant 0 : index
    %33 = vector.load %arg7[%c6_32, %c0_33, %c0_34] : memref<16x25x120xf32, #tpu.memory_space<vmem>>, vector<1x25x120xf32>
    %34 = vector.shape_cast %33 : vector<1x25x120xf32> to vector<25x120xf32>
    %cst_35 = arith.constant dense<0.000000e+00> : vector<2x120xf32>
    %35 = tpu.matmul %32, %34, %cst_35 {dimension_numbers = #tpu.dot_dimension_numbers<[1], [0], [0], [1], [0, 0, 1, 1], [], []>} : vector<2x25xf32>, vector<25x120xf32>, vector<2x120xf32> -> vector<2x120xf32>
    %36 = arith.addf %31, %35 : vector<2x120xf32>
    %c7 = arith.constant 7 : index
    %c0_36 = arith.constant 0 : index
    %37 = tpu.strided_load %arg17[%c7, %c0_36] {strides = array<i32: 16, 1>} : memref<32x25xf32, #tpu.memory_space<vmem>>, vector<2x25xf32>
    %c7_37 = arith.constant 7 : index
    %c0_38 = arith.constant 0 : index
    %c0_39 = arith.constant 0 : index
    %38 = vector.load %arg7[%c7_37, %c0_38, %c0_39] : memref<16x25x120xf32, #tpu.memory_space<vmem>>, vector<1x25x120xf32>
    %39 = vector.shape_cast %38 : vector<1x25x120xf32> to vector<25x120xf32>
    %cst_40 = arith.constant dense<0.000000e+00> : vector<2x120xf32>
    %40 = tpu.matmul %37, %39, %cst_40 {dimension_numbers = #tpu.dot_dimension_numbers<[1], [0], [0], [1], [0, 0, 1, 1], [], []>} : vector<2x25xf32>, vector<25x120xf32>, vector<2x120xf32> -> vector<2x120xf32>
    %41 = arith.addf %36, %40 : vector<2x120xf32>
    %c8 = arith.constant 8 : index
    %c0_41 = arith.constant 0 : index
    %42 = tpu.strided_load %arg17[%c8, %c0_41] {strides = array<i32: 16, 1>} : memref<32x25xf32, #tpu.memory_space<vmem>>, vector<2x25xf32>
    %c8_42 = arith.constant 8 : index
    %c0_43 = arith.constant 0 : index
    %c0_44 = arith.constant 0 : index
    %43 = vector.load %arg7[%c8_42, %c0_43, %c0_44] : memref<16x25x120xf32, #tpu.memory_space<vmem>>, vector<1x25x120xf32>
    %44 = vector.shape_cast %43 : vector<1x25x120xf32> to vector<25x120xf32>
    %cst_45 = arith.constant dense<0.000000e+00> : vector<2x120xf32>
    %45 = tpu.matmul %42, %44, %cst_45 {dimension_numbers = #tpu.dot_dimension_numbers<[1], [0], [0], [1], [0, 0, 1, 1], [], []>} : vector<2x25xf32>, vector<25x120xf32>, vector<2x120xf32> -> vector<2x120xf32>
    %46 = arith.addf %41, %45 : vector<2x120xf32>
    %c9 = arith.constant 9 : index
    %c0_46 = arith.constant 0 : index
    %47 = tpu.strided_load %arg17[%c9, %c0_46] {strides = array<i32: 16, 1>} : memref<32x25xf32, #tpu.memory_space<vmem>>, vector<2x25xf32>
    %c9_47 = arith.constant 9 : index
    %c0_48 = arith.constant 0 : index
    %c0_49 = arith.constant 0 : index
    %48 = vector.load %arg7[%c9_47, %c0_48, %c0_49] : memref<16x25x120xf32, #tpu.memory_space<vmem>>, vector<1x25x120xf32>
    %49 = vector.shape_cast %48 : vector<1x25x120xf32> to vector<25x120xf32>
    %cst_50 = arith.constant dense<0.000000e+00> : vector<2x120xf32>
    %50 = tpu.matmul %47, %49, %cst_50 {dimension_numbers = #tpu.dot_dimension_numbers<[1], [0], [0], [1], [0, 0, 1, 1], [], []>} : vector<2x25xf32>, vector<25x120xf32>, vector<2x120xf32> -> vector<2x120xf32>
    %51 = arith.addf %46, %50 : vector<2x120xf32>
    %c10 = arith.constant 10 : index
    %c0_51 = arith.constant 0 : index
    %52 = tpu.strided_load %arg17[%c10, %c0_51] {strides = array<i32: 16, 1>} : memref<32x25xf32, #tpu.memory_space<vmem>>, vector<2x25xf32>
    %c10_52 = arith.constant 10 : index
    %c0_53 = arith.constant 0 : index
    %c0_54 = arith.constant 0 : index
    %53 = vector.load %arg7[%c10_52, %c0_53, %c0_54] : memref<16x25x120xf32, #tpu.memory_space<vmem>>, vector<1x25x120xf32>
    %54 = vector.shape_cast %53 : vector<1x25x120xf32> to vector<25x120xf32>
    %cst_55 = arith.constant dense<0.000000e+00> : vector<2x120xf32>
    %55 = tpu.matmul %52, %54, %cst_55 {dimension_numbers = #tpu.dot_dimension_numbers<[1], [0], [0], [1], [0, 0, 1, 1], [], []>} : vector<2x25xf32>, vector<25x120xf32>, vector<2x120xf32> -> vector<2x120xf32>
    %56 = arith.addf %51, %55 : vector<2x120xf32>
    %c11 = arith.constant 11 : index
    %c0_56 = arith.constant 0 : index
    %57 = tpu.strided_load %arg17[%c11, %c0_56] {strides = array<i32: 16, 1>} : memref<32x25xf32, #tpu.memory_space<vmem>>, vector<2x25xf32>
    %c11_57 = arith.constant 11 : index
    %c0_58 = arith.constant 0 : index
    %c0_59 = arith.constant 0 : index
    %58 = vector.load %arg7[%c11_57, %c0_58, %c0_59] : memref<16x25x120xf32, #tpu.memory_space<vmem>>, vector<1x25x120xf32>
    %59 = vector.shape_cast %58 : vector<1x25x120xf32> to vector<25x120xf32>
    %cst_60 = arith.constant dense<0.000000e+00> : vector<2x120xf32>
    %60 = tpu.matmul %57, %59, %cst_60 {dimension_numbers = #tpu.dot_dimension_numbers<[1], [0], [0], [1], [0, 0, 1, 1], [], []>} : vector<2x25xf32>, vector<25x120xf32>, vector<2x120xf32> -> vector<2x120xf32>
    %61 = arith.addf %56, %60 : vector<2x120xf32>
    %c12 = arith.constant 12 : index
    %c0_61 = arith.constant 0 : index
    %62 = tpu.strided_load %arg17[%c12, %c0_61] {strides = array<i32: 16, 1>} : memref<32x25xf32, #tpu.memory_space<vmem>>, vector<2x25xf32>
    %c12_62 = arith.constant 12 : index
    %c0_63 = arith.constant 0 : index
    %c0_64 = arith.constant 0 : index
    %63 = vector.load %arg7[%c12_62, %c0_63, %c0_64] : memref<16x25x120xf32, #tpu.memory_space<vmem>>, vector<1x25x120xf32>
    %64 = vector.shape_cast %63 : vector<1x25x120xf32> to vector<25x120xf32>
    %cst_65 = arith.constant dense<0.000000e+00> : vector<2x120xf32>
    %65 = tpu.matmul %62, %64, %cst_65 {dimension_numbers = #tpu.dot_dimension_numbers<[1], [0], [0], [1], [0, 0, 1, 1], [], []>} : vector<2x25xf32>, vector<25x120xf32>, vector<2x120xf32> -> vector<2x120xf32>
    %66 = arith.addf %61, %65 : vector<2x120xf32>
    %c13 = arith.constant 13 : index
    %c0_66 = arith.constant 0 : index
    %67 = tpu.strided_load %arg17[%c13, %c0_66] {strides = array<i32: 16, 1>} : memref<32x25xf32, #tpu.memory_space<vmem>>, vector<2x25xf32>
    %c13_67 = arith.constant 13 : index
    %c0_68 = arith.constant 0 : index
    %c0_69 = arith.constant 0 : index
    %68 = vector.load %arg7[%c13_67, %c0_68, %c0_69] : memref<16x25x120xf32, #tpu.memory_space<vmem>>, vector<1x25x120xf32>
    %69 = vector.shape_cast %68 : vector<1x25x120xf32> to vector<25x120xf32>
    %cst_70 = arith.constant dense<0.000000e+00> : vector<2x120xf32>
    %70 = tpu.matmul %67, %69, %cst_70 {dimension_numbers = #tpu.dot_dimension_numbers<[1], [0], [0], [1], [0, 0, 1, 1], [], []>} : vector<2x25xf32>, vector<25x120xf32>, vector<2x120xf32> -> vector<2x120xf32>
    %71 = arith.addf %66, %70 : vector<2x120xf32>
    %c14 = arith.constant 14 : index
    %c0_71 = arith.constant 0 : index
    %72 = tpu.strided_load %arg17[%c14, %c0_71] {strides = array<i32: 16, 1>} : memref<32x25xf32, #tpu.memory_space<vmem>>, vector<2x25xf32>
    %c14_72 = arith.constant 14 : index
    %c0_73 = arith.constant 0 : index
    %c0_74 = arith.constant 0 : index
    %73 = vector.load %arg7[%c14_72, %c0_73, %c0_74] : memref<16x25x120xf32, #tpu.memory_space<vmem>>, vector<1x25x120xf32>
    %74 = vector.shape_cast %73 : vector<1x25x120xf32> to vector<25x120xf32>
    %cst_75 = arith.constant dense<0.000000e+00> : vector<2x120xf32>
    %75 = tpu.matmul %72, %74, %cst_75 {dimension_numbers = #tpu.dot_dimension_numbers<[1], [0], [0], [1], [0, 0, 1, 1], [], []>} : vector<2x25xf32>, vector<25x120xf32>, vector<2x120xf32> -> vector<2x120xf32>
    %76 = arith.addf %71, %75 : vector<2x120xf32>
    %c15 = arith.constant 15 : index
    %c0_76 = arith.constant 0 : index
    %77 = tpu.strided_load %arg17[%c15, %c0_76] {strides = array<i32: 16, 1>} : memref<32x25xf32, #tpu.memory_space<vmem>>, vector<2x25xf32>
    %c15_77 = arith.constant 15 : index
    %c0_78 = arith.constant 0 : index
    %c0_79 = arith.constant 0 : index
    %78 = vector.load %arg7[%c15_77, %c0_78, %c0_79] : memref<16x25x120xf32, #tpu.memory_space<vmem>>, vector<1x25x120xf32>
    %79 = vector.shape_cast %78 : vector<1x25x120xf32> to vector<25x120xf32>
    %cst_80 = arith.constant dense<0.000000e+00> : vector<2x120xf32>
    %80 = tpu.matmul %77, %79, %cst_80 {dimension_numbers = #tpu.dot_dimension_numbers<[1], [0], [0], [1], [0, 0, 1, 1], [], []>} : vector<2x25xf32>, vector<25x120xf32>, vector<2x120xf32> -> vector<2x120xf32>
    %81 = arith.addf %76, %80 : vector<2x120xf32>
    %c0_81 = arith.constant 0 : index
    %c0_82 = arith.constant 0 : index
    %82 = vector.load %arg8[%c0_81, %c0_82] : memref<1x120xf32, #tpu.memory_space<vmem>>, vector<1x120xf32>
    %83 = vector.broadcast %82 : vector<1x120xf32> to vector<2x120xf32>
    %84 = arith.addf %81, %83 : vector<2x120xf32>
    %cst_83 = arith.constant 0.000000e+00 : f32
    %85 = vector.broadcast %cst_83 : f32 to vector<2x120xf32>
    %86 = arith.maximumf %84, %85 : vector<2x120xf32>
    %c0_84 = arith.constant 0 : index
    %c0_85 = arith.constant 0 : index
    %87 = vector.load %arg9[%c0_84, %c0_85] : memref<120x84xf32, #tpu.memory_space<vmem>>, vector<120x84xf32>
    %cst_86 = arith.constant dense<0.000000e+00> : vector<2x84xf32>
    %88 = tpu.matmul %86, %87, %cst_86 {dimension_numbers = #tpu.dot_dimension_numbers<[1], [0], [0], [1], [0, 0, 1, 1], [], []>} : vector<2x120xf32>, vector<120x84xf32>, vector<2x84xf32> -> vector<2x84xf32>
    %c0_87 = arith.constant 0 : index
    %c0_88 = arith.constant 0 : index
    %89 = vector.load %arg10[%c0_87, %c0_88] : memref<1x84xf32, #tpu.memory_space<vmem>>, vector<1x84xf32>
    %90 = vector.broadcast %89 : vector<1x84xf32> to vector<2x84xf32>
    %91 = arith.addf %88, %90 : vector<2x84xf32>
    %cst_89 = arith.constant 0.000000e+00 : f32
    %92 = vector.broadcast %cst_89 : f32 to vector<2x84xf32>
    %93 = arith.maximumf %91, %92 : vector<2x84xf32>
    %c0_90 = arith.constant 0 : index
    %c0_91 = arith.constant 0 : index
    %94 = vector.load %arg11[%c0_90, %c0_91] : memref<84x128xf32, #tpu.memory_space<vmem>>, vector<84x128xf32>
    %cst_92 = arith.constant dense<0.000000e+00> : vector<2x128xf32>
    %95 = tpu.matmul %93, %94, %cst_92 {dimension_numbers = #tpu.dot_dimension_numbers<[1], [0], [0], [1], [0, 0, 1, 1], [], []>} : vector<2x84xf32>, vector<84x128xf32>, vector<2x128xf32> -> vector<2x128xf32>
    %c0_93 = arith.constant 0 : index
    %c0_94 = arith.constant 0 : index
    %96 = vector.load %arg12[%c0_93, %c0_94] : memref<1x128xf32, #tpu.memory_space<vmem>>, vector<1x128xf32>
    %97 = vector.broadcast %96 : vector<1x128xf32> to vector<2x128xf32>
    %98 = arith.addf %95, %97 : vector<2x128xf32>
    %c0_95 = arith.constant 0 : index
    %c0_96 = arith.constant 0 : index
    %99 = vector.load %arg13[%c0_95, %c0_96] : memref<2x128xf32, #tpu.memory_space<vmem>>, vector<2x128xf32>
    tpu.vector_store %arg13[%c0_95, %c0_96], %98 {strides = array<i32>} : memref<2x128xf32, #tpu.memory_space<vmem>>, vector<2x128xf32>,
    return
  }
  func.func @transform_0(%arg0: i32) -> (i32, i32, i32) {
    %c0_i32 = arith.constant 0 : i32
    %c0_i32_0 = arith.constant 0 : i32
    %c0_i32_1 = arith.constant 0 : i32
    return %arg0, %c0_i32, %c0_i32_0 : i32, i32, i32
  }
  func.func @transform_1(%arg0: i32) -> (i32, i32, i32) {
    %c0_i32 = arith.constant 0 : i32
    %c0_i32_0 = arith.constant 0 : i32
    %c0_i32_1 = arith.constant 0 : i32
    %c0_i32_2 = arith.constant 0 : i32
    return %c0_i32, %c0_i32_0, %c0_i32_1 : i32, i32, i32
  }
  func.func @transform_2(%arg0: i32) -> (i32, i32) {
    %c0_i32 = arith.constant 0 : i32
    %c0_i32_0 = arith.constant 0 : i32
    %c0_i32_1 = arith.constant 0 : i32
    return %c0_i32, %c0_i32_0 : i32, i32
  }
  func.func @transform_3(%arg0: i32) -> (i32, i32, i32) {
    %c0_i32 = arith.constant 0 : i32
    %c0_i32_0 = arith.constant 0 : i32
    %c0_i32_1 = arith.constant 0 : i32
    %c0_i32_2 = arith.constant 0 : i32
    return %c0_i32, %c0_i32_0, %c0_i32_1 : i32, i32, i32
  }
  func.func @transform_4(%arg0: i32) -> (i32, i32) {
    %c0_i32 = arith.constant 0 : i32
    %c0_i32_0 = arith.constant 0 : i32
    %c0_i32_1 = arith.constant 0 : i32
    return %c0_i32, %c0_i32_0 : i32, i32
  }
  func.func @transform_5(%arg0: i32) -> (i32, i32) {
    %c0_i32 = arith.constant 0 : i32
    %c0_i32_0 = arith.constant 0 : i32
    %c0_i32_1 = arith.constant 0 : i32
    return %c0_i32, %c0_i32_0 : i32, i32
  }
  func.func @transform_6(%arg0: i32) -> (i32, i32, i32) {
    %c0_i32 = arith.constant 0 : i32
    %c0_i32_0 = arith.constant 0 : i32
    %c0_i32_1 = arith.constant 0 : i32
    %c0_i32_2 = arith.constant 0 : i32
    return %c0_i32, %c0_i32_0, %c0_i32_1 : i32, i32, i32
  }
  func.func @transform_7(%arg0: i32) -> (i32, i32) {
    %c0_i32 = arith.constant 0 : i32
    %c0_i32_0 = arith.constant 0 : i32
    %c0_i32_1 = arith.constant 0 : i32
    return %c0_i32, %c0_i32_0 : i32, i32
  }
  func.func @transform_8(%arg0: i32) -> (i32, i32) {
    %c0_i32 = arith.constant 0 : i32
    %c0_i32_0 = arith.constant 0 : i32
    %c0_i32_1 = arith.constant 0 : i32
    return %c0_i32, %c0_i32_0 : i32, i32
  }
  func.func @transform_9(%arg0: i32) -> (i32, i32) {
    %c0_i32 = arith.constant 0 : i32
    %c0_i32_0 = arith.constant 0 : i32
    %c0_i32_1 = arith.constant 0 : i32
    return %c0_i32, %c0_i32_0 : i32, i32
  }
  func.func @transform_10(%arg0: i32) -> (i32, i32) {
    %c0_i32 = arith.constant 0 : i32
    %c0_i32_0 = arith.constant 0 : i32
    %c0_i32_1 = arith.constant 0 : i32
    return %c0_i32, %c0_i32_0 : i32, i32
  }
  func.func @transform_11(%arg0: i32) -> (i32, i32) {
    %c0_i32 = arith.constant 0 : i32
    %c0_i32_0 = arith.constant 0 : i32
    %c0_i32_1 = arith.constant 0 : i32
    return %c0_i32, %c0_i32_0 : i32, i32
  }
  func.func @transform_12(%arg0: i32) -> (i32, i32) {
    %c0_i32 = arith.constant 0 : i32
    %c0_i32_0 = arith.constant 0 : i32
    return %arg0, %c0_i32 : i32, i32
  }
}

</mosaic_0001>

<bundles_post_ra>
// kernel: _lambda_.1
= control target key start
LH: loop header
LB: loop body
LE: loop exit
PB: predicated region body
PF: predicated region fallthrough
CT: control target
= control target key end

     0   :  { %17 = vsyncpa [#allocation7], 0  ;;  %s11513_s21 = smov 0   ;;  %s15414_s0 = inlined_call_operand.vmem [shape: f32[2,3,1152], index: 0, kind: input, shape index: {}]   ;;  %s15415_s1 = inlined_call_operand.vmem [shape: f32[25,6,3], index: 1, kind: input, shape index: {}]   ;;  %s15416_s2 = inlined_call_operand.vmem [shape: f32[6,1], index: 2, kind: input, shape index: {}]   ;;  %s15417_s3 = inlined_call_operand.vmem [shape: f32[25,16,6], index: 3, kind: input, shape index: {}]   ;;  %s15418_s4 = inlined_call_operand.vmem [shape: f32[16,1], index: 4, kind: input, shape index: {}]   ;;  %s15419_s5 = inlined_call_operand.vmem [shape: f32[529,25], index: 5, kind: input, shape index: {}]   ;;  %s15420_s6 = inlined_call_operand.vmem [shape: f32[16,25,120], index: 6, kind: input, shape index: {}]   ;;  %s15421_s7 = inlined_call_operand.vmem [shape: f32[1,120], index: 7, kind: input, shape index: {}]   ;;  %s15422_s8 = inlined_call_operand.vmem [shape: f32[120,84], index: 8, kind: input, shape index: {}]   ;;  %s15423_s9 = inlined_call_operand.vmem [shape: f32[1,84], index: 9, kind: input, shape index: {}]   ;;  %s15424_s10 = inlined_call_operand.vmem [shape: f32[84,128], index: 10, kind: input, shape index: {}]   ;;  %s15425_s11 = inlined_call_operand.vmem [shape: f32[1,128], index: 11, kind: input, shape index: {}]   ;;  %s15426_s12 = inlined_call_operand.hbm [shape: f32[2,128], index: 12, kind: output, shape index: {}]  }
   0x1 LB: > { %s11309_s22 = smul.u32 36, %s11421_s21  ;;  %s11423_s26 = smov 127   ;;  %vm94_vm0 = vcmask 1039360   ;;  %vm106_vm1 = vcmask 1042432   ;;  %vm102_vm2 = vcmask 23552   ;;  %vm474_vm3 = vcmask 1031168   ;;  %s11421_s21 = sphi %s11513_s21, %s47_s21  }
   0x2   : > { %s11424_s27 = smov 126   ;;  %s11425_s28 = smov 125   ;;  %vm687_vm4 = vcmask 1022976   ;;  %vm900_vm5 = vcmask 1014784   ;;  %vm1113_vm6 = vcmask 785408   ;;  %vm1326_vm7 = vcmask 777216  }
   0x3   : > { %s11522_s25 = scalar_lea.vmem %s15414_s0, %s11309_s22  ;;  %s11426_s29 = smov 124   ;;  %vm1539_vm8 = vcmask 769024   ;;  %vm1752_vm9 = vcmask 760832   ;;  %vm1965_vm10 = vcmask 752640   ;;  %vm2178_vm11 = vcmask 523264  }
   0x4   : > { %v52_v0 = vld [vmem:[%s11522_s25 + $0x8] sm:$0x77]  ;;  %v51_v1 = vld [vmem:[%s11522_s25] sm:$0x77]  ;;  %v53_v2 = vld [vmem:[%s11522_s25 + $0x10] sm:$0x77] }
   0x5   : > { %65 = vst [vmem:[#allocation1 + $0x10] ss:$2 sm:$0xff] %v52_v0  ;;  %v56_v3 = vld [vmem:[%s11522_s25 + $0x18] sm:$0x77]  ;;  %v434_v13 = vld [vmem:[%s11522_s25 + $0x8] sm:$0x77] }
   0x6   : > { %63 = vst [vmem:[#allocation1] ss:$2 sm:$0xff] %v51_v1  ;;  %v54_v7 = vld [vmem:[%s11522_s25 + $0x18] sm:$0x7]  ;;  %v433_v14 = vld [vmem:[%s11522_s25] sm:$0x77] }
   0x7   : > { %67 = vst [vmem:[#allocation1 + $0x20] ss:$2 sm:$0xff] %v53_v2  ;;  %v436_v17 = vld [vmem:[%s11522_s25 + $0x18] sm:$0x77]  ;;  %v435_v18 = vld [vmem:[%s11522_s25 + $0x10] sm:$0x77] }
   0x8   : > { %69 = vst [vmem:[#allocation1 + $0x30] ss:$2 sm:$0xff] %v56_v3  ;;  %v647_v24 = vld [vmem:[%s11522_s25 + $0x8] sm:$0x77]  ;;  %v646_v25 = vld [vmem:[%s11522_s25] sm:$0x77] }
   0x9   : > { %v649_v30 = vld [vmem:[%s11522_s25 + $0x18] sm:$0x77]  ;;  %v648_v35 = vld [vmem:[%s11522_s25 + $0x10] sm:$0x77]  ;;  %v860_v36 = vld [vmem:[%s11522_s25 + $0x8] sm:$0x77] }
   0xa   : > { %v859_v39 = vld [vmem:[%s11522_s25] sm:$0x77]  ;;  %v861_v46 = vld [vmem:[%s11522_s25 + $0x10] sm:$0x77]  ;;  %v862_v47 = vld [vmem:[%s11522_s25 + $0x18] sm:$0x77] }
   0xb   : > { %v1072_v48 = vld [vmem:[%s11522_s25] sm:$0x77]  ;;  %v1073_v53 = vld [vmem:[%s11522_s25 + $0x8] sm:$0x77]  ;;  %v1074_v56 = vld [vmem:[%s11522_s25 + $0x10] sm:$0x77] }
   0xc   : > { %v72_v4 = vld.sshfl [vmem:[#allocation1 + $0x10] sm:$0xff pattern:$0x75316420]  ;;  %v73_v5 = vld.sshfl [vmem:[#allocation1 + $0x18] sm:$0xff pattern:$0x75316420] }
   0xd   : > { %82 = vrot.lane.b32.xlu1 %v72_v4, %s11423_s26  ;;  %v70_v6 = vld.sshfl [vmem:[#allocation1] sm:$0xff pattern:$0x75316420]  ;;  %264 = vst [vmem:[#allocation1 + $0x10] ss:$2 sm:$0xff] %v52_v0  ;;  %s11427_s30 = smov 96  }
   0xe   : > { %78 = vrot.lane.b32.xlu0 %v70_v6, %s11423_s26  ;;  %v71_v8 = vld.sshfl [vmem:[#allocation1 + $0x8] sm:$0xff pattern:$0x75316420]  ;;  %v74_v9 = vld.sshfl [vmem:[#allocation1 + $0x20] sm:$0xff pattern:$0x75316420] }
   0xf   : > { %262 = vst [vmem:[#allocation1] ss:$2 sm:$0xff] %v51_v1  ;;  %86 = vrot.lane.b32.xlu2 %v74_v9, %s11423_s26  ;;  %v75_v10 = vld.sshfl [vmem:[#allocation1 + $0x28] sm:$0xff pattern:$0x75316420]  ;;  %s11428_s13 = smov 95  }
  0x10   : > { %266 = vst [vmem:[#allocation1 + $0x20] ss:$2 sm:$0xff] %v53_v2  ;;  %v77_v11 = vld.sshfl [vmem:[#allocation1 + $0x38] sm:$0xff pattern:$0x75316420]  ;;  %s11429_s16 = smov 94  }
  0x11   : > { %v76_v12 = vld.sshfl [vmem:[#allocation1 + $0x30] sm:$0xff pattern:$0x75316420]  ;;  %v1286_v60 = vld [vmem:[%s11522_s25 + $0x8] sm:$0x77]  ;;  %s11430_s19 = smov 93  }
  0x12   : > { %268 = vst [vmem:[#allocation1 + $0x30] ss:$2 sm:$0xff] %v54_v7  ;;  %v1285_v61 = vld [vmem:[%s11522_s25] sm:$0x77]  ;;  %v1287_v2 = vld [vmem:[%s11522_s25 + $0x10] sm:$0x77] }
  0x13   : > { %v1075_v3 = vld [vmem:[%s11522_s25 + $0x18] sm:$0x77]  ;;  %s11434_s23 = smov 62   ;;  %s11435_s14 = smov 61   ;;  %vm2391_vm12 = vcmask 515072   ;;  %vm2604_vm13 = vcmask 506880  }
  0x14   : > { %v11534_v15 = vld.sshfl [vmem:[#allocation1 + $0x10] sm:$0xff pattern:$0x75316420]  ;;  %v11536_v16 = vld.sshfl [vmem:[#allocation1 + $0x18] sm:$0xff pattern:$0x75316420] }
  0x15   : > { %84 = vrot.lane.b32.xlu1 %v73_v5, %s11423_s26  ;;  %445 = vst [vmem:[#allocation1 + $0x10] ss:$2 sm:$0xff] %v434_v13  ;;  %v1288_v7 = vld [vmem:[%s11522_s25 + $0x18] sm:$0x77]  ;;  %s11436_s18 = smov 60   ;;  %s11437_s22 = smov 32  }
  0x16   : > { %80 = vrot.lane.b32.xlu0 %v71_v8, %s11423_s26  ;;  %v11542_v19 = vld.sshfl [vmem:[#allocation1] sm:$0xff pattern:$0x75316420]  ;;  %v11544_v20 = vld.sshfl [vmem:[#allocation1 + $0x8] sm:$0xff pattern:$0x75316420] }
  0x17   : > { %90 = vrot.lane.b32.xlu2 %v76_v12, %s11423_s26  ;;  %443 = vst [vmem:[#allocation1] ss:$2 sm:$0xff] %v433_v14  ;;  %v11547_v21 = vld.sshfl [vmem:[#allocation1 + $0x20] sm:$0xff pattern:$0x75316420]  ;;  %s11440_s24 = smov 29  }
  0x18   : > { %v11549_v22 = vld.sshfl [vmem:[#allocation1 + $0x28] sm:$0xff pattern:$0x75316420]  ;;  %vm2817_vm14 = vcmask 498688   ;;  %s11441_s15 = smov 28   ;;  %vm3030_vm15 = vcmask 490496  }
  0x19   : > { %v11551_v23 = vld.sshfl [vmem:[#allocation1 + $0x30] sm:$0xff pattern:$0x75316420]  ;;  %447 = vst [vmem:[#allocation1 + $0x20] ss:$2 sm:$0xff] %v435_v18 }
  0x1a   : > { %449 = vst [vmem:[#allocation1 + $0x30] ss:$2 sm:$0xff] %v436_v17  ;;  %v1500_v18 = vld [vmem:[%s11522_s25 + $0x10] sm:$0x77] }
  0x1c   : > { %v452_v26 = vld.sshfl [vmem:[#allocation1 + $0x10] sm:$0xff pattern:$0x75316420]  ;;  %v453_v27 = vld.sshfl [vmem:[#allocation1 + $0x18] sm:$0xff pattern:$0x75316420] }
  0x1d   : > { %88 = vrot.lane.b32.xlu1 %v75_v10, %s11423_s26  ;;  %658 = vst [vmem:[#allocation1 + $0x10] ss:$2 sm:$0xff] %v647_v24  ;;  %v1499_v10 = vld [vmem:[%s11522_s25 + $0x8] sm:$0x77]  ;;  %v1498_v24 = vld [vmem:[%s11522_s25] sm:$0x77] }
  0x1e   : > { %92 = vrot.lane.b32.xlu0 %v77_v11, %s11423_s26  ;;  %v451_v28 = vld.sshfl [vmem:[#allocation1 + $0x8] sm:$0xff pattern:$0x75316420]  ;;  %v450_v29 = vld.sshfl [vmem:[#allocation1] sm:$0xff pattern:$0x75316420] }
  0x1f   : > { %458 = vrot.lane.b32.xlu2 %v450_v29, %s11424_s27  ;;  %656 = vst [vmem:[#allocation1] ss:$2 sm:$0xff] %v646_v25 }
  0x20   : > { %v454_v33 = vld.sshfl [vmem:[#allocation1 + $0x20] sm:$0xff pattern:$0x75316420]  ;;  %v455_v37 = vld.sshfl [vmem:[#allocation1 + $0x28] sm:$0xff pattern:$0x75316420] }
  0x21   : > { %v456_v31 = vld.sshfl [vmem:[#allocation1 + $0x30] sm:$0xff pattern:$0x75316420]  ;;  %v457_v32 = vld.sshfl [vmem:[#allocation1 + $0x38] sm:$0xff pattern:$0x75316420] }
  0x22   : > { %662 = vst [vmem:[#allocation1 + $0x30] ss:$2 sm:$0xff] %v649_v30 }
  0x23   : > { %660 = vst [vmem:[#allocation1 + $0x20] ss:$2 sm:$0xff] %v648_v35 }
  0x24   : > { %v666_v34 = vld.sshfl [vmem:[#allocation1 + $0x18] sm:$0xff pattern:$0x75316420]  ;;  %v665_v38 = vld.sshfl [vmem:[#allocation1 + $0x10] sm:$0xff pattern:$0x75316420] }
  0x25   : > { %462 = vrot.lane.b32.xlu1 %v452_v26, %s11424_s27  ;;  %871 = vst [vmem:[#allocation1 + $0x10] ss:$2 sm:$0xff] %v860_v36  ;;  %v1712_v36 = vld [vmem:[%s11522_s25 + $0x8] sm:$0x77] }
  0x26   : > { %460 = vrot.lane.b32.xlu0 %v451_v28, %s11424_s27  ;;  %v664_v40 = vld.sshfl [vmem:[#allocation1 + $0x8] sm:$0xff pattern:$0x75316420]  ;;  %v663_v41 = vld.sshfl [vmem:[#allocation1] sm:$0xff pattern:$0x75316420] }
  0x27   : > { %466 = vrot.lane.b32.xlu2 %v454_v33, %s11424_s27  ;;  %869 = vst [vmem:[#allocation1] ss:$2 sm:$0xff] %v859_v39  ;;  %v1501_v28 = vld [vmem:[%s11522_s25 + $0x18] sm:$0x77] }
  0x29   : > { %v669_v44 = vld.sshfl [vmem:[#allocation1 + $0x30] sm:$0xff pattern:$0x75316420]  ;;  %v670_v45 = vld.sshfl [vmem:[#allocation1 + $0x38] sm:$0xff pattern:$0x75316420] }
  0x2a   : > { %v667_v42 = vld.sshfl [vmem:[#allocation1 + $0x20] sm:$0xff pattern:$0x75316420]  ;;  %v668_v43 = vld.sshfl [vmem:[#allocation1 + $0x28] sm:$0xff pattern:$0x75316420] }
  0x2b   : > { %873 = vst [vmem:[#allocation1 + $0x20] ss:$2 sm:$0xff] %v861_v46 }
  0x2c   : > { %875 = vst [vmem:[#allocation1 + $0x30] ss:$2 sm:$0xff] %v862_v47  ;;  %v878_v51 = vld.sshfl [vmem:[#allocation1 + $0x10] sm:$0xff pattern:$0x75316420] }
  0x2d   : > { %470 = vrot.lane.b32.xlu1 %v456_v31, %s11424_s27  ;;  %v879_v52 = vld.sshfl [vmem:[#allocation1 + $0x18] sm:$0xff pattern:$0x75316420] }
  0x2e   : > { %468 = vrot.lane.b32.xlu0 %v455_v37, %s11424_s27  ;;  %v877_v49 = vld.sshfl [vmem:[#allocation1 + $0x8] sm:$0xff pattern:$0x75316420]  ;;  %v876_v50 = vld.sshfl [vmem:[#allocation1] sm:$0xff pattern:$0x75316420] }
  0x2f   : > { %464 = vrot.lane.b32.xlu2 %v453_v27, %s11424_s27  ;;  %1082 = vst [vmem:[#allocation1] ss:$2 sm:$0xff] %v1072_v48 }
  0x30   : > { %1084 = vst [vmem:[#allocation1 + $0x10] ss:$2 sm:$0xff] %v1073_v53  ;;  %v1924_v53 = vld [vmem:[%s11522_s25] sm:$0x77] }
  0x32   : > { %v881_v54 = vld.sshfl [vmem:[#allocation1 + $0x28] sm:$0xff pattern:$0x75316420]  ;;  %v880_v55 = vld.sshfl [vmem:[#allocation1 + $0x20] sm:$0xff pattern:$0x75316420] }
  0x33   : > { %1086 = vst [vmem:[#allocation1 + $0x20] ss:$2 sm:$0xff] %v1074_v56  ;;  %v882_v0 = vld.sshfl [vmem:[#allocation1 + $0x30] sm:$0xff pattern:$0x75316420] }
  0x34   : > { %v883_v4 = vld.sshfl [vmem:[#allocation1 + $0x38] sm:$0xff pattern:$0x75316420] }
  0x35   : > { %675 = vrot.lane.b32.xlu1 %v665_v38, %s11425_s28  ;;  %1088 = vst [vmem:[#allocation1 + $0x30] ss:$2 sm:$0xff] %v1075_v3 }
  0x36   : > { %673 = vrot.lane.b32.xlu0 %v664_v40, %s11425_s28  ;;  %v1090_v58 = vld.sshfl [vmem:[#allocation1 + $0x8] sm:$0xff pattern:$0x75316420]  ;;  %v1089_v62 = vld.sshfl [vmem:[#allocation1] sm:$0xff pattern:$0x75316420] }
  0x37   : > { %677 = vrot.lane.b32.xlu2 %v666_v34, %s11425_s28  ;;  %v1092_v57 = vld.sshfl [vmem:[#allocation1 + $0x18] sm:$0xff pattern:$0x75316420]  ;;  %v1091_v59 = vld.sshfl [vmem:[#allocation1 + $0x10] sm:$0xff pattern:$0x75316420] }
  0x38   : > { %1297 = vst [vmem:[#allocation1 + $0x10] ss:$2 sm:$0xff] %v1286_v60  ;;  %v1713_v34 = vld [vmem:[%s11522_s25 + $0x10] sm:$0x77] }
  0x39   : > { %1295 = vst [vmem:[#allocation1] ss:$2 sm:$0xff] %v1285_v61 }
  0x3a   : > { %v1093_v63 = vld.sshfl [vmem:[#allocation1 + $0x20] sm:$0xff pattern:$0x75316420]  ;;  %v1094_v1 = vld.sshfl [vmem:[#allocation1 + $0x28] sm:$0xff pattern:$0x75316420] }
  0x3b   : > { %1299 = vst [vmem:[#allocation1 + $0x20] ss:$2 sm:$0xff] %v1287_v2 }
  0x3c   : > { %v1095_v5 = vld.sshfl [vmem:[#allocation1 + $0x30] sm:$0xff pattern:$0x75316420]  ;;  %v1096_v6 = vld.sshfl [vmem:[#allocation1 + $0x38] sm:$0xff pattern:$0x75316420] }
  0x3d   : > { %671 = vrot.lane.b32.xlu1 %v663_v41, %s11425_s28  ;;  %1301 = vst [vmem:[#allocation1 + $0x30] ss:$2 sm:$0xff] %v1288_v7  ;;  %v11631_v41 = vld [vmem:[%s15415_s1 + $0x8] sm:$0x3f]  ;;  %v2137_v7 = vld [vmem:[%s11522_s25] sm:$0x77] }
  0x3e   : > { %472 = vrot.lane.b32.xlu0 %v457_v32, %s11424_s27 }
  0x3f   : > { %681 = vrot.lane.b32.xlu2 %v668_v43, %s11425_s28  ;;  %v1305_v8 = vld.sshfl [vmem:[#allocation1 + $0x18] sm:$0xff pattern:$0x75316420]  ;;  %v1304_v9 = vld.sshfl [vmem:[#allocation1 + $0x10] sm:$0xff pattern:$0x75316420] }
  0x40   : > { %1510 = vst [vmem:[#allocation1 + $0x10] ss:$2 sm:$0xff] %v1499_v10  ;;  %v1302_v12 = vld.sshfl [vmem:[#allocation1] sm:$0xff pattern:$0x75316420] }
  0x41   : > { %v1303_v13 = vld.sshfl [vmem:[#allocation1 + $0x8] sm:$0xff pattern:$0x75316420] }
  0x42   : > { %v1306_v14 = vld.sshfl [vmem:[#allocation1 + $0x20] sm:$0xff pattern:$0x75316420]  ;;  %v1307_v17 = vld.sshfl [vmem:[#allocation1 + $0x28] sm:$0xff pattern:$0x75316420] }
  0x43   : > { %1512 = vst [vmem:[#allocation1 + $0x20] ss:$2 sm:$0xff] %v1500_v18 }
  0x44   : > { %1508 = vst [vmem:[#allocation1] ss:$2 sm:$0xff] %v1498_v24  ;;  %v1308_v26 = vld.sshfl [vmem:[#allocation1 + $0x30] sm:$0xff pattern:$0x75316420] }
  0x45   : > { %685 = vrot.lane.b32.xlu1 %v670_v45, %s11425_s28  ;;  %v1309_v27 = vld.sshfl [vmem:[#allocation1 + $0x38] sm:$0xff pattern:$0x75316420] }
  0x46   : > { %683 = vrot.lane.b32.xlu0 %v669_v44, %s11425_s28  ;;  %1514 = vst [vmem:[#allocation1 + $0x30] ss:$2 sm:$0xff] %v1501_v28  ;;  %v1714_v45 = vld [vmem:[%s11522_s25 + $0x18] sm:$0x77] }
  0x47   : > { %679 = vrot.lane.b32.xlu2 %v667_v42, %s11425_s28  ;;  %v1518_v31 = vld.sshfl [vmem:[#allocation1 + $0x18] sm:$0xff pattern:$0x75316420]  ;;  %v1517_v32 = vld.sshfl [vmem:[#allocation1 + $0x10] sm:$0xff pattern:$0x75316420] }
  0x48   : > { %1723 = vst [vmem:[#allocation1 + $0x10] ss:$2 sm:$0xff] %v1712_v36 }
  0x4a   : > { %v11615_v30 = vld.sshfl [vmem:[#allocation1 + $0x20] sm:$0xff pattern:$0x75316420]  ;;  %v11619_v33 = vld.sshfl [vmem:[#allocation1 + $0x28] sm:$0xff pattern:$0x75316420] }
  0x4b   : > { %1725 = vst [vmem:[#allocation1 + $0x20] ss:$2 sm:$0xff] %v1713_v34  ;;  %v1516_v39 = vld.sshfl [vmem:[#allocation1 + $0x8] sm:$0xff pattern:$0x75316420] }
  0x4c   : > { %v1515_v42 = vld.sshfl [vmem:[#allocation1] sm:$0xff pattern:$0x75316420]  ;;  %v2139_v34 = vld [vmem:[%s11522_s25 + $0x10] sm:$0x77] }
  0x4d   : > { %890 = vrot.lane.b32.xlu1 %v879_v52, %s11426_s29  ;;  %v1521_v40 = vld.sshfl [vmem:[#allocation1 + $0x30] sm:$0xff pattern:$0x75316420]  ;;  %v11634_v44 = vld.sshfl [vmem:[#allocation1 + $0x38] sm:$0xff pattern:$0x75316420] }
  0x4e   : > { %888 = vrot.lane.b32.xlu0 %v878_v51, %s11426_s29  ;;  %1727 = vst [vmem:[#allocation1 + $0x30] ss:$2 sm:$0xff] %v1714_v45 }
  0x4f   : > { %892 = vrot.lane.b32.xlu2 %v880_v55, %s11426_s29  ;;  %v1731_v2 = vld.sshfl [vmem:[#allocation1 + $0x18] sm:$0xff pattern:$0x75316420]  ;;  %v1730_v3 = vld.sshfl [vmem:[#allocation1 + $0x10] sm:$0xff pattern:$0x75316420] }
  0x52   : > { %v11693_v61 = vld.sshfl [vmem:[#allocation1 + $0x28] sm:$0xff pattern:$0x75316420] }
  0x55   : > { %886 = vrot.lane.b32.xlu1 %v877_v49, %s11426_s29  ;;  %v1711_v49 = vld [vmem:[%s11522_s25] sm:$0x77]  ;;  %v1735_v18 = vld.sshfl [vmem:[#allocation1 + $0x38] sm:$0xff pattern:$0x75316420] }
  0x56   : > { %884 = vrot.lane.b32.xlu0 %v876_v50, %s11426_s29  ;;  %1721 = vst [vmem:[#allocation1] ss:$2 sm:$0xff] %v1711_v49 }
  0x57   : > { %896 = vrot.lane.b32.xlu2 %v882_v0, %s11426_s29 }
  0x5d   : > { %1097 = vrot.lane.b32.xlu1 %v1089_v62, %s11427_s30  ;;  %v1732_v62 = vld.sshfl [vmem:[#allocation1 + $0x20] sm:$0xff pattern:$0x75316420] }
  0x5e   : > { %898 = vrot.lane.b32.xlu0 %v883_v4, %s11426_s29 }
  0x5f   : > { %1099 = vrot.lane.b32.xlu2 %v1090_v58, %s11427_s30  ;;  %v11667_v58 = vld.sshfl [vmem:[#allocation1 + $0x8] sm:$0xff pattern:$0x75316420] }
  0x65   : > { %1103 = vrot.lane.b32.xlu1 %v1092_v57, %s11427_s30 }
  0x66   : > { %894 = vrot.lane.b32.xlu0 %v881_v54, %s11426_s29 }
  0x67   : > { %1105 = vrot.lane.b32.xlu2 %v1093_v63, %s11427_s30  ;;  %v1925_v63 = vld [vmem:[%s11522_s25 + $0x8] sm:$0x77] }
  0x68   : > { %1936 = vst [vmem:[#allocation1 + $0x10] ss:$2 sm:$0xff] %v1925_v63 }
  0x69   : > { %v11600_v11 = vpop.permute.xlu2 %86 }
  0x6d   : > { %1101 = vrot.lane.b32.xlu1 %v1091_v59, %s11427_s30  ;;  %v11678_v59 = vld [vmem:[%s15415_s1] sm:$0x3f] }
  0x6e   : > { %1107 = vrot.lane.b32.xlu0 %v1094_v1, %s11427_s30 }
  0x6f   : > { %1310 = vrot.lane.b32.xlu2 %v1302_v12, %s11428_s13  ;;  %v10442_v12 = vld [vmem:[%s15415_s1 + $0x10] sm:$0x3f]  ;;  %v1944_v24 = vld.sshfl [vmem:[#allocation1 + $0x18] sm:$0xff pattern:$0x75316420] }
  0x71   : > { %v11607_v25 = vpop.permute.xlu2 %90 }
  0x75   : > { %1314 = vrot.lane.b32.xlu1 %v1304_v9, %s11428_s13 }
  0x76   : > { %1312 = vrot.lane.b32.xlu0 %v1303_v13, %s11428_s13 }
  0x77   : > { %1109 = vrot.lane.b32.xlu2 %v1095_v5, %s11427_s30 }
  0x79   : > { %v11613_v29 = vpop.permute.xlu2 %458 }
  0x7d   : > { %1318 = vrot.lane.b32.xlu1 %v1306_v14, %s11428_s13  ;;  %v11754_v14 = vld.sshfl [vmem:[#allocation1 + $0x10] sm:$0xff pattern:$0x75316420] }
  0x7e   : > { %1111 = vrot.lane.b32.xlu0 %v1096_v6, %s11427_s30 }
  0x7f   : > { %v83_v35 = vpop.permute.xlu1 %82  ;;  %1320 = vrot.lane.b32.xlu2 %v1307_v17, %s11428_s13  ;;  %v1734_v17 = vld.sshfl [vmem:[#allocation1 + $0x30] sm:$0xff pattern:$0x75316420] }
  0x80   : > { %v79_v37 = vpop.permute.xlu0 %78 }
  0x81   : > { %v11624_v38 = vpop.permute.xlu2 %466 }
  0x85   : > { %1316 = vrot.lane.b32.xlu1 %v1305_v8, %s11428_s13 }
  0x86   : > { %1322 = vrot.lane.b32.xlu0 %v1308_v26, %s11428_s13 }
  0x87   : > { %v85_v43 = vpop.permute.xlu1 %84  ;;  %1525 = vrot.lane.b32.xlu2 %v1516_v39, %s11429_s16 }
  0x88   : > { %v81_v46 = vpop.permute.xlu0 %80  ;;  %v97_v47 = vsel %vm94_vm0, %v83_v35, %v85_v43  ;;  %v98_v48 = vsel %vm94_vm0, %v85_v43, %v11600_v11 }
  0x89   : > { %v95_v50 = vsel %vm94_vm0, %v79_v37, %v81_v46  ;;  %10418 = vmatpush.msk.msra.mxu2 %vm106_vm1, %v97_v47  ;;  %10420 = vmatpush.msk.msra.mxu3 %vm106_vm1, %v98_v48  ;;  %v96_v51 = vsel %vm94_vm0, %v81_v46, %v83_v35  ;;  %v11645_v52 = vpop.permute.xlu2 %464  ;;  %v2350_v46 = vld [vmem:[%s11522_s25] sm:$0x77] }
  0x8a   : > { %10414 = vmatpush.msk.msra.mxu1 %vm106_vm1, %v95_v50  ;;  %10419 = vmatmul.msk.f32.vlgmr.msra.gmra.mxu2 %vm102_vm2, %v11631_v41 }
  0x8b   : > { %10415 = vmatmul.msk.f32.vlgmr.msra.gmra.mxu1 %vm102_vm2, %v11631_v41  ;;  %10421 = vmatmul.msk.f32.vlgmr.msra.gmra.mxu3 %vm102_vm2, %v11631_v41 }
  0x8c   : > { %10416 = vmatpush.msk.msrb.mxu1 %vm106_vm1, %v96_v51  ;;  %10428 = vmatpush.msk.msrb.mxu3 %vm106_vm1, %v11542_v19  ;;  %v11669_v19 = vld.sshfl [vmem:[#allocation1] sm:$0xff pattern:$0x75316420] }
  0x8d   : > { %1529 = vrot.lane.b32.xlu1 %v1518_v31, %s11429_s16  ;;  %1934 = vst [vmem:[#allocation1] ss:$2 sm:$0xff] %v1924_v53 }
  0x8e   : > { %10436 = vmatpush.msk.msra.mxu3 %vm106_vm1, %v11547_v21  ;;  %1527 = vrot.lane.b32.xlu0 %v1517_v32, %s11429_s16 }
  0x8f   : > { %v89_v54 = vpop.permute.xlu1 %88  ;;  %1324 = vrot.lane.b32.xlu2 %v1309_v27, %s11428_s13  ;;  %v1927_v27 = vld [vmem:[%s11522_s25 + $0x18] sm:$0x77]  ;;  %s11431_s13 = smov 92  }
  0x90   : > { %v100_v55 = vsel %vm94_vm0, %v89_v54, %v11607_v25  ;;  %v93_v56 = vpop.permute.xlu0 %92  ;;  %v99_v57 = vsel %vm94_vm0, %v11600_v11, %v89_v54  ;;  %1940 = vst [vmem:[#allocation1 + $0x30] ss:$2 sm:$0xff] %v1927_v27  ;;  %v2351_v54 = vld [vmem:[%s11522_s25 + $0x8] sm:$0x77]  ;;  %v2563_v27 = vld [vmem:[%s11522_s25] sm:$0x77] }
  0x91   : > { %10422 = vmatpush.msk.msra.mxu0 %vm106_vm1, %v99_v57  ;;  %10424 = vmatpush.msk.msra.mxu1 %vm106_vm1, %v100_v55  ;;  %v101_v21 = vsel %vm94_vm0, %v11607_v25, %v93_v56  ;;  %v11680_v60 = vpop.permute.xlu2 %677  ;;  %v2138_v25 = vld [vmem:[%s11522_s25 + $0x8] sm:$0x77] }
  0x92   : > { %10426 = vmatpush.msk.msrb.mxu2 %vm106_vm1, %v101_v21  ;;  %10423 = vmatmul.msk.f32.vlgmr.msra.gmra.mxu0 %vm102_vm2, %v11631_v41  ;;  %2149 = vst [vmem:[#allocation1 + $0x10] ss:$2 sm:$0xff] %v2138_v25 }
  0x93   : > { %10417 = vmatmul.msk.f32.vlgmr.msrb.gmra.mxu1 %vm102_vm2, %v11631_v41  ;;  %10427 = vmatmul.msk.f32.vlgmr.msrb.gmra.mxu2 %vm102_vm2, %v11631_v41 }
  0x94   : > { %10434 = vmatpush.msk.msra.mxu2 %vm106_vm1, %v11536_v16  ;;  %10429 = vmatmul.msk.f32.vlgmr.msrb.gmra.mxu3 %vm102_vm2, %v11678_v59  ;;  %v1926_v16 = vld [vmem:[%s11522_s25 + $0x10] sm:$0x77]  ;;  %v11733_v6 = vld.sshfl [vmem:[#allocation1] sm:$0xff pattern:$0x75316420] }
  0x95   : > { %1533 = vrot.lane.b32.xlu1 %v11619_v33, %s11429_s16  ;;  %10430 = vmatpush.msk.msrb.mxu0 %vm106_vm1, %v11544_v20  ;;  %1938 = vst [vmem:[#allocation1 + $0x20] ss:$2 sm:$0xff] %v1926_v16  ;;  %v2352_v16 = vld [vmem:[%s11522_s25 + $0x10] sm:$0x77] }
  0x96   : > { %1523 = vrot.lane.b32.xlu0 %v1515_v42, %s11429_s16  ;;  %10432 = vmatpush.msk.msrb.mxu1 %vm106_vm1, %v11534_v15  ;;  %v10457_v42 = vld [vmem:[%s15415_s1 + $0x18] sm:$0x3f] }
  0x97   : > { %v463_v0 = vpop.permute.xlu1 %462  ;;  %10438 = vmatpush.msk.msra.mxu0 %vm106_vm1, %v11549_v22  ;;  %1535 = vrot.lane.b32.xlu2 %v1521_v40, %s11429_s16  ;;  %v11728_v22 = vld.sshfl [vmem:[#allocation1 + $0x8] sm:$0xff pattern:$0x75316420]  ;;  %v1948_v53 = vld.sshfl [vmem:[#allocation1 + $0x38] sm:$0xff pattern:$0x75316420] }
  0x98   : > { %v461_v1 = vpop.permute.xlu0 %460  ;;  %v477_v15 = vsel %vm474_vm3, %v463_v0, %v11645_v52  ;;  %2147 = vst [vmem:[#allocation1] ss:$2 sm:$0xff] %v2137_v7  ;;  %v11865_v7 = vld [vmem:[%s15415_s1 + $0x28] sm:$0x3f] }
  0x99   : > { %v475_v20 = vsel %vm474_vm3, %v11613_v29, %v461_v1  ;;  %v476_v4 = vsel %vm474_vm3, %v461_v1, %v463_v0  ;;  %v11710_v5 = vpop.permute.xlu2 %681  ;;  %v11815_v51 = vld.sshfl [vmem:[#allocation1 + $0x18] sm:$0xff pattern:$0x75316420] }
  0x9a   : > { %10443 = vmatpush.msk.msrb.mxu2 %vm106_vm1, %v475_v20  ;;  %10445 = vmatpush.msk.msrb.mxu3 %vm106_vm1, %v476_v4  ;;  %v2353_v0 = vld [vmem:[%s11522_s25 + $0x18] sm:$0x77] }
  0x9b   : > { %10425 = vmatmul.msk.f32.vlgmr.msra.gmra.mxu1 %vm102_vm2, %v11631_v41  ;;  %10431 = vmatmul.msk.f32.vlgmr.msrb.gmra.mxu0 %vm102_vm2, %v11678_v59 }
  0x9c   : > { %10435 = vmatmul.msk.f32.vlgmr.msra.gmra.mxu2 %vm102_vm2, %v11678_v59  ;;  %10437 = vmatmul.msk.f32.vlgmr.msra.gmra.mxu3 %vm102_vm2, %v11678_v59  ;;  %v1946_v32 = vld.sshfl [vmem:[#allocation1 + $0x28] sm:$0xff pattern:$0x75316420]  ;;  %v1945_v33 = vld.sshfl [vmem:[#allocation1 + $0x20] sm:$0xff pattern:$0x75316420] }
  0x9d   : > { %1531 = vrot.lane.b32.xlu1 %v11615_v30, %s11429_s16  ;;  %10440 = vmatpush.msk.msra.mxu1 %vm106_vm1, %v11551_v23  ;;  %v478_v23 = vsel %vm474_vm3, %v11645_v52, %v11624_v38  ;;  %2151 = vst [vmem:[#allocation1 + $0x20] ss:$2 sm:$0xff] %v2139_v34  ;;  %v2156_v52 = vld.sshfl [vmem:[#allocation1 + $0x10] sm:$0xff pattern:$0x75316420] }
  0x9e   : > { %1537 = vrot.lane.b32.xlu0 %v11634_v44, %s11429_s16  ;;  %10447 = vmatpush.msk.msrb.mxu0 %vm106_vm1, %v477_v15  ;;  %2362 = vst [vmem:[#allocation1 + $0x10] ss:$2 sm:$0xff] %v2351_v54  ;;  %s11432_s16 = smov 64   ;;  %v2566_v34 = vld [vmem:[%s11522_s25 + $0x18] sm:$0x77] }
  0x9f   : > { %v471_v8 = vpop.permute.xlu1 %470  ;;  %1740 = vrot.lane.b32.xlu2 %v1730_v3, %s11430_s19  ;;  %v2155_v43 = vld.sshfl [vmem:[#allocation1 + $0x8] sm:$0xff pattern:$0x75316420]  ;;  %v2154_v45 = vld.sshfl [vmem:[#allocation1] sm:$0xff pattern:$0x75316420] }
  0xa0   : > { %v469_v9 = vpop.permute.xlu0 %468  ;;  %2360 = vst [vmem:[#allocation1] ss:$2 sm:$0xff] %v2350_v46  ;;  %v2776_v46 = vld [vmem:[%s11522_s25] sm:$0x77] }
  0xa1   : > { %v479_v10 = vsel %vm474_vm3, %v11624_v38, %v469_v9  ;;  %v480_v11 = vsel %vm474_vm3, %v469_v9, %v471_v8  ;;  %v680_v13 = vpop.permute.xlu2 %679 }
  0xa2   : > { %10451 = vmatpush.msk.msra.mxu2 %vm106_vm1, %v479_v10  ;;  %10453 = vmatpush.msk.msra.mxu3 %vm106_vm1, %v480_v11  ;;  %v691_v36 = vsel %vm687_vm4, %v11680_v60, %v680_v13  ;;  %v692_v39 = vsel %vm687_vm4, %v680_v13, %v11710_v5 }
  0xa3   : > { %10433 = vmatmul.msk.f32.vlgmr.msrb.gmra.mxu1 %vm102_vm2, %v11678_v59  ;;  %10439 = vmatmul.msk.f32.vlgmr.msra.gmra.mxu0 %vm102_vm2, %v11678_v59 }
  0xa4   : > { %10449 = vmatpush.msk.msrb.mxu1 %vm106_vm1, %v478_v23  ;;  %10444 = vmatmul.msk.f32.vlgmr.msrb.gmra.mxu2 %vm102_vm2, %v10442_v12 }
  0xa5   : > { %1744 = vrot.lane.b32.xlu1 %v1732_v62, %s11430_s19  ;;  %10446 = vmatmul.msk.f32.vlgmr.msrb.gmra.mxu3 %vm102_vm2, %v10442_v12  ;;  %v2159_v62 = vld.sshfl [vmem:[#allocation1 + $0x28] sm:$0xff pattern:$0x75316420]  ;;  %v2370_v15 = vld.sshfl [vmem:[#allocation1 + $0x18] sm:$0xff pattern:$0x75316420] }
  0xa6   : > { %1742 = vrot.lane.b32.xlu0 %v1731_v2, %s11430_s19 }
  0xa7   : > { %v676_v26 = vpop.permute.xlu1 %675  ;;  %1736 = vrot.lane.b32.xlu2 %v11669_v19, %s11430_s19  ;;  %v2140_v19 = vld [vmem:[%s11522_s25 + $0x18] sm:$0x77] }
  0xa8   : > { %v690_v28 = vsel %vm687_vm4, %v676_v26, %v11680_v60  ;;  %v674_v29 = vpop.permute.xlu0 %673  ;;  %v11835_v60 = vld [vmem:[%s15415_s1 + $0x20] sm:$0x3f] }
  0xa9   : > { %v689_v30 = vsel %vm687_vm4, %v674_v29, %v676_v26  ;;  %10462 = vmatpush.msk.msrb.mxu3 %vm106_vm1, %v690_v28  ;;  %v11767_v31 = vpop.permute.xlu2 %892  ;;  %v2368_v26 = vld.sshfl [vmem:[#allocation1 + $0x8] sm:$0xff pattern:$0x75316420] }
  0xaa   : > { %10460 = vmatpush.msk.msrb.mxu2 %vm106_vm1, %v689_v30 }
  0xab   : > { %10441 = vmatmul.msk.f32.vlgmr.msra.gmra.mxu1 %vm102_vm2, %v11678_v59  ;;  %10448 = vmatmul.msk.f32.vlgmr.msrb.gmra.mxu0 %vm102_vm2, %v10442_v12 }
  0xac   : > { %10452 = vmatmul.msk.f32.vlgmr.msra.gmra.mxu2 %vm102_vm2, %v10442_v12 }
  0xad   : > { %1748 = vrot.lane.b32.xlu1 %v1734_v17, %s11430_s19  ;;  %10454 = vmatmul.msk.f32.vlgmr.msra.gmra.mxu3 %vm102_vm2, %v10442_v12  ;;  %v2565_v17 = vld [vmem:[%s11522_s25 + $0x10] sm:$0x77] }
  0xae   : > { %1738 = vrot.lane.b32.xlu0 %v11667_v58, %s11430_s19  ;;  %v1947_v58 = vld.sshfl [vmem:[#allocation1 + $0x30] sm:$0xff pattern:$0x75316420] }
  0xaf   : > { %v672_v35 = vpop.permute.xlu1 %671  ;;  %1750 = vrot.lane.b32.xlu2 %v1735_v18, %s11430_s19  ;;  %2153 = vst [vmem:[#allocation1 + $0x30] ss:$2 sm:$0xff] %v2140_v19 }
  0xb0   : > { %v473_v37 = vpop.permute.xlu0 %472  ;;  %v688_v38 = vsel %vm687_vm4, %v672_v35, %v674_v29 }
  0xb1   : > { %v481_v40 = vsel %vm474_vm3, %v471_v8, %v473_v37  ;;  %10458 = vmatpush.msk.msra.mxu1 %vm106_vm1, %v688_v38  ;;  %v11787_v41 = vpop.permute.xlu2 %896  ;;  %v2564_v8 = vld [vmem:[%s11522_s25 + $0x8] sm:$0x77] }
  0xb2   : > { %10455 = vmatpush.msk.msra.mxu0 %vm106_vm1, %v481_v40 }
  0xb3   : > { %10450 = vmatmul.msk.f32.vlgmr.msrb.gmra.mxu1 %vm102_vm2, %v10442_v12  ;;  %10456 = vmatmul.msk.f32.vlgmr.msra.gmra.mxu0 %vm102_vm2, %v10442_v12 }
  0xb4   : > { %10464 = vmatpush.msk.msrb.mxu0 %vm106_vm1, %v691_v36  ;;  %10466 = vmatpush.msk.msrb.mxu1 %vm106_vm1, %v692_v39 }
  0xb5   : > { %10461 = vmatmul.msk.f32.vlgmr.msrb.gmra.mxu2 %vm102_vm2, %v10457_v42  ;;  %1951 = vrot.lane.b32.xlu1 %v11728_v22, %s11431_s13  ;;  %v2369_v22 = vld.sshfl [vmem:[#allocation1 + $0x10] sm:$0xff pattern:$0x75316420] }
  0xb6   : > { %1949 = vrot.lane.b32.xlu0 %v11733_v6, %s11431_s13  ;;  %10463 = vmatmul.msk.f32.vlgmr.msrb.gmra.mxu3 %vm102_vm2, %v10457_v42  ;;  %v2160_v3 = vld.sshfl [vmem:[#allocation1 + $0x30] sm:$0xff pattern:$0x75316420]  ;;  %v11848_v20 = vld.sshfl [vmem:[#allocation1 + $0x38] sm:$0xff pattern:$0x75316420] }
  0xb7   : > { %v686_v44 = vpop.permute.xlu1 %685  ;;  %1746 = vrot.lane.b32.xlu2 %v11693_v61, %s11430_s19  ;;  %v2158_v61 = vld.sshfl [vmem:[#allocation1 + $0x20] sm:$0xff pattern:$0x75316420]  ;;  %2366 = vst [vmem:[#allocation1 + $0x30] ss:$2 sm:$0xff] %v2353_v0  ;;  %s11433_s19 = smov 63  }
  0xb8   : > { %v684_v47 = vpop.permute.xlu0 %683  ;;  %2364 = vst [vmem:[#allocation1 + $0x20] ss:$2 sm:$0xff] %v2352_v16  ;;  %v2989_v0 = vld [vmem:[%s11522_s25] sm:$0x77] }
  0xb9   : > { %v693_v48 = vsel %vm687_vm4, %v11710_v5, %v684_v47  ;;  %v694_v49 = vsel %vm687_vm4, %v684_v47, %v686_v44  ;;  %v11809_v50 = vpop.permute.xlu2 %1099  ;;  %2575 = vst [vmem:[#allocation1 + $0x10] ss:$2 sm:$0xff] %v2564_v8 }
  0xba   : > { %10468 = vmatpush.msk.msra.mxu2 %vm106_vm1, %v693_v48  ;;  %10470 = vmatpush.msk.msra.mxu3 %vm106_vm1, %v694_v49 }
  0xbb   : > { %10459 = vmatmul.msk.f32.vlgmr.msra.gmra.mxu1 %vm102_vm2, %v10457_v42  ;;  %10465 = vmatmul.msk.f32.vlgmr.msrb.gmra.mxu0 %vm102_vm2, %v10457_v42 }
  0xbd   : > { %10469 = vmatmul.msk.f32.vlgmr.msra.gmra.mxu2 %vm102_vm2, %v10457_v42  ;;  %1957 = vrot.lane.b32.xlu1 %v1945_v33, %s11431_s13 }
  0xbe   : > { %1955 = vrot.lane.b32.xlu0 %v1944_v24, %s11431_s13  ;;  %10471 = vmatmul.msk.f32.vlgmr.msra.gmra.mxu3 %vm102_vm2, %v10457_v42  ;;  %v2373_v33 = vld.sshfl [vmem:[#allocation1 + $0x30] sm:$0xff pattern:$0x75316420] }
  0xbf   : > { %v891_v55 = vpop.permute.xlu1 %890  ;;  %1959 = vrot.lane.b32.xlu2 %v1946_v32, %s11431_s13  ;;  %v11880_v12 = vld.sshfl [vmem:[#allocation1 + $0x20] sm:$0xff pattern:$0x75316420]  ;;  %v11883_v13 = vld.sshfl [vmem:[#allocation1 + $0x28] sm:$0xff pattern:$0x75316420] }
  0xc0   : > { %v889_v56 = vpop.permute.xlu0 %888  ;;  %v904_v57 = vsel %vm900_vm5, %v891_v55, %v11767_v31  ;;  %2577 = vst [vmem:[#allocation1 + $0x20] ss:$2 sm:$0xff] %v2565_v17  ;;  %v2583_v19 = vld.sshfl [vmem:[#allocation1 + $0x18] sm:$0xff pattern:$0x75316420] }
  0xc1   : > { %v903_v21 = vsel %vm900_vm5, %v889_v56, %v891_v55  ;;  %10479 = vmatpush.msk.msrb.mxu3 %vm106_vm1, %v904_v57  ;;  %v11828_v59 = vpop.permute.xlu2 %1105  ;;  %v2990_v17 = vld [vmem:[%s11522_s25 + $0x8] sm:$0x77] }
  0xc2   : > { %10477 = vmatpush.msk.msrb.mxu2 %vm106_vm1, %v903_v21 }
  0xc3   : > { %10467 = vmatmul.msk.f32.vlgmr.msrb.gmra.mxu1 %vm102_vm2, %v10457_v42 }
  0xc5   : > { %10478 = vmatmul.msk.f32.vlgmr.msrb.gmra.mxu2 %vm102_vm2, %v11835_v60  ;;  %2162 = vrot.lane.b32.xlu1 %v2154_v45, %s11432_s16 }
  0xc6   : > { %1953 = vrot.lane.b32.xlu0 %v11754_v14, %s11431_s13  ;;  %10480 = vmatmul.msk.f32.vlgmr.msrb.gmra.mxu3 %vm102_vm2, %v11835_v60  ;;  %v2367_v14 = vld.sshfl [vmem:[#allocation1] sm:$0xff pattern:$0x75316420] }
  0xc7   : > { %v887_v63 = vpop.permute.xlu1 %886  ;;  %2164 = vrot.lane.b32.xlu2 %v2155_v43, %s11432_s16  ;;  %2573 = vst [vmem:[#allocation1] ss:$2 sm:$0xff] %v2563_v27  ;;  %v11939_v43 = vld [vmem:[%s15415_s1 + $0x30] sm:$0x3f] }
  0xc8   : > { %v902_v1 = vsel %vm900_vm5, %v887_v63, %v889_v56  ;;  %v885_v2 = vpop.permute.xlu0 %884 }
  0xc9   : > { %v901_v4 = vsel %vm900_vm5, %v885_v2, %v887_v63  ;;  %10475 = vmatpush.msk.msra.mxu1 %vm106_vm1, %v902_v1  ;;  %v11852_v5 = vpop.permute.xlu2 %1310 }
  0xca   : > { %10473 = vmatpush.msk.msra.mxu0 %vm106_vm1, %v901_v4 }
  0xcb   : > { %10474 = vmatmul.msk.f32.vlgmr.msra.gmra.mxu0 %vm102_vm2, %v11835_v60  ;;  %10476 = vmatmul.msk.f32.vlgmr.msra.gmra.mxu1 %vm102_vm2, %v11835_v60 }
  0xcd   : > { %1961 = vrot.lane.b32.xlu1 %v1947_v58, %s11431_s13  ;;  %v2582_v58 = vld.sshfl [vmem:[#allocation1 + $0x10] sm:$0xff pattern:$0x75316420] }
  0xce   : > { %2166 = vrot.lane.b32.xlu0 %v2156_v52, %s11432_s16  ;;  %v2580_v45 = vld.sshfl [vmem:[#allocation1] sm:$0xff pattern:$0x75316420]  ;;  %v2778_v52 = vld [vmem:[%s11522_s25 + $0x10] sm:$0x77] }
  0xcf   : > { %v1098_v6 = vpop.permute.xlu1 %1097  ;;  %1963 = vrot.lane.b32.xlu2 %v1948_v53, %s11431_s13 }
  0xd0   : > { %v899_v9 = vpop.permute.xlu0 %898  ;;  %v1114_v23 = vsel %vm1113_vm6, %v1098_v6, %v11809_v50  ;;  %v10517_v6 = vld [vmem:[%s15415_s1 + $0x38] sm:$0x3f] }
  0xd1   : > { %v907_v10 = vsel %vm900_vm5, %v11787_v41, %v899_v9  ;;  %10488 = vmatpush.msk.msra.mxu3 %vm106_vm1, %v1114_v23  ;;  %v11873_v11 = vpop.permute.xlu2 %1109 }
  0xd2   : > { %10485 = vmatpush.msk.msra.mxu2 %vm106_vm1, %v907_v10  ;;  %10489 = vmatmul.msk.f32.vlgmr.msra.gmra.mxu3 %vm102_vm2, %v11865_v7 }
  0xd3   : > { %10486 = vmatmul.msk.f32.vlgmr.msra.gmra.mxu2 %vm102_vm2, %v11835_v60 }
  0xd5   : > { %2172 = vrot.lane.b32.xlu1 %v2159_v62, %s11432_s16 }
  0xd6   : > { %2170 = vrot.lane.b32.xlu0 %v2158_v61, %s11432_s16  ;;  %v2777_v61 = vld [vmem:[%s11522_s25 + $0x8] sm:$0x77] }
  0xd7   : > { %v1104_v18 = vpop.permute.xlu1 %1103  ;;  %2174 = vrot.lane.b32.xlu2 %v2160_v3, %s11432_s16  ;;  %2788 = vst [vmem:[#allocation1 + $0x10] ss:$2 sm:$0xff] %v2777_v61  ;;  %v3204_v61 = vld [vmem:[%s11522_s25 + $0x10] sm:$0x77] }
  0xd8   : > { %v895_v24 = vpop.permute.xlu0 %894  ;;  %v1117_v25 = vsel %vm1113_vm6, %v1104_v18, %v11828_v59 }
  0xd9   : > { %v905_v28 = vsel %vm900_vm5, %v11767_v31, %v895_v24  ;;  %v906_v29 = vsel %vm900_vm5, %v895_v24, %v11787_v41  ;;  %10494 = vmatpush.msk.msrb.mxu2 %vm106_vm1, %v1117_v25  ;;  %v11896_v30 = vpop.permute.xlu2 %1320  ;;  %v2374_v31 = vld.sshfl [vmem:[#allocation1 + $0x38] sm:$0xff pattern:$0x75316420]  ;;  %v11933_v41 = vld.sshfl [vmem:[#allocation1 + $0x8] sm:$0xff pattern:$0x75316420] }
  0xda   : > { %10481 = vmatpush.msk.msrb.mxu0 %vm106_vm1, %v905_v28  ;;  %10483 = vmatpush.msk.msrb.mxu1 %vm106_vm1, %v906_v29  ;;  %2579 = vst [vmem:[#allocation1 + $0x30] ss:$2 sm:$0xff] %v2566_v34 }
  0xdb   : > { %10482 = vmatmul.msk.f32.vlgmr.msrb.gmra.mxu0 %vm102_vm2, %v11835_v60  ;;  %10484 = vmatmul.msk.f32.vlgmr.msrb.gmra.mxu1 %vm102_vm2, %v11835_v60  ;;  %2786 = vst [vmem:[#allocation1] ss:$2 sm:$0xff] %v2776_v46 }
  0xdc   : > { %10495 = vmatmul.msk.f32.vlgmr.msrb.gmra.mxu2 %vm102_vm2, %v11865_v7 }
  0xdd   : > { %2377 = vrot.lane.b32.xlu1 %v2368_v26, %s11433_s19  ;;  %v2991_v26 = vld [vmem:[%s11522_s25 + $0x10] sm:$0x77] }
  0xde   : > { %2168 = vrot.lane.b32.xlu0 %v11815_v51, %s11432_s16  ;;  %v2584_v51 = vld.sshfl [vmem:[#allocation1 + $0x20] sm:$0xff pattern:$0x75316420]  ;;  %v2796_v23 = vld.sshfl [vmem:[#allocation1 + $0x18] sm:$0xff pattern:$0x75316420] }
  0xdf   : > { %v1102_v32 = vpop.permute.xlu1 %1101  ;;  %2379 = vrot.lane.b32.xlu2 %v2369_v22, %s11433_s19  ;;  %v2795_v10 = vld.sshfl [vmem:[#allocation1 + $0x10] sm:$0xff pattern:$0x75316420] }
  0xe0   : > { %v1108_v35 = vpop.permute.xlu0 %1107  ;;  %v1115_v36 = vsel %vm1113_vm6, %v11809_v50, %v1102_v32  ;;  %v1116_v37 = vsel %vm1113_vm6, %v1102_v32, %v1104_v18  ;;  %v11953_v50 = vld.sshfl [vmem:[#allocation1 + $0x28] sm:$0xff pattern:$0x75316420]  ;;  %v2992_v18 = vld [vmem:[%s11522_s25 + $0x18] sm:$0x77] }
  0xe1   : > { %v1118_v38 = vsel %vm1113_vm6, %v11828_v59, %v1108_v35  ;;  %v1119_v39 = vsel %vm1113_vm6, %v1108_v35, %v11873_v11  ;;  %10490 = vmatpush.msk.msra.mxu0 %vm106_vm1, %v1115_v36  ;;  %10492 = vmatpush.msk.msra.mxu1 %vm106_vm1, %v1116_v37  ;;  %v11920_v40 = vpop.permute.xlu2 %1525  ;;  %2790 = vst [vmem:[#allocation1 + $0x20] ss:$2 sm:$0xff] %v2778_v52  ;;  %v2587_v4 = vld.sshfl [vmem:[#allocation1 + $0x38] sm:$0xff pattern:$0x75316420] }
  0xe2   : > { %10496 = vmatpush.msk.msrb.mxu3 %vm106_vm1, %v1118_v38  ;;  %v11975_v21 = vld.sshfl [vmem:[#allocation1 + $0x8] sm:$0xff pattern:$0x75316420]  ;;  %v2793_v60 = vld.sshfl [vmem:[#allocation1] sm:$0xff pattern:$0x75316420] }
  0xe3   : > { %10498 = vmatpush.msk.msrb.mxu0 %vm106_vm1, %v1119_v39  ;;  %10493 = vmatmul.msk.f32.vlgmr.msra.gmra.mxu1 %vm102_vm2, %v11865_v7  ;;  %2999 = vst [vmem:[#allocation1] ss:$2 sm:$0xff] %v2989_v0  ;;  %v3202_v32 = vld [vmem:[%s11522_s25] sm:$0x77] }
  0xe4   : > { %10491 = vmatmul.msk.f32.vlgmr.msra.gmra.mxu0 %vm102_vm2, %v11865_v7  ;;  %10497 = vmatmul.msk.f32.vlgmr.msrb.gmra.mxu3 %vm102_vm2, %v11865_v7  ;;  %3001 = vst [vmem:[#allocation1 + $0x10] ss:$2 sm:$0xff] %v2990_v17  ;;  %v3628_v17 = vld [vmem:[%s11522_s25] sm:$0x77] }
  0xe5   : > { %2176 = vrot.lane.b32.xlu1 %v11848_v20, %s11432_s16  ;;  %v2586_v20 = vld.sshfl [vmem:[#allocation1 + $0x30] sm:$0xff pattern:$0x75316420] }
  0xe6   : > { %2381 = vrot.lane.b32.xlu0 %v2370_v15, %s11433_s19 }
  0xe7   : > { %v1315_v42 = vpop.permute.xlu1 %1314  ;;  %2375 = vrot.lane.b32.xlu2 %v2367_v14, %s11433_s19 }
  0xe8   : > { %v1313_v44 = vpop.permute.xlu0 %1312  ;;  %v2798_v14 = vld.sshfl [vmem:[#allocation1 + $0x28] sm:$0xff pattern:$0x75316420]  ;;  %v2797_v28 = vld.sshfl [vmem:[#allocation1 + $0x20] sm:$0xff pattern:$0x75316420] }
  0xe9   : > { %v1327_v47 = vsel %vm1326_vm7, %v11852_v5, %v1313_v44  ;;  %v1328_v48 = vsel %vm1326_vm7, %v1313_v44, %v1315_v42  ;;  %v1325_v49 = vpop.permute.xlu2 %1324  ;;  %v2779_v5 = vld [vmem:[%s11522_s25 + $0x18] sm:$0x77]  ;;  %3003 = vst [vmem:[#allocation1 + $0x20] ss:$2 sm:$0xff] %v2991_v26  ;;  %v10532_v44 = vld [vmem:[%s15415_s1 + $0x40] sm:$0x3f] }
  0xea   : > { %10503 = vmatpush.msk.msra.mxu2 %vm106_vm1, %v1327_v47  ;;  %10505 = vmatpush.msk.msra.mxu3 %vm106_vm1, %v1328_v48  ;;  %2792 = vst [vmem:[#allocation1 + $0x30] ss:$2 sm:$0xff] %v2779_v5  ;;  %v3006_v39 = vld.sshfl [vmem:[#allocation1] sm:$0xff pattern:$0x75316420] }
  0xeb   : > { %10504 = vmatmul.msk.f32.vlgmr.msra.gmra.mxu2 %vm102_vm2, %v11939_v43  ;;  %v3008_v34 = vld.sshfl [vmem:[#allocation1 + $0x10] sm:$0xff pattern:$0x75316420]  ;;  %v12041_v35 = vld.sshfl [vmem:[#allocation1 + $0x18] sm:$0xff pattern:$0x75316420] }
  0xec   : > { %10499 = vmatmul.msk.f32.vlgmr.msrb.gmra.mxu0 %vm102_vm2, %v11865_v7  ;;  %10506 = vmatmul.msk.f32.vlgmr.msra.gmra.mxu3 %vm102_vm2, %v11939_v43 }
  0xed   : > { %2387 = vrot.lane.b32.xlu1 %v2373_v33, %s11433_s19 }
  0xee   : > { %2385 = vrot.lane.b32.xlu0 %v11883_v13, %s11433_s19 }
  0xef   : > { %v1319_v53 = vpop.permute.xlu1 %1318  ;;  %2389 = vrot.lane.b32.xlu2 %v2374_v31, %s11433_s19  ;;  %v3203_v31 = vld [vmem:[%s11522_s25 + $0x8] sm:$0x77] }
  0xf0   : > { %v1331_v54 = vsel %vm1326_vm7, %v1319_v53, %v11896_v30  ;;  %v1112_v55 = vpop.permute.xlu0 %1111  ;;  %3214 = vst [vmem:[#allocation1 + $0x10] ss:$2 sm:$0xff] %v3203_v31 }
  0xf1   : > { %v1120_v56 = vsel %vm1113_vm6, %v11873_v11, %v1112_v55  ;;  %10511 = vmatpush.msk.msrb.mxu2 %vm106_vm1, %v1331_v54  ;;  %v11965_v57 = vpop.permute.xlu2 %1535  ;;  %v12018_v11 = vld.sshfl [vmem:[#allocation1 + $0x38] sm:$0xff pattern:$0x75316420] }
  0xf2   : > { %10500 = vmatpush.msk.msrb.mxu1 %vm106_vm1, %v1120_v56 }
  0xf3   : > { %10501 = vmatmul.msk.f32.vlgmr.msrb.gmra.mxu1 %vm102_vm2, %v11865_v7  ;;  %10512 = vmatmul.msk.f32.vlgmr.msrb.gmra.mxu2 %vm102_vm2, %v11939_v43 }
  0xf5   : > { %2592 = vrot.lane.b32.xlu1 %v2582_v58, %s11434_s23 }
  0xf6   : > { %2383 = vrot.lane.b32.xlu0 %v11880_v12, %s11433_s19  ;;  %v12020_v12 = vld.sshfl [vmem:[#allocation1 + $0x30] sm:$0xff pattern:$0x75316420]  ;;  %s11439_s19 = smov 30  }
  0xf7   : > { %v1317_v59 = vpop.permute.xlu1 %1316  ;;  %2594 = vrot.lane.b32.xlu2 %v2583_v19, %s11434_s23  ;;  %3005 = vst [vmem:[#allocation1 + $0x30] ss:$2 sm:$0xff] %v2992_v18  ;;  %v3010_v19 = vld.sshfl [vmem:[#allocation1 + $0x20] sm:$0xff pattern:$0x75316420] }
  0xf8   : > { %v1329_v62 = vsel %vm1326_vm7, %v1315_v42, %v1317_v59  ;;  %v1330_v16 = vsel %vm1326_vm7, %v1317_v59, %v1319_v53  ;;  %v1323_v63 = vpop.permute.xlu0 %1322  ;;  %v3222_v59 = vld.sshfl [vmem:[#allocation1 + $0x18] sm:$0xff pattern:$0x75316420] }
  0xf9   : > { %v1332_v1 = vsel %vm1326_vm7, %v11896_v30, %v1323_v63  ;;  %v1333_v2 = vsel %vm1326_vm7, %v1323_v63, %v1325_v49  ;;  %10507 = vmatpush.msk.msra.mxu0 %vm106_vm1, %v1329_v62  ;;  %10509 = vmatpush.msk.msra.mxu1 %vm106_vm1, %v1330_v16  ;;  %v11987_v3 = vpop.permute.xlu2 %1740  ;;  %v3007_v30 = vld.sshfl [vmem:[#allocation1 + $0x8] sm:$0xff pattern:$0x75316420]  ;;  %v3221_v63 = vld.sshfl [vmem:[#allocation1 + $0x10] sm:$0xff pattern:$0x75316420] }
  0xfa   : > { %10513 = vmatpush.msk.msrb.mxu3 %vm106_vm1, %v1332_v1  ;;  %10508 = vmatmul.msk.f32.vlgmr.msra.gmra.mxu0 %vm102_vm2, %v11939_v43  ;;  %3212 = vst [vmem:[#allocation1] ss:$2 sm:$0xff] %v3202_v32  ;;  %v3416_v62 = vld [vmem:[%s11522_s25 + $0x8] sm:$0x77]  ;;  %vm3243_vm7 = vcmask 261120  }
  0xfb   : > { %10515 = vmatpush.msk.msrb.mxu0 %vm106_vm1, %v1333_v2  ;;  %10510 = vmatmul.msk.f32.vlgmr.msra.gmra.mxu1 %vm102_vm2, %v11939_v43  ;;  %v12102_v1 = vld [vmem:[%s15415_s1 + $0x48] sm:$0x3f]  ;;  %3427 = vst [vmem:[#allocation1 + $0x10] ss:$2 sm:$0xff] %v3416_v62 }
  0xfc   : > { %10514 = vmatmul.msk.f32.vlgmr.msrb.gmra.mxu3 %vm102_vm2, %v11939_v43  ;;  %v3629_v32 = vld [vmem:[%s11522_s25 + $0x8] sm:$0x77] }
  0xfd   : > { %2588 = vrot.lane.b32.xlu1 %v2580_v45, %s11434_s23 }
  0xfe   : > { %2596 = vrot.lane.b32.xlu0 %v2584_v51, %s11434_s23  ;;  %v12068_v48 = vld.sshfl [vmem:[#allocation1 + $0x38] sm:$0xff pattern:$0x75316420]  ;;  %v3012_v49 = vld.sshfl [vmem:[#allocation1 + $0x30] sm:$0xff pattern:$0x75316420] }
  0xff   : > { %v1530_v15 = vpop.permute.xlu1 %1529  ;;  %2590 = vrot.lane.b32.xlu2 %v11933_v41, %s11434_s23 }
 0x100   : > { %v1528_v22 = vpop.permute.xlu0 %1527 }
 0x101   : > { %v1541_v7 = vsel %vm1539_vm8, %v11920_v40, %v1528_v22  ;;  %v1542_v8 = vsel %vm1539_vm8, %v1528_v22, %v1530_v15  ;;  %v12008_v9 = vpop.permute.xlu2 %1736 }
 0x102   : > { %10520 = vmatpush.msk.msra.mxu2 %vm106_vm1, %v1541_v7  ;;  %10522 = vmatpush.msk.msra.mxu3 %vm106_vm1, %v1542_v8  ;;  %v3435_v31 = vld.sshfl [vmem:[#allocation1 + $0x18] sm:$0xff pattern:$0x75316420] }
 0x103   : > { %10521 = vmatmul.msk.f32.vlgmr.msra.gmra.mxu2 %vm102_vm2, %v10517_v6  ;;  %10516 = vmatmul.msk.f32.vlgmr.msrb.gmra.mxu0 %vm102_vm2, %v11939_v43 }
 0x104   : > { %10523 = vmatmul.msk.f32.vlgmr.msra.gmra.mxu3 %vm102_vm2, %v10517_v6 }
 0x105   : > { %2602 = vrot.lane.b32.xlu1 %v2587_v4, %s11434_s23  ;;  %v3415_v4 = vld [vmem:[%s11522_s25] sm:$0x77] }
 0x106   : > { %2600 = vrot.lane.b32.xlu0 %v2586_v20, %s11434_s23  ;;  %v3219_v20 = vld.sshfl [vmem:[#allocation1] sm:$0xff pattern:$0x75316420] }
 0x107   : > { %v1534_v13 = vpop.permute.xlu1 %1533  ;;  %2801 = vrot.lane.b32.xlu2 %v2793_v60, %s11435_s14 }
 0x108   : > { %v1545_v24 = vsel %vm1539_vm8, %v1534_v13, %v11965_v57  ;;  %v1524_v25 = vpop.permute.xlu0 %1523 }
 0x109   : > { %v1540_v27 = vsel %vm1539_vm8, %v1524_v25, %v11920_v40  ;;  %10528 = vmatpush.msk.msrb.mxu2 %vm106_vm1, %v1545_v24  ;;  %v1751_v29 = vpop.permute.xlu2 %1750 }
 0x10a   : > { %10518 = vmatpush.msk.msrb.mxu1 %vm106_vm1, %v1540_v27 }
 0x10b   : > { %10519 = vmatmul.msk.f32.vlgmr.msrb.gmra.mxu1 %vm102_vm2, %v10517_v6  ;;  %10529 = vmatmul.msk.f32.vlgmr.msrb.gmra.mxu2 %vm102_vm2, %v10517_v6 }
 0x10d   : > { %2598 = vrot.lane.b32.xlu1 %v11953_v50, %s11434_s23  ;;  %v3205_v50 = vld [vmem:[%s11522_s25 + $0x18] sm:$0x77] }
 0x10e   : > { %2803 = vrot.lane.b32.xlu0 %v11975_v21, %s11435_s14  ;;  %3218 = vst [vmem:[#allocation1 + $0x30] ss:$2 sm:$0xff] %v3205_v50  ;;  %v3011_v21 = vld.sshfl [vmem:[#allocation1 + $0x28] sm:$0xff pattern:$0x75316420] }
 0x10f   : > { %v1532_v33 = vpop.permute.xlu1 %1531  ;;  %2807 = vrot.lane.b32.xlu2 %v2796_v23, %s11435_s14  ;;  %3216 = vst [vmem:[#allocation1 + $0x20] ss:$2 sm:$0xff] %v3204_v61 }
 0x110   : > { %v1543_v36 = vsel %vm1539_vm8, %v1530_v15, %v1532_v33  ;;  %v1544_v37 = vsel %vm1539_vm8, %v1532_v33, %v1534_v13  ;;  %v1538_v38 = vpop.permute.xlu0 %1537  ;;  %v3417_v13 = vld [vmem:[%s11522_s25 + $0x10] sm:$0x77] }
 0x111   : > { %v1546_v40 = vsel %vm1539_vm8, %v11965_v57, %v1538_v38  ;;  %10524 = vmatpush.msk.msra.mxu0 %vm106_vm1, %v1543_v36  ;;  %10526 = vmatpush.msk.msra.mxu1 %vm106_vm1, %v1544_v37  ;;  %v1747_v41 = vpop.permute.xlu2 %1746  ;;  %vm3456_vm8 = vcmask 252928  }
 0x112   : > { %10530 = vmatpush.msk.msrb.mxu3 %vm106_vm1, %v1546_v40  ;;  %10525 = vmatmul.msk.f32.vlgmr.msra.gmra.mxu0 %vm102_vm2, %v10517_v6 }
 0x113   : > { %10527 = vmatmul.msk.f32.vlgmr.msra.gmra.mxu1 %vm102_vm2, %v10517_v6  ;;  %10531 = vmatmul.msk.f32.vlgmr.msrb.gmra.mxu3 %vm102_vm2, %v10517_v6 }
 0x115   : > { %2811 = vrot.lane.b32.xlu1 %v2798_v14, %s11435_s14  ;;  %v3225_v23 = vld.sshfl [vmem:[#allocation1 + $0x30] sm:$0xff pattern:$0x75316420]  ;;  %v3418_v14 = vld [vmem:[%s11522_s25 + $0x18] sm:$0x77] }
 0x116   : > { %2809 = vrot.lane.b32.xlu0 %v2797_v28, %s11435_s14  ;;  %v3224_v8 = vld.sshfl [vmem:[#allocation1 + $0x28] sm:$0xff pattern:$0x75316420]  ;;  %v3226_v25 = vld.sshfl [vmem:[#allocation1 + $0x38] sm:$0xff pattern:$0x75316420] }
 0x117   : > { %v1745_v42 = vpop.permute.xlu1 %1744  ;;  %2805 = vrot.lane.b32.xlu2 %v2795_v10, %s11435_s14  ;;  %v12145_v28 = vld [vmem:[%s15415_s1 + $0x50] sm:$0x3f]  ;;  %3431 = vst [vmem:[#allocation1 + $0x30] ss:$2 sm:$0xff] %v3418_v14  ;;  %v3844_v14 = vld [vmem:[%s11522_s25 + $0x18] sm:$0x77] }
 0x118   : > { %v1743_v43 = vpop.permute.xlu0 %1742  ;;  %v1757_v56 = vsel %vm1752_vm9, %v1745_v42, %v1747_v41 }
 0x119   : > { %v1755_v45 = vsel %vm1752_vm9, %v11987_v3, %v1743_v43  ;;  %v1756_v46 = vsel %vm1752_vm9, %v1743_v43, %v1745_v42  ;;  %v12062_v47 = vpop.permute.xlu2 %1959 }
 0x11a   : > { %10537 = vmatpush.msk.msra.mxu2 %vm106_vm1, %v1755_v45  ;;  %10539 = vmatpush.msk.msra.mxu3 %vm106_vm1, %v1756_v46 }
 0x11b   : > { %10538 = vmatmul.msk.f32.vlgmr.msra.gmra.mxu2 %vm102_vm2, %v10532_v44  ;;  %10540 = vmatmul.msk.f32.vlgmr.msra.gmra.mxu3 %vm102_vm2, %v10532_v44 }
 0x11d   : > { %3016 = vrot.lane.b32.xlu1 %v3007_v30, %s11436_s18  ;;  %v3434_v30 = vld.sshfl [vmem:[#allocation1 + $0x10] sm:$0xff pattern:$0x75316420] }
 0x11e   : > { %3014 = vrot.lane.b32.xlu0 %v3006_v39, %s11436_s18  ;;  %3640 = vst [vmem:[#allocation1 + $0x10] ss:$2 sm:$0xff] %v3629_v32  ;;  %v3438_v62 = vld.sshfl [vmem:[#allocation1 + $0x30] sm:$0xff pattern:$0x75316420] }
 0x11f   : > { %v1749_v51 = vpop.permute.xlu1 %1748  ;;  %3018 = vrot.lane.b32.xlu2 %v3008_v34, %s11436_s18 }
 0x120   : > { %v1759_v52 = vsel %vm1752_vm9, %v1749_v51, %v1751_v29  ;;  %v1739_v53 = vpop.permute.xlu0 %1738  ;;  %v1758_v58 = vsel %vm1752_vm9, %v1747_v41, %v1749_v51  ;;  %v3630_v41 = vld [vmem:[%s11522_s25 + $0x10] sm:$0x77] }
 0x121   : > { %v1753_v54 = vsel %vm1752_vm9, %v12008_v9, %v1739_v53  ;;  %v1754_v55 = vsel %vm1752_vm9, %v1739_v53, %v11987_v3  ;;  %10545 = vmatpush.msk.msrb.mxu2 %vm106_vm1, %v1759_v52  ;;  %v12081_v57 = vpop.permute.xlu2 %2164  ;;  %v3220_v3 = vld.sshfl [vmem:[#allocation1 + $0x8] sm:$0xff pattern:$0x75316420]  ;;  %v3223_v9 = vld.sshfl [vmem:[#allocation1 + $0x20] sm:$0xff pattern:$0x75316420] }
 0x122   : > { %10533 = vmatpush.msk.msrb.mxu0 %vm106_vm1, %v1753_v54  ;;  %10535 = vmatpush.msk.msrb.mxu1 %vm106_vm1, %v1754_v55  ;;  %3425 = vst [vmem:[#allocation1] ss:$2 sm:$0xff] %v3415_v4  ;;  %v3842_v53 = vld [vmem:[%s11522_s25 + $0x8] sm:$0x77]  ;;  %vm3669_vm9 = vcmask 244736  }
 0x123   : > { %10534 = vmatmul.msk.f32.vlgmr.msrb.gmra.mxu0 %vm102_vm2, %v10532_v44  ;;  %10536 = vmatmul.msk.f32.vlgmr.msrb.gmra.mxu1 %vm102_vm2, %v10532_v44  ;;  %3429 = vst [vmem:[#allocation1 + $0x20] ss:$2 sm:$0xff] %v3417_v13 }
 0x124   : > { %10541 = vmatpush.msk.msra.mxu0 %vm106_vm1, %v1757_v56  ;;  %10546 = vmatmul.msk.f32.vlgmr.msrb.gmra.mxu2 %vm102_vm2, %v10532_v44  ;;  %v3841_v56 = vld [vmem:[%s11522_s25] sm:$0x77] }
 0x125   : > { %2815 = vrot.lane.b32.xlu1 %v12018_v11, %s11435_s14  ;;  %10543 = vmatpush.msk.msra.mxu1 %vm106_vm1, %v1758_v58  ;;  %v12201_v52 = vld.sshfl [vmem:[#allocation1 + $0x10] sm:$0xff pattern:$0x75316420] }
 0x126   : > { %2813 = vrot.lane.b32.xlu0 %v12020_v12, %s11435_s14  ;;  %s11438_s14 = smov 31  }
 0x127   : > { %v1952_v60 = vpop.permute.xlu1 %1951  ;;  %3022 = vrot.lane.b32.xlu2 %v3010_v19, %s11436_s18 }
 0x128   : > { %v1950_v16 = vpop.permute.xlu0 %1949 }
 0x129   : > { %v1966_v0 = vsel %vm1965_vm10, %v1950_v16, %v1952_v60  ;;  %v12104_v2 = vpop.permute.xlu2 %1963  ;;  %v12129_v10 = vld.sshfl [vmem:[#allocation1 + $0x8] sm:$0xff pattern:$0x75316420]  ;;  %v12131_v11 = vld.sshfl [vmem:[#allocation1] sm:$0xff pattern:$0x75316420] }
 0x12a   : > { %10548 = vmatpush.msk.msrb.mxu3 %vm106_vm1, %v1966_v0  ;;  %3638 = vst [vmem:[#allocation1] ss:$2 sm:$0xff] %v3628_v17  ;;  %v12177_v39 = vld.sshfl [vmem:[#allocation1 + $0x28] sm:$0xff pattern:$0x75316420]  ;;  %v12235_v0 = vpop.f32.mrf.mxu3 }
 0x12b   : > { %10542 = vmatmul.msk.f32.vlgmr.msra.gmra.mxu0 %vm102_vm2, %v10532_v44  ;;  %10544 = vmatmul.msk.f32.vlgmr.msra.gmra.mxu1 %vm102_vm2, %v10532_v44  ;;  %v3436_v40 = vld.sshfl [vmem:[#allocation1 + $0x20] sm:$0xff pattern:$0x75316420] }
 0x12c   : > { %10549 = vmatmul.msk.f32.vlgmr.msrb.gmra.mxu3 %vm102_vm2, %v12102_v1  ;;  %3642 = vst [vmem:[#allocation1 + $0x20] ss:$2 sm:$0xff] %v3630_v41 }
 0x12d   : > { %3026 = vrot.lane.b32.xlu1 %v3012_v49, %s11436_s18  ;;  %v12198_v49 = vld.sshfl [vmem:[#allocation1 + $0x18] sm:$0xff pattern:$0x75316420] }
 0x12e   : > { %3024 = vrot.lane.b32.xlu0 %v3011_v21, %s11436_s18  ;;  %3853 = vst [vmem:[#allocation1 + $0x10] ss:$2 sm:$0xff] %v3842_v53  ;;  %v12214_v21 = vld [vmem:[%s15415_s1 + $0x58] sm:$0x3f] }
 0x12f   : > { %v1958_v5 = vpop.permute.xlu1 %1957  ;;  %3020 = vrot.lane.b32.xlu2 %v12041_v35, %s11436_s18 }
 0x130   : > { %v1970_v15 = vsel %vm1965_vm10, %v1958_v5, %v12062_v47  ;;  %v1956_v22 = vpop.permute.xlu0 %1955 }
 0x131   : > { %v1969_v6 = vsel %vm1965_vm10, %v1956_v22, %v1958_v5  ;;  %10556 = vmatpush.msk.msra.mxu3 %vm106_vm1, %v1970_v15  ;;  %v12120_v7 = vpop.permute.xlu2 %2174  ;;  %v3646_v50 = vld.sshfl [vmem:[#allocation1 + $0x8] sm:$0xff pattern:$0x75316420] }
 0x132   : > { %10554 = vmatpush.msk.msra.mxu2 %vm106_vm1, %v1969_v6 }
 0x133   : > { %10555 = vmatmul.msk.f32.vlgmr.msra.gmra.mxu2 %vm102_vm2, %v12102_v1  ;;  %v3649_v16 = vld.sshfl [vmem:[#allocation1 + $0x20] sm:$0xff pattern:$0x75316420] }
 0x134   : > { %10557 = vmatmul.msk.f32.vlgmr.msra.gmra.mxu3 %vm102_vm2, %v12102_v1 }
 0x135   : > { %3231 = vrot.lane.b32.xlu1 %v3221_v63, %s11437_s22  ;;  %v12233_v63 = vld.sshfl [vmem:[#allocation1 + $0x28] sm:$0xff pattern:$0x75316420] }
 0x136   : > { %3229 = vrot.lane.b32.xlu0 %v3220_v3, %s11437_s22 }
 0x137   : > { %v2163_v12 = vpop.permute.xlu1 %2162  ;;  %3233 = vrot.lane.b32.xlu2 %v3222_v59, %s11437_s22 }
 0x138   : > { %v1954_v18 = vpop.permute.xlu0 %1953  ;;  %v2179_v24 = vsel %vm2178_vm11, %v2163_v12, %v12081_v57 }
 0x139   : > { %v1967_v26 = vsel %vm1965_vm10, %v1952_v60, %v1954_v18  ;;  %v1968_v27 = vsel %vm1965_vm10, %v1954_v18, %v1956_v22  ;;  %10563 = vmatpush.msk.msrb.mxu2 %vm106_vm1, %v2179_v24  ;;  %v12147_v29 = vpop.permute.xlu2 %2379  ;;  %v12218_v60 = vpop.f32.mrf.mxu2  ;;  %v12283_v24 = vld.sshfl [vmem:[#allocation1 + $0x18] sm:$0xff pattern:$0x75316420] }
 0x13a   : > { %10550 = vmatpush.msk.msrb.mxu0 %vm106_vm1, %v1967_v26  ;;  %10552 = vmatpush.msk.msrb.mxu1 %vm106_vm1, %v1968_v27  ;;  %v3860_v26 = vld.sshfl [vmem:[#allocation1 + $0x10] sm:$0xff pattern:$0x75316420]  ;;  %v4055_v27 = vld [vmem:[%s11522_s25 + $0x8] sm:$0x77] }
 0x13b   : > { %10551 = vmatmul.msk.f32.vlgmr.msrb.gmra.mxu0 %vm102_vm2, %v12102_v1  ;;  %10553 = vmatmul.msk.f32.vlgmr.msrb.gmra.mxu1 %vm102_vm2, %v12102_v1  ;;  %4066 = vst [vmem:[#allocation1 + $0x10] ss:$2 sm:$0xff] %v4055_v27 }
 0x13c   : > { %10564 = vmatmul.msk.f32.vlgmr.msrb.gmra.mxu2 %vm102_vm2, %v12145_v28 }
 0x13d   : > { %3227 = vrot.lane.b32.xlu1 %v3219_v20, %s11437_s22  ;;  %v3439_v20 = vld.sshfl [vmem:[#allocation1 + $0x38] sm:$0xff pattern:$0x75316420] }
 0x13e   : > { %3028 = vrot.lane.b32.xlu0 %v12068_v48, %s11436_s18  ;;  %v3645_v48 = vld.sshfl [vmem:[#allocation1] sm:$0xff pattern:$0x75316420] }
 0x13f   : > { %v1962_v33 = vpop.permute.xlu1 %1961  ;;  %3237 = vrot.lane.b32.xlu2 %v3224_v8, %s11437_s22  ;;  %3851 = vst [vmem:[#allocation1] ss:$2 sm:$0xff] %v3841_v56 }
 0x140   : > { %v2167_v34 = vpop.permute.xlu0 %2166  ;;  %v1971_v35 = vsel %vm1965_vm10, %v12062_v47, %v1962_v33  ;;  %v1972_v36 = vsel %vm1965_vm10, %v1962_v33, %v12104_v2  ;;  %v12189_v47 = vpop.f32.mrf.mxu1  ;;  %v3631_v2 = vld [vmem:[%s11522_s25 + $0x18] sm:$0x77]  ;;  %vm3882_vm10 = vcmask 236544  }
 0x141   : > { %v2180_v37 = vsel %vm2178_vm11, %v12081_v57, %v2167_v34  ;;  %10558 = vmatpush.msk.msra.mxu0 %vm106_vm1, %v1971_v35  ;;  %10560 = vmatpush.msk.msra.mxu1 %vm106_vm1, %v1972_v36  ;;  %v2376_v38 = vpop.permute.xlu2 %2375  ;;  %3644 = vst [vmem:[#allocation1 + $0x30] ss:$2 sm:$0xff] %v3631_v2  ;;  %v12254_v6 = vpop.f32.mrf.mxu2  ;;  %v12307_v36 = vld [vmem:[%s15415_s1 + $0x60] sm:$0x3f] }
 0x142   : > { %10565 = vmatpush.msk.msrb.mxu3 %vm106_vm1, %v2180_v37 }
 0x143   : > { %10559 = vmatmul.msk.f32.vlgmr.msra.gmra.mxu0 %vm102_vm2, %v12102_v1  ;;  %10561 = vmatmul.msk.f32.vlgmr.msra.gmra.mxu1 %vm102_vm2, %v12102_v1  ;;  %v3843_v1 = vld [vmem:[%s11522_s25 + $0x10] sm:$0x77] }
 0x144   : > { %10566 = vmatmul.msk.f32.vlgmr.msrb.gmra.mxu3 %vm102_vm2, %v12145_v28  ;;  %3855 = vst [vmem:[#allocation1 + $0x20] ss:$2 sm:$0xff] %v3843_v1 }
 0x145   : > { %3241 = vrot.lane.b32.xlu1 %v3226_v25, %s11437_s22 }
 0x146   : > { %3239 = vrot.lane.b32.xlu0 %v3225_v23, %s11437_s22 }
 0x147   : > { %v2173_v42 = vpop.permute.xlu1 %2172  ;;  %3235 = vrot.lane.b32.xlu2 %v3223_v9, %s11437_s22 }
 0x148   : > { %v2171_v43 = vpop.permute.xlu0 %2170  ;;  %v2184_v44 = vsel %vm2178_vm11, %v2173_v42, %v12120_v7  ;;  %v12226_v61 = vpop.f32.mrf.mxu1  ;;  %v12265_v23 = vld.sshfl [vmem:[#allocation1 + $0x30] sm:$0xff pattern:$0x75316420] }
 0x149   : > { %v2183_v45 = vsel %vm2178_vm11, %v2171_v43, %v2173_v42  ;;  %10573 = vmatpush.msk.msra.mxu3 %vm106_vm1, %v2184_v44  ;;  %v12187_v46 = vpop.permute.xlu2 %2389  ;;  %v12287_v25 = vpop.f32.mrf.mxu2  ;;  %v12327_v42 = vld.sshfl [vmem:[#allocation1 + $0x18] sm:$0xff pattern:$0x75316420] }
 0x14a   : > { %10571 = vmatpush.msk.msra.mxu2 %vm106_vm1, %v2183_v45 }
 0x14b   : > { %10572 = vmatmul.msk.f32.vlgmr.msra.gmra.mxu2 %vm102_vm2, %v12145_v28  ;;  %v3862_v41 = vld.sshfl [vmem:[#allocation1 + $0x20] sm:$0xff pattern:$0x75316420]  ;;  %v3863_v45 = vld.sshfl [vmem:[#allocation1 + $0x28] sm:$0xff pattern:$0x75316420] }
 0x14c   : > { %10574 = vmatmul.msk.f32.vlgmr.msra.gmra.mxu3 %vm102_vm2, %v12145_v28 }
 0x14d   : > { %3446 = vrot.lane.b32.xlu1 %v3435_v31, %s11438_s14 }
 0x14e   : > { %3444 = vrot.lane.b32.xlu0 %v3434_v30, %s11438_s14 }
 0x14f   : > { %v2378_v51 = vpop.permute.xlu1 %2377  ;;  %3448 = vrot.lane.b32.xlu2 %v3436_v40, %s11438_s14  ;;  %v4268_v40 = vld [vmem:[%s11522_s25 + $0xc] sm:$0x77] }
 0x150   : > { %v2169_v54 = vpop.permute.xlu0 %2168  ;;  %v2393_v55 = vsel %vm2391_vm12, %v2378_v51, %v12147_v29  ;;  %v2392_v19 = vsel %vm2391_vm12, %v2376_v38, %v2378_v51  ;;  %v12261_v8 = vpop.f32.mrf.mxu1  ;;  %v4054_v51 = vld [vmem:[%s11522_s25] sm:$0x77] }
 0x151   : > { %v2181_v57 = vsel %vm2178_vm11, %v2167_v34, %v2169_v54  ;;  %v2182_v58 = vsel %vm2178_vm11, %v2169_v54, %v2171_v43  ;;  %10580 = vmatpush.msk.msrb.mxu2 %vm106_vm1, %v2393_v55  ;;  %v12216_v59 = vpop.permute.xlu2 %2594  ;;  %v12329_v43 = vld.sshfl [vmem:[#allocation1 + $0x10] sm:$0xff pattern:$0x75316420]  ;;  %v3859_v54 = vld.sshfl [vmem:[#allocation1 + $0x8] sm:$0xff pattern:$0x75316420] }
 0x152   : > { %10567 = vmatpush.msk.msrb.mxu0 %vm106_vm1, %v2181_v57  ;;  %10569 = vmatpush.msk.msrb.mxu1 %vm106_vm1, %v2182_v58  ;;  %4279 = vst [vmem:[#allocation1 + $0x10] ss:$2 sm:$0xff] %v4268_v40 }
 0x153   : > { %10568 = vmatmul.msk.f32.vlgmr.msrb.gmra.mxu0 %vm102_vm2, %v12145_v28  ;;  %10570 = vmatmul.msk.f32.vlgmr.msrb.gmra.mxu1 %vm102_vm2, %v12145_v28 }
 0x154   : > { %10581 = vmatmul.msk.f32.vlgmr.msrb.gmra.mxu2 %vm102_vm2, %v12214_v21  ;;  %10578 = vmatpush.msk.msra.mxu1 %vm106_vm1, %v2392_v19  ;;  %v4267_v19 = vld [vmem:[%s11522_s25 + $0x4] sm:$0x77] }
 0x155   : > { %3442 = vrot.lane.b32.xlu1 %v12129_v10, %s11438_s14  ;;  %v12267_v10 = vld.sshfl [vmem:[#allocation1 + $0x38] sm:$0xff pattern:$0x75316420] }
 0x156   : > { %3440 = vrot.lane.b32.xlu0 %v12131_v11, %s11438_s14  ;;  %v12269_v11 = vpop.f32.mrf.mxu3  ;;  %3857 = vst [vmem:[#allocation1 + $0x30] ss:$2 sm:$0xff] %v3844_v14 }
 0x157   : > { %v2177_v3 = vpop.permute.xlu1 %2176  ;;  %3452 = vrot.lane.b32.xlu2 %v3438_v62, %s11438_s14  ;;  %v4057_v62 = vld [vmem:[%s11522_s25 + $0x18] sm:$0x77] }
 0x158   : > { %v2382_v4 = vpop.permute.xlu0 %2381  ;;  %v2185_v5 = vsel %vm2178_vm11, %v12120_v7, %v2177_v3  ;;  %v12258_v7 = vpop.f32.mrf.mxu0 }
 0x159   : > { %v2394_v15 = vsel %vm2391_vm12, %v12147_v29, %v2382_v4  ;;  %10575 = vmatpush.msk.msra.mxu0 %vm106_vm1, %v2185_v5  ;;  %v12247_v22 = vpop.permute.xlu2 %2590  ;;  %v12295_v30 = vpop.f32.mrf.mxu1  ;;  %v12388_v14 = vld.sshfl [vmem:[#allocation1 + $0x18] sm:$0xff pattern:$0x75316420] }
 0x15a   : > { %10582 = vmatpush.msk.msrb.mxu3 %vm106_vm1, %v2394_v15  ;;  %v12377_v15 = vld.sshfl [vmem:[#allocation1 + $0x10] sm:$0xff pattern:$0x75316420] }
 0x15b   : > { %10576 = vmatmul.msk.f32.vlgmr.msra.gmra.mxu0 %vm102_vm2, %v12145_v28  ;;  %10579 = vmatmul.msk.f32.vlgmr.msra.gmra.mxu1 %vm102_vm2, %v12214_v21 }
 0x15c   : > { %10583 = vmatmul.msk.f32.vlgmr.msrb.gmra.mxu3 %vm102_vm2, %v12214_v21 }
 0x15d   : > { %3653 = vrot.lane.b32.xlu1 %v3645_v48, %s11439_s19  ;;  %v3864_v58 = vld.sshfl [vmem:[#allocation1 + $0x30] sm:$0xff pattern:$0x75316420] }
 0x15e   : > { %3454 = vrot.lane.b32.xlu0 %v3439_v20, %s11438_s14  ;;  %v12311_v38 = vpop.f32.mrf.mxu3 }
 0x15f   : > { %v2388_v9 = vpop.permute.xlu1 %2387  ;;  %3655 = vrot.lane.b32.xlu2 %v3646_v50, %s11439_s19  ;;  %v4056_v50 = vld [vmem:[%s11522_s25 + $0x10] sm:$0x77] }
 0x160   : > { %v2386_v12 = vpop.permute.xlu0 %2385  ;;  %v2398_v13 = vsel %vm2391_vm12, %v2388_v9, %v12187_v46  ;;  %v12292_v28 = vpop.f32.mrf.mxu0  ;;  %4068 = vst [vmem:[#allocation1 + $0x20] ss:$2 sm:$0xff] %v4056_v50 }
 0x161   : > { %v2397_v17 = vsel %vm2391_vm12, %v2386_v12, %v2388_v9  ;;  %10590 = vmatpush.msk.msra.mxu3 %vm106_vm1, %v2398_v13  ;;  %v12276_v18 = vpop.permute.xlu2 %2801  ;;  %v12332_v46 = vpop.f32.mrf.mxu2 }
 0x162   : > { %10588 = vmatpush.msk.msra.mxu2 %vm106_vm1, %v2397_v17  ;;  %v12343_v56 = vpop.f32.mrf.mxu1 }
 0x163   : > { %10589 = vmatmul.msk.f32.vlgmr.msra.gmra.mxu2 %vm102_vm2, %v12214_v21 }
 0x164   : > { %10591 = vmatmul.msk.f32.vlgmr.msra.gmra.mxu3 %vm102_vm2, %v12214_v21 }
 0x165   : > { %3659 = vrot.lane.b32.xlu1 %v12198_v49, %s11439_s19 }
 0x166   : > { %3450 = vrot.lane.b32.xlu0 %v12177_v39, %s11438_s14  ;;  %v3858_v39 = vld.sshfl [vmem:[#allocation1] sm:$0xff pattern:$0x75316420]  ;;  %v12350_v57 = vpop.f32.mrf.mxu3  ;;  %s11446_s14 = smov 56  }
 0x167   : > { %v2593_v29 = vpop.permute.xlu1 %2592  ;;  %3661 = vrot.lane.b32.xlu2 %v3649_v16, %s11439_s19  ;;  %4064 = vst [vmem:[#allocation1] ss:$2 sm:$0xff] %v4054_v51  ;;  %v4457_v51 = vld [vmem:[%s11522_s25 + $0x14] sm:$0x77] }
 0x168   : > { %v2384_v31 = vpop.permute.xlu0 %2383  ;;  %v2607_v32 = vsel %vm2604_vm13, %v2593_v29, %v12216_v59  ;;  %v2606_v35 = vsel %vm2604_vm13, %v12247_v22, %v2593_v29  ;;  %v12396_v29 = vld [vmem:[%s15415_s1 + $0x68] sm:$0x3f] }
 0x169   : > { %v2395_v33 = vsel %vm2391_vm12, %v2382_v4, %v2384_v31  ;;  %v2396_v34 = vsel %vm2391_vm12, %v2384_v31, %v2386_v12  ;;  %10597 = vmatpush.msk.msrb.mxu2 %vm106_vm1, %v2607_v32  ;;  %v12309_v37 = vpop.permute.xlu2 %2807  ;;  %v12367_v20 = vpop.f32.mrf.mxu2  ;;  %v4269_v12 = vld [vmem:[%s11522_s25 + $0x14] sm:$0x77]  ;;  %v4455_v31 = vld [vmem:[%s11522_s25 + $0x4] sm:$0x77]  ;;  %vm4095_vm12 = vcmask 228352  }
 0x16a   : > { %10584 = vmatpush.msk.msrb.mxu0 %vm106_vm1, %v2395_v33  ;;  %10586 = vmatpush.msk.msrb.mxu1 %vm106_vm1, %v2396_v34  ;;  %v12374_v5 = vpop.f32.mrf.mxu1 }
 0x16b   : > { %10585 = vmatmul.msk.f32.vlgmr.msrb.gmra.mxu0 %vm102_vm2, %v12214_v21  ;;  %10587 = vmatmul.msk.f32.vlgmr.msrb.gmra.mxu1 %vm102_vm2, %v12214_v21 }
 0x16c   : > { %10598 = vmatmul.msk.f32.vlgmr.msrb.gmra.mxu2 %vm102_vm2, %v12307_v36  ;;  %10595 = vmatpush.msk.msra.mxu1 %vm106_vm1, %v2606_v35 }
 0x16d   : > { %3657 = vrot.lane.b32.xlu1 %v12201_v52, %s11439_s19  ;;  %v12338_v52 = vpop.f32.mrf.mxu0 }
 0x16e   : > { %3663 = vrot.lane.b32.xlu0 %v12233_v63, %s11439_s19  ;;  %v4072_v2 = vld.sshfl [vmem:[#allocation1 + $0x8] sm:$0xff pattern:$0x75316420]  ;;  %v12365_v3 = vld.sshfl [vmem:[#allocation1] sm:$0xff pattern:$0x75316420]  ;;  %v12381_v9 = vpop.f32.mrf.mxu3 }
 0x16f   : > { %v2589_v44 = vpop.permute.xlu1 %2588  ;;  %3866 = vrot.lane.b32.xlu2 %v3858_v39, %s11440_s24  ;;  %4277 = vst [vmem:[#allocation1] ss:$2 sm:$0xff] %v4267_v19 }
 0x170   : > { %v2597_v48 = vpop.permute.xlu0 %2596  ;;  %v2605_v49 = vsel %vm2604_vm13, %v2589_v44, %v12247_v22  ;;  %v12379_v22 = vld.sshfl [vmem:[#allocation1 + $0x28] sm:$0xff pattern:$0x75316420] }
 0x171   : > { %v2608_v53 = vsel %vm2604_vm13, %v12216_v59, %v2597_v48  ;;  %10593 = vmatpush.msk.msra.mxu0 %vm106_vm1, %v2605_v49  ;;  %v2806_v55 = vpop.permute.xlu2 %2805  ;;  %v12359_v59 = vld.sshfl [vmem:[#allocation1 + $0x38] sm:$0xff pattern:$0x75316420] }
 0x172   : > { %10599 = vmatpush.msk.msrb.mxu3 %vm106_vm1, %v2608_v53  ;;  %4070 = vst [vmem:[#allocation1 + $0x30] ss:$2 sm:$0xff] %v4057_v62  ;;  %v2820_v34 = vsel %vm2817_vm14, %v2806_v55, %v12309_v37  ;;  %v12428_v44 = vpop.f32.mrf.mxu1 }
 0x173   : > { %10594 = vmatmul.msk.f32.vlgmr.msra.gmra.mxu0 %vm102_vm2, %v12307_v36  ;;  %10596 = vmatmul.msk.f32.vlgmr.msra.gmra.mxu1 %vm102_vm2, %v12307_v36 }
 0x174   : > { %10600 = vmatmul.msk.f32.vlgmr.msrb.gmra.mxu3 %vm102_vm2, %v12307_v36 }
 0x175   : > { %3870 = vrot.lane.b32.xlu1 %v3860_v26, %s11440_s24  ;;  %v12370_v4 = vpop.f32.mrf.mxu0 }
 0x176   : > { %3868 = vrot.lane.b32.xlu0 %v3859_v54, %s11440_s24  ;;  %v12409_v39 = vld.sshfl [vmem:[#allocation1] sm:$0xff pattern:$0x75316420]  ;;  %v12411_v40 = vld.sshfl [vmem:[#allocation1 + $0x8] sm:$0xff pattern:$0x75316420]  ;;  %v12439_v53 = vpop.f32.mrf.mxu3 }
 0x177   : > { %v2603_v21 = vpop.permute.xlu1 %2602  ;;  %3665 = vrot.lane.b32.xlu2 %v12265_v23, %s11439_s19  ;;  %v12385_v23 = vld.sshfl [vmem:[#allocation1 + $0x20] sm:$0xff pattern:$0x75316420]  ;;  %4465 = vst [vmem:[#allocation1] ss:$2 sm:$0xff] %v4455_v31 }
 0x178   : > { %v2601_v16 = vpop.permute.xlu0 %2600  ;;  %4281 = vst [vmem:[#allocation1 + $0x20] ss:$2 sm:$0xff] %v4269_v12  ;;  %v4668_v12 = vld [vmem:[%s11522_s25 + $0xc] sm:$0x77] }
 0x179   : > { %v2611_v63 = vsel %vm2604_vm13, %v2601_v16, %v2603_v21  ;;  %v12363_v1 = vpop.permute.xlu2 %3018  ;;  %v4077_v50 = vld.sshfl [vmem:[#allocation1 + $0x30] sm:$0xff pattern:$0x75316420] }
 0x17a   : > { %10605 = vmatpush.msk.msra.mxu2 %vm106_vm1, %v2611_v63 }
 0x17b   : > { %10606 = vmatmul.msk.f32.vlgmr.msra.gmra.mxu2 %vm102_vm2, %v12307_v36 }
 0x17d   : > { %3874 = vrot.lane.b32.xlu1 %v3862_v41, %s11440_s24  ;;  %v12424_v41 = vpop.f32.mrf.mxu0 }
 0x17e   : > { %3667 = vrot.lane.b32.xlu0 %v12267_v10, %s11439_s19  ;;  %v4456_v10 = vld [vmem:[%s11522_s25 + $0xc] sm:$0x77]  ;;  %v12484_v31 = vpop.f32.mrf.mxu3 }
 0x17f   : > { %v2599_v13 = vpop.permute.xlu1 %2598  ;;  %3876 = vrot.lane.b32.xlu2 %v3863_v45, %s11440_s24  ;;  %4467 = vst [vmem:[#allocation1 + $0x10] ss:$2 sm:$0xff] %v4456_v10  ;;  %v12433_v45 = vld.sshfl [vmem:[#allocation1 + $0x28] sm:$0xff pattern:$0x75316420] }
 0x180   : > { %v2609_v17 = vsel %vm2604_vm13, %v2597_v48, %v2599_v13  ;;  %v2610_v26 = vsel %vm2604_vm13, %v2599_v13, %v2601_v16  ;;  %v2804_v27 = vpop.permute.xlu0 %2803  ;;  %v12435_v48 = vld.sshfl [vmem:[#allocation1 + $0x38] sm:$0xff pattern:$0x75316420]  ;;  %v4667_v10 = vld [vmem:[%s11522_s25 + $0x4] sm:$0x77] }
 0x181   : > { %v2818_v32 = vsel %vm2817_vm14, %v12276_v18, %v2804_v27  ;;  %v2819_v33 = vsel %vm2817_vm14, %v2804_v27, %v2806_v55  ;;  %10601 = vmatpush.msk.msrb.mxu0 %vm106_vm1, %v2609_v17  ;;  %10603 = vmatpush.msk.msrb.mxu1 %vm106_vm1, %v2610_v26  ;;  %v12407_v35 = vpop.permute.xlu2 %3022  ;;  %v12420_v18 = vpop.f32.mrf.mxu2 }
 0x182   : > { %10608 = vmatpush.msk.msra.mxu3 %vm106_vm1, %v2818_v32  ;;  %10602 = vmatmul.msk.f32.vlgmr.msrb.gmra.mxu0 %vm102_vm2, %v12307_v36 }
 0x183   : > { %10604 = vmatmul.msk.f32.vlgmr.msrb.gmra.mxu1 %vm102_vm2, %v12307_v36  ;;  %10609 = vmatmul.msk.f32.vlgmr.msra.gmra.mxu3 %vm102_vm2, %v12396_v29  ;;  %v12431_v36 = vld.sshfl [vmem:[#allocation1 + $0x20] sm:$0xff pattern:$0x75316420] }
 0x184   : > { %10610 = vmatpush.msk.msra.mxu0 %vm106_vm1, %v2819_v33  ;;  %10612 = vmatpush.msk.msra.mxu1 %vm106_vm1, %v2820_v34  ;;  %4469 = vst [vmem:[#allocation1 + $0x20] ss:$2 sm:$0xff] %v4457_v51 }
 0x185   : > { %3872 = vrot.lane.b32.xlu1 %v12283_v24, %s11440_s24  ;;  %v4270_v24 = vld [vmem:[%s11522_s25 + $0x1c] sm:$0x7]  ;;  %v12465_v16 = vpop.f32.mrf.mxu0 }
 0x186   : > { %3878 = vrot.lane.b32.xlu0 %v3864_v58, %s11440_s24  ;;  %4283 = vst [vmem:[#allocation1 + $0x30] ss:$2 sm:$0xff] %v4270_v24  ;;  %v12463_v62 = vld.sshfl [vmem:[#allocation1 + $0x18] sm:$0xff pattern:$0x75316420] }
 0x187   : > { %v2812_v49 = vpop.permute.xlu1 %2811  ;;  %4081 = vrot.lane.b32.xlu2 %v4072_v2, %s11441_s15  ;;  %v4472_v2 = vld.sshfl [vmem:[#allocation1] sm:$0xff pattern:$0x75316420] }
 0x188   : > { %v2810_v54 = vpop.permute.xlu0 %2809 }
 0x189   : > { %v2821_v55 = vsel %vm2817_vm14, %v12309_v37, %v2810_v54  ;;  %v2822_v58 = vsel %vm2817_vm14, %v2810_v54, %v2812_v49  ;;  %v3021_v19 = vpop.permute.xlu2 %3020  ;;  %v12457_v37 = vld.sshfl [vmem:[#allocation1 + $0x10] sm:$0xff pattern:$0x75316420]  ;;  %v12459_v21 = vpop.f32.mrf.mxu2 }
 0x18a   : > { %10614 = vmatpush.msk.msrb.mxu2 %vm106_vm1, %v2821_v55  ;;  %10616 = vmatpush.msk.msrb.mxu3 %vm106_vm1, %v2822_v58  ;;  %15427 = vst [vmem:[#allocation9_spill] sm:$0xff] %v12459_v21  ;;  %v4669_v55 = vld [vmem:[%s11522_s25 + $0x14] sm:$0x77]  ;;  %v4458_v58 = vld [vmem:[%s11522_s25 + $0x1c] sm:$0x77] }
 0x18b   : > { %10611 = vmatmul.msk.f32.vlgmr.msra.gmra.mxu0 %vm102_vm2, %v12396_v29  ;;  %10613 = vmatmul.msk.f32.vlgmr.msra.gmra.mxu1 %vm102_vm2, %v12396_v29  ;;  %4679 = vst [vmem:[#allocation1 + $0x10] ss:$2 sm:$0xff] %v4668_v12  ;;  %v12495_v32 = vld.sshfl [vmem:[#allocation1 + $0x28] sm:$0xff pattern:$0x75316420] }
 0x18c   : > { %10615 = vmatmul.msk.f32.vlgmr.msrb.gmra.mxu2 %vm102_vm2, %v12396_v29  ;;  %10617 = vmatmul.msk.f32.vlgmr.msrb.gmra.mxu3 %vm102_vm2, %v12396_v29  ;;  %v4476_v51 = vld.sshfl [vmem:[#allocation1 + $0x20] sm:$0xff pattern:$0x75316420]  ;;  %v4881_v21 = vld [vmem:[%s11522_s25 + $0x14] sm:$0x77] }
 0x18d   : > { %4085 = vrot.lane.b32.xlu1 %v12327_v42, %s11441_s15  ;;  %v12470_v42 = vpop.f32.mrf.mxu1  ;;  %v12497_v34 = vld.sshfl [vmem:[#allocation1 + $0x30] sm:$0xff pattern:$0x75316420]  ;;  %4681 = vst [vmem:[#allocation1 + $0x20] ss:$2 sm:$0xff] %v4669_v55 }
 0x18e   : > { %4083 = vrot.lane.b32.xlu0 %v12329_v43, %s11441_s15  ;;  %v12477_v43 = vld [vmem:[%s15415_s1 + $0x70] sm:$0x3f]  ;;  %4471 = vst [vmem:[#allocation1 + $0x30] ss:$2 sm:$0xff] %v4458_v58 }
 0x18f   : > { %v3017_v63 = vpop.permute.xlu1 %3016  ;;  %3880 = vrot.lane.b32.xlu2 %v12359_v59, %s11440_s24  ;;  %v4473_v59 = vld.sshfl [vmem:[#allocation1 + $0x8] sm:$0xff pattern:$0x75316420]  ;;  %s11444_s24 = smov 120  }
 0x190   : > { %v3032_v13 = vsel %vm3030_vm15, %v3017_v63, %v12363_v1  ;;  %v3015_v17 = vpop.permute.xlu0 %3014  ;;  %4677 = vst [vmem:[#allocation1] ss:$2 sm:$0xff] %v4667_v10 }
 0x191   : > { %v3031_v26 = vsel %vm3030_vm15, %v3015_v17, %v3017_v63  ;;  %10625 = vmatpush.msk.msra.mxu3 %vm106_vm1, %v3032_v13  ;;  %v12481_v27 = vpop.permute.xlu2 %3233  ;;  %v12500_v54 = vpop.f32.mrf.mxu2  ;;  %v3033_v63 = vsel %vm3030_vm15, %v12363_v1, %v3021_v19 }
 0x192   : > { %10623 = vmatpush.msk.msra.mxu2 %vm106_vm1, %v3031_v26  ;;  %v12522_v1 = vpop.f32.mrf.mxu3 }
 0x194   : > { %10624 = vmatmul.msk.f32.vlgmr.msra.gmra.mxu2 %vm102_vm2, %v12477_v43  ;;  %10626 = vmatmul.msk.f32.vlgmr.msra.gmra.mxu3 %vm102_vm2, %v12477_v43 }
 0x195   : > { %4089 = vrot.lane.b32.xlu1 %v12379_v22, %s11441_s15  ;;  %v3034_v22 = vsel %vm3030_vm15, %v3021_v19, %v12407_v35  ;;  %v12514_v17 = vpop.f32.mrf.mxu1  ;;  %v4670_v19 = vld [vmem:[%s11522_s25 + $0x1c] sm:$0x77] }
 0x196   : > { %4079 = vrot.lane.b32.xlu0 %v12365_v3, %s11441_s15 }
 0x197   : > { %v2816_v33 = vpop.permute.xlu1 %2815  ;;  %4091 = vrot.lane.b32.xlu2 %v4077_v50, %s11441_s15  ;;  %v12512_v50 = vpop.f32.mrf.mxu0 }
 0x198   : > { %v2814_v24 = vpop.permute.xlu0 %2813 }
 0x199   : > { %v2823_v3 = vsel %vm2817_vm14, %v2812_v49, %v2814_v24  ;;  %v2824_v12 = vsel %vm2817_vm14, %v2814_v24, %v2816_v33  ;;  %v12510_v13 = vpop.permute.xlu2 %3237  ;;  %v12532_v33 = vld.sshfl [vmem:[#allocation1 + $0x30] sm:$0xff pattern:$0x75316420]  ;;  %v12536_v24 = vpop.f32.mrf.mxu2  ;;  %vm6706_vm14 = vcmask 474112  }
 0x19a   : > { %10618 = vmatpush.msk.msrb.mxu0 %vm106_vm1, %v2823_v3  ;;  %10620 = vmatpush.msk.msrb.mxu1 %vm106_vm1, %v2824_v12  ;;  %15428 = vst [vmem:[#allocation10_spill] sm:$0xff] %v12536_v24  ;;  %v12557_v58 = vpop.f32.mrf.mxu3  ;;  %v4880_v3 = vld [vmem:[%s11522_s25 + $0xc] sm:$0x77] }
 0x19b   : > { %10619 = vmatmul.msk.f32.vlgmr.msrb.gmra.mxu0 %vm102_vm2, %v12396_v29  ;;  %10621 = vmatmul.msk.f32.vlgmr.msrb.gmra.mxu1 %vm102_vm2, %v12396_v29  ;;  %v12534_v29 = vld.sshfl [vmem:[#allocation1 + $0x38] sm:$0xff pattern:$0x75316420]  ;;  %15431 = vst [vmem:[#allocation13_spill] sm:$0xff] %v12557_v58 }
 0x19c   : > { %10627 = vmatpush.msk.msra.mxu0 %vm106_vm1, %v3033_v63  ;;  %10629 = vmatpush.msk.msra.mxu1 %vm106_vm1, %v3034_v22  ;;  %4683 = vst [vmem:[#allocation1 + $0x30] ss:$2 sm:$0xff] %v4670_v19  ;;  %v4686_v22 = vld.sshfl [vmem:[#allocation1 + $0x10] sm:$0xff pattern:$0x75316420] }
 0x19d   : > { %4087 = vrot.lane.b32.xlu1 %v12385_v23, %s11441_s15  ;;  %v4689_v24 = vld.sshfl [vmem:[#allocation1 + $0x28] sm:$0xff pattern:$0x75316420] }
 0x19e   : > { %4093 = vrot.lane.b32.xlu0 %v12435_v48, %s11441_s15 }
 0x19f   : > { %v3027_v49 = vpop.permute.xlu1 %3026  ;;  %4480 = vrot.lane.b32.xlu2 %v4472_v2, %s11423_s26  ;;  %v12543_v48 = vpop.f32.mrf.mxu0 }
 0x1a0   : > { %v3025_v26 = vpop.permute.xlu0 %3024  ;;  %15429 = vst [vmem:[#allocation11_spill] sm:$0xff] %v12543_v48  ;;  %v12545_v2 = vpop.f32.mrf.mxu1 }
 0x1a1   : > { %v3236_v10 = vpop.permute.xlu2 %3235  ;;  %v3035_v55 = vsel %vm3030_vm15, %v12407_v35, %v3025_v26  ;;  %v3036_v23 = vsel %vm3030_vm15, %v3025_v26, %v3027_v49  ;;  %15430 = vst [vmem:[#allocation12_spill] sm:$0xff] %v12545_v2  ;;  %v12555_v35 = vld.sshfl [vmem:[#allocation1 + $0x18] sm:$0xff pattern:$0x75316420] }
 0x1a2   : > { %10631 = vmatpush.msk.msrb.mxu2 %vm106_vm1, %v3035_v55  ;;  %10633 = vmatpush.msk.msrb.mxu3 %vm106_vm1, %v3036_v23  ;;  %4891 = vst [vmem:[#allocation1 + $0x10] ss:$2 sm:$0xff] %v4880_v3  ;;  %v12587_v2 = vpop.f32.mrf.mxu3  ;;  %v3248_v48 = vsel %vm3243_vm7, %v3236_v10, %v12510_v13 }
 0x1a3   : > { %10628 = vmatmul.msk.f32.vlgmr.msra.gmra.mxu0 %vm102_vm2, %v12477_v43  ;;  %10630 = vmatmul.msk.f32.vlgmr.msra.gmra.mxu1 %vm102_vm2, %v12477_v43  ;;  %15433 = vst [vmem:[#allocation15_spill] sm:$0xff] %v12587_v2 }
 0x1a4   : > { %10632 = vmatmul.msk.f32.vlgmr.msrb.gmra.mxu2 %vm102_vm2, %v12477_v43  ;;  %10634 = vmatmul.msk.f32.vlgmr.msrb.gmra.mxu3 %vm102_vm2, %v12477_v43 }
 0x1a5   : > { %4486 = vrot.lane.b32.xlu1 %v12463_v62, %s11423_s26  ;;  %v10637_v62 = vld [vmem:[%s15415_s1 + $0x78] sm:$0x3f] }
 0x1a6   : > { %4482 = vrot.lane.b32.xlu0 %v4473_v59, %s11423_s26  ;;  %v12574_v59 = vpop.f32.mrf.mxu2 }
 0x1a7   : > { %v3232_v63 = vpop.permute.xlu1 %3231  ;;  %4488 = vrot.lane.b32.xlu2 %v4476_v51, %s11423_s26  ;;  %v4684_v51 = vld.sshfl [vmem:[#allocation1] sm:$0xff pattern:$0x75316420]  ;;  %v12578_v23 = vpop.f32.mrf.mxu0 }
 0x1a8   : > { %v3246_v12 = vsel %vm3243_vm7, %v3232_v63, %v12481_v27  ;;  %v3230_v19 = vpop.permute.xlu0 %3229  ;;  %15432 = vst [vmem:[#allocation14_spill] sm:$0xff] %v12578_v23  ;;  %v12580_v3 = vpop.f32.mrf.mxu1 }
 0x1a9   : > { %10642 = vmatpush.msk.msra.mxu3 %vm106_vm1, %v3246_v12  ;;  %v12567_v26 = vpop.permute.xlu2 %3448  ;;  %v3245_v55 = vsel %vm3243_vm7, %v3230_v19, %v3232_v63  ;;  %v4685_v12 = vld.sshfl [vmem:[#allocation1 + $0x8] sm:$0xff pattern:$0x75316420] }
 0x1aa   : > { %10640 = vmatpush.msk.msra.mxu2 %vm106_vm1, %v3245_v55  ;;  %v4688_v55 = vld.sshfl [vmem:[#allocation1 + $0x20] sm:$0xff pattern:$0x75316420] }
 0x1ab   : > { %4893 = vst [vmem:[#allocation1 + $0x20] ss:$2 sm:$0xff] %v4881_v21 }
 0x1ac   : > { %10641 = vmatmul.msk.f32.vlgmr.msra.gmra.mxu2 %vm102_vm2, %v10637_v62  ;;  %10643 = vmatmul.msk.f32.vlgmr.msra.gmra.mxu3 %vm102_vm2, %v10637_v62 }
 0x1ad   : > { %4484 = vrot.lane.b32.xlu1 %v12457_v37, %s11423_s26 }
 0x1ae   : > { %4490 = vrot.lane.b32.xlu0 %v12495_v32, %s11423_s26  ;;  %v4879_v32 = vld [vmem:[%s11522_s25 + $0x4] sm:$0x77]  ;;  %v12606_v21 = vpop.f32.mrf.mxu2 }
 0x1af   : > { %v3228_v63 = vpop.permute.xlu1 %3227  ;;  %4692 = vrot.lane.b32.xlu2 %v4684_v51, %s11424_s27  ;;  %v3247_v51 = vsel %vm3243_vm7, %v12481_v27, %v3236_v10  ;;  %4889 = vst [vmem:[#allocation1] ss:$2 sm:$0xff] %v4879_v32  ;;  %v4690_v27 = vld.sshfl [vmem:[#allocation1 + $0x30] sm:$0xff pattern:$0x75316420] }
 0x1b0   : > { %v3244_v23 = vsel %vm3243_vm7, %v3228_v63, %v3230_v19  ;;  %v3029_v58 = vpop.permute.xlu0 %3028  ;;  %15434 = vst [vmem:[#allocation16_spill] sm:$0xff] %v12606_v21  ;;  %v12612_v10 = vld.sshfl [vmem:[#allocation1 + $0x38] sm:$0xff pattern:$0x75316420] }
 0x1b1   : > { %10638 = vmatpush.msk.msrb.mxu1 %vm106_vm1, %v3244_v23  ;;  %v12594_v37 = vpop.permute.xlu2 %3452  ;;  %v3037_v2 = vsel %vm3030_vm15, %v3027_v49, %v3029_v58  ;;  %v12617_v58 = vpop.f32.mrf.mxu1 }
 0x1b2   : > { %10639 = vmatmul.msk.f32.vlgmr.msrb.gmra.mxu1 %vm102_vm2, %v10637_v62  ;;  %10635 = vmatpush.msk.msrb.mxu0 %vm106_vm1, %v3037_v2  ;;  %v4882_v2 = vld [vmem:[%s11522_s25 + $0x1c] sm:$0x77]  ;;  %15436 = vst [vmem:[#allocation18_spill] sm:$0xff] %v12617_v58  ;;  %v12621_v23 = vpop.f32.mrf.mxu3  ;;  %v4901_v32 = vld.sshfl [vmem:[#allocation1 + $0x28] sm:$0xff pattern:$0x75316420] }
 0x1b3   : > { %10646 = vmatpush.msk.msra.mxu1 %vm106_vm1, %v3248_v48  ;;  %10636 = vmatmul.msk.f32.vlgmr.msrb.gmra.mxu0 %vm102_vm2, %v12477_v43  ;;  %v12615_v48 = vpop.f32.mrf.mxu0  ;;  %4895 = vst [vmem:[#allocation1 + $0x30] ss:$2 sm:$0xff] %v4882_v2  ;;  %v5092_v2 = vld [vmem:[%s11522_s25 + $0xc] sm:$0x77] }
 0x1b4   : > { %10644 = vmatpush.msk.msra.mxu0 %vm106_vm1, %v3247_v51  ;;  %15435 = vst [vmem:[#allocation17_spill] sm:$0xff] %v12615_v48 }
 0x1b5   : > { %4696 = vrot.lane.b32.xlu1 %v4686_v22, %s11424_s27  ;;  %15437 = vst [vmem:[#allocation19_spill] sm:$0xff] %v12621_v23 }
 0x1b6   : > { %4694 = vrot.lane.b32.xlu0 %v4685_v12, %s11424_s27  ;;  %v4899_v12 = vld.sshfl [vmem:[#allocation1 + $0x18] sm:$0xff pattern:$0x75316420]  ;;  %v12638_v51 = vpop.f32.mrf.mxu2  ;;  %v4896_v58 = vld.sshfl [vmem:[#allocation1] sm:$0xff pattern:$0x75316420] }
 0x1b7   : > { %v3242_v49 = vpop.permute.xlu1 %3241  ;;  %4492 = vrot.lane.b32.xlu2 %v12532_v33, %s11423_s26  ;;  %15438 = vst [vmem:[#allocation20_spill] sm:$0xff] %v12638_v51 }
 0x1b8   : > { %v3240_v43 = vpop.permute.xlu0 %3239 }
 0x1b9   : > { %v12619_v19 = vpop.permute.xlu2 %3655  ;;  %v3249_v22 = vsel %vm3243_vm7, %v12510_v13, %v3240_v43  ;;  %v3250_v63 = vsel %vm3243_vm7, %v3240_v43, %v3242_v49  ;;  %v12635_v13 = vld.sshfl [vmem:[#allocation1 + $0x20] sm:$0xff pattern:$0x75316420]  ;;  %v4898_v43 = vld.sshfl [vmem:[#allocation1 + $0x10] sm:$0xff pattern:$0x75316420] }
 0x1ba   : > { %10647 = vmatmul.msk.f32.vlgmr.msra.gmra.mxu1 %vm102_vm2, %v10637_v62  ;;  %10648 = vmatpush.msk.msrb.mxu2 %vm106_vm1, %v3249_v22  ;;  %5103 = vst [vmem:[#allocation1 + $0x10] ss:$2 sm:$0xff] %v5092_v2  ;;  %v12658_v48 = vpop.f32.mrf.mxu3  ;;  %v4903_v23 = vld.sshfl [vmem:[#allocation1 + $0x38] sm:$0xff pattern:$0x75316420]  ;;  %vm6868_vm7 = vcmask 457728  }
 0x1bb   : > { %10650 = vmatpush.msk.msrb.mxu3 %vm106_vm1, %v3250_v63  ;;  %10645 = vmatmul.msk.f32.vlgmr.msra.gmra.mxu0 %vm102_vm2, %v10637_v62  ;;  %v12654_v63 = vpop.f32.mrf.mxu1  ;;  %15441 = vst [vmem:[#allocation23_spill] sm:$0xff] %v12658_v48  ;;  %v5091_v2 = vld [vmem:[%s11522_s25 + $0x4] sm:$0x77] }
 0x1bc   : > { %10649 = vmatmul.msk.f32.vlgmr.msrb.gmra.mxu2 %vm102_vm2, %v10637_v62  ;;  %10651 = vmatmul.msk.f32.vlgmr.msrb.gmra.mxu3 %vm102_vm2, %v10637_v62  ;;  %v12645_v62 = vld [vmem:[%s15415_s1 + $0x80] sm:$0x3f]  ;;  %15440 = vst [vmem:[#allocation22_spill] sm:$0xff] %v12654_v63 }
 0x1bd   : > { %4700 = vrot.lane.b32.xlu1 %v4688_v55, %s11424_s27  ;;  %v5093_v55 = vld [vmem:[%s11522_s25 + $0x14] sm:$0x77] }
 0x1be   : > { %4494 = vrot.lane.b32.xlu0 %v12534_v29, %s11423_s26  ;;  %5105 = vst [vmem:[#allocation1 + $0x20] ss:$2 sm:$0xff] %v5093_v55  ;;  %v4902_v55 = vld.sshfl [vmem:[#allocation1 + $0x30] sm:$0xff pattern:$0x75316420] }
 0x1bf   : > { %v3447_v33 = vpop.permute.xlu1 %3446  ;;  %4702 = vrot.lane.b32.xlu2 %v4689_v24, %s11424_s27  ;;  %v12652_v24 = vpop.f32.mrf.mxu0 }
 0x1c0   : > { %v3460_v49 = vsel %vm3456_vm8, %v3447_v33, %v12567_v26  ;;  %v3445_v29 = vpop.permute.xlu0 %3444  ;;  %15439 = vst [vmem:[#allocation21_spill] sm:$0xff] %v12652_v24  ;;  %v12674_v24 = vpop.f32.mrf.mxu2 }
 0x1c1   : > { %10659 = vmatpush.msk.msra.mxu3 %vm106_vm1, %v3460_v49  ;;  %v12650_v22 = vpop.permute.xlu2 %3661  ;;  %v3459_v51 = vsel %vm3456_vm8, %v3445_v29, %v3447_v33  ;;  %v4897_v49 = vld.sshfl [vmem:[#allocation1 + $0x8] sm:$0xff pattern:$0x75316420] }
 0x1c2   : > { %10657 = vmatpush.msk.msra.mxu2 %vm106_vm1, %v3459_v51  ;;  %v5094_v51 = vld [vmem:[%s11522_s25 + $0x1c] sm:$0x77]  ;;  %5101 = vst [vmem:[#allocation1] ss:$2 sm:$0xff] %v5091_v2 }
 0x1c3   : > { %5107 = vst [vmem:[#allocation1 + $0x30] ss:$2 sm:$0xff] %v5094_v51 }
 0x1c4   : > { %10658 = vmatmul.msk.f32.vlgmr.msra.gmra.mxu2 %vm102_vm2, %v12645_v62  ;;  %10660 = vmatmul.msk.f32.vlgmr.msra.gmra.mxu3 %vm102_vm2, %v12645_v62 }
 0x1c5   : > { %4698 = vrot.lane.b32.xlu1 %v12555_v35, %s11424_s27 }
 0x1c6   : > { %4704 = vrot.lane.b32.xlu0 %v4690_v27, %s11424_s27 }
 0x1c7   : > { %v3443_v33 = vpop.permute.xlu1 %3442  ;;  %4906 = vrot.lane.b32.xlu2 %v4897_v49, %s11425_s28  ;;  %v12680_v27 = vpop.f32.mrf.mxu0  ;;  %v12693_v49 = vld [vmem:[%s15415_s1 + $0x88] sm:$0x3f] }
 0x1c8   : > { %v3458_v48 = vsel %vm3456_vm8, %v3443_v33, %v3445_v29  ;;  %v3441_v21 = vpop.permute.xlu0 %3440  ;;  %v12682_v29 = vpop.f32.mrf.mxu1 }
 0x1c9   : > { %10655 = vmatpush.msk.msrb.mxu1 %vm106_vm1, %v3458_v48  ;;  %v12672_v63 = vpop.permute.xlu2 %3866  ;;  %v3457_v35 = vsel %vm3456_vm8, %v3441_v21, %v3443_v33  ;;  %v12686_v48 = vpop.f32.mrf.mxu3 }
 0x1ca   : > { %10656 = vmatmul.msk.f32.vlgmr.msrb.gmra.mxu1 %vm102_vm2, %v12645_v62  ;;  %10653 = vmatpush.msk.msrb.mxu0 %vm106_vm1, %v3457_v35 }
 0x1cb   : > { %10654 = vmatmul.msk.f32.vlgmr.msrb.gmra.mxu0 %vm102_vm2, %v12645_v62 }
 0x1cd   : > { %4910 = vrot.lane.b32.xlu1 %v4899_v12, %s11425_s28 }
 0x1ce   : > { %4908 = vrot.lane.b32.xlu0 %v4898_v43, %s11425_s28  ;;  %v12707_v43 = vpop.f32.mrf.mxu2 }
 0x1cf   : > { %v3654_v21 = vpop.permute.xlu1 %3653  ;;  %4706 = vrot.lane.b32.xlu2 %v12612_v10, %s11424_s27  ;;  %15442 = vst [vmem:[#allocation24_spill] sm:$0xff] %v12707_v43  ;;  %v12711_v10 = vpop.f32.mrf.mxu0 }
 0x1d0   : > { %v3670_v33 = vsel %vm3669_vm9, %v3654_v21, %v12619_v19  ;;  %v3455_v51 = vpop.permute.xlu0 %3454  ;;  %v12713_v35 = vpop.f32.mrf.mxu1 }
 0x1d1   : > { %10668 = vmatpush.msk.msrb.mxu3 %vm106_vm1, %v3670_v33  ;;  %v12700_v2 = vpop.permute.xlu2 %3665  ;;  %v3463_v12 = vsel %vm3456_vm8, %v12594_v37, %v3455_v51  ;;  %15443 = vst [vmem:[#allocation25_spill] sm:$0xff] %v12713_v35  ;;  %v12718_v33 = vpop.f32.mrf.mxu3 }
 0x1d2   : > { %10669 = vmatmul.msk.f32.vlgmr.msrb.gmra.mxu3 %vm102_vm2, %v12693_v49  ;;  %10665 = vmatpush.msk.msrb.mxu2 %vm106_vm1, %v3463_v12  ;;  %15444 = vst [vmem:[#allocation26_spill] sm:$0xff] %v12718_v33 }
 0x1d3   : > { %10666 = vmatmul.msk.f32.vlgmr.msrb.gmra.mxu2 %vm102_vm2, %v12645_v62 }
 0x1d5   : > { %4914 = vrot.lane.b32.xlu1 %v4901_v32, %s11425_s28 }
 0x1d6   : > { %4904 = vrot.lane.b32.xlu0 %v4896_v58, %s11425_s28  ;;  %v5110_v58 = vld.sshfl [vmem:[#allocation1 + $0x10] sm:$0xff pattern:$0x75316420] }
 0x1d7   : > { %v3660_v21 = vpop.permute.xlu1 %3659  ;;  %4916 = vrot.lane.b32.xlu2 %v4902_v55, %s11425_s28  ;;  %v12737_v55 = vpop.f32.mrf.mxu2 }
 0x1d8   : > { %v3673_v51 = vsel %vm3669_vm9, %v3660_v21, %v12650_v22  ;;  %v3451_v12 = vpop.permute.xlu0 %3450 }
 0x1d9   : > { %10674 = vmatpush.msk.msra.mxu2 %vm106_vm1, %v3673_v51  ;;  %v12723_v43 = vpop.permute.xlu2 %3876  ;;  %v3461_v35 = vsel %vm3456_vm8, %v12567_v26, %v3451_v12  ;;  %v3462_v32 = vsel %vm3456_vm8, %v3451_v12, %v12594_v37  ;;  %v12743_v37 = vpop.f32.mrf.mxu0 }
 0x1da   : > { %10661 = vmatpush.msk.msra.mxu0 %vm106_vm1, %v3461_v35  ;;  %10663 = vmatpush.msk.msra.mxu1 %vm106_vm1, %v3462_v32  ;;  %15445 = vst [vmem:[#allocation27_spill] sm:$0xff] %v12743_v37  ;;  %v12745_v35 = vpop.f32.mrf.mxu1 }
 0x1db   : > { %10662 = vmatmul.msk.f32.vlgmr.msra.gmra.mxu0 %vm102_vm2, %v12645_v62  ;;  %10664 = vmatmul.msk.f32.vlgmr.msra.gmra.mxu1 %vm102_vm2, %v12645_v62  ;;  %15446 = vst [vmem:[#allocation28_spill] sm:$0xff] %v12745_v35 }
 0x1dc   : > { %10675 = vmatmul.msk.f32.vlgmr.msra.gmra.mxu2 %vm102_vm2, %v12693_v49 }
 0x1dd   : > { %4912 = vrot.lane.b32.xlu1 %v12635_v13, %s11425_s28 }
 0x1de   : > { %4918 = vrot.lane.b32.xlu0 %v4903_v23, %s11425_s28  ;;  %v12754_v23 = vpop.f32.mrf.mxu3 }
 0x1df   : > { %v3658_v26 = vpop.permute.xlu1 %3657  ;;  %5120 = vrot.lane.b32.xlu2 %v5110_v58, %s11426_s29 }
 0x1e0   : > { %v3671_v62 = vsel %vm3669_vm9, %v12619_v19, %v3658_v26  ;;  %v3672_v51 = vsel %vm3669_vm9, %v3658_v26, %v3660_v21  ;;  %v3664_v12 = vpop.permute.xlu0 %3663  ;;  %v5112_v19 = vld.sshfl [vmem:[#allocation1 + $0x20] sm:$0xff pattern:$0x75316420]  ;;  %v5111_v21 = vld.sshfl [vmem:[#allocation1 + $0x18] sm:$0xff pattern:$0x75316420] }
 0x1e1   : > { %10670 = vmatpush.msk.msrb.mxu0 %vm106_vm1, %v3671_v62  ;;  %10672 = vmatpush.msk.msrb.mxu1 %vm106_vm1, %v3672_v51  ;;  %v12752_v13 = vpop.permute.xlu2 %4081  ;;  %v3674_v32 = vsel %vm3669_vm9, %v12650_v22, %v3664_v12  ;;  %v3675_v58 = vsel %vm3669_vm9, %v3664_v12, %v12700_v2  ;;  %v5108_v26 = vld.sshfl [vmem:[#allocation1] sm:$0xff pattern:$0x75316420]  ;;  %v12771_v62 = vpop.f32.mrf.mxu2  ;;  %v10682_v12 = vld [vmem:[%s15415_s1 + $0x90] sm:$0x3f] }
 0x1e2   : > { %10676 = vmatpush.msk.msra.mxu3 %vm106_vm1, %v3674_v32  ;;  %15447 = vst [vmem:[#allocation29_spill] sm:$0xff] %v12771_v62  ;;  %v5109_v62 = vld.sshfl [vmem:[#allocation1 + $0x8] sm:$0xff pattern:$0x75316420] }
 0x1e3   : > { %10678 = vmatpush.msk.msra.mxu0 %vm106_vm1, %v3675_v58  ;;  %10673 = vmatmul.msk.f32.vlgmr.msrb.gmra.mxu1 %vm102_vm2, %v12693_v49  ;;  %v12776_v58 = vpop.f32.mrf.mxu0 }
 0x1e4   : > { %10671 = vmatmul.msk.f32.vlgmr.msrb.gmra.mxu0 %vm102_vm2, %v12693_v49  ;;  %10677 = vmatmul.msk.f32.vlgmr.msra.gmra.mxu3 %vm102_vm2, %v12693_v49  ;;  %15448 = vst [vmem:[#allocation30_spill] sm:$0xff] %v12776_v58  ;;  %v5115_v58 = vld.sshfl [vmem:[#allocation1 + $0x38] sm:$0xff pattern:$0x75316420] }
 0x1e5   : > { %5124 = vrot.lane.b32.xlu1 %v5112_v19, %s11426_s29 }
 0x1e6   : > { %5122 = vrot.lane.b32.xlu0 %v5111_v21, %s11426_s29  ;;  %v12781_v21 = vpop.f32.mrf.mxu1  ;;  %v12785_v35 = vpop.f32.mrf.mxu3 }
 0x1e7   : > { %v3871_v22 = vpop.permute.xlu1 %3870  ;;  %5116 = vrot.lane.b32.xlu2 %v5108_v26, %s11426_s29  ;;  %15449 = vst [vmem:[#allocation31_spill] sm:$0xff] %v12781_v21  ;;  %v5114_v26 = vld.sshfl [vmem:[#allocation1 + $0x30] sm:$0xff pattern:$0x75316420] }
 0x1e8   : > { %v3869_v51 = vpop.permute.xlu0 %3868  ;;  %15450 = vst [vmem:[#allocation32_spill] sm:$0xff] %v12785_v35 }
 0x1e9   : > { %v3881_v32 = vpop.permute.xlu2 %3880  ;;  %v3883_v33 = vsel %vm3882_vm10, %v12672_v63, %v3869_v51  ;;  %v3884_v19 = vsel %vm3882_vm10, %v3869_v51, %v3871_v22  ;;  %v12796_v51 = vpop.f32.mrf.mxu2 }
 0x1ea   : > { %10683 = vmatpush.msk.msrb.mxu2 %vm106_vm1, %v3883_v33  ;;  %10685 = vmatpush.msk.msrb.mxu3 %vm106_vm1, %v3884_v19 }
 0x1eb   : > { %10684 = vmatmul.msk.f32.vlgmr.msrb.gmra.mxu2 %vm102_vm2, %v10682_v12  ;;  %v12799_v21 = vpop.f32.mrf.mxu0 }
 0x1ec   : > { %10679 = vmatmul.msk.f32.vlgmr.msra.gmra.mxu0 %vm102_vm2, %v12693_v49  ;;  %10686 = vmatmul.msk.f32.vlgmr.msrb.gmra.mxu3 %vm102_vm2, %v10682_v12  ;;  %15451 = vst [vmem:[#allocation33_spill] sm:$0xff] %v12799_v21 }
 0x1ed   : > { %5128 = vrot.lane.b32.xlu1 %v5114_v26, %s11426_s29 }
 0x1ee   : > { %5118 = vrot.lane.b32.xlu0 %v5109_v62, %s11426_s29  ;;  %v12803_v37 = vpop.f32.mrf.mxu1  ;;  %v5113_v62 = vld.sshfl [vmem:[#allocation1 + $0x28] sm:$0xff pattern:$0x75316420] }
 0x1ef   : > { %v3875_v63 = vpop.permute.xlu1 %3874  ;;  %5130 = vrot.lane.b32.xlu2 %v5115_v58, %s11426_s29  ;;  %v12809_v58 = vpop.f32.mrf.mxu3 }
 0x1f0   : > { %v3887_v33 = vsel %vm3882_vm10, %v3875_v63, %v12723_v43  ;;  %v3668_v19 = vpop.permute.xlu0 %3667  ;;  %15452 = vst [vmem:[#allocation34_spill] sm:$0xff] %v12809_v58 }
 0x1f1   : > { %10691 = vmatpush.msk.msra.mxu2 %vm106_vm1, %v3887_v33  ;;  %v3676_v35 = vsel %vm3669_vm9, %v12700_v2, %v3668_v19  ;;  %v4092_v26 = vpop.permute.xlu2 %4091  ;;  %v12820_v58 = vpop.f32.mrf.mxu2 }
 0x1f2   : > { %10680 = vmatpush.msk.msra.mxu1 %vm106_vm1, %v3676_v35  ;;  %15453 = vst [vmem:[#allocation35_spill] sm:$0xff] %v12820_v58 }
 0x1f3   : > { %10681 = vmatmul.msk.f32.vlgmr.msra.gmra.mxu1 %vm102_vm2, %v12693_v49  ;;  %10692 = vmatmul.msk.f32.vlgmr.msra.gmra.mxu2 %vm102_vm2, %v10682_v12 }
 0x1f6   : > { %5126 = vrot.lane.b32.xlu0 %v5113_v62, %s11426_s29 }
 0x1f7   : > { %v3873_v33 = vpop.permute.xlu1 %3872 }
 0x1f8   : > { %v3885_v21 = vsel %vm3882_vm10, %v3871_v22, %v3873_v33  ;;  %v3886_v2 = vsel %vm3882_vm10, %v3873_v33, %v3875_v63  ;;  %v3879_v19 = vpop.permute.xlu0 %3878  ;;  %v12824_v22 = vpop.f32.mrf.mxu0  ;;  %v10697_v33 = vld [vmem:[%s15415_s1 + $0x98] sm:$0x3f] }
 0x1f9   : > { %10687 = vmatpush.msk.msrb.mxu0 %vm106_vm1, %v3885_v21  ;;  %10689 = vmatpush.msk.msrb.mxu1 %vm106_vm1, %v3886_v2  ;;  %v3888_v35 = vsel %vm3882_vm10, %v12723_v43, %v3879_v19  ;;  %v3889_v49 = vsel %vm3882_vm10, %v3879_v19, %v3881_v32  ;;  %15454 = vst [vmem:[#allocation36_spill] sm:$0xff] %v12824_v22  ;;  %v12828_v21 = vpop.f32.mrf.mxu1  ;;  %v4481_v63 = vpop.permute.xlu2 %4480 }
 0x1fa   : > { %10688 = vmatmul.msk.f32.vlgmr.msrb.gmra.mxu0 %vm102_vm2, %v10682_v12  ;;  %10693 = vmatpush.msk.msra.mxu3 %vm106_vm1, %v3888_v35  ;;  %15455 = vst [vmem:[#allocation37_spill] sm:$0xff] %v12828_v21  ;;  %v12830_v43 = vpop.f32.mrf.mxu3  ;;  %v12839_v35 = vpop.f32.mrf.mxu2 }
 0x1fb   : > { %10695 = vmatpush.msk.msra.mxu0 %vm106_vm1, %v3889_v49  ;;  %10690 = vmatmul.msk.f32.vlgmr.msrb.gmra.mxu1 %vm102_vm2, %v10682_v12  ;;  %15456 = vst [vmem:[#allocation38_spill] sm:$0xff] %v12830_v43 }
 0x1fc   : > { %10694 = vmatmul.msk.f32.vlgmr.msra.gmra.mxu3 %vm102_vm2, %v10682_v12  ;;  %15457 = vst [vmem:[#allocation39_spill] sm:$0xff] %v12839_v35 }
 0x1ff   : > { %v4086_v32 = vpop.permute.xlu1 %4085 }
 0x200   : > { %v4084_v62 = vpop.permute.xlu0 %4083  ;;  %v12845_v49 = vpop.f32.mrf.mxu0 }
 0x201   : > { %v4097_v2 = vsel %vm4095_vm12, %v12752_v13, %v4084_v62  ;;  %v4098_v19 = vsel %vm4095_vm12, %v4084_v62, %v4086_v32  ;;  %15458 = vst [vmem:[#allocation40_spill] sm:$0xff] %v12845_v49  ;;  %v12847_v22 = vpop.f32.mrf.mxu1  ;;  %v4489_v43 = vpop.permute.xlu2 %4488 }
 0x202   : > { %10696 = vmatmul.msk.f32.vlgmr.msra.gmra.mxu0 %vm102_vm2, %v10682_v12  ;;  %10700 = vmatpush.msk.msrb.mxu2 %vm106_vm1, %v4097_v2  ;;  %15459 = vst [vmem:[#allocation41_spill] sm:$0xff] %v12847_v22  ;;  %v12849_v58 = vpop.f32.mrf.mxu3 }
 0x203   : > { %10702 = vmatpush.msk.msrb.mxu3 %vm106_vm1, %v4098_v19  ;;  %10701 = vmatmul.msk.f32.vlgmr.msrb.gmra.mxu2 %vm102_vm2, %v10697_v33  ;;  %15460 = vst [vmem:[#allocation42_spill] sm:$0xff] %v12849_v58  ;;  %v12860_v19 = vpop.f32.mrf.mxu2 }
 0x204   : > { %10703 = vmatmul.msk.f32.vlgmr.msrb.gmra.mxu3 %vm102_vm2, %v10697_v33 }
 0x207   : > { %v4090_v21 = vpop.permute.xlu1 %4089 }
 0x208   : > { %v4101_v12 = vsel %vm4095_vm12, %v4090_v21, %v4092_v26  ;;  %v4080_v62 = vpop.permute.xlu0 %4079  ;;  %v12864_v58 = vpop.f32.mrf.mxu0 }
 0x209   : > { %10708 = vmatpush.msk.msra.mxu2 %vm106_vm1, %v4101_v12  ;;  %v4096_v2 = vsel %vm4095_vm12, %v4080_v62, %v12752_v13  ;;  %15461 = vst [vmem:[#allocation43_spill] sm:$0xff] %v12864_v58  ;;  %v12866_v12 = vpop.f32.mrf.mxu1  ;;  %v4693_v22 = vpop.permute.xlu2 %4692 }
 0x20a   : > { %10698 = vmatpush.msk.msra.mxu1 %vm106_vm1, %v4096_v2  ;;  %v12868_v35 = vpop.f32.mrf.mxu3 }
 0x20b   : > { %10717 = vmatpush.msk.msrb.mxu2 %vm106_vm1, %v12377_v15  ;;  %10699 = vmatmul.msk.f32.vlgmr.msra.gmra.mxu1 %vm102_vm2, %v10697_v33 }
 0x20c   : > { %10709 = vmatmul.msk.f32.vlgmr.msra.gmra.mxu2 %vm102_vm2, %v10697_v33 }
 0x20d   : > { %10725 = vmatpush.msk.msra.mxu2 %vm106_vm1, %v12497_v34  ;;  %v10712_v34 = vld [vmem:[%s15415_s1 + $0xa0] sm:$0x3f] }
 0x20f   : > { %v4088_v13 = vpop.permute.xlu1 %4087 }
 0x210   : > { %v4099_v15 = vsel %vm4095_vm12, %v4086_v32, %v4088_v13  ;;  %v4100_v62 = vsel %vm4095_vm12, %v4088_v13, %v4090_v21  ;;  %v4094_v2 = vpop.permute.xlu0 %4093  ;;  %v12882_v21 = vpop.f32.mrf.mxu2 }
 0x211   : > { %v4102_v49 = vsel %vm4095_vm12, %v4092_v26, %v4094_v2  ;;  %10704 = vmatpush.msk.msrb.mxu0 %vm106_vm1, %v4099_v15  ;;  %10706 = vmatpush.msk.msrb.mxu1 %vm106_vm1, %v4100_v62  ;;  %15462 = vst [vmem:[#allocation44_spill] sm:$0xff] %v12882_v21  ;;  %v12891_v26 = vpop.f32.mrf.mxu0  ;;  %v12897_v32 = vpop.f32.mrf.mxu1 }
 0x212   : > { %10710 = vmatpush.msk.msra.mxu3 %vm106_vm1, %v4102_v49  ;;  %10705 = vmatmul.msk.f32.vlgmr.msrb.gmra.mxu0 %vm102_vm2, %v10697_v33  ;;  %15463 = vst [vmem:[#allocation45_spill] sm:$0xff] %v12897_v32  ;;  %v12900_v13 = vpop.f32.mrf.mxu3 }
 0x213   : > { %10707 = vmatmul.msk.f32.vlgmr.msrb.gmra.mxu1 %vm102_vm2, %v10697_v33  ;;  %10711 = vmatmul.msk.f32.vlgmr.msra.gmra.mxu3 %vm102_vm2, %v10697_v33  ;;  %15464 = vst [vmem:[#allocation46_spill] sm:$0xff] %v12900_v13 }
 0x214   : > { %10718 = vmatmul.msk.f32.vlgmr.msrb.gmra.mxu2 %vm102_vm2, %v10712_v34  ;;  %10719 = vmatpush.msk.msrb.mxu3 %vm106_vm1, %v12388_v14 }
 0x215   : > { %10713 = vmatpush.msk.msra.mxu0 %vm106_vm1, %v12409_v39  ;;  %10715 = vmatpush.msk.msra.mxu1 %vm106_vm1, %v12411_v40  ;;  %v4493_v40 = vpop.permute.xlu2 %4492 }
 0x217   : > { %10721 = vmatpush.msk.msrb.mxu0 %vm106_vm1, %v12431_v36  ;;  %10723 = vmatpush.msk.msrb.mxu1 %vm106_vm1, %v12433_v45  ;;  %v4487_v33 = vpop.permute.xlu1 %4486 }
 0x218   : > { %v4483_v49 = vpop.permute.xlu0 %4482  ;;  %v4499_v39 = vsel %vm94_vm0, %v4487_v33, %v4489_v43  ;;  %v12909_v36 = vpop.f32.mrf.mxu2 }
 0x219   : > { %v4496_v14 = vsel %vm94_vm0, %v4481_v63, %v4483_v49  ;;  %10734 = vmatpush.msk.msrb.mxu2 %vm106_vm1, %v4499_v39  ;;  %v12911_v45 = vpop.f32.mrf.mxu0  ;;  %v12913_v62 = vpop.f32.mrf.mxu1  ;;  %v10727_v39 = vld [vmem:[%s15415_s1 + $0xa8] sm:$0x3f] }
 0x21a   : > { %10728 = vmatpush.msk.msra.mxu3 %vm106_vm1, %v4496_v14  ;;  %10714 = vmatmul.msk.f32.vlgmr.msra.gmra.mxu0 %vm102_vm2, %v10712_v34  ;;  %15465 = vst [vmem:[#allocation47_spill] sm:$0xff] %v12913_v62  ;;  %v12915_v2 = vpop.f32.mrf.mxu3 }
 0x21b   : > { %10716 = vmatmul.msk.f32.vlgmr.msra.gmra.mxu1 %vm102_vm2, %v10712_v34  ;;  %10720 = vmatmul.msk.f32.vlgmr.msrb.gmra.mxu3 %vm102_vm2, %v10712_v34 }
 0x21c   : > { %10726 = vmatmul.msk.f32.vlgmr.msra.gmra.mxu2 %vm102_vm2, %v10712_v34 }
 0x21f   : > { %v4485_v63 = vpop.permute.xlu1 %4484 }
 0x220   : > { %v4491_v15 = vpop.permute.xlu0 %4490  ;;  %v4497_v14 = vsel %vm94_vm0, %v4483_v49, %v4485_v63  ;;  %v4498_v21 = vsel %vm94_vm0, %v4485_v63, %v4487_v33  ;;  %v4703_v49 = vpop.permute.xlu2 %4702 }
 0x221   : > { %v4500_v32 = vsel %vm94_vm0, %v4489_v43, %v4491_v15  ;;  %v4501_v13 = vsel %vm94_vm0, %v4491_v15, %v4493_v40  ;;  %10730 = vmatpush.msk.msra.mxu0 %vm106_vm1, %v4497_v14  ;;  %10732 = vmatpush.msk.msra.mxu1 %vm106_vm1, %v4498_v21  ;;  %v12931_v43 = vpop.f32.mrf.mxu2  ;;  %v12934_v33 = vpop.f32.mrf.mxu0 }
 0x222   : > { %10722 = vmatmul.msk.f32.vlgmr.msrb.gmra.mxu0 %vm102_vm2, %v10712_v34  ;;  %10736 = vmatpush.msk.msrb.mxu3 %vm106_vm1, %v4500_v32  ;;  %15466 = vst [vmem:[#allocation48_spill] sm:$0xff] %v12931_v43  ;;  %v12936_v14 = vpop.f32.mrf.mxu1  ;;  %v12938_v21 = vpop.f32.mrf.mxu3  ;;  %v10742_v43 = vld [vmem:[%s15415_s1 + $0xb0] sm:$0x3f] }
 0x223   : > { %10724 = vmatmul.msk.f32.vlgmr.msrb.gmra.mxu1 %vm102_vm2, %v10712_v34  ;;  %10729 = vmatmul.msk.f32.vlgmr.msra.gmra.mxu3 %vm102_vm2, %v10727_v39  ;;  %15467 = vst [vmem:[#allocation49_spill] sm:$0xff] %v12934_v33 }
 0x224   : > { %10735 = vmatmul.msk.f32.vlgmr.msrb.gmra.mxu2 %vm102_vm2, %v10727_v39  ;;  %10738 = vmatpush.msk.msrb.mxu0 %vm106_vm1, %v4501_v13  ;;  %15468 = vst [vmem:[#allocation50_spill] sm:$0xff] %v12936_v14 }
 0x225   : > { %15469 = vst [vmem:[#allocation51_spill] sm:$0xff] %v12938_v21 }
 0x227   : > { %v4697_v63 = vpop.permute.xlu1 %4696 }
 0x228   : > { %v4695_v15 = vpop.permute.xlu0 %4694 }
 0x229   : > { %v4708_v32 = vsel %vm474_vm3, %v4693_v22, %v4695_v15  ;;  %v4709_v34 = vsel %vm474_vm3, %v4695_v15, %v4697_v63  ;;  %v12951_v13 = vpop.f32.mrf.mxu2  ;;  %v4907_v22 = vpop.permute.xlu2 %4906 }
 0x22a   : > { %10731 = vmatmul.msk.f32.vlgmr.msra.gmra.mxu0 %vm102_vm2, %v10727_v39  ;;  %10743 = vmatpush.msk.msra.mxu2 %vm106_vm1, %v4708_v32  ;;  %15470 = vst [vmem:[#allocation52_spill] sm:$0xff] %v12951_v13  ;;  %v12956_v32 = vpop.f32.mrf.mxu0  ;;  %v12962_v21 = vpop.f32.mrf.mxu3 }
 0x22b   : > { %10745 = vmatpush.msk.msra.mxu3 %vm106_vm1, %v4709_v34  ;;  %10733 = vmatmul.msk.f32.vlgmr.msra.gmra.mxu1 %vm102_vm2, %v10727_v39  ;;  %15471 = vst [vmem:[#allocation53_spill] sm:$0xff] %v12956_v32  ;;  %v12960_v34 = vpop.f32.mrf.mxu1 }
 0x22c   : > { %10737 = vmatmul.msk.f32.vlgmr.msrb.gmra.mxu3 %vm102_vm2, %v10727_v39  ;;  %10744 = vmatmul.msk.f32.vlgmr.msra.gmra.mxu2 %vm102_vm2, %v10742_v43  ;;  %15472 = vst [vmem:[#allocation54_spill] sm:$0xff] %v12960_v34 }
 0x22d   : > { %15473 = vst [vmem:[#allocation55_spill] sm:$0xff] %v12962_v21 }
 0x22f   : > { %v4701_v15 = vpop.permute.xlu1 %4700 }
 0x230   : > { %v4495_v14 = vpop.permute.xlu0 %4494  ;;  %v4712_v33 = vsel %vm474_vm3, %v4701_v15, %v4703_v49 }
 0x231   : > { %v4502_v58 = vsel %vm94_vm0, %v4493_v40, %v4495_v14  ;;  %10751 = vmatpush.msk.msrb.mxu2 %vm106_vm1, %v4712_v33  ;;  %v12967_v13 = vpop.f32.mrf.mxu2  ;;  %v4707_v40 = vpop.permute.xlu2 %4706 }
 0x232   : > { %10739 = vmatmul.msk.f32.vlgmr.msrb.gmra.mxu0 %vm102_vm2, %v10727_v39  ;;  %10740 = vmatpush.msk.msrb.mxu1 %vm106_vm1, %v4502_v58  ;;  %15474 = vst [vmem:[#allocation56_spill] sm:$0xff] %v12967_v13  ;;  %v12972_v34 = vpop.f32.mrf.mxu0 }
 0x233   : > { %10741 = vmatmul.msk.f32.vlgmr.msrb.gmra.mxu1 %vm102_vm2, %v10727_v39  ;;  %15475 = vst [vmem:[#allocation57_spill] sm:$0xff] %v12972_v34  ;;  %v12977_v39 = vpop.f32.mrf.mxu1 }
 0x234   : > { %10746 = vmatmul.msk.f32.vlgmr.msra.gmra.mxu3 %vm102_vm2, %v10742_v43  ;;  %10752 = vmatmul.msk.f32.vlgmr.msrb.gmra.mxu2 %vm102_vm2, %v10742_v43  ;;  %15476 = vst [vmem:[#allocation58_spill] sm:$0xff] %v12977_v39 }
 0x237   : > { %v4699_v14 = vpop.permute.xlu1 %4698 }
 0x238   : > { %v4705_v62 = vpop.permute.xlu0 %4704  ;;  %v4710_v32 = vsel %vm474_vm3, %v4697_v63, %v4699_v14  ;;  %v4711_v58 = vsel %vm474_vm3, %v4699_v14, %v4701_v15  ;;  %v12983_v63 = vpop.f32.mrf.mxu3 }
 0x239   : > { %v4713_v33 = vsel %vm474_vm3, %v4703_v49, %v4705_v62  ;;  %v4714_v21 = vsel %vm474_vm3, %v4705_v62, %v4707_v40  ;;  %10747 = vmatpush.msk.msra.mxu0 %vm106_vm1, %v4710_v32  ;;  %10749 = vmatpush.msk.msra.mxu1 %vm106_vm1, %v4711_v58  ;;  %15477 = vst [vmem:[#allocation59_spill] sm:$0xff] %v12983_v63  ;;  %v12986_v49 = vpop.f32.mrf.mxu2  ;;  %v4917_v62 = vpop.permute.xlu2 %4916  ;;  %v10757_v40 = vld [vmem:[%s15415_s1 + $0xb8] sm:$0x3f] }
 0x23a   : > { %10753 = vmatpush.msk.msrb.mxu3 %vm106_vm1, %v4713_v33  ;;  %10748 = vmatmul.msk.f32.vlgmr.msra.gmra.mxu0 %vm102_vm2, %v10742_v43  ;;  %15478 = vst [vmem:[#allocation60_spill] sm:$0xff] %v12986_v49 }
 0x23b   : > { %10750 = vmatmul.msk.f32.vlgmr.msra.gmra.mxu1 %vm102_vm2, %v10742_v43  ;;  %10755 = vmatpush.msk.msrb.mxu0 %vm106_vm1, %v4714_v21  ;;  %v12997_v21 = vpop.f32.mrf.mxu0  ;;  %v13000_v33 = vpop.f32.mrf.mxu1 }
 0x23c   : > { %10754 = vmatmul.msk.f32.vlgmr.msrb.gmra.mxu3 %vm102_vm2, %v10742_v43  ;;  %15479 = vst [vmem:[#allocation61_spill] sm:$0xff] %v12997_v21 }
 0x23d   : > { %15480 = vst [vmem:[#allocation62_spill] sm:$0xff] %v13000_v33 }
 0x23f   : > { %v4911_v15 = vpop.permute.xlu1 %4910 }
 0x240   : > { %v4909_v32 = vpop.permute.xlu0 %4908  ;;  %v13002_v49 = vpop.f32.mrf.mxu3 }
 0x241   : > { %v4921_v14 = vsel %vm687_vm4, %v4907_v22, %v4909_v32  ;;  %v4922_v58 = vsel %vm687_vm4, %v4909_v32, %v4911_v15  ;;  %15481 = vst [vmem:[#allocation63_spill] sm:$0xff] %v13002_v49  ;;  %v13006_v63 = vpop.f32.mrf.mxu2  ;;  %v5303_v49 = vld [vmem:[%s15416_s2] sm:$0x3f] }
 0x242   : > { %10760 = vmatpush.msk.msra.mxu2 %vm106_vm1, %v4921_v14  ;;  %10762 = vmatpush.msk.msra.mxu3 %vm106_vm1, %v4922_v58  ;;  %15482 = vst [vmem:[#allocation64_spill] sm:$0xff] %v13006_v63 }
 0x243   : > { %10756 = vmatmul.msk.f32.vlgmr.msrb.gmra.mxu0 %vm102_vm2, %v10742_v43  ;;  %10761 = vmatmul.msk.f32.vlgmr.msra.gmra.mxu2 %vm102_vm2, %v10757_v40  ;;  %v5121_v43 = vpop.permute.xlu2 %5120  ;;  %v13012_v58 = vpop.f32.mrf.mxu0 }
 0x244   : > { %10763 = vmatmul.msk.f32.vlgmr.msra.gmra.mxu3 %vm102_vm2, %v10757_v40  ;;  %15483 = vst [vmem:[#allocation65_spill] sm:$0xff] %v13012_v58  ;;  %v13017_v13 = vpop.f32.mrf.mxu1 }
 0x245   : > { %15484 = vst [vmem:[#allocation66_spill] sm:$0xff] %v13017_v13 }
 0x247   : > { %v4915_v34 = vpop.permute.xlu1 %4914 }
 0x248   : > { %v4905_v39 = vpop.permute.xlu0 %4904  ;;  %v4925_v32 = vsel %vm687_vm4, %v4915_v34, %v4917_v62 }
 0x249   : > { %v4920_v14 = vsel %vm687_vm4, %v4905_v39, %v4907_v22  ;;  %10768 = vmatpush.msk.msrb.mxu2 %vm106_vm1, %v4925_v32  ;;  %v11442_v22 = vmov 0   ;;  %v13019_v39 = vpop.f32.mrf.mxu3  ;;  %v13024_v21 = vpop.f32.mrf.mxu2 }
 0x24a   : > { %10758 = vmatpush.msk.msrb.mxu1 %vm106_vm1, %v4920_v14  ;;  %11343 = vset.pattern.permute.xlu1 %v11442_v22  ;;  %15485 = vst [vmem:[#allocation67_spill] sm:$0xff] %v13024_v21 }
 0x24b   : > { %10759 = vmatmul.msk.f32.vlgmr.msrb.gmra.mxu1 %vm102_vm2, %v10757_v40  ;;  %10769 = vmatmul.msk.f32.vlgmr.msrb.gmra.mxu2 %vm102_vm2, %v10757_v40 }
 0x24c   : > { %11344 = vset.pattern.permute.xlu2 %v11442_v22  ;;  %5306 = vperm.xlu1 %11343, %v5303_v49   ;;  %v5117_v49 = vpop.permute.xlu2 %5116 }
 0x24d   : > { %11380 = vset.pattern.permute.xlu0 %v11442_v22 }
 0x24f   : > { %v4913_v32 = vpop.permute.xlu1 %4912 }
 0x250   : > { %v4919_v14 = vpop.permute.xlu0 %4918  ;;  %v4923_v63 = vsel %vm687_vm4, %v4911_v15, %v4913_v32  ;;  %v4924_v33 = vsel %vm687_vm4, %v4913_v32, %v4915_v34  ;;  %v13032_v15 = vpop.f32.mrf.mxu0 }
 0x251   : > { %v4926_v58 = vsel %vm687_vm4, %v4917_v62, %v4919_v14  ;;  %10764 = vmatpush.msk.msra.mxu0 %vm106_vm1, %v4923_v63  ;;  %10766 = vmatpush.msk.msra.mxu1 %vm106_vm1, %v4924_v33  ;;  %15486 = vst [vmem:[#allocation68_spill] sm:$0xff] %v13032_v15  ;;  %v13034_v34 = vpop.f32.mrf.mxu1  ;;  %v13036_v62 = vpop.f32.mrf.mxu3  ;;  %v10772_v63 = vld [vmem:[%s15415_s1 + $0xc0] sm:$0x3f]  ;;  %vm5425_vm4 = vcmask 742400  }
 0x252   : > { %10770 = vmatpush.msk.msrb.mxu3 %vm106_vm1, %v4926_v58  ;;  %10765 = vmatmul.msk.f32.vlgmr.msra.gmra.mxu0 %vm102_vm2, %v10757_v40  ;;  %15487 = vst [vmem:[#allocation69_spill] sm:$0xff] %v13034_v34 }
 0x253   : > { %10767 = vmatmul.msk.f32.vlgmr.msra.gmra.mxu1 %vm102_vm2, %v10757_v40  ;;  %10771 = vmatmul.msk.f32.vlgmr.msrb.gmra.mxu3 %vm102_vm2, %v10757_v40  ;;  %15488 = vst [vmem:[#allocation70_spill] sm:$0xff] %v13036_v62  ;;  %v13046_v40 = vpop.f32.mrf.mxu2 }
 0x254   : > { %v5131_v21 = vpop.permute.xlu2 %5130 }
 0x257   : > { %v5125_v22 = vpop.permute.xlu1 %5124 }
 0x258   : > { %v5123_v32 = vpop.permute.xlu0 %5122  ;;  %v13049_v14 = vpop.f32.mrf.mxu0 }
 0x259   : > { %v5134_v33 = vsel %vm900_vm5, %v5121_v43, %v5123_v32  ;;  %v5135_v58 = vsel %vm900_vm5, %v5123_v32, %v5125_v22  ;;  %15489 = vst [vmem:[#allocation71_spill] sm:$0xff] %v13049_v14  ;;  %v13051_v34 = vpop.f32.mrf.mxu1  ;;  %v13053_v15 = vpop.f32.mrf.mxu3 }
 0x25a   : > { %10777 = vmatpush.msk.msra.mxu2 %vm106_vm1, %v5134_v33  ;;  %10779 = vmatpush.msk.msra.mxu3 %vm106_vm1, %v5135_v58  ;;  %15490 = vst [vmem:[#allocation72_spill] sm:$0xff] %v13051_v34 }
 0x25b   : > { %10778 = vmatmul.msk.f32.vlgmr.msra.gmra.mxu2 %vm102_vm2, %v10772_v63  ;;  %10780 = vmatmul.msk.f32.vlgmr.msra.gmra.mxu3 %vm102_vm2, %v10772_v63  ;;  %v13062_v14 = vpop.f32.mrf.mxu2 }
 0x25c   : > { %15491 = vst [vmem:[#allocation73_spill] sm:$0xff] %v13062_v14 }
 0x25f   : > { %v5129_v62 = vpop.permute.xlu1 %5128 }
 0x260   : > { %v5119_v13 = vpop.permute.xlu0 %5118  ;;  %v5138_v58 = vsel %vm900_vm5, %v5129_v62, %v5131_v21  ;;  %v13066_v34 = vpop.f32.mrf.mxu0 }
 0x261   : > { %v5132_v32 = vsel %vm900_vm5, %v5117_v49, %v5119_v13  ;;  %v5133_v33 = vsel %vm900_vm5, %v5119_v13, %v5121_v43  ;;  %10785 = vmatpush.msk.msrb.mxu2 %vm106_vm1, %v5138_v58  ;;  %15492 = vst [vmem:[#allocation74_spill] sm:$0xff] %v13066_v34  ;;  %v13068_v49 = vpop.f32.mrf.mxu1  ;;  %v13070_v21 = vpop.f32.mrf.mxu3 }
 0x262   : > { %10773 = vmatpush.msk.msrb.mxu0 %vm106_vm1, %v5132_v32  ;;  %10775 = vmatpush.msk.msrb.mxu1 %vm106_vm1, %v5133_v33  ;;  %15493 = vst [vmem:[#allocation75_spill] sm:$0xff] %v13068_v49 }
 0x263   : > { %10774 = vmatmul.msk.f32.vlgmr.msrb.gmra.mxu0 %vm102_vm2, %v10772_v63  ;;  %10776 = vmatmul.msk.f32.vlgmr.msrb.gmra.mxu1 %vm102_vm2, %v10772_v63  ;;  %15494 = vst [vmem:[#allocation76_spill] sm:$0xff] %v13070_v21  ;;  %v13078_v33 = vpop.f32.mrf.mxu2 }
 0x264   : > { %10786 = vmatmul.msk.f32.vlgmr.msrb.gmra.mxu2 %vm102_vm2, %v10772_v63  ;;  %15495 = vst [vmem:[#allocation77_spill] sm:$0xff] %v13078_v33 }
 0x268   : > { %v5127_v13 = vpop.permute.xlu0 %5126  ;;  %v13080_v58 = vpop.f32.mrf.mxu0 }
 0x269   : > { %v5136_v43 = vsel %vm900_vm5, %v5125_v22, %v5127_v13  ;;  %v5137_v32 = vsel %vm900_vm5, %v5127_v13, %v5129_v62  ;;  %15496 = vst [vmem:[#allocation78_spill] sm:$0xff] %v13080_v58  ;;  %v13082_v49 = vpop.f32.mrf.mxu1  ;;  %v13084_v34 = vpop.f32.mrf.mxu3 }
 0x26a   : > { %10781 = vmatpush.msk.msra.mxu0 %vm106_vm1, %v5136_v43  ;;  %10783 = vmatpush.msk.msra.mxu1 %vm106_vm1, %v5137_v32  ;;  %15497 = vst [vmem:[#allocation79_spill] sm:$0xff] %v13084_v34  ;;  %vm5456_vm1 = vcmask 48128  }
 0x26b   : > { %10782 = vmatmul.msk.f32.vlgmr.msra.gmra.mxu0 %vm102_vm2, %v10772_v63  ;;  %10784 = vmatmul.msk.f32.vlgmr.msra.gmra.mxu1 %vm102_vm2, %v10772_v63  ;;  %vm5891_vm2 = vcmask 998400  }
 0x26e   : > { %v13086_v14 = vpop.f32.mrf.mxu2 }
 0x26f   : > { %15498 = vst [vmem:[#allocation80_spill] sm:$0xff] %v13086_v14 }
 0x270   : > { %v13090_v62 = vpop.f32.mrf.mxu0 }
 0x271   : > { %v13088_v22 = vpop.f32.mrf.mxu1  ;;  %15500 = vst [vmem:[#allocation82_spill] sm:$0xff] %v13090_v62  ;;  %v13092_v13 = vpop.f32.mrf.mxu3 }
 0x272   : > { %15499 = vst [vmem:[#allocation81_spill] sm:$0xff] %v13088_v22 }
 0x273   : > { %15501 = vst [vmem:[#allocation83_spill] sm:$0xff] %v13092_v13 }
 0x276   : > { %v13094_v43 = vpop.f32.mrf.mxu2 }
 0x277   : > { %15502 = vst [vmem:[#allocation84_spill] sm:$0xff] %v13094_v43 }
 0x278   : > { %v13096_v32 = vpop.f32.mrf.mxu0 }
 0x279   : > { %15503 = vst [vmem:[#allocation85_spill] sm:$0xff] %v13096_v32  ;;  %v13098_v63 = vpop.f32.mrf.mxu1 }
 0x27a   : > { %15504 = vst [vmem:[#allocation86_spill] sm:$0xff] %v13098_v63 }
 0x27f   : > { %v13100_v21 = vpop.f32.mrf.mxu3 }
 0x280   : > { %15505 = vst [vmem:[#allocation87_spill] sm:$0xff] %v13100_v21  ;;  %v13106_v34 = vpop.f32.mrf.mxu0 }
 0x281   : > { %15508 = vst [vmem:[#allocation90_spill] sm:$0xff] %v13106_v34  ;;  %v351_v34 = vadd.f32 %v12295_v30, %v12218_v60 }
 0x286   : > { %v13102_v58 = vpop.f32.mrf.mxu2 }
 0x287   : > { %15506 = vst [vmem:[#allocation88_spill] sm:$0xff] %v13102_v58  ;;  %v13108_v14 = vpop.f32.mrf.mxu3 }
 0x288   : > { %v13104_v33 = vpop.f32.mrf.mxu1 }
 0x289   : > { %15507 = vst [vmem:[#allocation89_spill] sm:$0xff] %v13104_v33 }
 0x28f   : > { %v13110_v22 = vpop.f32.mrf.mxu2  ;;  %v13112_v62 = vpop.f32.mrf.mxu0 }
 0x290   : > { %15509 = vst [vmem:[#allocation91_spill] sm:$0xff] %v13110_v22  ;;  %v13114_v13 = vpop.f32.mrf.mxu1  ;;  %v371_v22 = vadd.f32 %v12287_v25, %v12235_v0 }
 0x291   : > { %15510 = vst [vmem:[#allocation92_spill] sm:$0xff] %v13114_v13  ;;  %v311_v13 = vadd.f32 %v12269_v11, %v12189_v47  ;;  %v431_v47 = vadd.f32 %v12343_v56, %v12254_v6 }
 0x293   : > { %v639_v0 = vadd.f32 %v12332_v46, %v311_v13  ;;  %v15519_v13 = vld [vmem:[#allocation10_spill] sm:$0xff] }
 0x296   : > { %v13116_v43 = vpop.f32.mrf.mxu3 }
 0x297   : > { %15511 = vst [vmem:[#allocation93_spill] sm:$0xff] %v13116_v43  ;;  %v13118_v32 = vpop.f32.mrf.mxu2  ;;  %v13122_v21 = vpop.f32.mrf.mxu0  ;;  %v641_v43 = vadd.f32 %v12370_v4, %v351_v34  ;;  %v15516_v34 = vld [vmem:[#allocation13_spill] sm:$0xff] }
 0x298   : > { %15512 = vst [vmem:[#allocation94_spill] sm:$0xff] %v13118_v32  ;;  %v13124_v58 = vpop.f32.mrf.mxu1 }
 0x299   : > { %15514 = vst [vmem:[#allocation96_spill] sm:$0xff] %v13122_v21  ;;  %v331_v21 = vadd.f32 %v12292_v28, %v12226_v61  ;;  %v854_v25 = vadd.f32 %v12439_v53, %v641_v43  ;;  %v391_v61 = vadd.f32 %v12311_v38, %v12258_v7  ;;  %v852_v28 = vadd.f32 %v12428_v44, %v639_v0  ;;  %v15520_v43 = vld [vmem:[#allocation14_spill] sm:$0xff] }
 0x29a   : > { %15515 = vst [vmem:[#allocation97_spill] sm:$0xff] %v13124_v58  ;;  %v642_v58 = vadd.f32 %v12374_v5, %v371_v22  ;;  %v411_v5 = vadd.f32 %v12338_v52, %v12261_v8  ;;  %v645_v53 = vadd.f32 %v12424_v41, %v431_v47  ;;  %v15518_v22 = vld [vmem:[#allocation9_spill] sm:$0xff] }
 0x29b   : > { %v640_v11 = vadd.f32 %v12350_v57, %v331_v21  ;;  %v1067_v4 = vadd.f32 %v12500_v54, %v854_v25  ;;  %v643_v7 = vadd.f32 %v12367_v20, %v391_v61  ;;  %v1065_v38 = vadd.f32 %v12512_v50, %v852_v28  ;;  %v15521_v25 = vld [vmem:[#allocation22_spill] sm:$0xff]  ;;  %v15524_v61 = vld [vmem:[#allocation12_spill] sm:$0xff] }
 0x29c   : > { %v855_v30 = vadd.f32 %v12465_v16, %v642_v58  ;;  %v644_v8 = vadd.f32 %v12381_v9, %v411_v5  ;;  %v858_v52 = vadd.f32 %v12484_v31, %v645_v53  ;;  %v15517_v58 = vld [vmem:[#allocation21_spill] sm:$0xff]  ;;  %v15522_v31 = vld [vmem:[#allocation11_spill] sm:$0xff] }
 0x29d   : > { %v853_v46 = vadd.f32 %v12420_v18, %v640_v11  ;;  %v1280_v44 = vadd.f32 %v12580_v3, %v1067_v4  ;;  %v1278_v21 = vadd.f32 %v15516_v34, %v1065_v38  ;;  %v15523_v11 = vld [vmem:[#allocation16_spill] sm:$0xff]  ;;  %v15525_v4 = vld [vmem:[#allocation18_spill] sm:$0xff] }
 0x29e   : > { %v13120_v63 = vpop.f32.mrf.mxu3  ;;  %v1068_v6 = vadd.f32 %v12522_v1, %v855_v30  ;;  %v856_v1 = vadd.f32 %v12470_v42, %v643_v7  ;;  %v857_v50 = vadd.f32 %v15518_v22, %v644_v8  ;;  %v1071_v3 = vadd.f32 %v15519_v13, %v858_v52  ;;  %v15530_v22 = vld [vmem:[#allocation28_spill] sm:$0xff] }
 0x29f   : > { %15513 = vst [vmem:[#allocation95_spill] sm:$0xff] %v13120_v63  ;;  %v13130_v33 = vpop.f32.mrf.mxu2  ;;  %v13140_v63 = vpop.f32.mrf.mxu0  ;;  %v1066_v18 = vadd.f32 %v12514_v17, %v853_v46  ;;  %v1493_v20 = vadd.f32 %v15517_v58, %v1280_v44  ;;  %v15526_v46 = vld [vmem:[#allocation19_spill] sm:$0xff] }
 0x2a0   : > { %v13142_v60 = vpop.f32.mrf.mxu1  ;;  %v1281_v41 = vadd.f32 %v12574_v59, %v1068_v6  ;;  %v1069_v17 = vadd.f32 %v15522_v31, %v856_v1  ;;  %v1491_v59 = vadd.f32 %v15523_v11, %v1278_v21  ;;  %v1070_v28 = vadd.f32 %v15524_v61, %v857_v50  ;;  %v15527_v44 = vld [vmem:[#allocation15_spill] sm:$0xff]  ;;  %v15535_v31 = vld [vmem:[#allocation26_spill] sm:$0xff]  ;;  %v15537_v11 = vld [vmem:[#allocation41_spill] sm:$0xff] }
 0x2a1   : > { %v1279_v0 = vadd.f32 %v15520_v43, %v1066_v18  ;;  %v1706_v42 = vadd.f32 %v12686_v48, %v1493_v20  ;;  %v1284_v5 = vadd.f32 %v15525_v4, %v1071_v3  ;;  %v15528_v18 = vld [vmem:[#allocation17_spill] sm:$0xff]  ;;  %v15529_v58 = vld [vmem:[#allocation27_spill] sm:$0xff]  ;;  %v15531_v3 = vld [vmem:[#allocation20_spill] sm:$0xff] }
 0x2a2   : > { %v1494_v9 = vadd.f32 %v15521_v25, %v1281_v41  ;;  %v1282_v8 = vadd.f32 %v15527_v44, %v1069_v17  ;;  %v1704_v52 = vadd.f32 %v12682_v29, %v1491_v59  ;;  %v1283_v41 = vadd.f32 %v15528_v18, %v1070_v28  ;;  %v15532_v43 = vld [vmem:[#allocation32_spill] sm:$0xff]  ;;  %v15536_v17 = vld [vmem:[#allocation33_spill] sm:$0xff]  ;;  %v15539_v4 = vld [vmem:[#allocation38_spill] sm:$0xff] }
 0x2a3   : > { %v1492_v53 = vadd.f32 %v15526_v46, %v1279_v0  ;;  %v1919_v48 = vadd.f32 %v12737_v55, %v1706_v42  ;;  %v1497_v34 = vadd.f32 %v12680_v27, %v1284_v5  ;;  %v15533_v0 = vld [vmem:[#allocation40_spill] sm:$0xff] }
 0x2a4   : > { %v1707_v6 = vadd.f32 %v12711_v10, %v1494_v9  ;;  %v1917_v10 = vadd.f32 %v15529_v58, %v1704_v52  ;;  %v1495_v29 = vadd.f32 %v15531_v3, %v1282_v8  ;;  %v15534_v9 = vld [vmem:[#allocation23_spill] sm:$0xff]  ;;  %v15541_v18 = vld [vmem:[#allocation24_spill] sm:$0xff]  ;;  %v15543_v58 = vld [vmem:[#allocation30_spill] sm:$0xff] }
 0x2a5   : > { %v1705_v1 = vadd.f32 %v12674_v24, %v1492_v53  ;;  %v2132_v20 = vadd.f32 %v12803_v37, %v1919_v48  ;;  %v1496_v24 = vadd.f32 %v15534_v9, %v1283_v41  ;;  %v1710_v27 = vadd.f32 %v15535_v31, %v1497_v34  ;;  %v15538_v37 = vld [vmem:[#allocation35_spill] sm:$0xff]  ;;  %v15552_v31 = vld [vmem:[#allocation36_spill] sm:$0xff] }
 0x2a6   : > { %v13135_v32 = vpop.f32.mrf.mxu3  ;;  %v1920_v21 = vadd.f32 %v12754_v23, %v1707_v6  ;;  %v2130_v55 = vadd.f32 %v15532_v43, %v1917_v10  ;;  %v15540_v6 = vld [vmem:[#allocation25_spill] sm:$0xff]  ;;  %v15547_v3 = vld [vmem:[#allocation47_spill] sm:$0xff]  ;;  %v15548_v43 = vld [vmem:[#allocation52_spill] sm:$0xff] }
 0x2a7   : > { %v13159_v56 = vpop.f32.mrf.mxu2  ;;  %v13163_v16 = vpop.f32.mrf.mxu0  ;;  %v1918_v50 = vadd.f32 %v15530_v22, %v1705_v1  ;;  %v2345_v25 = vadd.f32 %v15533_v0, %v2132_v20  ;;  %v1708_v44 = vadd.f32 %v15540_v6, %v1495_v29  ;;  %v1709_v41 = vadd.f32 %v15541_v18, %v1496_v24  ;;  %v15542_v1 = vld [vmem:[#allocation29_spill] sm:$0xff]  ;;  %v15544_v20 = vld [vmem:[#allocation54_spill] sm:$0xff]  ;;  %v15550_v9 = vld [vmem:[#allocation51_spill] sm:$0xff] }
 0x2a8   : > { %v13168_v54 = vpop.f32.mrf.mxu1  ;;  %v2133_v13 = vadd.f32 %v12796_v51, %v1920_v21  ;;  %v2343_v61 = vadd.f32 %v15538_v37, %v2130_v55  ;;  %v15549_v0 = vld [vmem:[#allocation34_spill] sm:$0xff]  ;;  %v15551_v24 = vld [vmem:[#allocation61_spill] sm:$0xff] }
 0x2a9   : > { %v2131_v23 = vadd.f32 %v15536_v17, %v1918_v50  ;;  %v2558_v51 = vadd.f32 %v12868_v35, %v2345_v25  ;;  %v1923_v35 = vadd.f32 %v15542_v1, %v1710_v27  ;;  %v15545_v50 = vld [vmem:[#allocation31_spill] sm:$0xff] }
 0x2aa   : > { %v2346_v59 = vadd.f32 %v15537_v11, %v2133_v13  ;;  %v2556_v8 = vadd.f32 %v12866_v12, %v2343_v61  ;;  %v1922_v12 = vadd.f32 %v15545_v50, %v1709_v41  ;;  %v15546_v13 = vld [vmem:[#allocation37_spill] sm:$0xff]  ;;  %v15553_v17 = vld [vmem:[#allocation43_spill] sm:$0xff] }
 0x2ab   : > { %v2344_v5 = vadd.f32 %v15539_v4, %v2131_v23  ;;  %v2771_v52 = vadd.f32 %v12909_v36, %v2558_v51  ;;  %v2136_v36 = vadd.f32 %v15546_v13, %v1923_v35  ;;  %v15554_v23 = vld [vmem:[#allocation53_spill] sm:$0xff]  ;;  %v15556_v51 = vld [vmem:[#allocation39_spill] sm:$0xff]  ;;  %v15561_v35 = vld [vmem:[#allocation68_spill] sm:$0xff] }
 0x2ac   : > { %v2559_v46 = vadd.f32 %v12891_v26, %v2346_v59  ;;  %v1921_v26 = vadd.f32 %v15543_v58, %v1708_v44  ;;  %v2769_v10 = vadd.f32 %v12911_v45, %v2556_v8  ;;  %v2135_v27 = vadd.f32 %v15552_v31, %v1922_v12  ;;  %v15555_v59 = vld [vmem:[#allocation62_spill] sm:$0xff]  ;;  %v15560_v41 = vld [vmem:[#allocation59_spill] sm:$0xff]  ;;  %v15564_v12 = vld [vmem:[#allocation44_spill] sm:$0xff] }
 0x2ad   : > { %v2557_v34 = vadd.f32 %v12860_v19, %v2344_v5  ;;  %v2984_v22 = vadd.f32 %v15544_v20, %v2771_v52  ;;  %v2349_v45 = vadd.f32 %v15553_v17, %v2136_v36  ;;  %v15557_v5 = vld [vmem:[#allocation56_spill] sm:$0xff]  ;;  %v15558_v44 = vld [vmem:[#allocation42_spill] sm:$0xff] }
 0x2ae   : > { %v2772_v21 = vadd.f32 %v12915_v2, %v2559_v46  ;;  %v2134_v25 = vadd.f32 %v15549_v0, %v1921_v26  ;;  %v2982_v19 = vadd.f32 %v15550_v9, %v2769_v10  ;;  %v2348_v8 = vadd.f32 %v15558_v44, %v2135_v27  ;;  %v15559_v52 = vld [vmem:[#allocation46_spill] sm:$0xff]  ;;  %v15565_v36 = vld [vmem:[#allocation48_spill] sm:$0xff]  ;;  %v15567_v0 = vld [vmem:[#allocation49_spill] sm:$0xff] }
 0x2af   : > { %v13161_v57 = vpop.f32.mrf.mxu3  ;;  %v13181_v47 = vpop.f32.mrf.mxu2  ;;  %v2770_v29 = vadd.f32 %v15547_v3, %v2557_v34  ;;  %v3197_v2 = vadd.f32 %v15551_v24, %v2984_v22  ;;  %v2562_v18 = vadd.f32 %v15559_v52, %v2349_v45  ;;  %v15563_v26 = vld [vmem:[#allocation66_spill] sm:$0xff]  ;;  %v15566_v3 = vld [vmem:[#allocation64_spill] sm:$0xff]  ;;  %v15568_v9 = vld [vmem:[#allocation71_spill] sm:$0xff] }
 0x2b0   : > { %v13192_v7 = vpop.f32.mrf.mxu0  ;;  %v13194_v38 = vpop.f32.mrf.mxu1  ;;  %v2985_v55 = vadd.f32 %v15548_v43, %v2772_v21  ;;  %v2347_v4 = vadd.f32 %v15556_v51, %v2134_v25  ;;  %v3195_v46 = vadd.f32 %v15557_v5, %v2982_v19  ;;  %v15562_v21 = vld [vmem:[#allocation45_spill] sm:$0xff]  ;;  %v2561_v13 = vadd.f32 %v15564_v12, %v2348_v8  ;;  %v15570_v31 = vld [vmem:[#allocation58_spill] sm:$0xff]  ;;  %v15571_v17 = vld [vmem:[#allocation72_spill] sm:$0xff] }
 0x2b1   : > { %v2983_v11 = vadd.f32 %v15554_v23, %v2770_v29  ;;  %v3410_v6 = vadd.f32 %v13019_v39, %v3197_v2  ;;  %v2775_v39 = vadd.f32 %v15565_v36, %v2562_v18  ;;  %v15569_v2 = vld [vmem:[#allocation50_spill] sm:$0xff]  ;;  %v15572_v23 = vld [vmem:[#allocation77_spill] sm:$0xff]  ;;  %v15574_v51 = vld [vmem:[#allocation76_spill] sm:$0xff] }
 0x2b2   : > { %v3198_v37 = vadd.f32 %v15555_v59, %v2985_v55  ;;  %v2560_v58 = vadd.f32 %v15562_v21, %v2347_v4  ;;  %v3408_v10 = vadd.f32 %v15563_v26, %v3195_v46  ;;  %v15573_v59 = vld [vmem:[#allocation55_spill] sm:$0xff]  ;;  %v15575_v4 = vld [vmem:[#allocation85_spill] sm:$0xff]  ;;  %v15578_v52 = vld [vmem:[#allocation78_spill] sm:$0xff] }
 0x2b3   : > { %v3196_v1 = vadd.f32 %v15560_v41, %v2983_v11  ;;  %v3623_v20 = vadd.f32 %v13046_v40, %v3410_v6  ;;  %v2774_v40 = vadd.f32 %v15569_v2, %v2561_v13  ;;  %v2988_v27 = vadd.f32 %v15570_v31, %v2775_v39  ;;  %v15576_v46 = vld [vmem:[#allocation57_spill] sm:$0xff]  ;;  %v15579_v18 = vld [vmem:[#allocation86_spill] sm:$0xff]  ;;  %v15582_v26 = vld [vmem:[#allocation63_spill] sm:$0xff] }
 0x2b4   : > { %v3411_v34 = vadd.f32 %v15561_v35, %v3198_v37  ;;  %v2773_v25 = vadd.f32 %v15567_v0, %v2560_v58  ;;  %v3621_v19 = vadd.f32 %v15568_v9, %v3408_v10  ;;  %v15577_v44 = vld [vmem:[#allocation65_spill] sm:$0xff]  ;;  %v15584_v13 = vld [vmem:[#allocation83_spill] sm:$0xff]  ;;  %v15587_v9 = vld [vmem:[#allocation94_spill] sm:$0xff] }
 0x2b5   : > { %v3409_v29 = vadd.f32 %v15566_v3, %v3196_v1  ;;  %v3836_v24 = vadd.f32 %v13082_v49, %v3623_v20  ;;  %v2987_v6 = vadd.f32 %v15576_v46, %v2774_v40  ;;  %v3201_v8 = vadd.f32 %v15577_v44, %v2988_v27  ;;  %v15580_v1 = vld [vmem:[#allocation60_spill] sm:$0xff]  ;;  %v15583_v20 = vld [vmem:[#allocation70_spill] sm:$0xff]  ;;  %v15586_v0 = vld [vmem:[#allocation89_spill] sm:$0xff] }
 0x2b6   : > { %v3624_v43 = vadd.f32 %v13053_v15, %v3411_v34  ;;  %v2986_v37 = vadd.f32 %v15573_v59, %v2773_v25  ;;  %v3834_v15 = vadd.f32 %v15574_v51, %v3621_v19  ;;  %v15581_v34 = vld [vmem:[#allocation80_spill] sm:$0xff]  ;;  %v15588_v2 = vld [vmem:[#allocation67_spill] sm:$0xff]  ;;  %v15592_v59 = vld [vmem:[#allocation74_spill] sm:$0xff] }
 0x2b7   : > { %v13186_v30 = vpop.f32.mrf.mxu3  ;;  %v13214_v42 = vpop.f32.mrf.mxu2  ;;  %v3622_v45 = vadd.f32 %v15571_v17, %v3409_v29  ;;  %v4049_v5 = vadd.f32 %v15575_v4, %v3836_v24  ;;  %v3200_v10 = vadd.f32 %v15582_v26, %v2987_v6  ;;  %v3414_v12 = vadd.f32 %v15583_v20, %v3201_v8  ;;  %v15585_v29 = vld [vmem:[#allocation69_spill] sm:$0xff]  ;;  %v15590_v27 = vld [vmem:[#allocation88_spill] sm:$0xff] }
 0x2b8   : > { %v13222_v53 = vpop.f32.mrf.mxu0  ;;  %v13227_v48 = vpop.f32.mrf.mxu1  ;;  %v3837_v11 = vadd.f32 %v15572_v23, %v3624_v43  ;;  %v3199_v35 = vadd.f32 %v15580_v1, %v2986_v37  ;;  %v4047_v21 = vadd.f32 %v15581_v34, %v3834_v15  ;;  %v15593_v37 = vld [vmem:[#allocation96_spill] sm:$0xff]  ;;  %v15595_v6 = vld [vmem:[#allocation81_spill] sm:$0xff]  ;;  %v15598_v34 = vld [vmem:[#allocation82_spill] sm:$0xff] }
 0x2b9   : > { %v3835_v49 = vadd.f32 %v15578_v52, %v3622_v45  ;;  %v4262_v58 = vadd.f32 %v13108_v14, %v4049_v5  ;;  %v3413_v40 = vadd.f32 %v15588_v2, %v3200_v10  ;;  %v15589_v14 = vld [vmem:[#allocation73_spill] sm:$0xff]  ;;  %v15591_v45 = vld [vmem:[#allocation95_spill] sm:$0xff]  ;;  %v15600_v20 = vld [vmem:[#allocation84_spill] sm:$0xff] }
 0x2ba   : > { %v4050_v41 = vadd.f32 %v15579_v18, %v3837_v11  ;;  %v3412_v43 = vadd.f32 %v15585_v29, %v3199_v35  ;;  %v4260_v25 = vadd.f32 %v15586_v0, %v4047_v21  ;;  %v3627_v31 = vadd.f32 %v15589_v14, %v3414_v12  ;;  %v15594_v5 = vld [vmem:[#allocation75_spill] sm:$0xff]  ;;  %v15596_v8 = vld [vmem:[#allocation97_spill] sm:$0xff] }
 0x2bb   : > { %v4048_v36 = vadd.f32 %v15584_v13, %v3835_v49  ;;  %v4450_v19 = vadd.f32 %v15587_v9, %v4262_v58  ;;  %v3626_v46 = vadd.f32 %v15594_v5, %v3413_v40  ;;  %v15597_v18 = vld [vmem:[#allocation79_spill] sm:$0xff]  ;;  %v15599_v58 = vld [vmem:[#allocation90_spill] sm:$0xff]  ;;  %v15602_v29 = vld [vmem:[#allocation93_spill] sm:$0xff] }
 0x2bc   : > { %v4263_v39 = vadd.f32 %v13112_v62, %v4050_v41  ;;  %v3625_v62 = vadd.f32 %v15592_v59, %v3412_v43  ;;  %v4448_v51 = vadd.f32 %v15593_v37, %v4260_v25  ;;  %v3840_v44 = vadd.f32 %v15595_v6, %v3627_v31  ;;  %v15603_v9 = vld [vmem:[#allocation92_spill] sm:$0xff] }
 0x2bd   : > { %v4261_v17 = vadd.f32 %v15590_v27, %v4048_v36  ;;  %v4662_v15 = vadd.f32 %v13168_v54, %v4450_v19  ;;  %v3839_v21 = vadd.f32 %v15598_v34, %v3626_v46 }
 0x2be   : > { %v4451_v23 = vadd.f32 %v15591_v45, %v4263_v39  ;;  %v3838_v41 = vadd.f32 %v15597_v18, %v3625_v62  ;;  %v4660_v1 = vadd.f32 %v13135_v32, %v4448_v51  ;;  %v4053_v26 = vadd.f32 %v15599_v58, %v3840_v44  ;;  %v5307_v25 = vpop.permute.xlu1 %5306 }
 0x2bf   : > { %v13218_v28 = vpop.f32.mrf.mxu3  ;;  %v4449_v52 = vadd.f32 %v15596_v8, %v4261_v17  ;;  %v4874_v35 = vadd.f32 %v13222_v53, %v4662_v15 }
 0x2c0   : > { %v13263_v55 = vpop.f32.mrf.mxu0  ;;  %v4663_v49 = vadd.f32 %v13159_v56, %v4451_v23  ;;  %v4051_v12 = vadd.f32 %v15600_v20, %v3838_v41  ;;  %v4872_v13 = vadd.f32 %v13181_v47, %v4660_v1  ;;  %v15601_v56 = vld [vmem:[#allocation87_spill] sm:$0xff]  ;;  %v4266_v43 = vadd.f32 %v15602_v29, %v4053_v26 }
 0x2c1   : > { %v4661_v54 = vadd.f32 %v13163_v16, %v4449_v52  ;;  %v4052_v39 = vadd.f32 %v15601_v56, %v3839_v21 }
 0x2c2   : > { %v4875_v10 = vadd.f32 %v13227_v48, %v4663_v49  ;;  %v4264_v19 = vadd.f32 %v15603_v9, %v4051_v12  ;;  %v15604_v48 = vld [vmem:[#allocation91_spill] sm:$0xff]  ;;  %v4454_v31 = vadd.f32 %v13130_v33, %v4266_v43 }
 0x2c3   : > { %v4873_v32 = vadd.f32 %v13186_v30, %v4661_v54  ;;  %v4265_v14 = vadd.f32 %v15604_v48, %v4052_v39 }
 0x2c4   : > { %v4452_v17 = vadd.f32 %v13140_v63, %v4264_v19  ;;  %v4666_v59 = vadd.f32 %v13194_v38, %v4454_v31 }
 0x2c6   : > { %v13247_v61 = vpop.f32.mrf.mxu2  ;;  %v4664_v37 = vadd.f32 %v13161_v57, %v4452_v17 }
 0x2c7   : > { %v5001_v22 = vpop.f32.mrf.mxu3  ;;  %v5085_v47 = vadd.f32 %v13247_v61, %v4873_v32  ;;  %v4878_v61 = vadd.f32 %v13263_v55, %v4666_v59 }
 0x2c8   : > { %v4961_v50 = vpop.f32.mrf.mxu1  ;;  %v5086_v36 = vadd.f32 %v5001_v22, %v4874_v35  ;;  %v4876_v63 = vadd.f32 %v13214_v42, %v4664_v37 }
 0x2c9   : > { %v5084_v2 = vadd.f32 %v4961_v50, %v4872_v13 }
 0x2ce   : > { %v13286_v3 = vpop.f32.mrf.mxu2 }
 0x2cf   : > { %v5021_v11 = vpop.f32.mrf.mxu0 }
 0x2d0   : > { %v5041_v4 = vpop.f32.mrf.mxu1  ;;  %v5087_v53 = vadd.f32 %v5021_v11, %v4875_v10  ;;  %v4453_v11 = vadd.f32 %v13142_v60, %v4265_v14 }
 0x2d1   : > { %v5088_v8 = vadd.f32 %v5041_v4, %v4876_v63 }
 0x2d2   : > { %v4665_v33 = vadd.f32 %v13192_v7, %v4453_v11 }
 0x2d4   : > { %v4877_v60 = vadd.f32 %v13218_v28, %v4665_v33 }
 0x2d6   : > { %v5081_v24 = vpop.f32.mrf.mxu3  ;;  %v5089_v52 = vadd.f32 %v13286_v3, %v4877_v60 }
 0x2d7   : > { %v5090_v44 = vadd.f32 %v5081_v24, %v4878_v61 }
 0x2de   : > { %v5213_v0 = vpop.f32.mrf.mxu2  ;;  %v5233_v40 = vpop.f32.mrf.mxu3 }
 0x2df   : > { %v5298_v16 = vadd.f32 %v5213_v0, %v5086_v36  ;;  %v5299_v22 = vadd.f32 %v5233_v40, %v5087_v53 }
 0x2e0   : > { %v5173_v27 = vpop.f32.mrf.mxu0  ;;  %v5193_v23 = vpop.f32.mrf.mxu1 }
 0x2e1   : > { %v5311_v45 = vadd.f32 %v5307_v25, %v5298_v16  ;;  %v5296_v30 = vadd.f32 %v5173_v27, %v5084_v2  ;;  %v5312_v50 = vadd.f32 %v5307_v25, %v5299_v22  ;;  %v5297_v62 = vadd.f32 %v5193_v23, %v5085_v47 }
 0x2e3   : > { %v5318_v51 = vmax.f32 %v5311_v45, 0.0  ;;  %v5309_v15 = vadd.f32 %v5307_v25, %v5296_v30  ;;  %v5319_v5 = vmax.f32 %v5312_v50, 0.0  ;;  %v5310_v46 = vadd.f32 %v5307_v25, %v5297_v62 }
 0x2e5   : > { %5325 = vst [vmem:[#allocation2 + $0x18] sm:$0x3f] %v5318_v51  ;;  %v5316_v6 = vmax.f32 %v5309_v15, 0.0  ;;  %v5317_v38 = vmax.f32 %v5310_v46, 0.0 }
 0x2e6   : > { %5326 = vst [vmem:[#allocation2 + $0x10] sm:$0x3f] %v5319_v5 }
 0x2e7   : > { %5323 = vst [vmem:[#allocation2 + $0x30] sm:$0x3f] %v5316_v6  ;;  %v5293_v57 = vpop.f32.mrf.mxu2 }
 0x2e8   : > { %5324 = vst [vmem:[#allocation2] sm:$0x3f] %v5317_v38  ;;  %v5302_v7 = vadd.f32 %v5293_v57, %v5090_v44  ;;  %v5253_v49 = vpop.f32.mrf.mxu0  ;;  %v5273_v18 = vpop.f32.mrf.mxu1 }
 0x2e9   : > { %v5300_v55 = vadd.f32 %v5253_v49, %v5088_v8  ;;  %v5301_v1 = vadd.f32 %v5273_v18, %v5089_v52 }
 0x2ea   : > { %v5315_v41 = vadd.f32 %v5307_v25, %v5302_v7 }
 0x2eb   : > { %v5313_v42 = vadd.f32 %v5307_v25, %v5300_v55  ;;  %v5314_v34 = vadd.f32 %v5307_v25, %v5301_v1  ;;  %v10787_v55 = vld [vmem:[%s15417_s3 + $0x10] sm:$0xff] }
 0x2ec   : > { %v5322_v35 = vmax.f32 %v5315_v41, 0.0  ;;  %v5332_v21 = vld [vmem:[#allocation2 + $0x18] sm:$0x3f] }
 0x2ed   : > { %v5320_v28 = vmax.f32 %v5313_v42, 0.0  ;;  %5348 = vrot.lane.b32.xlu1 %v5332_v21, %s11423_s26  ;;  %v5321_v24 = vmax.f32 %v5314_v34, 0.0  ;;  %v5333_v26 = vld [vmem:[#allocation2 + $0x10] sm:$0x3f] }
 0x2ee   : > { %5329 = vst [vmem:[#allocation2 + $0x28] sm:$0x3f] %v5322_v35  ;;  %v5330_v4 = vld [vmem:[#allocation2 + $0x30] sm:$0x3f] }
 0x2ef   : > { %5327 = vst [vmem:[#allocation2 + $0x8] sm:$0x3f] %v5320_v28  ;;  %v5331_v58 = vld [vmem:[#allocation2] sm:$0x3f]  ;;  %5344 = vrot.lane.b32.xlu2 %v5330_v4, %s11423_s26  ;;  %v10788_v34 = vld [vmem:[%s15417_s3 + $0x18] sm:$0xff] }
 0x2f0   : > { %5328 = vst [vmem:[#allocation2 + $0x20] sm:$0x3f] %v5321_v24  ;;  %5346 = vrot.lane.b32.xlu0 %v5331_v58, %s11423_s26 }
 0x2f5   : > { %v13333_v10 = vld [vmem:[#allocation2 + $0x28] sm:$0x3f] }
 0x2f6   : > { %v5334_v3 = vld [vmem:[#allocation2 + $0x8] sm:$0x3f] }
 0x2f7   : > { %v5335_v54 = vld [vmem:[#allocation2 + $0x20] sm:$0x3f]  ;;  %5350 = vrot.lane.b32.xlu2 %v5333_v26, %s11423_s26 }
 0x2f8   : > { %5354 = vrot.lane.b32.xlu1 %v5335_v54, %s11423_s26  ;;  %5352 = vrot.lane.b32.xlu0 %v5334_v3, %s11423_s26 }
 0x2ff   : > { %5356 = vrot.lane.b32.xlu2 %v13333_v10, %s11423_s26  ;;  %s11443_s26 = smov 122  }
 0x349   : > { %v5345_v20 = vpop.permute.xlu2 %5344 }
 0x351   : > { %v5351_v12 = vpop.permute.xlu2 %5350 }
 0x359   : > { %v5357_v0 = vpop.permute.xlu2 %5356 }
 0x35a   : > { %v13393_v60 = vmax.f32 %v13333_v10, %v5357_v0 }
 0x35f   : > { %v5349_v13 = vpop.permute.xlu1 %5348 }
 0x360   : > { %v5360_v36 = vsel %vm94_vm0, %v5349_v13, %v5351_v12 }
 0x361   : > { %v5373_v56 = vmax.f32 %v5332_v21, %v5360_v36  ;;  %v5433_v36 = vld [vmem:[%s15417_s3 + $0x8] sm:$0xff] }
 0x362   : > { %v5347_v39 = vpop.permute.xlu0 %5346 }
 0x363   : > { %v5358_v29 = vsel %vm94_vm0, %v5345_v20, %v5347_v39  ;;  %v5359_v43 = vsel %vm94_vm0, %v5347_v39, %v5349_v13  ;;  %5389 = vrot.lane.b32.xlu2 %v5373_v56, %s11427_s30 }
 0x364   : > { %v5371_v32 = vmax.f32 %v5330_v4, %v5358_v29  ;;  %v5372_v53 = vmax.f32 %v5331_v58, %v5359_v43 }
 0x366   : > { %5387 = vrot.lane.b32.xlu1 %v5372_v53, %s11427_s30  ;;  %5385 = vrot.lane.b32.xlu0 %v5371_v32, %s11427_s30 }
 0x36a   : > { %v5355_v25 = vpop.permute.xlu1 %5354  ;;  %v5353_v9 = vpop.permute.xlu0 %5352 }
 0x36b   : > { %v5363_v19 = vsel %vm94_vm0, %v5355_v25, %v5357_v0  ;;  %v5361_v2 = vsel %vm94_vm0, %v5351_v12, %v5353_v9  ;;  %v5362_v16 = vsel %vm94_vm0, %v5353_v9, %v5355_v25  ;;  %vm5463_vm0 = vcmask 1045504  }
 0x36c   : > { %v13346_v40 = vmax.f32 %v5335_v54, %v5363_v19  ;;  %v5374_v48 = vmax.f32 %v5333_v26, %v5361_v2  ;;  %v5375_v14 = vmax.f32 %v5334_v3, %v5362_v16  ;;  %v5432_v3 = vld [vmem:[%s15417_s3] sm:$0xff] }
 0x36e   : > { %5393 = vrot.lane.b32.xlu1 %v5375_v14, %s11427_s30  ;;  %5391 = vrot.lane.b32.xlu0 %v5374_v48, %s11427_s30 }
 0x36f   : > { %5395 = vrot.lane.b32.xlu2 %v13346_v40, %s11427_s30 }
 0x3bd   : > { %v5390_v31 = vpop.permute.xlu2 %5389 }
 0x3c9   : > { %v13354_v23 = vpop.permute.xlu2 %5395 }
 0x3d8   : > { %v5388_v47 = vpop.permute.xlu1 %5387  ;;  %v5386_v22 = vpop.permute.xlu0 %5385 }
 0x3d9   : > { %v5400_v27 = vsel %vm1113_vm6, %v5388_v47, %v5390_v31  ;;  %v5399_v17 = vsel %vm1113_vm6, %v5386_v22, %v5388_v47 }
 0x3da   : > { %v5413_v45 = vmax.f32 %v5372_v53, %v5400_v27  ;;  %v5412_v30 = vmax.f32 %v5371_v32, %v5399_v17  ;;  %v10820_v27 = vld [vmem:[%s15417_s3 + $0x28] sm:$0xff] }
 0x3dc   : > { %5420 = vst [vmem:[#allocation3 + $0x8] sm:$0x3f] %v5413_v45 }
 0x3dd   : > { %5419 = vst [vmem:[#allocation3] sm:$0x3f] %v5412_v30 }
 0x3e0   : > { %v5394_v11 = vpop.permute.xlu1 %5393  ;;  %v5392_v59 = vpop.permute.xlu0 %5391 }
 0x3e1   : > { %v5403_v50 = vsel %vm1113_vm6, %v5394_v11, %v13354_v23  ;;  %v5401_v62 = vsel %vm1113_vm6, %v5390_v31, %v5392_v59  ;;  %v5402_v37 = vsel %vm1113_vm6, %v5392_v59, %v5394_v11 }
 0x3e2   : > { %v5416_v51 = vmax.f32 %v5375_v14, %v5403_v50  ;;  %v5414_v15 = vmax.f32 %v5373_v56, %v5401_v62  ;;  %v5415_v33 = vmax.f32 %v5374_v48, %v5402_v37 }
 0x3e3   : > { %v13360_v61 = vld [vmem:[#allocation3 + $0x8] sm:$0x3f] }
 0x3e4   : > { %5423 = vst [vmem:[#allocation3 + $0x20] sm:$0x3f] %v5416_v51  ;;  %v13362_v5 = vld [vmem:[#allocation3] sm:$0x3f]  ;;  %5444 = vrot.lane.b32.xlu1 %v13360_v61, %s11424_s27  ;;  %v13413_v44 = vld [vmem:[#allocation3 + $0x8] sm:$0x3f] }
 0x3e5   : > { %5421 = vst [vmem:[#allocation3 + $0x10] sm:$0x3f] %v5414_v15  ;;  %5442 = vrot.lane.b32.xlu0 %v13362_v5, %s11424_s27  ;;  %v6196_v38 = vld [vmem:[#allocation3] sm:$0x3f]  ;;  %v10837_v15 = vld [vmem:[%s15417_s3 + $0x38] sm:$0xff] }
 0x3e6   : > { %5422 = vst [vmem:[#allocation3 + $0x18] sm:$0x3f] %v5415_v33 }
 0x3eb   : > { %v13368_v46 = vld [vmem:[#allocation3 + $0x20] sm:$0x3f] }
 0x3ec   : > { %v13370_v63 = vld [vmem:[#allocation3 + $0x10] sm:$0x3f]  ;;  %5450 = vrot.lane.b32.xlu1 %v13368_v46, %s11424_s27  ;;  %v13420_v8 = vld [vmem:[#allocation3 + $0x20] sm:$0x3f] }
 0x3ed   : > { %v13374_v6 = vld [vmem:[#allocation3 + $0x18] sm:$0x3f]  ;;  %5446 = vrot.lane.b32.xlu2 %v13370_v63, %s11424_s27  ;;  %v13422_v57 = vld [vmem:[#allocation3 + $0x10] sm:$0x3f] }
 0x3ee   : > { %5448 = vrot.lane.b32.xlu0 %v13374_v6, %s11424_s27  ;;  %v13428_v52 = vld [vmem:[#allocation3 + $0x18] sm:$0x3f] }
 0x3f4   : > { %5727 = vrot.lane.b32.xlu1 %v13370_v63, %s11426_s29 }
 0x3f5   : > { %5723 = vrot.lane.b32.xlu2 %v13362_v5, %s11426_s29 }
 0x3f6   : > { %5725 = vrot.lane.b32.xlu0 %v13360_v61, %s11426_s29 }
 0x3fc   : > { %5881 = vrot.lane.b32.xlu1 %v13362_v5, %s11443_s26 }
 0x3fd   : > { %5729 = vrot.lane.b32.xlu2 %v13374_v6, %s11426_s29 }
 0x3fe   : > { %5731 = vrot.lane.b32.xlu0 %v13368_v46, %s11426_s29 }
 0x404   : > { %5397 = vrot.lane.b32.xlu1 %v13393_v60, %s11427_s30  ;;  %s11445_s30 = smov 58  }
 0x405   : > { %5883 = vrot.lane.b32.xlu2 %v13360_v61, %s11443_s26 }
 0x406   : > { %5885 = vrot.lane.b32.xlu0 %v13370_v63, %s11443_s26 }
 0x40c   : > { %6040 = vrot.lane.b32.xlu1 %v13362_v5, %s11444_s24 }
 0x40d   : > { %5887 = vrot.lane.b32.xlu2 %v13374_v6, %s11443_s26 }
 0x40e   : > { %5889 = vrot.lane.b32.xlu0 %v13368_v46, %s11443_s26 }
 0x414   : > { %6046 = vrot.lane.b32.xlu1 %v13374_v6, %s11444_s24 }
 0x415   : > { %6042 = vrot.lane.b32.xlu2 %v13360_v61, %s11444_s24 }
 0x416   : > { %6044 = vrot.lane.b32.xlu0 %v13370_v63, %s11444_s24 }
 0x41c   : > { %6213 = vrot.lane.b32.xlu1 %v13413_v44, %s11432_s16 }
 0x41d   : > { %6048 = vrot.lane.b32.xlu2 %v13368_v46, %s11444_s24 }
 0x41e   : > { %6211 = vrot.lane.b32.xlu0 %v6196_v38, %s11432_s16 }
 0x424   : > { %6219 = vrot.lane.b32.xlu1 %v13420_v8, %s11432_s16 }
 0x425   : > { %6215 = vrot.lane.b32.xlu2 %v13422_v57, %s11432_s16 }
 0x426   : > { %6217 = vrot.lane.b32.xlu0 %v13428_v52, %s11432_s16 }
 0x42c   : > { %6374 = vrot.lane.b32.xlu1 %v13413_v44, %s11434_s23 }
 0x42d   : > { %6376 = vrot.lane.b32.xlu2 %v13422_v57, %s11434_s23 }
 0x42e   : > { %6372 = vrot.lane.b32.xlu0 %v6196_v38, %s11434_s23 }
 0x434   : > { %6535 = vrot.lane.b32.xlu1 %v13413_v44, %s11436_s18 }
 0x436   : > { %6378 = vrot.lane.b32.xlu0 %v13428_v52, %s11434_s23 }
 0x43c   : > { %6380 = vrot.lane.b32.xlu1 %v13420_v8, %s11434_s23 }
 0x43e   : > { %6533 = vrot.lane.b32.xlu0 %v6196_v38, %s11436_s18 }
 0x444   : > { %6541 = vrot.lane.b32.xlu1 %v13420_v8, %s11436_s18 }
 0x446   : > { %6539 = vrot.lane.b32.xlu0 %v13428_v52, %s11436_s18 }
 0x447   : > { %v5447_v7 = vpop.permute.xlu2 %5446 }
 0x44c   : > { %6696 = vrot.lane.b32.xlu1 %v13413_v44, %s11445_s30 }
 0x44e   : > { %6694 = vrot.lane.b32.xlu0 %v6196_v38, %s11445_s30 }
 0x44f   : > { %v5724_v42 = vpop.permute.xlu2 %5723 }
 0x454   : > { %6702 = vrot.lane.b32.xlu1 %v13420_v8, %s11445_s30 }
 0x456   : > { %6700 = vrot.lane.b32.xlu0 %v13428_v52, %s11445_s30  ;;  %v5445_v49 = vpop.permute.xlu1 %5444 }
 0x457   : > { %v5443_v18 = vpop.permute.xlu0 %5442  ;;  %v5453_v41 = vsel %vm474_vm3, %v5445_v49, %v5447_v7  ;;  %v5730_v4 = vpop.permute.xlu2 %5729 }
 0x458   : > { %v5452_v1 = vsel %vm474_vm3, %v5443_v18, %v5445_v49  ;;  %10792 = vmatpush.msk.msrb.mxu0 %vm5463_vm0, %v5453_v41  ;;  %v13646_v41 = vld [vmem:[#allocation3 + $0x18] sm:$0x3f] }
 0x459   : > { %10789 = vmatpush.msk.msrb.mxu3 %vm5463_vm0, %v5452_v1  ;;  %10793 = vmatmul.msk.f32.vlgmr.msrb.gmra.mxu0 %vm5456_vm1, %v10787_v55 }
 0x45a   : > { %10790 = vmatmul.msk.f32.vlgmr.msrb.gmra.mxu3 %vm5456_vm1, %v10787_v55  ;;  %10804 = vmatpush.msk.msra.mxu0 %vm5463_vm0, %v13362_v5 }
 0x45c   : > { %10816 = vmatpush.msk.msrb.mxu0 %vm5463_vm0, %v13368_v46  ;;  %6858 = vrot.lane.b32.xlu1 %v13413_v44, %s11446_s14 }
 0x45e   : > { %6856 = vrot.lane.b32.xlu0 %v6196_v38, %s11446_s14  ;;  %v5451_v35 = vpop.permute.xlu1 %5450 }
 0x45f   : > { %10801 = vmatpush.msk.msra.mxu3 %vm5463_vm0, %v5451_v35  ;;  %v5884_v12 = vpop.permute.xlu2 %5883 }
 0x460   : > { %v5449_v21 = vpop.permute.xlu0 %5448 }
 0x461   : > { %10813 = vmatpush.msk.msrb.mxu3 %vm5463_vm0, %v13374_v6  ;;  %v5454_v28 = vsel %vm474_vm3, %v5447_v7, %v5449_v21  ;;  %v5455_v24 = vsel %vm474_vm3, %v5449_v21, %v5451_v35  ;;  %10794 = vmatmul.msk.f32.gmra.mxu0 %vm5456_vm1, %v10788_v34 }
 0x462   : > { %10795 = vmatpush.msk.msrb.mxu1 %vm5463_vm0, %v5454_v28  ;;  %10798 = vmatpush.msk.msra.mxu2 %vm5463_vm0, %v5455_v24 }
 0x463   : > { %10791 = vmatmul.msk.f32.gmra.mxu3 %vm5456_vm1, %v10788_v34  ;;  %10796 = vmatmul.msk.f32.vlgmr.msrb.gmra.mxu1 %vm5456_vm1, %v10787_v55 }
 0x464   : > { %10799 = vmatmul.msk.f32.vlgmr.msra.gmra.mxu2 %vm5456_vm1, %v10787_v55  ;;  %10807 = vmatpush.msk.msra.mxu1 %vm5463_vm0, %v13360_v61 }
 0x465   : > { %10810 = vmatpush.msk.msrb.mxu2 %vm5463_vm0, %v13370_v63  ;;  %6864 = vrot.lane.b32.xlu1 %v13420_v8, %s11446_s14  ;;  %v13618_v63 = vld [vmem:[#allocation3 + $0x10] sm:$0x3f] }
 0x466   : > { %6862 = vrot.lane.b32.xlu0 %v13428_v52, %s11446_s14  ;;  %v5728_v58 = vpop.permute.xlu1 %5727 }
 0x467   : > { %v5735_v20 = vsel %vm900_vm5, %v5728_v58, %v5730_v4  ;;  %v5888_v0 = vpop.permute.xlu2 %5887 }
 0x468   : > { %v5726_v26 = vpop.permute.xlu0 %5725 }
 0x469   : > { %v5733_v54 = vsel %vm900_vm5, %v5724_v42, %v5726_v26  ;;  %v5734_v10 = vsel %vm900_vm5, %v5726_v26, %v5728_v58  ;;  %10805 = vmatmul.msk.f32.vlgmr.msra.gmra.mxu0 %vm5456_vm1, %v5432_v3 }
 0x46a   : > { %10821 = vmatpush.msk.msrb.mxu1 %vm5463_vm0, %v5733_v54  ;;  %10824 = vmatpush.msk.msra.mxu2 %vm5463_vm0, %v5734_v10  ;;  %v10887_v54 = vld [vmem:[%s15417_s3 + $0x60] sm:$0xff] }
 0x46b   : > { %10797 = vmatmul.msk.f32.gmra.mxu1 %vm5456_vm1, %v10788_v34  ;;  %10802 = vmatmul.msk.f32.vlgmr.msra.gmra.mxu3 %vm5456_vm1, %v10787_v55  ;;  %v10854_v55 = vld [vmem:[%s15417_s3 + $0x48] sm:$0xff] }
 0x46c   : > { %10800 = vmatmul.msk.f32.gmra.mxu2 %vm5456_vm1, %v10788_v34  ;;  %10827 = vmatpush.msk.msra.mxu3 %vm5463_vm0, %v5735_v20 }
 0x46d   : > { %7164 = vrot.lane.b32.xlu1 %v13422_v57, %s11424_s27 }
 0x46e   : > { %7162 = vrot.lane.b32.xlu0 %v13413_v44, %s11424_s27  ;;  %v5882_v13 = vpop.permute.xlu1 %5881 }
 0x46f   : > { %v5892_v29 = vsel %vm5891_vm2, %v5882_v13, %v5884_v12  ;;  %v6043_v47 = vpop.permute.xlu2 %6042 }
 0x470   : > { %v5732_v56 = vpop.permute.xlu0 %5731 }
 0x471   : > { %v5736_v39 = vsel %vm900_vm5, %v5730_v4, %v5732_v56  ;;  %10806 = vmatmul.msk.f32.gmra.mxu0 %vm5456_vm1, %v5433_v36  ;;  %v10871_v4 = vld [vmem:[%s15417_s3 + $0x58] sm:$0xff] }
 0x472   : > { %10830 = vmatpush.msk.msra.mxu0 %vm5463_vm0, %v5736_v39 }
 0x473   : > { %10803 = vmatmul.msk.f32.gmra.mxu3 %vm5456_vm1, %v10788_v34  ;;  %10808 = vmatmul.msk.f32.vlgmr.msra.gmra.mxu1 %vm5456_vm1, %v5432_v3  ;;  %v10870_v34 = vld [vmem:[%s15417_s3 + $0x50] sm:$0xff] }
 0x474   : > { %10811 = vmatmul.msk.f32.vlgmr.msrb.gmra.mxu2 %vm5456_vm1, %v5432_v3  ;;  %10833 = vmatpush.msk.msra.mxu1 %vm5463_vm0, %v5732_v56 }
 0x475   : > { %10838 = vmatpush.msk.msrb.mxu2 %vm5463_vm0, %v5892_v29 }
 0x476   : > { %7168 = vrot.lane.b32.xlu0 %v13420_v8, %s11424_s27  ;;  %v5398_v43 = vpop.permute.xlu1 %5397 }
 0x477   : > { %v5404_v32 = vsel %vm1113_vm6, %v13354_v23, %v5398_v43  ;;  %v5418_v53 = vmax.f32 %v13393_v60, %v5398_v43  ;;  %vm6050_vm6 = vcmask 982016   ;;  %v10836_v23 = vld [vmem:[%s15417_s3 + $0x30] sm:$0xff]  ;;  %v6049_v11 = vpop.permute.xlu2 %6048  ;;  %v10853_v60 = vld [vmem:[%s15417_s3 + $0x40] sm:$0xff] }
 0x478   : > { %v5886_v25 = vpop.permute.xlu0 %5885  ;;  %v5417_v9 = vmax.f32 %v13346_v40, %v5404_v32  ;;  %v10819_v40 = vld [vmem:[%s15417_s3 + $0x20] sm:$0xff] }
 0x479   : > { %v5893_v19 = vsel %vm5891_vm2, %v5884_v12, %v5886_v25  ;;  %v5894_v2 = vsel %vm5891_vm2, %v5886_v25, %v5888_v0  ;;  %5426 = vst.msk [vmem:[#allocation3 + $0x30] sm:$0x3f] %vm5425_vm4, %v5418_v53  ;;  %10817 = vmatmul.msk.f32.vlgmr.msrb.gmra.mxu0 %vm5456_vm1, %v5432_v3  ;;  %v13722_v12 = vld [vmem:[%s15417_s3 + $0x68] sm:$0xff] }
 0x47a   : > { %5424 = vst [vmem:[#allocation3 + $0x28] sm:$0x3f] %v5417_v9  ;;  %10844 = vmatpush.msk.msrb.mxu0 %vm5463_vm0, %v5894_v2 }
 0x47b   : > { %10809 = vmatmul.msk.f32.gmra.mxu1 %vm5456_vm1, %v5433_v36  ;;  %10814 = vmatmul.msk.f32.vlgmr.msrb.gmra.mxu3 %vm5456_vm1, %v5432_v3 }
 0x47c   : > { %10812 = vmatmul.msk.f32.gmra.mxu2 %vm5456_vm1, %v5433_v36  ;;  %10841 = vmatpush.msk.msrb.mxu3 %vm5463_vm0, %v5893_v19 }
 0x47e   : > { %7322 = vrot.lane.b32.xlu0 %v13422_v57, %s11426_s29  ;;  %v6041_v31 = vpop.permute.xlu1 %6040 }
 0x47f   : > { %v6051_v45 = vsel %vm6050_vm6, %v6041_v31, %v6043_v47  ;;  %v6216_v61 = vpop.permute.xlu2 %6215 }
 0x480   : > { %v5890_v16 = vpop.permute.xlu0 %5889  ;;  %v13665_v28 = vld [vmem:[#allocation3 + $0x30] sm:$0x3f] }
 0x481   : > { %v5895_v48 = vsel %vm5891_vm2, %v5888_v0, %v5890_v16  ;;  %10818 = vmatmul.msk.f32.gmra.mxu0 %vm5456_vm1, %v5433_v36  ;;  %v13543_v14 = vld [vmem:[#allocation3 + $0x28] sm:$0x3f]  ;;  %v13752_v0 = vld [vmem:[%s15417_s3 + $0x70] sm:$0xff] }
 0x482   : > { %7170 = vrot.lane.b32.xlu1 %v13543_v14, %s11424_s27  ;;  %6221 = vrot.lane.b32.xlu2 %v13543_v14, %s11432_s16  ;;  %v13638_v49 = vld [vmem:[#allocation3 + $0x28] sm:$0x3f] }
 0x483   : > { %10815 = vmatmul.msk.f32.gmra.mxu3 %vm5456_vm1, %v5433_v36  ;;  %10822 = vmatmul.msk.f32.vlgmr.msrb.gmra.mxu1 %vm5456_vm1, %v10819_v40 }
 0x484   : > { %10825 = vmatmul.msk.f32.vlgmr.msra.gmra.mxu2 %vm5456_vm1, %v10819_v40  ;;  %10847 = vmatpush.msk.msrb.mxu1 %vm5463_vm0, %v5895_v48 }
 0x485   : > { %10850 = vmatpush.msk.msra.mxu2 %vm5463_vm0, %v5890_v16 }
 0x486   : > { %7328 = vrot.lane.b32.xlu0 %v13543_v14, %s11426_s29  ;;  %v6047_v30 = vpop.permute.xlu1 %6046 }
 0x487   : > { %v6054_v50 = vsel %vm6050_vm6, %v6047_v30, %v6049_v11  ;;  %v6377_v1 = vpop.permute.xlu2 %6376 }
 0x488   : > { %v6045_v22 = vpop.permute.xlu0 %6044 }
 0x489   : > { %v6052_v17 = vsel %vm6050_vm6, %v6043_v47, %v6045_v22  ;;  %10831 = vmatmul.msk.f32.vlgmr.msra.gmra.mxu0 %vm5456_vm1, %v10819_v40  ;;  %v6053_v59 = vsel %vm6050_vm6, %v6045_v22, %v6047_v30  ;;  %v13780_v47 = vld [vmem:[%s15417_s3 + $0x78] sm:$0xff] }
 0x48a   : > { %10858 = vmatpush.msk.msra.mxu0 %vm5463_vm0, %v6052_v17  ;;  %7324 = vrot.lane.b32.xlu1 %v13428_v52, %s11426_s29 }
 0x48b   : > { %10823 = vmatmul.msk.f32.gmra.mxu1 %vm5456_vm1, %v10820_v27  ;;  %10828 = vmatmul.msk.f32.vlgmr.msra.gmra.mxu3 %vm5456_vm1, %v10819_v40 }
 0x48c   : > { %10826 = vmatmul.msk.f32.gmra.mxu2 %vm5456_vm1, %v10820_v27  ;;  %10855 = vmatpush.msk.msra.mxu3 %vm5463_vm0, %v6051_v45 }
 0x48d   : > { %6382 = vrot.lane.b32.xlu2 %v13543_v14, %s11434_s23 }
 0x48e   : > { %7482 = vrot.lane.b32.xlu0 %v13428_v52, %s11443_s26  ;;  %v6214_v37 = vpop.permute.xlu1 %6213 }
 0x48f   : > { %v6224_v5 = vsel %vm2178_vm11, %v6214_v37, %v6216_v61 }
 0x490   : > { %v6212_v62 = vpop.permute.xlu0 %6211 }
 0x491   : > { %10832 = vmatmul.msk.f32.gmra.mxu0 %vm5456_vm1, %v10820_v27  ;;  %v6223_v51 = vsel %vm2178_vm11, %v6212_v62, %v6214_v37 }
 0x492   : > { %7478 = vrot.lane.b32.xlu1 %v13413_v44, %s11443_s26 }
 0x493   : > { %10829 = vmatmul.msk.f32.gmra.mxu3 %vm5456_vm1, %v10820_v27  ;;  %10834 = vmatmul.msk.f32.vlgmr.msra.gmra.mxu1 %vm5456_vm1, %v10819_v40 }
 0x494   : > { %10839 = vmatmul.msk.f32.vlgmr.msrb.gmra.mxu2 %vm5456_vm1, %v10836_v23  ;;  %10861 = vmatpush.msk.msra.mxu1 %vm5463_vm0, %v6053_v59 }
 0x495   : > { %10864 = vmatpush.msk.msrb.mxu2 %vm5463_vm0, %v6054_v50  ;;  %6537 = vrot.lane.b32.xlu2 %v13422_v57, %s11436_s18 }
 0x496   : > { %7636 = vrot.lane.b32.xlu0 %v13413_v44, %s11444_s24  ;;  %v13620_v6 = vpop.permute.xlu1 %6219 }
 0x498   : > { %v6218_v33 = vpop.permute.xlu0 %6217 }
 0x499   : > { %10845 = vmatmul.msk.f32.vlgmr.msrb.gmra.mxu0 %vm5456_vm1, %v10836_v23  ;;  %v6225_v46 = vsel %vm2178_vm11, %v6216_v61, %v6218_v33  ;;  %v6226_v38 = vsel %vm2178_vm11, %v6218_v33, %v13620_v6 }
 0x49a   : > { %10872 = vmatpush.msk.msrb.mxu0 %vm5463_vm0, %v6223_v51  ;;  %7484 = vrot.lane.b32.xlu1 %v13420_v8, %s11443_s26  ;;  %v13817_v51 = vld [vmem:[#allocation3 + $0x8] sm:$0x3f] }
 0x49b   : > { %10835 = vmatmul.msk.f32.gmra.mxu1 %vm5456_vm1, %v10820_v27  ;;  %10842 = vmatmul.msk.f32.vlgmr.msrb.gmra.mxu3 %vm5456_vm1, %v10836_v23 }
 0x49c   : > { %10840 = vmatmul.msk.f32.gmra.mxu2 %vm5456_vm1, %v10837_v15  ;;  %10867 = vmatpush.msk.msrb.mxu3 %vm5463_vm0, %v6049_v11 }
 0x49d   : > { %6543 = vrot.lane.b32.xlu2 %v13543_v14, %s11436_s18 }
 0x49e   : > { %7642 = vrot.lane.b32.xlu0 %v13420_v8, %s11444_s24  ;;  %v6375_v18 = vpop.permute.xlu1 %6374 }
 0x49f   : > { %v6385_v35 = vsel %vm2604_vm13, %v6375_v18, %v6377_v1 }
 0x4a0   : > { %v6373_v7 = vpop.permute.xlu0 %6372 }
 0x4a1   : > { %10846 = vmatmul.msk.f32.gmra.mxu0 %vm5456_vm1, %v10837_v15  ;;  %v6384_v42 = vsel %vm2604_vm13, %v6373_v7, %v6375_v18 }
 0x4a2   : > { %7638 = vrot.lane.b32.xlu1 %v13422_v57, %s11444_s24 }
 0x4a3   : > { %10843 = vmatmul.msk.f32.gmra.mxu3 %vm5456_vm1, %v10837_v15  ;;  %10848 = vmatmul.msk.f32.vlgmr.msrb.gmra.mxu1 %vm5456_vm1, %v10836_v23 }
 0x4a4   : > { %10851 = vmatmul.msk.f32.vlgmr.msra.gmra.mxu2 %vm5456_vm1, %v10836_v23  ;;  %10875 = vmatpush.msk.msrb.mxu1 %vm5463_vm0, %v6224_v5 }
 0x4a5   : > { %10878 = vmatpush.msk.msra.mxu2 %vm5463_vm0, %v6225_v46  ;;  %6698 = vrot.lane.b32.xlu2 %v13422_v57, %s11445_s30 }
 0x4a6   : > { %7808 = vrot.lane.b32.xlu0 %v13618_v63, %s11432_s16  ;;  %v13684_v3 = vpop.permute.xlu1 %6535 }
 0x4a8   : > { %v6379_v21 = vpop.permute.xlu0 %6378 }
 0x4a9   : > { %10859 = vmatmul.msk.f32.vlgmr.msra.gmra.mxu0 %vm5456_vm1, %v10853_v60  ;;  %v6386_v24 = vsel %vm2604_vm13, %v6377_v1, %v6379_v21 }
 0x4aa   : > { %7644 = vrot.lane.b32.xlu1 %v13543_v14, %s11444_s24 }
 0x4ab   : > { %10849 = vmatmul.msk.f32.gmra.mxu1 %vm5456_vm1, %v10837_v15  ;;  %10856 = vmatmul.msk.f32.vlgmr.msra.gmra.mxu3 %vm5456_vm1, %v10853_v60 }
 0x4ac   : > { %10852 = vmatmul.msk.f32.gmra.mxu2 %vm5456_vm1, %v10837_v15  ;;  %10881 = vmatpush.msk.msra.mxu3 %vm5463_vm0, %v6226_v38 }
 0x4ad   : > { %6704 = vrot.lane.b32.xlu2 %v13543_v14, %s11445_s30 }
 0x4ae   : > { %7814 = vrot.lane.b32.xlu0 %v13638_v49, %s11432_s16  ;;  %v6381_v10 = vpop.permute.xlu1 %6380 }
 0x4af   : > { %v6387_v32 = vsel %vm2604_vm13, %v6379_v21, %v6381_v10 }
 0x4b0   : > { %v6534_v58 = vpop.permute.xlu0 %6533 }
 0x4b1   : > { %10860 = vmatmul.msk.f32.gmra.mxu0 %vm5456_vm1, %v10854_v55  ;;  %v6545_v26 = vsel %vm3030_vm15, %v6534_v58, %v13684_v3 }
 0x4b2   : > { %7810 = vrot.lane.b32.xlu1 %v13646_v41, %s11432_s16 }
 0x4b3   : > { %10857 = vmatmul.msk.f32.gmra.mxu3 %vm5456_vm1, %v10854_v55  ;;  %10862 = vmatmul.msk.f32.vlgmr.msra.gmra.mxu1 %vm5456_vm1, %v10853_v60 }
 0x4b4   : > { %10865 = vmatmul.msk.f32.vlgmr.msrb.gmra.mxu2 %vm5456_vm1, %v10853_v60  ;;  %10889 = vmatpush.msk.msra.mxu1 %vm5463_vm0, %v6384_v42 }
 0x4b5   : > { %10892 = vmatpush.msk.msrb.mxu2 %vm5463_vm0, %v6385_v35  ;;  %6860 = vrot.lane.b32.xlu2 %v13422_v57, %s11446_s14  ;;  %v10921_v35 = vld [vmem:[%s15417_s3 + $0x80] sm:$0xff] }
 0x4b6   : > { %7969 = vrot.lane.b32.xlu0 %v13618_v63, %s11434_s23  ;;  %v13726_v13 = vpop.permute.xlu1 %6541 }
 0x4b8   : > { %v6540_v29 = vpop.permute.xlu0 %6539 }
 0x4b9   : > { %10873 = vmatmul.msk.f32.vlgmr.msrb.gmra.mxu0 %vm5456_vm1, %v10870_v34  ;;  %v6548_v22 = vsel %vm3030_vm15, %v6540_v29, %v13726_v13 }
 0x4ba   : > { %7816 = vrot.lane.b32.xlu1 %v13665_v28, %s11432_s16 }
 0x4bb   : > { %10863 = vmatmul.msk.f32.gmra.mxu1 %vm5456_vm1, %v10854_v55  ;;  %10868 = vmatmul.msk.f32.vlgmr.msrb.gmra.mxu3 %vm5456_vm1, %v10853_v60 }
 0x4bc   : > { %10866 = vmatmul.msk.f32.gmra.mxu2 %vm5456_vm1, %v10854_v55  ;;  %10895 = vmatpush.msk.msrb.mxu3 %vm5463_vm0, %v6386_v24 }
 0x4bd   : > { %6866 = vrot.lane.b32.xlu2 %v13543_v14, %s11446_s14 }
 0x4be   : > { %7975 = vrot.lane.b32.xlu0 %v13638_v49, %s11434_s23  ;;  %v13760_v25 = vpop.permute.xlu1 %6696 }
 0x4c0   : > { %v6695_v40 = vpop.permute.xlu0 %6694 }
 0x4c1   : > { %10874 = vmatmul.msk.f32.gmra.mxu0 %vm5456_vm1, %v10871_v4  ;;  %v6707_v62 = vsel %vm6706_vm14, %v6695_v40, %v13760_v25 }
 0x4c2   : > { %7971 = vrot.lane.b32.xlu1 %v13646_v41, %s11434_s23 }
 0x4c3   : > { %10869 = vmatmul.msk.f32.gmra.mxu3 %vm5456_vm1, %v10854_v55  ;;  %10876 = vmatmul.msk.f32.vlgmr.msrb.gmra.mxu1 %vm5456_vm1, %v10870_v34  ;;  %v13846_v55 = vld [vmem:[#allocation3 + $0x20] sm:$0x3f] }
 0x4c4   : > { %10879 = vmatmul.msk.f32.vlgmr.msra.gmra.mxu2 %vm5456_vm1, %v10870_v34 }
 0x4c5   : > { %10906 = vmatpush.msk.msra.mxu2 %vm5463_vm0, %v6545_v26  ;;  %7166 = vrot.lane.b32.xlu2 %v13428_v52, %s11424_s27 }
 0x4c6   : > { %8130 = vrot.lane.b32.xlu0 %v13618_v63, %s11436_s18  ;;  %v6703_v50 = vpop.permute.xlu1 %6702 }
 0x4c8   : > { %v6701_v37 = vpop.permute.xlu0 %6700 }
 0x4c9   : > { %v6710_v60 = vsel %vm6706_vm14, %v6701_v37, %v6703_v50 }
 0x4ca   : > { %7977 = vrot.lane.b32.xlu1 %v13665_v28, %s11434_s23 }
 0x4cb   : > { %10877 = vmatmul.msk.f32.gmra.mxu1 %vm5456_vm1, %v10871_v4  ;;  %10882 = vmatmul.msk.f32.vlgmr.msra.gmra.mxu3 %vm5456_vm1, %v10870_v34 }
 0x4cc   : > { %10880 = vmatmul.msk.f32.gmra.mxu2 %vm5456_vm1, %v10871_v4 }
 0x4cd   : > { %7320 = vrot.lane.b32.xlu2 %v13413_v44, %s11426_s29 }
 0x4ce   : > { %8136 = vrot.lane.b32.xlu0 %v13638_v49, %s11436_s18  ;;  %v6859_v38 = vpop.permute.xlu1 %6858 }
 0x4d0   : > { %v6857_v7 = vpop.permute.xlu0 %6856 }
 0x4d2   : > { %8132 = vrot.lane.b32.xlu1 %v13646_v41, %s11436_s18 }
 0x4d3   : > { %10883 = vmatmul.msk.f32.gmra.mxu3 %vm5456_vm1, %v10871_v4  ;;  %10890 = vmatmul.msk.f32.vlgmr.msra.gmra.mxu1 %vm5456_vm1, %v10887_v54 }
 0x4d4   : > { %10893 = vmatmul.msk.f32.vlgmr.msrb.gmra.mxu2 %vm5456_vm1, %v10887_v54 }
 0x4d5   : > { %7326 = vrot.lane.b32.xlu2 %v13420_v8, %s11426_s29 }
 0x4d6   : > { %8291 = vrot.lane.b32.xlu0 %v13618_v63, %s11445_s30  ;;  %v13717_v20 = vpop.f32.mrf.mxu0 }
 0x4d8   : > { %v6863_v26 = vpop.permute.xlu0 %6862 }
 0x4da   : > { %8138 = vrot.lane.b32.xlu1 %v13665_v28, %s11436_s18 }
 0x4db   : > { %10891 = vmatmul.msk.f32.gmra.mxu1 %vm5456_vm1, %v13722_v12  ;;  %10896 = vmatmul.msk.f32.vlgmr.msrb.gmra.mxu3 %vm5456_vm1, %v10887_v54 }
 0x4dc   : > { %10894 = vmatmul.msk.f32.gmra.mxu2 %vm5456_vm1, %v13722_v12  ;;  %v6222_v36 = vpop.permute.xlu2 %6221 }
 0x4dd   : > { %7480 = vrot.lane.b32.xlu2 %v13422_v57, %s11443_s26  ;;  %v13735_v56 = vpop.f32.mrf.mxu3  ;;  %v6227_v39 = vsel %vm2178_vm11, %v13620_v6, %v6222_v36 }
 0x4de   : > { %8297 = vrot.lane.b32.xlu0 %v13638_v49, %s11445_s30  ;;  %v13741_v43 = vpop.f32.mrf.mxu0  ;;  %10884 = vmatpush.msk.msra.mxu0 %vm5463_vm0, %v6227_v39 }
 0x4df   : > { %10885 = vmatmul.msk.f32.vlgmr.msra.gmra.mxu0 %vm5456_vm1, %v10870_v34 }
 0x4e0   : > { %v13746_v53 = vpop.f32.mrf.mxu1  ;;  %10898 = vmatpush.msk.msrb.mxu0 %vm5463_vm0, %v6387_v32 }
 0x4e2   : > { %8293 = vrot.lane.b32.xlu1 %v13646_v41, %s11445_s30 }
 0x4e3   : > { %10897 = vmatmul.msk.f32.gmra.mxu3 %vm5456_vm1, %v13722_v12 }
 0x4e4   : > { %10907 = vmatmul.msk.f32.vlgmr.msra.gmra.mxu2 %vm5456_vm1, %v13752_v0 }
 0x4e5   : > { %7486 = vrot.lane.b32.xlu2 %v13543_v14, %s11443_s26 }
 0x4e6   : > { %v13764_v9 = vpop.f32.mrf.mxu3  ;;  %8452 = vrot.lane.b32.xlu0 %v13618_v63, %s11446_s14  ;;  %v13768_v19 = vpop.f32.mrf.mxu0 }
 0x4e7   : > { %v13770_v2 = vpop.f32.mrf.mxu2  ;;  %v6383_v16 = vpop.permute.xlu2 %6382  ;;  %10886 = vmatmul.msk.f32.gmra.mxu0 %vm5456_vm1, %v10871_v4  ;;  %v6869_v4 = vsel %vm6868_vm7, %v6857_v7, %v6859_v38 }
 0x4e8   : > { %v6388_v48 = vsel %vm2604_vm13, %v6381_v10, %v6383_v16  ;;  %v13774_v31 = vpop.f32.mrf.mxu1 }
 0x4e9   : > { %15605 = vst [vmem:[#allocation13_spill] sm:$0xff] %v13774_v31  ;;  %10901 = vmatpush.msk.msrb.mxu1 %vm5463_vm0, %v6388_v48 }
 0x4ea   : > { %10902 = vmatmul.msk.f32.vlgmr.msrb.gmra.mxu1 %vm5456_vm1, %v10887_v54  ;;  %8299 = vrot.lane.b32.xlu1 %v13665_v28, %s11445_s30 }
 0x4eb   : > { %10915 = vmatpush.msk.msra.mxu1 %vm5463_vm0, %v6548_v22 }
 0x4ec   : > { %10908 = vmatmul.msk.f32.gmra.mxu2 %vm5456_vm1, %v13780_v47 }
 0x4ed   : > { %7640 = vrot.lane.b32.xlu2 %v13428_v52, %s11444_s24 }
 0x4ee   : > { %v13792_v27 = vpop.f32.mrf.mxu3  ;;  %8458 = vrot.lane.b32.xlu0 %v13638_v49, %s11446_s14  ;;  %v13802_v11 = vpop.f32.mrf.mxu0 }
 0x4ef   : > { %v13796_v17 = vpop.f32.mrf.mxu2  ;;  %v6538_v45 = vpop.permute.xlu2 %6537  ;;  %10899 = vmatmul.msk.f32.vlgmr.msrb.gmra.mxu0 %vm5456_vm1, %v10887_v54 }
 0x4f0   : > { %v6546_v30 = vsel %vm3030_vm15, %v13684_v3, %v6538_v45  ;;  %v6547_v23 = vsel %vm3030_vm15, %v6538_v45, %v6540_v29  ;;  %v13804_v59 = vpop.f32.mrf.mxu1  ;;  %v6865_v3 = vpop.permute.xlu1 %6864 }
 0x4f1   : > { %10909 = vmatpush.msk.msra.mxu3 %vm5463_vm0, %v6546_v30  ;;  %10912 = vmatpush.msk.msra.mxu0 %vm5463_vm0, %v6547_v23  ;;  %v6872_v29 = vsel %vm6868_vm7, %v6863_v26, %v6865_v3  ;;  %v7163_v45 = vpop.permute.xlu0 %7162 }
 0x4f2   : > { %10903 = vmatmul.msk.f32.gmra.mxu1 %vm5456_vm1, %v13722_v12  ;;  %10910 = vmatmul.msk.f32.vlgmr.msra.gmra.mxu3 %vm5456_vm1, %v13752_v0 }
 0x4f3   : > { %10923 = vmatpush.msk.msrb.mxu3 %vm5463_vm0, %v6707_v62  ;;  %8454 = vrot.lane.b32.xlu1 %v13646_v41, %s11446_s14 }
 0x4f5   : > { %7806 = vrot.lane.b32.xlu2 %v13817_v51, %s11432_s16 }
 0x4f6   : > { %v13821_v15 = vpop.f32.mrf.mxu3  ;;  %8757 = vrot.lane.b32.xlu0 %v13646_v41, %s11424_s27  ;;  %v13834_v6 = vpop.f32.mrf.mxu0 }
 0x4f7   : > { %v13825_v33 = vpop.f32.mrf.mxu2  ;;  %v6544_v61 = vpop.permute.xlu2 %6543  ;;  %10900 = vmatmul.msk.f32.gmra.mxu0 %vm5456_vm1, %v13722_v12 }
 0x4f8   : > { %v6549_v5 = vsel %vm3030_vm15, %v13726_v13, %v6544_v61  ;;  %v13831_v46 = vpop.f32.mrf.mxu1  ;;  %v10922_v13 = vld [vmem:[%s15417_s3 + $0x88] sm:$0xff]  ;;  %v7165_v22 = vpop.permute.xlu1 %7164 }
 0x4f9   : > { %15606 = vst [vmem:[#allocation21_spill] sm:$0xff] %v13831_v46  ;;  %10918 = vmatpush.msk.msrb.mxu2 %vm5463_vm0, %v6549_v5 }
 0x4fa   : > { %10911 = vmatmul.msk.f32.gmra.mxu3 %vm5456_vm1, %v13780_v47  ;;  %10916 = vmatmul.msk.f32.vlgmr.msra.gmra.mxu1 %vm5456_vm1, %v13752_v0 }
 0x4fb   : > { %10919 = vmatmul.msk.f32.vlgmr.msrb.gmra.mxu2 %vm5456_vm1, %v13752_v0  ;;  %8460 = vrot.lane.b32.xlu1 %v13665_v28, %s11446_s14 }
 0x4fc   : > { %10932 = vmatpush.msk.msra.mxu2 %vm5463_vm0, %v6710_v60 }
 0x4fd   : > { %7812 = vrot.lane.b32.xlu2 %v13846_v55, %s11432_s16 }
 0x4fe   : > { %v13850_v18 = vpop.f32.mrf.mxu3  ;;  %8763 = vrot.lane.b32.xlu0 %v13665_v28, %s11424_s27  ;;  %v13875_v58 = vpop.f32.mrf.mxu0 }
 0x4ff   : > { %v13854_v1 = vpop.f32.mrf.mxu2  ;;  %v6699_v42 = vpop.permute.xlu2 %6698  ;;  %10913 = vmatmul.msk.f32.vlgmr.msra.gmra.mxu0 %vm5456_vm1, %v13752_v0 }
 0x500   : > { %15607 = vst [vmem:[#allocation9_spill] sm:$0xff] %v13854_v1  ;;  %v6708_v34 = vsel %vm6706_vm14, %v13760_v25, %v6699_v42  ;;  %v6709_v21 = vsel %vm6706_vm14, %v6699_v42, %v6701_v37  ;;  %v13864_v24 = vpop.f32.mrf.mxu1  ;;  %v7172_v37 = vsel %vm474_vm3, %v7163_v45, %v7165_v22 }
 0x501   : > { %10926 = vmatpush.msk.msrb.mxu0 %vm5463_vm0, %v6708_v34  ;;  %10929 = vmatpush.msk.msrb.mxu1 %vm5463_vm0, %v6709_v21  ;;  %v7171_v34 = vpop.permute.xlu1 %7170 }
 0x502   : > { %10917 = vmatmul.msk.f32.gmra.mxu1 %vm5456_vm1, %v13780_v47  ;;  %10924 = vmatmul.msk.f32.vlgmr.msrb.gmra.mxu3 %vm5456_vm1, %v10921_v35 }
 0x503   : > { %10920 = vmatmul.msk.f32.gmra.mxu2 %vm5456_vm1, %v13780_v47  ;;  %10940 = vmatpush.msk.msra.mxu0 %vm5463_vm0, %v6869_v4  ;;  %v10955_v4 = vld [vmem:[%s15417_s3 + $0xa0] sm:$0xff] }
 0x504   : > { %8759 = vrot.lane.b32.xlu1 %v13846_v55, %s11424_s27 }
 0x505   : > { %7967 = vrot.lane.b32.xlu2 %v13817_v51, %s11434_s23 }
 0x506   : > { %v13881_v54 = vpop.f32.mrf.mxu3  ;;  %8917 = vrot.lane.b32.xlu0 %v13846_v55, %s11426_s29  ;;  %v13905_v32 = vpop.f32.mrf.mxu0 }
 0x507   : > { %v13885_v10 = vpop.f32.mrf.mxu2  ;;  %v6705_v12 = vpop.permute.xlu2 %6704  ;;  %10914 = vmatmul.msk.f32.gmra.mxu0 %vm5456_vm1, %v13780_v47 }
 0x508   : > { %v6711_v36 = vsel %vm6706_vm14, %v6703_v50, %v6705_v12  ;;  %v13893_v39 = vpop.f32.mrf.mxu1 }
 0x509   : > { %10935 = vmatpush.msk.msra.mxu3 %vm5463_vm0, %v6711_v36 }
 0x50a   : > { %10925 = vmatmul.msk.f32.gmra.mxu3 %vm5456_vm1, %v10922_v13  ;;  %10930 = vmatmul.msk.f32.vlgmr.msrb.gmra.mxu1 %vm5456_vm1, %v10921_v35 }
 0x50b   : > { %10933 = vmatmul.msk.f32.vlgmr.msra.gmra.mxu2 %vm5456_vm1, %v10921_v35  ;;  %10949 = vmatpush.msk.msrb.mxu3 %vm5463_vm0, %v6872_v29 }
 0x50c   : > { %8913 = vrot.lane.b32.xlu1 %v13618_v63, %s11426_s29 }
 0x50d   : > { %7973 = vrot.lane.b32.xlu2 %v13846_v55, %s11434_s23 }
 0x50e   : > { %9071 = vrot.lane.b32.xlu0 %v13618_v63, %s11443_s26  ;;  %v13909_v0 = vpop.f32.mrf.mxu3 }
 0x50f   : > { %15608 = vst [vmem:[#allocation10_spill] sm:$0xff] %v13909_v0  ;;  %v13911_v25 = vpop.f32.mrf.mxu2  ;;  %v6861_v16 = vpop.permute.xlu2 %6860  ;;  %10927 = vmatmul.msk.f32.vlgmr.msrb.gmra.mxu0 %vm5456_vm1, %v10921_v35 }
 0x510   : > { %15609 = vst [vmem:[#allocation14_spill] sm:$0xff] %v13911_v25  ;;  %v6870_v40 = vsel %vm6868_vm7, %v6859_v38, %v6861_v16  ;;  %v6871_v48 = vsel %vm6868_vm7, %v6861_v16, %v6863_v26  ;;  %v13916_v47 = vpop.f32.mrf.mxu1 }
 0x511   : > { %10943 = vmatpush.msk.msra.mxu1 %vm5463_vm0, %v6870_v40  ;;  %10946 = vmatpush.msk.msrb.mxu2 %vm5463_vm0, %v6871_v48  ;;  %v10956_v40 = vld [vmem:[%s15417_s3 + $0xa8] sm:$0xff] }
 0x512   : > { %10931 = vmatmul.msk.f32.gmra.mxu1 %vm5456_vm1, %v10922_v13  ;;  %10936 = vmatmul.msk.f32.vlgmr.msra.gmra.mxu3 %vm5456_vm1, %v10921_v35  ;;  %v7169_v35 = vpop.permute.xlu0 %7168 }
 0x513   : > { %10934 = vmatmul.msk.f32.gmra.mxu2 %vm5456_vm1, %v10922_v13  ;;  %10957 = vmatpush.msk.msrb.mxu1 %vm5463_vm0, %v13413_v44  ;;  %v7175_v26 = vsel %vm474_vm3, %v7169_v35, %v7171_v34 }
 0x514   : > { %10960 = vmatpush.msk.msra.mxu2 %vm5463_vm0, %v13422_v57  ;;  %10963 = vmatpush.msk.msra.mxu3 %vm5463_vm0, %v13428_v52  ;;  %v10938_v57 = vld [vmem:[%s15417_s3 + $0x90] sm:$0xff]  ;;  %v13943_v52 = vpop.f32.mrf.mxu0 }
 0x515   : > { %8919 = vrot.lane.b32.xlu1 %v13638_v49, %s11426_s29  ;;  %8128 = vrot.lane.b32.xlu2 %v13817_v51, %s11436_s18 }
 0x516   : > { %9077 = vrot.lane.b32.xlu0 %v13638_v49, %s11443_s26  ;;  %v13935_v30 = vpop.f32.mrf.mxu3 }
 0x517   : > { %15610 = vst [vmem:[#allocation22_spill] sm:$0xff] %v13935_v30  ;;  %v13937_v44 = vpop.f32.mrf.mxu2  ;;  %v6867_v23 = vpop.permute.xlu2 %6866  ;;  %10928 = vmatmul.msk.f32.gmra.mxu0 %vm5456_vm1, %v10922_v13 }
 0x518   : > { %v6873_v50 = vsel %vm6868_vm7, %v6865_v3, %v6867_v23  ;;  %v13946_v62 = vpop.f32.mrf.mxu1  ;;  %v9384_v23 = vld [vmem:[%s15418_s4] sm:$0xff] }
 0x519   : > { %10952 = vmatpush.msk.msrb.mxu0 %vm5463_vm0, %v6873_v50 }
 0x51a   : > { %10937 = vmatmul.msk.f32.gmra.mxu3 %vm5456_vm1, %v10922_v13  ;;  %10944 = vmatmul.msk.f32.vlgmr.msra.gmra.mxu1 %vm5456_vm1, %v10938_v57  ;;  %v7323_v48 = vpop.permute.xlu0 %7322 }
 0x51b   : > { %10947 = vmatmul.msk.f32.vlgmr.msrb.gmra.mxu2 %vm5456_vm1, %v10938_v57  ;;  %10969 = vmatpush.msk.msra.mxu1 %vm5463_vm0, %v13543_v14  ;;  %v10939_v14 = vld [vmem:[%s15417_s3 + $0x98] sm:$0xff] }
 0x51c   : > { %10974 = vmatpush.msk.msrb.mxu2 %vm5463_vm0, %v7172_v37  ;;  %v13975_v42 = vpop.f32.mrf.mxu0 }
 0x51d   : > { %9073 = vrot.lane.b32.xlu1 %v13646_v41, %s11443_s26  ;;  %8134 = vrot.lane.b32.xlu2 %v13846_v55, %s11436_s18  ;;  %15611 = vst [vmem:[#allocation11_spill] sm:$0xff] %v13975_v42 }
 0x51e   : > { %9231 = vrot.lane.b32.xlu0 %v13646_v41, %s11444_s24  ;;  %v13962_v61 = vpop.f32.mrf.mxu3 }
 0x51f   : > { %v13964_v5 = vpop.f32.mrf.mxu2  ;;  %v7167_v60 = vpop.permute.xlu2 %7166  ;;  %10941 = vmatmul.msk.f32.vlgmr.msra.gmra.mxu0 %vm5456_vm1, %v10938_v57 }
 0x520   : > { %v7173_v38 = vsel %vm474_vm3, %v7165_v22, %v7167_v60  ;;  %v13971_v7 = vpop.f32.mrf.mxu1  ;;  %10966 = vmatpush.msk.msra.mxu0 %vm5463_vm0, %v13420_v8  ;;  %v7174_v29 = vsel %vm474_vm3, %v7167_v60, %v7169_v35 }
 0x522   : > { %10945 = vmatmul.msk.f32.gmra.mxu1 %vm5456_vm1, %v10939_v14  ;;  %10950 = vmatmul.msk.f32.vlgmr.msrb.gmra.mxu3 %vm5456_vm1, %v10938_v57 }
 0x523   : > { %10948 = vmatmul.msk.f32.gmra.mxu2 %vm5456_vm1, %v10939_v14  ;;  %10977 = vmatpush.msk.msrb.mxu3 %vm5463_vm0, %v7173_v38 }
 0x524   : > { %v14002_v12 = vpop.f32.mrf.mxu0 }
 0x525   : > { %9079 = vrot.lane.b32.xlu1 %v13665_v28, %s11443_s26  ;;  %8289 = vrot.lane.b32.xlu2 %v13817_v51, %s11445_s30  ;;  %15613 = vst [vmem:[#allocation12_spill] sm:$0xff] %v14002_v12 }
 0x526   : > { %9237 = vrot.lane.b32.xlu0 %v13665_v28, %s11444_s24  ;;  %v13987_v8 = vpop.f32.mrf.mxu3 }
 0x527   : > { %15612 = vst [vmem:[#allocation16_spill] sm:$0xff] %v13987_v8  ;;  %v13989_v21 = vpop.f32.mrf.mxu2  ;;  %10942 = vmatmul.msk.f32.gmra.mxu0 %vm5456_vm1, %v10939_v14  ;;  %v7321_v13 = vpop.permute.xlu2 %7320 }
 0x528   : > { %v13995_v3 = vpop.f32.mrf.mxu1  ;;  %v7330_v45 = vsel %vm900_vm5, %v7321_v13, %v7323_v48 }
 0x52a   : > { %10951 = vmatmul.msk.f32.gmra.mxu3 %vm5456_vm1, %v10939_v14  ;;  %10958 = vmatmul.msk.f32.vlgmr.msrb.gmra.mxu1 %vm5456_vm1, %v10955_v4 }
 0x52b   : > { %10961 = vmatmul.msk.f32.vlgmr.msra.gmra.mxu2 %vm5456_vm1, %v10955_v4  ;;  %10983 = vmatpush.msk.msrb.mxu1 %vm5463_vm0, %v7175_v26  ;;  %v7329_v26 = vpop.permute.xlu0 %7328 }
 0x52c   : > { %10986 = vmatpush.msk.msra.mxu2 %vm5463_vm0, %v7171_v34  ;;  %v14031_v50 = vpop.f32.mrf.mxu0  ;;  %v10972_v34 = vld [vmem:[%s15417_s3 + $0xb0] sm:$0xff] }
 0x52d   : > { %9233 = vrot.lane.b32.xlu1 %v13846_v55, %s11444_s24  ;;  %8295 = vrot.lane.b32.xlu2 %v13846_v55, %s11445_s30 }
 0x52e   : > { %v14009_v36 = vpop.f32.mrf.mxu3 }
 0x52f   : > { %v14012_v16 = vpop.f32.mrf.mxu2  ;;  %10953 = vmatmul.msk.f32.vlgmr.msrb.gmra.mxu0 %vm5456_vm1, %v10938_v57  ;;  %v7325_v57 = vpop.permute.xlu1 %7324 }
 0x530   : > { %v14018_v22 = vpop.f32.mrf.mxu1  ;;  %10980 = vmatpush.msk.msrb.mxu0 %vm5463_vm0, %v7174_v29  ;;  %v7327_v60 = vpop.permute.xlu2 %7326 }
 0x531   : > { %15614 = vst [vmem:[#allocation18_spill] sm:$0xff] %v14018_v22  ;;  %v7332_v13 = vsel %vm900_vm5, %v7325_v57, %v7327_v60 }
 0x532   : > { %10959 = vmatmul.msk.f32.gmra.mxu1 %vm5456_vm1, %v10956_v40  ;;  %10964 = vmatmul.msk.f32.vlgmr.msra.gmra.mxu3 %vm5456_vm1, %v10955_v4 }
 0x533   : > { %10962 = vmatmul.msk.f32.gmra.mxu2 %vm5456_vm1, %v10956_v40  ;;  %10991 = vmatpush.msk.msra.mxu3 %vm5463_vm0, %v7330_v45  ;;  %v7331_v45 = vsel %vm900_vm5, %v7323_v48, %v7325_v57 }
 0x535   : > { %9388 = vperm.xlu1 %11343, %v9384_v23   ;;  %8450 = vrot.lane.b32.xlu2 %v13817_v51, %s11446_s14  ;;  %v7333_v51 = vsel %vm900_vm5, %v7327_v60, %v7329_v26  ;;  %v10973_v60 = vld [vmem:[%s15417_s3 + $0xb8] sm:$0xff] }
 0x536   : > { %v14033_v37 = vpop.f32.mrf.mxu3 }
 0x537   : > { %v14035_v38 = vpop.f32.mrf.mxu2  ;;  %10954 = vmatmul.msk.f32.gmra.mxu0 %vm5456_vm1, %v10939_v14  ;;  %v7479_v14 = vpop.permute.xlu1 %7478 }
 0x538   : > { %v14038_v35 = vpop.f32.mrf.mxu1  ;;  %v7481_v48 = vpop.permute.xlu2 %7480 }
 0x539   : > { %15615 = vst [vmem:[#allocation19_spill] sm:$0xff] %v14038_v35  ;;  %v14058_v35 = vpop.f32.mrf.mxu0 }
 0x53a   : > { %10965 = vmatmul.msk.f32.gmra.mxu3 %vm5456_vm1, %v10956_v40  ;;  %10970 = vmatmul.msk.f32.vlgmr.msra.gmra.mxu1 %vm5456_vm1, %v10955_v4  ;;  %15616 = vst [vmem:[#allocation15_spill] sm:$0xff] %v14058_v35 }
 0x53b   : > { %10975 = vmatmul.msk.f32.vlgmr.msrb.gmra.mxu2 %vm5456_vm1, %v10972_v34  ;;  %10997 = vmatpush.msk.msra.mxu1 %vm5463_vm0, %v7332_v13 }
 0x53c   : > { %11000 = vmatpush.msk.msrb.mxu2 %vm5463_vm0, %v7333_v51 }
 0x53d   : > { %8456 = vrot.lane.b32.xlu2 %v13846_v55, %s11446_s14 }
 0x53e   : > { %v14052_v29 = vpop.f32.mrf.mxu3 }
 0x53f   : > { %v14055_v23 = vpop.f32.mrf.mxu2  ;;  %10967 = vmatmul.msk.f32.vlgmr.msra.gmra.mxu0 %vm5456_vm1, %v10955_v4  ;;  %v7485_v51 = vpop.permute.xlu1 %7484 }
 0x540   : > { %10994 = vmatpush.msk.msra.mxu0 %vm5463_vm0, %v7331_v45  ;;  %v14064_v13 = vpop.f32.mrf.mxu1  ;;  %v7483_v45 = vpop.permute.xlu0 %7482 }
 0x541   : > { %15617 = vst [vmem:[#allocation17_spill] sm:$0xff] %v14064_v13  ;;  %v7489_v12 = vsel %vm5891_vm2, %v7481_v48, %v7483_v45  ;;  %v14078_v30 = vpop.f32.mrf.mxu0 }
 0x542   : > { %10971 = vmatmul.msk.f32.gmra.mxu1 %vm5456_vm1, %v10956_v40  ;;  %10978 = vmatmul.msk.f32.vlgmr.msrb.gmra.mxu3 %vm5456_vm1, %v10972_v34 }
 0x543   : > { %10976 = vmatmul.msk.f32.gmra.mxu2 %vm5456_vm1, %v10973_v60  ;;  %11003 = vmatpush.msk.msrb.mxu3 %vm5463_vm0, %v7329_v26  ;;  %v7490_v26 = vsel %vm5891_vm2, %v7483_v45, %v7485_v51  ;;  %v10989_v45 = vld [vmem:[%s15417_s3 + $0xc0] sm:$0xff] }
 0x545   : > { %8755 = vrot.lane.b32.xlu2 %v13618_v63, %s11424_s27 }
 0x546   : > { %v14072_v4 = vpop.f32.mrf.mxu3 }
 0x547   : > { %v14074_v57 = vpop.f32.mrf.mxu2  ;;  %10968 = vmatmul.msk.f32.gmra.mxu0 %vm5456_vm1, %v10956_v40  ;;  %v7487_v40 = vpop.permute.xlu2 %7486 }
 0x548   : > { %15618 = vst [vmem:[#allocation27_spill] sm:$0xff] %v14074_v57  ;;  %v14083_v1 = vpop.f32.mrf.mxu1  ;;  %v7488_v57 = vsel %vm5891_vm2, %v7479_v14, %v7481_v48 }
 0x549   : > { %15619 = vst [vmem:[#allocation28_spill] sm:$0xff] %v14083_v1  ;;  %v14105_v14 = vpop.f32.mrf.mxu0 }
 0x54a   : > { %10979 = vmatmul.msk.f32.gmra.mxu3 %vm5456_vm1, %v10973_v60  ;;  %10984 = vmatmul.msk.f32.vlgmr.msrb.gmra.mxu1 %vm5456_vm1, %v10972_v34 }
 0x54b   : > { %10987 = vmatmul.msk.f32.vlgmr.msra.gmra.mxu2 %vm5456_vm1, %v10972_v34  ;;  %11011 = vmatpush.msk.msrb.mxu1 %vm5463_vm0, %v7489_v12  ;;  %v7491_v12 = vsel %vm5891_vm2, %v7485_v51, %v7487_v40 }
 0x54c   : > { %11014 = vmatpush.msk.msra.mxu2 %vm5463_vm0, %v7490_v26  ;;  %v7639_v26 = vpop.permute.xlu1 %7638 }
 0x54d   : > { %8761 = vrot.lane.b32.xlu2 %v13638_v49, %s11424_s27 }
 0x54e   : > { %v14093_v35 = vpop.f32.mrf.mxu3 }
 0x54f   : > { %v14091_v31 = vpop.f32.mrf.mxu2  ;;  %10981 = vmatmul.msk.f32.vlgmr.msrb.gmra.mxu0 %vm5456_vm1, %v10972_v34  ;;  %v7637_v34 = vpop.permute.xlu0 %7636 }
 0x550   : > { %15620 = vst [vmem:[#allocation20_spill] sm:$0xff] %v14091_v31  ;;  %11008 = vmatpush.msk.msrb.mxu0 %vm5463_vm0, %v7488_v57  ;;  %v14107_v48 = vpop.f32.mrf.mxu1  ;;  %v10990_v57 = vld [vmem:[%s15417_s3 + $0xc8] sm:$0xff]  ;;  %v7641_v51 = vpop.permute.xlu2 %7640 }
 0x552   : > { %10985 = vmatmul.msk.f32.gmra.mxu1 %vm5456_vm1, %v10973_v60  ;;  %10992 = vmatmul.msk.f32.vlgmr.msra.gmra.mxu3 %vm5456_vm1, %v10989_v45 }
 0x553   : > { %10988 = vmatmul.msk.f32.gmra.mxu2 %vm5456_vm1, %v10973_v60  ;;  %11017 = vmatpush.msk.msra.mxu3 %vm5463_vm0, %v7491_v12  ;;  %v7646_v12 = vsel %vm6050_vm6, %v7637_v34, %v7639_v26 }
 0x554   : > { %v7645_v8 = vpop.permute.xlu1 %7644 }
 0x555   : > { %8915 = vrot.lane.b32.xlu2 %v13646_v41, %s11426_s29  ;;  %v7647_v41 = vsel %vm6050_vm6, %v7639_v26, %v7641_v51 }
 0x556   : > { %v14117_v1 = vpop.f32.mrf.mxu3 }
 0x557   : > { %10982 = vmatmul.msk.f32.gmra.mxu0 %vm5456_vm1, %v10973_v60  ;;  %v14115_v31 = vpop.f32.mrf.mxu2  ;;  %v7643_v34 = vpop.permute.xlu0 %7642 }
 0x558   : > { %15621 = vst [vmem:[#allocation32_spill] sm:$0xff] %v14115_v31  ;;  %v14130_v22 = vpop.f32.mrf.mxu1  ;;  %v7648_v26 = vsel %vm6050_vm6, %v7641_v51, %v7643_v34  ;;  %v11006_v51 = vld [vmem:[%s15417_s3 + $0xd0] sm:$0xff] }
 0x55a   : > { %10993 = vmatmul.msk.f32.gmra.mxu3 %vm5456_vm1, %v10990_v57  ;;  %10998 = vmatmul.msk.f32.vlgmr.msra.gmra.mxu1 %vm5456_vm1, %v10989_v45 }
 0x55b   : > { %11001 = vmatmul.msk.f32.vlgmr.msrb.gmra.mxu2 %vm5456_vm1, %v10989_v45  ;;  %11025 = vmatpush.msk.msra.mxu1 %vm5463_vm0, %v7646_v12 }
 0x55c   : > { %11028 = vmatpush.msk.msrb.mxu2 %vm5463_vm0, %v7647_v41  ;;  %v14126_v60 = vpop.f32.mrf.mxu0 }
 0x55d   : > { %8921 = vrot.lane.b32.xlu2 %v13665_v28, %s11426_s29 }
 0x55e   : > { %v14139_v12 = vpop.f32.mrf.mxu3 }
 0x55f   : > { %10995 = vmatmul.msk.f32.vlgmr.msra.gmra.mxu0 %vm5456_vm1, %v10989_v45  ;;  %v14135_v42 = vpop.f32.mrf.mxu2  ;;  %15623 = vst [vmem:[#allocation23_spill] sm:$0xff] %v14139_v12 }
 0x560   : > { %11020 = vmatpush.msk.msra.mxu0 %vm5463_vm0, %v7487_v40  ;;  %15622 = vst [vmem:[#allocation40_spill] sm:$0xff] %v14135_v42  ;;  %v7807_v40 = vpop.permute.xlu2 %7806  ;;  %v7811_v42 = vpop.permute.xlu1 %7810 }
 0x562   : > { %10999 = vmatmul.msk.f32.gmra.mxu1 %vm5456_vm1, %v10990_v57  ;;  %11004 = vmatmul.msk.f32.vlgmr.msrb.gmra.mxu3 %vm5456_vm1, %v10989_v45  ;;  %v7809_v45 = vpop.permute.xlu0 %7808 }
 0x563   : > { %11002 = vmatmul.msk.f32.gmra.mxu2 %vm5456_vm1, %v10990_v57  ;;  %11031 = vmatpush.msk.msrb.mxu3 %vm5463_vm0, %v7648_v26  ;;  %v7818_v26 = vsel %vm2178_vm11, %v7807_v40, %v7809_v45  ;;  %v14172_v40 = vld [vmem:[%s15417_s3 + $0xd8] sm:$0xff] }
 0x564   : > { %v14143_v28 = vpop.f32.mrf.mxu0 }
 0x565   : > { %9075 = vrot.lane.b32.xlu2 %v13846_v55, %s11443_s26 }
 0x566   : > { %v14161_v31 = vpop.f32.mrf.mxu3 }
 0x567   : > { %v6514_v41 = vpop.f32.mrf.mxu1  ;;  %10996 = vmatmul.msk.f32.gmra.mxu0 %vm5456_vm1, %v10990_v57  ;;  %v14156_v55 = vpop.f32.mrf.mxu2  ;;  %15624 = vst [vmem:[#allocation26_spill] sm:$0xff] %v14161_v31 }
 0x568   : > { %v7813_v0 = vpop.permute.xlu2 %7812  ;;  %v7817_v31 = vpop.permute.xlu1 %7816 }
 0x56a   : > { %11005 = vmatmul.msk.f32.gmra.mxu3 %vm5456_vm1, %v10990_v57  ;;  %11012 = vmatmul.msk.f32.vlgmr.msrb.gmra.mxu1 %vm5456_vm1, %v11006_v51  ;;  %v7649_v57 = vsel %vm6050_vm6, %v7643_v34, %v7645_v8 }
 0x56b   : > { %11015 = vmatmul.msk.f32.vlgmr.msra.gmra.mxu2 %vm5456_vm1, %v11006_v51  ;;  %11037 = vmatpush.msk.msrb.mxu1 %vm5463_vm0, %v7645_v8  ;;  %v7815_v8 = vpop.permute.xlu0 %7814 }
 0x56c   : > { %11042 = vmatpush.msk.msra.mxu2 %vm5463_vm0, %v7818_v26  ;;  %v14159_v12 = vpop.f32.mrf.mxu0  ;;  %v7819_v26 = vsel %vm2178_vm11, %v7809_v45, %v7811_v42  ;;  %v7822_v46 = vsel %vm2178_vm11, %v7815_v8, %v7817_v31 }
 0x56d   : > { %9229 = vrot.lane.b32.xlu2 %v13618_v63, %s11444_s24  ;;  %v5715_v63 = vadd.f32 %v13834_v6, %v13792_v27 }
 0x56f   : > { %v14166_v25 = vpop.f32.mrf.mxu1  ;;  %11009 = vmatmul.msk.f32.vlgmr.msrb.gmra.mxu0 %vm5456_vm1, %v11006_v51  ;;  %v14191_v13 = vpop.f32.mrf.mxu2 }
 0x570   : > { %11034 = vmatpush.msk.msrb.mxu0 %vm5463_vm0, %v7649_v57  ;;  %v5872_v57 = vadd.f32 %v13916_v47, %v5715_v63 }
 0x572   : > { %11013 = vmatmul.msk.f32.gmra.mxu1 %vm5456_vm1, %v14172_v40  ;;  %11018 = vmatmul.msk.f32.vlgmr.msra.gmra.mxu3 %vm5456_vm1, %v11006_v51  ;;  %v6031_v27 = vadd.f32 %v13989_v21, %v5872_v57  ;;  %v7968_v21 = vpop.permute.xlu2 %7967  ;;  %v5718_v57 = vadd.f32 %v13875_v58, %v13821_v15 }
 0x573   : > { %11016 = vmatmul.msk.f32.gmra.mxu2 %vm5456_vm1, %v14172_v40  ;;  %11045 = vmatpush.msk.msra.mxu3 %vm5463_vm0, %v7819_v26  ;;  %v14201_v26 = vld [vmem:[%s15417_s3 + $0xe0] sm:$0xff]  ;;  %v14226_v15 = vpop.permute.xlu0 %7969 }
 0x574   : > { %v14184_v34 = vpop.f32.mrf.mxu0  ;;  %v6190_v47 = vadd.f32 %v14052_v29, %v6031_v27  ;;  %v5877_v29 = vadd.f32 %v13946_v62, %v5718_v57  ;;  %v5626_v62 = vadd.f32 %v13802_v11, %v13764_v9 }
 0x575   : > { %9235 = vrot.lane.b32.xlu2 %v13638_v49, %s11444_s24  ;;  %v14189_v45 = vpop.f32.mrf.mxu3  ;;  %v5623_v49 = vadd.f32 %v13768_v19, %v13735_v56  ;;  %s11210_s24 = sshll.u32 %s11421_s21, 4  ;;  %s47_s21 = sadd.s32 1, %s11421_s21  }
 0x576   : > { %15625 = vst [vmem:[#allocation33_spill] sm:$0xff] %v14189_v45  ;;  %v7821_v45 = vsel %vm2178_vm11, %v7813_v0, %v7815_v8  ;;  %v6363_v56 = vadd.f32 %v14126_v60, %v6190_v47  ;;  %v6036_v60 = vadd.f32 %v14012_v16, %v5877_v29  ;;  %v7820_v8 = vsel %vm2178_vm11, %v7811_v42, %v7813_v0  ;;  %s9747_s15 = scalar_lea.vmem [#allocation5], %s11210_s24  ;;  %p44_p0 = scmp.ge.s32.totalorder %s47_s21, 2  }
 0x577   : > { %v14194_v6 = vpop.f32.mrf.mxu1  ;;  %11010 = vmatmul.msk.f32.gmra.mxu0 %vm5456_vm1, %v14172_v40  ;;  %v5868_v63 = vadd.f32 %v13864_v24, %v5623_v49  ;;  %v5692_v0 = vadd.f32 %v13850_v18, %v13770_v2  ;;  %v5873_v16 = vadd.f32 %v13893_v39, %v5626_v62  ;;  %v7979_v47 = vsel %vm2604_vm13, %v7968_v21, %v14226_v15 }
 0x578   : > { %v6524_v27 = vadd.f32 %v6514_v41, %v6363_v56  ;;  %v6195_v42 = vadd.f32 %v14072_v4, %v6036_v60  ;;  %vm10358_vm8 = vcmask (%p44_p0), 687104  }
 0x579   : > { %v6027_v19 = vadd.f32 %v13937_v44, %v5868_v63  ;;  %v5871_v9 = vadd.f32 %v13905_v32, %v5692_v0  ;;  %v6032_v2 = vadd.f32 %v13964_v5, %v5873_v16 }
 0x57a   : > { %11019 = vmatmul.msk.f32.gmra.mxu3 %vm5456_vm1, %v14172_v40  ;;  %11026 = vmatmul.msk.f32.vlgmr.msra.gmra.mxu1 %vm5456_vm1, %v14201_v26  ;;  %v6368_v11 = vadd.f32 %v14143_v28, %v6195_v42  ;;  %v7974_v39 = vpop.permute.xlu2 %7973 }
 0x57b   : > { %11029 = vmatmul.msk.f32.vlgmr.msrb.gmra.mxu2 %vm5456_vm1, %v14201_v26  ;;  %11051 = vmatpush.msk.msra.mxu1 %vm5463_vm0, %v7821_v45  ;;  %v6186_v31 = vadd.f32 %v14009_v36, %v6027_v19  ;;  %v7972_v36 = vpop.permute.xlu1 %7971  ;;  %v6030_v4 = vadd.f32 %v13971_v7, %v5871_v9  ;;  %v6191_v32 = vadd.f32 %v14033_v37, %v6032_v2 }
 0x57c   : > { %11054 = vmatpush.msk.msrb.mxu2 %vm5463_vm0, %v7822_v46  ;;  %v14221_v24 = vpop.f32.mrf.mxu0  ;;  %v14239_v46 = vld [vmem:[%s15417_s3 + $0xe8] sm:$0xff]  ;;  %v5695_v37 = vadd.f32 %v13881_v54, %v13796_v17 }
 0x57d   : > { %v14224_v49 = vpop.f32.mrf.mxu3  ;;  %v6359_v41 = vadd.f32 %v14078_v30, %v6186_v31  ;;  %v6189_v57 = vadd.f32 %v14035_v38, %v6030_v4  ;;  %v6364_v7 = vadd.f32 %v14105_v14, %v6191_v32 }
 0x57e   : > { %v6675_v58 = vpop.f32.mrf.mxu2  ;;  %v5876_v14 = vadd.f32 %v13943_v52, %v5695_v37  ;;  %v15627_v37 = vld [vmem:[#allocation17_spill] sm:$0xff] }
 0x57f   : > { %v14231_v45 = vadd.f32 %v6675_v58, %v6524_v27  ;;  %v14233_v44 = vpop.f32.mrf.mxu1  ;;  %11021 = vmatmul.msk.f32.vlgmr.msra.gmra.mxu0 %vm5456_vm1, %v11006_v51  ;;  %v6520_v51 = vadd.f32 %v14107_v48, %v6359_v41  ;;  %v6529_v48 = vadd.f32 %v14166_v25, %v6368_v11  ;;  %v14281_v25 = vld [vmem:[%s15417_s3 + $0xf0] sm:$0xff]  ;;  %v6362_v38 = vadd.f32 %v14093_v35, %v6189_v57 }
 0x580   : > { %11048 = vmatpush.msk.msra.mxu0 %vm5463_vm0, %v7820_v8  ;;  %v6525_v29 = vadd.f32 %v14130_v22, %v6364_v7  ;;  %v7981_v27 = vsel %vm2604_vm13, %v7972_v36, %v7974_v39  ;;  %v6035_v22 = vadd.f32 %v13995_v3, %v5876_v14  ;;  %v7980_v8 = vsel %vm2604_vm13, %v14226_v15, %v7972_v36  ;;  %v11041_v3 = vld [vmem:[%s15417_s3 + $0xf8] sm:$0xff] }
 0x581   : > { %v6681_v18 = vadd.f32 %v14156_v55, %v6520_v51  ;;  %v7976_v55 = vpop.permute.xlu0 %7975  ;;  %v6523_v31 = vadd.f32 %v14159_v12, %v6362_v38 }
 0x582   : > { %11027 = vmatmul.msk.f32.gmra.mxu1 %vm5456_vm1, %v14239_v46  ;;  %11032 = vmatmul.msk.f32.vlgmr.msrb.gmra.mxu3 %vm5456_vm1, %v14201_v26  ;;  %v6686_v17 = vadd.f32 %v14191_v13, %v6525_v29  ;;  %v8129_v58 = vpop.permute.xlu2 %8128  ;;  %v6194_v62 = vadd.f32 %v14055_v23, %v6035_v22  ;;  %v15628_v29 = vld [vmem:[#allocation10_spill] sm:$0xff]  ;;  %v15630_v22 = vld [vmem:[#allocation32_spill] sm:$0xff] }
 0x583   : > { %11030 = vmatmul.msk.f32.gmra.mxu2 %vm5456_vm1, %v14239_v46  ;;  %11059 = vmatpush.msk.msrb.mxu3 %vm5463_vm0, %v7979_v47  ;;  %v7978_v19 = vpop.permute.xlu1 %7977  ;;  %v6684_v35 = vadd.f32 %v14194_v6, %v6523_v31  ;;  %v15629_v31 = vld [vmem:[#allocation14_spill] sm:$0xff] }
 0x584   : > { %v14263_v30 = vpop.f32.mrf.mxu0  ;;  %v6367_v6 = vadd.f32 %v14117_v1, %v6194_v62  ;;  %v7983_v42 = vsel %vm2604_vm13, %v7976_v55, %v7978_v19  ;;  %v15633_v62 = vld [vmem:[#allocation33_spill] sm:$0xff] }
 0x585   : > { %v6745_v63 = vpop.f32.mrf.mxu3 }
 0x586   : > { %v6678_v28 = vpop.f32.mrf.mxu2  ;;  %v14268_v21 = vadd.f32 %v6745_v63, %v6681_v18  ;;  %v6528_v23 = vadd.f32 %v14184_v34, %v6367_v6  ;;  %v15634_v6 = vld [vmem:[#allocation18_spill] sm:$0xff] }
 0x587   : > { %v14271_v56 = vadd.f32 %v6678_v28, %v6529_v48  ;;  %v14273_v5 = vpop.f32.mrf.mxu1  ;;  %11022 = vmatmul.msk.f32.gmra.mxu0 %vm5456_vm1, %v14172_v40  ;;  %v7982_v40 = vsel %vm2604_vm13, %v7974_v39, %v7976_v55  ;;  %vm9621_vm13 = vcmask 138240  }
 0x588   : > { %v6689_v1 = vadd.f32 %v14233_v44, %v6528_v23 }
 0x589   : > { %v8131_v0 = vpop.permute.xlu0 %8130 }
 0x58a   : > { %11033 = vmatmul.msk.f32.gmra.mxu3 %vm5456_vm1, %v14239_v46  ;;  %11038 = vmatmul.msk.f32.vlgmr.msrb.gmra.mxu1 %vm5456_vm1, %v14201_v26  ;;  %v8135_v34 = vpop.permute.xlu2 %8134  ;;  %v8140_v32 = vsel %vm3030_vm15, %v8129_v58, %v8131_v0 }
 0x58b   : > { %11043 = vmatmul.msk.f32.vlgmr.msra.gmra.mxu2 %vm5456_vm1, %v14281_v25  ;;  %11065 = vmatpush.msk.msrb.mxu1 %vm5463_vm0, %v7981_v27 }
 0x58c   : > { %11068 = vmatpush.msk.msra.mxu2 %vm5463_vm0, %v7982_v40  ;;  %v14300_v54 = vpop.f32.mrf.mxu0 }
 0x58d   : > { %v6748_v52 = vpop.f32.mrf.mxu3 }
 0x58e   : > { %v14304_v60 = vadd.f32 %v6748_v52, %v6686_v17  ;;  %v6814_v12 = vpop.f32.mrf.mxu2 }
 0x58f   : > { %v6846_v41 = vadd.f32 %v6814_v12, %v6684_v35  ;;  %v14309_v13 = vpop.f32.mrf.mxu1  ;;  %11035 = vmatmul.msk.f32.vlgmr.msrb.gmra.mxu0 %vm5456_vm1, %v14201_v26  ;;  %v8133_v26 = vpop.permute.xlu1 %8132  ;;  %v15631_v35 = vld [vmem:[#allocation11_spill] sm:$0xff]  ;;  %v15632_v12 = vld [vmem:[#allocation16_spill] sm:$0xff] }
 0x590   : > { %11062 = vmatpush.msk.msrb.mxu0 %vm5463_vm0, %v7980_v8  ;;  %v8141_v11 = vsel %vm3030_vm15, %v8131_v0, %v8133_v26  ;;  %v8142_v44 = vsel %vm3030_vm15, %v8133_v26, %v8135_v34 }
 0x592   : > { %11039 = vmatmul.msk.f32.gmra.mxu1 %vm5456_vm1, %v14239_v46  ;;  %11046 = vmatmul.msk.f32.vlgmr.msra.gmra.mxu3 %vm5456_vm1, %v14281_v25  ;;  %v8290_v55 = vpop.permute.xlu2 %8289 }
 0x593   : > { %11044 = vmatmul.msk.f32.gmra.mxu2 %vm5456_vm1, %v11041_v3  ;;  %11071 = vmatpush.msk.msra.mxu3 %vm5463_vm0, %v7983_v42 }
 0x594   : > { %v14326_v15 = vpop.f32.mrf.mxu0 }
 0x595   : > { %v6837_v36 = vpop.f32.mrf.mxu3 }
 0x596   : > { %v6817_v16 = vpop.f32.mrf.mxu2  ;;  %v14330_v51 = vadd.f32 %v6837_v36, %v14231_v45  ;;  %v8137_v45 = vpop.permute.xlu0 %8136  ;;  %v15636_v36 = vld [vmem:[#allocation13_spill] sm:$0xff] }
 0x597   : > { %v14332_v47 = vadd.f32 %v6817_v16, %v6689_v1  ;;  %v14334_v9 = vpop.f32.mrf.mxu1  ;;  %11036 = vmatmul.msk.f32.gmra.mxu0 %vm5456_vm1, %v14239_v46  ;;  %v5646_v46 = vadd.f32 %v13804_v59, %v13717_v20  ;;  %v8139_v39 = vpop.permute.xlu1 %8138  ;;  %v14365_v20 = vld [vmem:[%s15417_s3 + $0x100] sm:$0xff]  ;;  %v8143_v57 = vsel %vm3030_vm15, %v8135_v34, %v8137_v45  ;;  %v15637_v16 = vld [vmem:[#allocation9_spill] sm:$0xff] }
 0x598   : > { %v5672_v34 = vadd.f32 %v15637_v16, %v15636_v36 }
 0x599   : > { %v5869_v63 = vadd.f32 %v13885_v10, %v5646_v46 }
 0x59a   : > { %11047 = vmatmul.msk.f32.gmra.mxu3 %vm5456_vm1, %v11041_v3  ;;  %11052 = vmatmul.msk.f32.vlgmr.msra.gmra.mxu1 %vm5456_vm1, %v14281_v25 }
 0x59b   : > { %11055 = vmatmul.msk.f32.vlgmr.msrb.gmra.mxu2 %vm5456_vm1, %v14281_v25  ;;  %11079 = vmatpush.msk.msra.mxu1 %vm5463_vm0, %v8141_v11  ;;  %v6028_v59 = vadd.f32 %v13962_v61, %v5869_v63  ;;  %v15626_v61 = vld [vmem:[#allocation21_spill] sm:$0xff]  ;;  %v15638_v11 = vld [vmem:[#allocation27_spill] sm:$0xff] }
 0x59c   : > { %11082 = vmatpush.msk.msrb.mxu2 %vm5463_vm0, %v8142_v44  ;;  %v14347_v2 = vpop.f32.mrf.mxu0 }
 0x59d   : > { %v6840_v18 = vpop.f32.mrf.mxu3  ;;  %v6187_v10 = vadd.f32 %v14031_v50, %v6028_v59  ;;  %v7005_v36 = vadd.f32 %v14347_v2, %v14268_v21 }
 0x59e   : > { %v14352_v4 = vadd.f32 %v6840_v18, %v14271_v56  ;;  %v14354_v48 = vpop.f32.mrf.mxu2  ;;  %v5669_v56 = vadd.f32 %v13825_v33, %v13746_v53  ;;  %v8292_v14 = vpop.permute.xlu0 %8291  ;;  %v15639_v18 = vld [vmem:[#allocation28_spill] sm:$0xff] }
 0x59f   : > { %v14358_v28 = vpop.f32.mrf.mxu1  ;;  %11049 = vmatmul.msk.f32.vlgmr.msra.gmra.mxu0 %vm5456_vm1, %v14281_v25  ;;  %v5649_v25 = vadd.f32 %v15626_v61, %v13741_v43  ;;  %v6360_v38 = vadd.f32 %v15627_v37, %v6187_v10  ;;  %v11058_v43 = vld [vmem:[%s15417_s3 + $0x108] sm:$0xff]  ;;  %v8294_v58 = vpop.permute.xlu1 %8293  ;;  %v8301_v42 = vsel %vm6706_vm14, %v8290_v55, %v8292_v14  ;;  %v15641_v10 = vld [vmem:[#allocation23_spill] sm:$0xff]  ;;  %v8144_v37 = vsel %vm3030_vm15, %v8137_v45, %v8139_v39 }
 0x5a0   : > { %11076 = vmatpush.msk.msra.mxu0 %vm5463_vm0, %v8140_v32  ;;  %v5870_v27 = vadd.f32 %v15628_v29, %v5669_v56  ;;  %v8302_v26 = vsel %vm6706_vm14, %v8292_v14, %v8294_v58  ;;  %v8296_v55 = vpop.permute.xlu2 %8295  ;;  %vm10362_vm15 = vcmask (%p44_p0), 1043456  }
 0x5a1   : > { %v5874_v17 = vadd.f32 %v15629_v31, %v5649_v25  ;;  %v6521_v53 = vadd.f32 %v15630_v22, %v6360_v38  ;;  %v15642_v38 = vld [vmem:[#allocation40_spill] sm:$0xff]  ;;  %v15644_v22 = vld [vmem:[#allocation19_spill] sm:$0xff]  ;;  %v8303_v39 = vsel %vm6706_vm14, %v8294_v58, %v8296_v55 }
 0x5a2   : > { %11053 = vmatmul.msk.f32.gmra.mxu1 %vm5456_vm1, %v11041_v3  ;;  %11060 = vmatmul.msk.f32.vlgmr.msrb.gmra.mxu3 %vm5456_vm1, %v14365_v20  ;;  %v6029_v52 = vadd.f32 %v15631_v35, %v5870_v27 }
 0x5a3   : > { %11056 = vmatmul.msk.f32.gmra.mxu2 %vm5456_vm1, %v11041_v3  ;;  %11085 = vmatpush.msk.msrb.mxu3 %vm5463_vm0, %v8143_v57  ;;  %v6033_v8 = vadd.f32 %v15632_v12, %v5874_v17 }
 0x5a4   : > { %v14378_v7 = vpop.f32.mrf.mxu0  ;;  %v6188_v0 = vadd.f32 %v15634_v6, %v6029_v52 }
 0x5a5   : > { %v6976_v19 = vpop.f32.mrf.mxu3 }
 0x5a6   : > { %v14384_v50 = vpop.f32.mrf.mxu2  ;;  %v14386_v40 = vadd.f32 %v6976_v19, %v6846_v41  ;;  %v6682_v41 = vadd.f32 %v15633_v62, %v6521_v53  ;;  %v6361_v44 = vadd.f32 %v15638_v11, %v6188_v0  ;;  %v8298_v31 = vpop.permute.xlu0 %8297  ;;  %v15646_v62 = vld [vmem:[#allocation26_spill] sm:$0xff] }
 0x5a7   : > { %v14390_v33 = vpop.f32.mrf.mxu1  ;;  %11050 = vmatmul.msk.f32.gmra.mxu0 %vm5456_vm1, %v11041_v3  ;;  %v15635_v3 = vld [vmem:[#allocation15_spill] sm:$0xff] }
 0x5a8   : > { %v6192_v23 = vadd.f32 %v15635_v3, %v6033_v8  ;;  %v6844_v1 = vadd.f32 %v14300_v54, %v6682_v41  ;;  %v15640_v54 = vld [vmem:[#allocation22_spill] sm:$0xff]  ;;  %v6522_v56 = vadd.f32 %v15641_v10, %v6361_v44  ;;  %v8451_v3 = vpop.permute.xlu2 %8450 }
 0x5a9   : > { %v5875_v57 = vadd.f32 %v15640_v54, %v5672_v34 }
 0x5aa   : > { %11061 = vmatmul.msk.f32.gmra.mxu3 %vm5456_vm1, %v11058_v43  ;;  %11066 = vmatmul.msk.f32.vlgmr.msrb.gmra.mxu1 %vm5456_vm1, %v14365_v20  ;;  %v6365_v63 = vadd.f32 %v15639_v18, %v6192_v23  ;;  %v7006_v32 = vadd.f32 %v14334_v9, %v6844_v1  ;;  %v15643_v9 = vld [vmem:[#allocation12_spill] sm:$0xff]  ;;  %v6683_v17 = vadd.f32 %v14221_v24, %v6522_v56 }
 0x5ab   : > { %11069 = vmatmul.msk.f32.vlgmr.msra.gmra.mxu2 %vm5456_vm1, %v14365_v20  ;;  %11093 = vmatpush.msk.msrb.mxu1 %vm5463_vm0, %v8301_v42  ;;  %v6034_v14 = vadd.f32 %v15643_v9, %v5875_v57  ;;  %v15645_v24 = vld [vmem:[#allocation20_spill] sm:$0xff]  ;;  %v11074_v42 = vld [vmem:[%s15417_s3 + $0x110] sm:$0xff]  ;;  %v8304_v18 = vsel %vm6706_vm14, %v8296_v55, %v8298_v31 }
 0x5ac   : > { %11096 = vmatpush.msk.msra.mxu2 %vm5463_vm0, %v8302_v26  ;;  %v14414_v46 = vpop.f32.mrf.mxu0  ;;  %v6526_v19 = vadd.f32 %v15642_v38, %v6365_v63  ;;  %v6845_v45 = vadd.f32 %v14273_v5, %v6683_v17 }
 0x5ad   : > { %v6979_v59 = vpop.f32.mrf.mxu3  ;;  %v6193_v53 = vadd.f32 %v15644_v22, %v6034_v14 }
 0x5ae   : > { %v14421_v61 = vadd.f32 %v6979_v59, %v14332_v47  ;;  %v7074_v25 = vpop.f32.mrf.mxu2  ;;  %v6687_v47 = vadd.f32 %v14224_v49, %v6526_v19  ;;  %v8300_v49 = vpop.permute.xlu1 %8299  ;;  %v7007_v12 = vadd.f32 %v14354_v48, %v6845_v45  ;;  %v11381_v45 = vld [vmem:[#allocation3 + $0x10] sm:$0x3f] }
 0x5af   : > { %v14425_v29 = vadd.f32 %v7074_v25, %v7006_v32  ;;  %v7054_v27 = vpop.f32.mrf.mxu1  ;;  %11063 = vmatmul.msk.f32.vlgmr.msrb.gmra.mxu0 %vm5456_vm1, %v14365_v20  ;;  %v6366_v52 = vadd.f32 %v15645_v24, %v6193_v53  ;;  %v8453_v23 = vpop.permute.xlu0 %8452 }
 0x5b0   : > { %11088 = vmatpush.msk.msrb.mxu0 %vm5463_vm0, %v8144_v37  ;;  %v6849_v35 = vadd.f32 %v14326_v15, %v6687_v47  ;;  %v8462_v1 = vsel %vm6868_vm7, %v8451_v3, %v8453_v23  ;;  %v8457_v56 = vpop.permute.xlu2 %8456 }
 0x5b1   : > { %v6527_v41 = vadd.f32 %v15646_v62, %v6366_v52  ;;  %v11383_v62 = vld [vmem:[#allocation3 + $0x28] sm:$0x3f] }
 0x5b2   : > { %11067 = vmatmul.msk.f32.gmra.mxu1 %vm5456_vm1, %v11058_v43  ;;  %11072 = vmatmul.msk.f32.vlgmr.msra.gmra.mxu3 %vm5456_vm1, %v14365_v20  ;;  %v7011_v5 = vadd.f32 %v14358_v28, %v6849_v35  ;;  %v8305_v28 = vsel %vm6706_vm14, %v8298_v31, %v8300_v49 }
 0x5b3   : > { %11070 = vmatmul.msk.f32.gmra.mxu2 %vm5456_vm1, %v11058_v43  ;;  %11099 = vmatpush.msk.msra.mxu3 %vm5463_vm0, %v8303_v39  ;;  %v6688_v48 = vadd.f32 %v14263_v30, %v6527_v41 }
 0x5b4   : > { %v14444_v8 = vpop.f32.mrf.mxu0 }
 0x5b5   : > { %v7097_v58 = vpop.f32.mrf.mxu3  ;;  %v6850_v26 = vadd.f32 %v14309_v13, %v6688_v48  ;;  %v7149_v13 = vadd.f32 %v14390_v33, %v7005_v36  ;;  %v7010_v33 = vadd.f32 %v14378_v7, %v14304_v60  ;;  %v11091_v60 = vld [vmem:[%s15417_s3 + $0x120] sm:$0xff] }
 0x5b6   : > { %v7077_v6 = vpop.f32.mrf.mxu2  ;;  %v14448_v20 = vadd.f32 %v7097_v58, %v7007_v12  ;;  %v8455_v34 = vpop.permute.xlu1 %8454  ;;  %v11382_v58 = vld [vmem:[#allocation3 + $0x20] sm:$0x3f] }
 0x5b7   : > { %v7155_v15 = vadd.f32 %v7077_v6, %v7011_v5  ;;  %v7143_v0 = vpop.f32.mrf.mxu1  ;;  %11064 = vmatmul.msk.f32.gmra.mxu0 %vm5456_vm1, %v11058_v43  ;;  %v7012_v30 = vadd.f32 %v14384_v50, %v6850_v26  ;;  %v11075_v50 = vld [vmem:[%s15417_s3 + $0x118] sm:$0xff]  ;;  %v8463_v63 = vsel %vm6868_vm7, %v8453_v23, %v8455_v34  ;;  %v7154_v59 = vadd.f32 %v7054_v27, %v7010_v33  ;;  %v8459_v37 = vpop.permute.xlu0 %8458 }
 0x5b8   : > { %v8465_v38 = vsel %vm6868_vm7, %v8457_v56, %v8459_v37  ;;  %v8464_v47 = vsel %vm6868_vm7, %v8455_v34, %v8457_v56 }
 0x5ba   : > { %11073 = vmatmul.msk.f32.gmra.mxu3 %vm5456_vm1, %v11058_v43  ;;  %11080 = vmatmul.msk.f32.vlgmr.msra.gmra.mxu1 %vm5456_vm1, %v11074_v42 }
 0x5bb   : > { %11083 = vmatmul.msk.f32.vlgmr.msrb.gmra.mxu2 %vm5456_vm1, %v11074_v42  ;;  %11105 = vmatpush.msk.msra.mxu1 %vm5463_vm0, %v8305_v28  ;;  %v11384_v28 = vld [vmem:[#allocation3 + $0x18] sm:$0x3f] }
 0x5bc   : > { %11110 = vmatpush.msk.msrb.mxu2 %vm5463_vm0, %v8462_v1  ;;  %v14466_v16 = vpop.f32.mrf.mxu0  ;;  %v11385_v1 = vld [vmem:[#allocation3 + $0x30] sm:$0x3f] }
 0x5bd   : > { %v7100_v43 = vpop.f32.mrf.mxu3 }
 0x5be   : > { %v14469_v11 = vadd.f32 %v7100_v43, %v7012_v30  ;;  %v7209_v44 = vpop.f32.mrf.mxu2  ;;  %v8461_v7 = vpop.permute.xlu1 %8460 }
 0x5bf   : > { %v7307_v21 = vadd.f32 %v7209_v44, %v7149_v13  ;;  %v7146_v2 = vpop.f32.mrf.mxu1  ;;  %11077 = vmatmul.msk.f32.vlgmr.msra.gmra.mxu0 %vm5456_vm1, %v11074_v42  ;;  %v8466_v19 = vsel %vm6868_vm7, %v8459_v37, %v8461_v7  ;;  %v8758_v13 = vpop.permute.xlu0 %8757 }
 0x5c0   : > { %11102 = vmatpush.msk.msra.mxu0 %vm5463_vm0, %v8304_v18 }
 0x5c2   : > { %11081 = vmatmul.msk.f32.gmra.mxu1 %vm5456_vm1, %v11075_v50  ;;  %11086 = vmatmul.msk.f32.vlgmr.msrb.gmra.mxu3 %vm5456_vm1, %v11074_v42 }
 0x5c3   : > { %11084 = vmatmul.msk.f32.gmra.mxu2 %vm5456_vm1, %v11075_v50  ;;  %11113 = vmatpush.msk.msrb.mxu3 %vm5463_vm0, %v8463_v63 }
 0x5c4   : > { %v14484_v32 = vpop.f32.mrf.mxu0 }
 0x5c5   : > { %v7232_v54 = vpop.f32.mrf.mxu3  ;;  %v7157_v26 = vadd.f32 %v14484_v32, %v14421_v61 }
 0x5c6   : > { %v7212_v57 = vpop.f32.mrf.mxu2  ;;  %v14487_v10 = vadd.f32 %v7232_v54, %v14425_v29  ;;  %v7009_v29 = vadd.f32 %v14414_v46, %v14330_v51  ;;  %v11092_v51 = vld [vmem:[%s15417_s3 + $0x128] sm:$0xff]  ;;  %v7014_v46 = vadd.f32 %v14444_v8, %v14352_v4  ;;  %v11108_v4 = vld [vmem:[%s15417_s3 + $0x130] sm:$0xff]  ;;  %v7152_v8 = vadd.f32 %v14466_v16, %v14386_v40  ;;  %v11109_v40 = vld [vmem:[%s15417_s3 + $0x138] sm:$0xff]  ;;  %v8760_v44 = vpop.permute.xlu1 %8759 }
 0x5c7   : > { %v7312_v55 = vadd.f32 %v7212_v57, %v7154_v59  ;;  %v7278_v25 = vpop.f32.mrf.mxu1  ;;  %11078 = vmatmul.msk.f32.gmra.mxu0 %vm5456_vm1, %v11075_v50  ;;  %v8766_v61 = vsel %vm474_vm3, %v8758_v13, %v8760_v44 }
 0x5c8   : > { %v7153_v9 = vadd.f32 %v7143_v0, %v7009_v29  ;;  %v7158_v35 = vadd.f32 %v7146_v2, %v7014_v46  ;;  %v7310_v6 = vadd.f32 %v7278_v25, %v7152_v8  ;;  %v8756_v0 = vpop.permute.xlu2 %8755 }
 0x5c9   : > { %v8765_v56 = vsel %vm474_vm3, %v8756_v0, %v8758_v13 }
 0x5ca   : > { %11087 = vmatmul.msk.f32.gmra.mxu3 %vm5456_vm1, %v11075_v50  ;;  %11094 = vmatmul.msk.f32.vlgmr.msrb.gmra.mxu1 %vm5456_vm1, %v11091_v60 }
 0x5cb   : > { %11097 = vmatmul.msk.f32.vlgmr.msra.gmra.mxu2 %vm5456_vm1, %v11091_v60  ;;  %11119 = vmatpush.msk.msrb.mxu1 %vm5463_vm0, %v8465_v38 }
 0x5cc   : > { %11122 = vmatpush.msk.msra.mxu2 %vm5463_vm0, %v8466_v19  ;;  %v14502_v27 = vpop.f32.mrf.mxu0 }
 0x5cd   : > { %v7235_v14 = vpop.f32.mrf.mxu3  ;;  %v7309_v63 = vadd.f32 %v14502_v27, %v14448_v20  ;;  %v11125_v20 = vld [vmem:[%s15417_s3 + $0x140] sm:$0xff] }
 0x5ce   : > { %v14504_v31 = vadd.f32 %v7235_v14, %v7155_v15  ;;  %v7301_v17 = vpop.f32.mrf.mxu2  ;;  %v8914_v38 = vpop.permute.xlu1 %8913 }
 0x5cf   : > { %v7311_v22 = vadd.f32 %v7301_v17, %v7153_v9  ;;  %v7281_v53 = vpop.f32.mrf.mxu1  ;;  %11089 = vmatmul.msk.f32.vlgmr.msrb.gmra.mxu0 %vm5456_vm1, %v11074_v42 }
 0x5d0   : > { %11116 = vmatpush.msk.msrb.mxu0 %vm5463_vm0, %v8464_v47  ;;  %v7315_v30 = vadd.f32 %v7281_v53, %v7157_v26  ;;  %v8762_v2 = vpop.permute.xlu2 %8761 }
 0x5d2   : > { %11095 = vmatmul.msk.f32.gmra.mxu1 %vm5456_vm1, %v11092_v51  ;;  %11100 = vmatmul.msk.f32.vlgmr.msra.gmra.mxu3 %vm5456_vm1, %v11091_v60 }
 0x5d3   : > { %11098 = vmatmul.msk.f32.gmra.mxu2 %vm5456_vm1, %v11092_v51  ;;  %11127 = vmatpush.msk.msra.mxu3 %vm5463_vm0, %v11381_v45 }
 0x5d4   : > { %v14518_v39 = vpop.f32.mrf.mxu0 }
 0x5d5   : > { %v7367_v24 = vpop.f32.mrf.mxu3  ;;  %v7314_v37 = vadd.f32 %v14518_v39, %v14469_v11  ;;  %v11126_v11 = vld [vmem:[%s15417_s3 + $0x148] sm:$0xff] }
 0x5d6   : > { %v7304_v52 = vpop.f32.mrf.mxu2  ;;  %v14520_v49 = vadd.f32 %v7367_v24, %v7307_v21 }
 0x5d7   : > { %v7316_v12 = vadd.f32 %v7304_v52, %v7158_v35  ;;  %v7413_v5 = vpop.f32.mrf.mxu1  ;;  %11090 = vmatmul.msk.f32.gmra.mxu0 %vm5456_vm1, %v11075_v50  ;;  %v8767_v50 = vsel %vm474_vm3, %v8760_v44, %v8762_v2  ;;  %v8920_v52 = vpop.permute.xlu1 %8919 }
 0x5d8   : > { %v7467_v32 = vadd.f32 %v7413_v5, %v7309_v63  ;;  %v8916_v17 = vpop.permute.xlu2 %8915 }
 0x5da   : > { %11101 = vmatmul.msk.f32.gmra.mxu3 %vm5456_vm1, %v11092_v51  ;;  %11106 = vmatmul.msk.f32.vlgmr.msra.gmra.mxu1 %vm5456_vm1, %v11091_v60 }
 0x5db   : > { %11111 = vmatmul.msk.f32.vlgmr.msrb.gmra.mxu2 %vm5456_vm1, %v11108_v4  ;;  %11133 = vmatpush.msk.msra.mxu1 %vm5463_vm0, %v11382_v58 }
 0x5dc   : > { %11136 = vmatpush.msk.msrb.mxu2 %vm5463_vm0, %v11383_v62  ;;  %v14533_v41 = vpop.f32.mrf.mxu0 }
 0x5dd   : > { %v7370_v15 = vpop.f32.mrf.mxu3  ;;  %v7466_v45 = vadd.f32 %v14533_v41, %v14487_v10 }
 0x5de   : > { %v14535_v42 = vadd.f32 %v7370_v15, %v7312_v55  ;;  %v7436_v48 = vpop.f32.mrf.mxu2 }
 0x5df   : > { %v7468_v3 = vadd.f32 %v7436_v48, %v7310_v6  ;;  %v7416_v23 = vpop.f32.mrf.mxu1  ;;  %11103 = vmatmul.msk.f32.vlgmr.msra.gmra.mxu0 %vm5456_vm1, %v11091_v60  ;;  %v8764_v60 = vpop.permute.xlu0 %8763 }
 0x5e0   : > { %11130 = vmatpush.msk.msra.mxu0 %vm5463_vm0, %v11384_v28  ;;  %v8768_v7 = vsel %vm474_vm3, %v8762_v2, %v8764_v60  ;;  %v7472_v29 = vadd.f32 %v7416_v23, %v7314_v37  ;;  %v8922_v41 = vpop.permute.xlu2 %8921 }
 0x5e1   : > { %v8926_v44 = vsel %vm900_vm5, %v8920_v52, %v8922_v41 }
 0x5e2   : > { %11107 = vmatmul.msk.f32.gmra.mxu1 %vm5456_vm1, %v11092_v51  ;;  %11114 = vmatmul.msk.f32.vlgmr.msrb.gmra.mxu3 %vm5456_vm1, %v11108_v4 }
 0x5e3   : > { %11112 = vmatmul.msk.f32.gmra.mxu2 %vm5456_vm1, %v11109_v40  ;;  %11139 = vmatpush.msk.msrb.mxu3 %vm5463_vm0, %v11385_v1 }
 0x5e4   : > { %v14548_v36 = vpop.f32.mrf.mxu0 }
 0x5e5   : > { %v7459_v16 = vpop.f32.mrf.mxu3  ;;  %v7471_v58 = vadd.f32 %v14548_v36, %v14504_v31  ;;  %v11142_v31 = vld [vmem:[%s15417_s3 + $0x150] sm:$0xff] }
 0x5e6   : > { %v7439_v43 = vpop.f32.mrf.mxu2  ;;  %v14550_v34 = vadd.f32 %v7459_v16, %v7311_v22 }
 0x5e7   : > { %v7473_v18 = vadd.f32 %v7439_v43, %v7315_v30  ;;  %v7548_v21 = vpop.f32.mrf.mxu1  ;;  %11104 = vmatmul.msk.f32.gmra.mxu0 %vm5456_vm1, %v11092_v51  ;;  %v8918_v53 = vpop.permute.xlu0 %8917  ;;  %v8923_v51 = vsel %vm900_vm5, %v8914_v38, %v8916_v17 }
 0x5e8   : > { %v8924_v46 = vsel %vm900_vm5, %v8916_v17, %v8918_v53  ;;  %v7624_v35 = vadd.f32 %v7548_v21, %v7466_v45  ;;  %v8925_v10 = vsel %vm900_vm5, %v8918_v53, %v8920_v52  ;;  %v11160_v17 = vld [vmem:[%s15417_s3 + $0x168] sm:$0xff]  ;;  %v11176_v52 = vld [vmem:[%s15417_s3 + $0x170] sm:$0xff]  ;;  %vm9420_vm5 = vcmask 678912  }
 0x5ea   : > { %11115 = vmatmul.msk.f32.gmra.mxu3 %vm5456_vm1, %v11109_v40  ;;  %11120 = vmatmul.msk.f32.vlgmr.msrb.gmra.mxu1 %vm5456_vm1, %v11108_v4 }
 0x5eb   : > { %11123 = vmatmul.msk.f32.vlgmr.msra.gmra.mxu2 %vm5456_vm1, %v11108_v4  ;;  %11147 = vmatpush.msk.msrb.mxu1 %vm5463_vm0, %v8766_v61 }
 0x5ec   : > { %11150 = vmatpush.msk.msra.mxu2 %vm5463_vm0, %v8767_v50  ;;  %v14562_v33 = vpop.f32.mrf.mxu0 }
 0x5ed   : > { %v7462_v59 = vpop.f32.mrf.mxu3  ;;  %v7623_v1 = vadd.f32 %v14562_v33, %v14520_v49  ;;  %v11143_v49 = vld [vmem:[%s15417_s3 + $0x158] sm:$0xff] }
 0x5ee   : > { %v14564_v54 = vadd.f32 %v7462_v59, %v7316_v12  ;;  %v7571_v57 = vpop.f32.mrf.mxu2 }
 0x5ef   : > { %v7625_v55 = vadd.f32 %v7571_v57, %v7467_v32  ;;  %v7551_v25 = vpop.f32.mrf.mxu1  ;;  %11117 = vmatmul.msk.f32.vlgmr.msrb.gmra.mxu0 %vm5456_vm1, %v11108_v4  ;;  %v9072_v28 = vpop.permute.xlu0 %9071 }
 0x5f0   : > { %11144 = vmatpush.msk.msrb.mxu0 %vm5463_vm0, %v8765_v56  ;;  %v7629_v6 = vadd.f32 %v7551_v25, %v7471_v58 }
 0x5f2   : > { %11121 = vmatmul.msk.f32.gmra.mxu1 %vm5456_vm1, %v11109_v40  ;;  %11128 = vmatmul.msk.f32.vlgmr.msra.gmra.mxu3 %vm5456_vm1, %v11125_v20 }
 0x5f3   : > { %11124 = vmatmul.msk.f32.gmra.mxu2 %vm5456_vm1, %v11109_v40  ;;  %11153 = vmatpush.msk.msra.mxu3 %vm5463_vm0, %v8768_v7 }
 0x5f4   : > { %v14579_v19 = vpop.f32.mrf.mxu0 }
 0x5f5   : > { %v7594_v27 = vpop.f32.mrf.mxu3  ;;  %v7628_v50 = vadd.f32 %v14579_v19, %v14535_v42  ;;  %v11159_v42 = vld [vmem:[%s15417_s3 + $0x160] sm:$0xff] }
 0x5f6   : > { %v7574_v9 = vpop.f32.mrf.mxu2  ;;  %v14581_v14 = vadd.f32 %v7594_v27, %v7468_v3 }
 0x5f7   : > { %v7630_v47 = vadd.f32 %v7574_v9, %v7472_v29  ;;  %v7683_v22 = vpop.f32.mrf.mxu1  ;;  %11118 = vmatmul.msk.f32.gmra.mxu0 %vm5456_vm1, %v11109_v40  ;;  %v9074_v40 = vpop.permute.xlu1 %9073 }
 0x5f8   : > { %v9081_v26 = vsel %vm5891_vm2, %v9072_v28, %v9074_v40  ;;  %v7781_v30 = vadd.f32 %v7683_v22, %v7623_v1  ;;  %v9078_v59 = vpop.permute.xlu0 %9077 }
 0x5fa   : > { %11129 = vmatmul.msk.f32.gmra.mxu3 %vm5456_vm1, %v11126_v11  ;;  %11134 = vmatmul.msk.f32.vlgmr.msra.gmra.mxu1 %vm5456_vm1, %v11125_v20 }
 0x5fb   : > { %11137 = vmatmul.msk.f32.vlgmr.msrb.gmra.mxu2 %vm5456_vm1, %v11125_v20  ;;  %11161 = vmatpush.msk.msra.mxu1 %vm5463_vm0, %v8923_v51 }
 0x5fc   : > { %11164 = vmatpush.msk.msrb.mxu2 %vm5463_vm0, %v8924_v46  ;;  %v14596_v39 = vpop.f32.mrf.mxu0 }
 0x5fd   : > { %v7597_v24 = vpop.f32.mrf.mxu3 }
 0x5fe   : > { %v14598_v12 = vadd.f32 %v7597_v24, %v7473_v18  ;;  %v7706_v5 = vpop.f32.mrf.mxu2  ;;  %v9076_v18 = vpop.permute.xlu2 %9075 }
 0x5ff   : > { %v7782_v4 = vadd.f32 %v7706_v5, %v7624_v35  ;;  %v7686_v8 = vpop.f32.mrf.mxu1  ;;  %11131 = vmatmul.msk.f32.vlgmr.msra.gmra.mxu0 %vm5456_vm1, %v11125_v20  ;;  %v9082_v61 = vsel %vm5891_vm2, %v9074_v40, %v9076_v18  ;;  %v9083_v27 = vsel %vm5891_vm2, %v9076_v18, %v9078_v59 }
 0x600   : > { %11156 = vmatpush.msk.msra.mxu0 %vm5463_vm0, %v8764_v60  ;;  %v7786_v33 = vadd.f32 %v7686_v8, %v7628_v50 }
 0x602   : > { %11135 = vmatmul.msk.f32.gmra.mxu1 %vm5456_vm1, %v11126_v11  ;;  %11140 = vmatmul.msk.f32.vlgmr.msrb.gmra.mxu3 %vm5456_vm1, %v11125_v20 }
 0x603   : > { %11138 = vmatmul.msk.f32.gmra.mxu2 %vm5456_vm1, %v11126_v11  ;;  %11167 = vmatpush.msk.msrb.mxu3 %vm5463_vm0, %v8925_v10 }
 0x604   : > { %v14609_v62 = vpop.f32.mrf.mxu0 }
 0x605   : > { %v7729_v15 = vpop.f32.mrf.mxu3 }
 0x606   : > { %v7709_v0 = vpop.f32.mrf.mxu2  ;;  %v14611_v48 = vadd.f32 %v7729_v15, %v7625_v55  ;;  %v9080_v55 = vpop.permute.xlu1 %9079 }
 0x607   : > { %v7787_v3 = vadd.f32 %v7709_v0, %v7629_v6  ;;  %v14613_v23 = vpop.f32.mrf.mxu1  ;;  %11132 = vmatmul.msk.f32.gmra.mxu0 %vm5456_vm1, %v11126_v11  ;;  %v9084_v60 = vsel %vm5891_vm2, %v9078_v59, %v9080_v55  ;;  %v9230_v37 = vpop.permute.xlu2 %9229 }
 0x60a   : > { %11141 = vmatmul.msk.f32.gmra.mxu3 %vm5456_vm1, %v11126_v11  ;;  %11148 = vmatmul.msk.f32.vlgmr.msrb.gmra.mxu1 %vm5456_vm1, %v11142_v31 }
 0x60b   : > { %11151 = vmatmul.msk.f32.vlgmr.msra.gmra.mxu2 %vm5456_vm1, %v11142_v31  ;;  %11173 = vmatpush.msk.msrb.mxu1 %vm5463_vm0, %v8922_v41 }
 0x60c   : > { %11178 = vmatpush.msk.msra.mxu2 %vm5463_vm0, %v9081_v26  ;;  %v14627_v36 = vpop.f32.mrf.mxu0  ;;  %v11177_v26 = vld [vmem:[%s15417_s3 + $0x178] sm:$0xff] }
 0x60d   : > { %v7732_v16 = vpop.f32.mrf.mxu3  ;;  %v7784_v58 = vadd.f32 %v14627_v36, %v14581_v14  ;;  %v7627_v14 = vadd.f32 %v14596_v39, %v14550_v34 }
 0x60e   : > { %v14629_v13 = vadd.f32 %v7732_v16, %v7630_v47  ;;  %v7856_v43 = vpop.f32.mrf.mxu2  ;;  %v9232_v47 = vpop.permute.xlu0 %9231 }
 0x60f   : > { %v14632_v21 = vadd.f32 %v7856_v43, %v7781_v30  ;;  %v14634_v2 = vpop.f32.mrf.mxu1  ;;  %11145 = vmatmul.msk.f32.vlgmr.msrb.gmra.mxu0 %vm5456_vm1, %v11142_v31  ;;  %v9239_v22 = vsel %vm6050_vm6, %v9230_v37, %v9232_v47  ;;  %v9236_v45 = vpop.permute.xlu2 %9235  ;;  %v7785_v1 = vadd.f32 %v14613_v23, %v7627_v14 }
 0x610   : > { %11170 = vmatpush.msk.msrb.mxu0 %vm5463_vm0, %v8926_v44  ;;  %v9234_v5 = vpop.permute.xlu1 %9233 }
 0x611   : > { %v9241_v8 = vsel %vm6050_vm6, %v9234_v5, %v9236_v45 }
 0x612   : > { %11149 = vmatmul.msk.f32.gmra.mxu1 %vm5456_vm1, %v11143_v49  ;;  %11154 = vmatmul.msk.f32.vlgmr.msra.gmra.mxu3 %vm5456_vm1, %v11142_v31 }
 0x613   : > { %11152 = vmatmul.msk.f32.gmra.mxu2 %vm5456_vm1, %v11143_v49  ;;  %11181 = vmatpush.msk.msra.mxu3 %vm5463_vm0, %v9082_v61 }
 0x614   : > { %v14648_v63 = vpop.f32.mrf.mxu0 }
 0x615   : > { %v7879_v32 = vpop.f32.mrf.mxu3  ;;  %v7789_v36 = vadd.f32 %v14648_v63, %v14598_v12 }
 0x616   : > { %v7859_v57 = vpop.f32.mrf.mxu2  ;;  %v14650_v56 = vadd.f32 %v7879_v32, %v7782_v4  ;;  %v9238_v4 = vpop.permute.xlu0 %9237 }
 0x617   : > { %v14652_v25 = vadd.f32 %v7859_v57, %v7786_v33  ;;  %v7925_v20 = vpop.f32.mrf.mxu1  ;;  %11146 = vmatmul.msk.f32.gmra.mxu0 %vm5456_vm1, %v11143_v49  ;;  %v9242_v10 = vsel %vm6050_vm6, %v9236_v45, %v9238_v4  ;;  %v9385_v45 = vld [vmem:[%s15418_s4 + $0x8] sm:$0xff] }
 0x618   : > { %v7957_v6 = vadd.f32 %v7925_v20, %v7784_v58  ;;  %9393 = vperm.xlu2 %11344, %v9385_v45  }
 0x61a   : > { %11155 = vmatmul.msk.f32.gmra.mxu3 %vm5456_vm1, %v11143_v49  ;;  %11162 = vmatmul.msk.f32.vlgmr.msra.gmra.mxu1 %vm5456_vm1, %v11159_v42 }
 0x61b   : > { %11165 = vmatmul.msk.f32.vlgmr.msrb.gmra.mxu2 %vm5456_vm1, %v11159_v42  ;;  %11187 = vmatpush.msk.msra.mxu1 %vm5463_vm0, %v9084_v60 }
 0x61c   : > { %11190 = vmatpush.msk.msrb.mxu2 %vm5463_vm0, %v9080_v55  ;;  %v7902_v7 = vpop.f32.mrf.mxu0 }
 0x61d   : > { %v7882_v38 = vpop.f32.mrf.mxu3  ;;  %v7956_v51 = vadd.f32 %v7902_v7, %v14611_v48 }
 0x61e   : > { %v14664_v19 = vadd.f32 %v7882_v38, %v7787_v3  ;;  %v7948_v29 = vpop.f32.mrf.mxu2  ;;  %v9240_v3 = vsel %vm6050_vm6, %v9232_v47, %v9234_v5 }
 0x61f   : > { %v7928_v9 = vpop.f32.mrf.mxu1  ;;  %11157 = vmatmul.msk.f32.vlgmr.msra.gmra.mxu0 %vm5456_vm1, %v11142_v31  ;;  %v7958_v34 = vadd.f32 %v7948_v29, %v7785_v1 }
 0x620   : > { %11184 = vmatpush.msk.msra.mxu0 %vm5463_vm0, %v9083_v27  ;;  %v7962_v30 = vadd.f32 %v7928_v9, %v7789_v36  ;;  %v11194_v27 = vld [vmem:[%s15417_s3 + $0x188] sm:$0xff] }
 0x622   : > { %11163 = vmatmul.msk.f32.gmra.mxu1 %vm5456_vm1, %v11160_v17  ;;  %11168 = vmatmul.msk.f32.vlgmr.msrb.gmra.mxu3 %vm5456_vm1, %v11159_v42 }
 0x623   : > { %11166 = vmatmul.msk.f32.gmra.mxu2 %vm5456_vm1, %v11160_v17  ;;  %11195 = vmatpush.msk.msrb.mxu3 %vm5463_vm0, %v9239_v22 }
 0x624   : > { %v7905_v11 = vpop.f32.mrf.mxu0 }
 0x625   : > { %v8017_v53 = vpop.f32.mrf.mxu3  ;;  %v7961_v0 = vadd.f32 %v7905_v11, %v14629_v13 }
 0x626   : > { %v7951_v46 = vpop.f32.mrf.mxu2  ;;  %v8115_v50 = vadd.f32 %v8017_v53, %v14632_v21 }
 0x627   : > { %v8063_v35 = vpop.f32.mrf.mxu1  ;;  %11158 = vmatmul.msk.f32.gmra.mxu0 %vm5456_vm1, %v11143_v49  ;;  %v7632_v49 = vadd.f32 %v14609_v62, %v14564_v54 }
 0x628   : > { %v8117_v24 = vadd.f32 %v8063_v35, %v7956_v51 }
 0x629   : > { %v7790_v61 = vadd.f32 %v14634_v2, %v7632_v49  ;;  %v11193_v2 = vld [vmem:[%s15417_s3 + $0x180] sm:$0xff] }
 0x62a   : > { %11169 = vmatmul.msk.f32.gmra.mxu3 %vm5456_vm1, %v11160_v17  ;;  %11174 = vmatmul.msk.f32.vlgmr.msrb.gmra.mxu1 %vm5456_vm1, %v11159_v42 }
 0x62b   : > { %11179 = vmatmul.msk.f32.vlgmr.msra.gmra.mxu2 %vm5456_vm1, %v11176_v52  ;;  %11201 = vmatpush.msk.msrb.mxu1 %vm5463_vm0, %v9241_v8  ;;  %v7963_v63 = vadd.f32 %v7951_v46, %v7790_v61 }
 0x62c   : > { %11204 = vmatpush.msk.msra.mxu2 %vm5463_vm0, %v9242_v10  ;;  %v8040_v41 = vpop.f32.mrf.mxu0 }
 0x62d   : > { %v8020_v15 = vpop.f32.mrf.mxu3  ;;  %v8116_v13 = vadd.f32 %v8040_v41, %v14650_v56 }
 0x62e   : > { %v8086_v48 = vpop.f32.mrf.mxu2  ;;  %v8120_v21 = vadd.f32 %v8020_v15, %v14652_v25 }
 0x62f   : > { %v8118_v31 = vadd.f32 %v8086_v48, %v7957_v6  ;;  %v8066_v40 = vpop.f32.mrf.mxu1  ;;  %11171 = vmatmul.msk.f32.vlgmr.msrb.gmra.mxu0 %vm5456_vm1, %v11159_v42 }
 0x630   : > { %v8122_v28 = vadd.f32 %v8066_v40, %v7961_v0  ;;  %11198 = vmatpush.msk.msrb.mxu0 %vm5463_vm0, %v9240_v3 }
 0x632   : > { %11175 = vmatmul.msk.f32.gmra.mxu1 %vm5456_vm1, %v11160_v17  ;;  %11182 = vmatmul.msk.f32.vlgmr.msra.gmra.mxu3 %vm5456_vm1, %v11176_v52 }
 0x633   : > { %11180 = vmatmul.msk.f32.gmra.mxu2 %vm5456_vm1, %v11177_v26  ;;  %11207 = vmatpush.msk.msra.mxu3 %vm5463_vm0, %v9238_v4 }
 0x634   : > { %v8043_v39 = vpop.f32.mrf.mxu0 }
 0x635   : > { %v8109_v16 = vpop.f32.mrf.mxu3  ;;  %v8121_v57 = vadd.f32 %v8043_v39, %v14664_v19 }
 0x636   : > { %v8089_v43 = vpop.f32.mrf.mxu2  ;;  %v8119_v44 = vadd.f32 %v8109_v16, %v7958_v34 }
 0x637   : > { %v8123_v23 = vadd.f32 %v8089_v43, %v7962_v30  ;;  %v8201_v18 = vpop.f32.mrf.mxu1  ;;  %11172 = vmatmul.msk.f32.gmra.mxu0 %vm5456_vm1, %v11160_v17 }
 0x638   : > { %v8277_v12 = vadd.f32 %v8201_v18, %v8116_v13 }
 0x63a   : > { %11183 = vmatmul.msk.f32.gmra.mxu3 %vm5456_vm1, %v11177_v26  ;;  %11188 = vmatmul.msk.f32.vlgmr.msra.gmra.mxu1 %vm5456_vm1, %v11176_v52 }
 0x63b   : > { %11191 = vmatmul.msk.f32.vlgmr.msrb.gmra.mxu2 %vm5456_vm1, %v11176_v52 }
 0x63c   : > { %v8178_v33 = vpop.f32.mrf.mxu0 }
 0x63d   : > { %v8112_v32 = vpop.f32.mrf.mxu3  ;;  %v8276_v59 = vadd.f32 %v8178_v33, %v8115_v50 }
 0x63e   : > { %v8124_v56 = vadd.f32 %v8112_v32, %v7963_v63  ;;  %v8224_v55 = vpop.f32.mrf.mxu2 }
 0x63f   : > { %v8278_v54 = vadd.f32 %v8224_v55, %v8117_v24  ;;  %v8204_v62 = vpop.f32.mrf.mxu1  ;;  %11185 = vmatmul.msk.f32.vlgmr.msra.gmra.mxu0 %vm5456_vm1, %v11176_v52 }
 0x640   : > { %v8282_v20 = vadd.f32 %v8204_v62, %v8121_v57 }
 0x642   : > { %11189 = vmatmul.msk.f32.gmra.mxu1 %vm5456_vm1, %v11177_v26  ;;  %11196 = vmatmul.msk.f32.vlgmr.msrb.gmra.mxu3 %vm5456_vm1, %v11193_v2 }
 0x643   : > { %11192 = vmatmul.msk.f32.gmra.mxu2 %vm5456_vm1, %v11177_v26 }
 0x644   : > { %v8181_v42 = vpop.f32.mrf.mxu0 }
 0x645   : > { %v8247_v60 = vpop.f32.mrf.mxu3  ;;  %v8281_v7 = vadd.f32 %v8181_v42, %v8120_v21 }
 0x646   : > { %v8227_v37 = vpop.f32.mrf.mxu2  ;;  %v8279_v38 = vadd.f32 %v8247_v60, %v8118_v31 }
 0x647   : > { %v8283_v19 = vadd.f32 %v8227_v37, %v8122_v28  ;;  %v8339_v29 = vpop.f32.mrf.mxu1  ;;  %11186 = vmatmul.msk.f32.gmra.mxu0 %vm5456_vm1, %v11177_v26 }
 0x648   : > { %v8437_v9 = vadd.f32 %v8339_v29, %v8276_v59 }
 0x64a   : > { %11197 = vmatmul.msk.f32.gmra.mxu3 %vm5456_vm1, %v11194_v27  ;;  %11202 = vmatmul.msk.f32.vlgmr.msrb.gmra.mxu1 %vm5456_vm1, %v11193_v2 }
 0x64b   : > { %11205 = vmatmul.msk.f32.vlgmr.msra.gmra.mxu2 %vm5456_vm1, %v11193_v2 }
 0x64c   : > { %v8270_v25 = vpop.f32.mrf.mxu0 }
 0x64d   : > { %v8250_v17 = vpop.f32.mrf.mxu3  ;;  %v8280_v47 = vadd.f32 %v8270_v25, %v8119_v44 }
 0x64e   : > { %v8284_v22 = vadd.f32 %v8250_v17, %v8123_v23  ;;  %v8362_v11 = vpop.f32.mrf.mxu2 }
 0x64f   : > { %v8438_v53 = vadd.f32 %v8362_v11, %v8277_v12  ;;  %v8342_v51 = vpop.f32.mrf.mxu1  ;;  %11199 = vmatmul.msk.f32.vlgmr.msrb.gmra.mxu0 %vm5456_vm1, %v11193_v2 }
 0x650   : > { %v8442_v46 = vadd.f32 %v8342_v51, %v8281_v7 }
 0x652   : > { %11203 = vmatmul.msk.f32.gmra.mxu1 %vm5456_vm1, %v11194_v27  ;;  %11208 = vmatmul.msk.f32.vlgmr.msra.gmra.mxu3 %vm5456_vm1, %v11193_v2 }
 0x653   : > { %11206 = vmatmul.msk.f32.gmra.mxu2 %vm5456_vm1, %v11194_v27 }
 0x654   : > { %v8273_v35 = vpop.f32.mrf.mxu0 }
 0x655   : > { %v8385_v24 = vpop.f32.mrf.mxu3  ;;  %v8285_v52 = vadd.f32 %v8273_v35, %v8124_v56 }
 0x656   : > { %v8365_v5 = vpop.f32.mrf.mxu2  ;;  %v8439_v4 = vadd.f32 %v8385_v24, %v8278_v54 }
 0x657   : > { %v8443_v8 = vadd.f32 %v8365_v5, %v8282_v20  ;;  %v8431_v10 = vpop.f32.mrf.mxu1  ;;  %11200 = vmatmul.msk.f32.gmra.mxu0 %vm5456_vm1, %v11194_v27 }
 0x658   : > { %v8441_v58 = vadd.f32 %v8431_v10, %v8280_v47 }
 0x65a   : > { %11209 = vmatmul.msk.f32.gmra.mxu3 %vm5456_vm1, %v11194_v27 }
 0x65c   : > { %v8408_v41 = vpop.f32.mrf.mxu0 }
 0x65d   : > { %v8388_v6 = vpop.f32.mrf.mxu3  ;;  %v8440_v15 = vadd.f32 %v8408_v41, %v8279_v38 }
 0x65e   : > { %v8444_v0 = vadd.f32 %v8388_v6, %v8283_v19  ;;  %v8500_v48 = vpop.f32.mrf.mxu2 }
 0x65f   : > { %v8598_v3 = vadd.f32 %v8500_v48, %v8437_v9  ;;  %v8434_v31 = vpop.f32.mrf.mxu1 }
 0x660   : > { %v8446_v40 = vadd.f32 %v8434_v31, %v8285_v52 }
 0x664   : > { %v8411_v14 = vpop.f32.mrf.mxu0 }
 0x665   : > { %v8523_v28 = vpop.f32.mrf.mxu3  ;;  %v8445_v26 = vadd.f32 %v8411_v14, %v8284_v22 }
 0x666   : > { %v8503_v1 = vpop.f32.mrf.mxu2  ;;  %v8599_v36 = vadd.f32 %v8523_v28, %v8438_v53 }
 0x667   : > { %v8603_v34 = vadd.f32 %v8503_v1, %v8442_v46  ;;  %v8569_v39 = vpop.f32.mrf.mxu1 }
 0x668   : > { %v8601_v30 = vadd.f32 %v8569_v39, %v8440_v15 }
 0x66c   : > { %v8546_v16 = vpop.f32.mrf.mxu0 }
 0x66d   : > { %v8526_v13 = vpop.f32.mrf.mxu3  ;;  %v8600_v43 = vadd.f32 %v8546_v16, %v8439_v4 }
 0x66e   : > { %v8604_v44 = vadd.f32 %v8526_v13, %v8443_v8  ;;  %v8592_v23 = vpop.f32.mrf.mxu2 }
 0x66f   : > { %v8602_v18 = vadd.f32 %v8592_v23, %v8441_v58  ;;  %v8572_v49 = vpop.f32.mrf.mxu1 }
 0x670   : > { %v8606_v12 = vadd.f32 %v8572_v49, %v8445_v26  ;;  %v9389_v49 = vpop.permute.xlu1 %9388 }
 0x674   : > { %v8549_v61 = vpop.f32.mrf.mxu0 }
 0x675   : > { %v8644_v50 = vpop.f32.mrf.mxu3  ;;  %v8605_v63 = vadd.f32 %v8549_v61, %v8444_v0 }
 0x676   : > { %v8595_v33 = vpop.f32.mrf.mxu2  ;;  %v8742_v32 = vadd.f32 %v8644_v50, %v8598_v3 }
 0x677   : > { %v8607_v59 = vadd.f32 %v8595_v33, %v8446_v40  ;;  %v8690_v57 = vpop.f32.mrf.mxu1 }
 0x678   : > { %v8744_v56 = vadd.f32 %v8690_v57, %v8600_v43 }
 0x67c   : > { %v8667_v55 = vpop.f32.mrf.mxu0 }
 0x67d   : > { %v8647_v54 = vpop.f32.mrf.mxu3  ;;  %v8743_v62 = vadd.f32 %v8667_v55, %v8599_v36 }
 0x67e   : > { %v8747_v2 = vadd.f32 %v8647_v54, %v8603_v34  ;;  %v8713_v20 = vpop.f32.mrf.mxu2 }
 0x67f   : > { %v8745_v21 = vadd.f32 %v8713_v20, %v8601_v30  ;;  %v8693_v42 = vpop.f32.mrf.mxu1 }
 0x680   : > { %v8749_v60 = vadd.f32 %v8693_v42, %v8605_v63 }
 0x684   : > { %v8670_v7 = vpop.f32.mrf.mxu0 }
 0x685   : > { %v8736_v37 = vpop.f32.mrf.mxu3  ;;  %v14741_v38 = vadd.f32 %v8670_v7, %v8604_v44 }
 0x686   : > { %v8716_v19 = vpop.f32.mrf.mxu2  ;;  %v14743_v29 = vadd.f32 %v8736_v37, %v8602_v18 }
 0x687   : > { %v14745_v27 = vadd.f32 %v8716_v19, %v8606_v12  ;;  %v8825_v9 = vpop.f32.mrf.mxu1 }
 0x688   : > { %v8901_v12 = vadd.f32 %v8825_v9, %v8743_v62 }
 0x68c   : > { %v8802_v25 = vpop.f32.mrf.mxu0 }
 0x68d   : > { %v8739_v17 = vpop.f32.mrf.mxu3  ;;  %v8900_v36 = vadd.f32 %v8802_v25, %v8742_v32 }
 0x68e   : > { %v14747_v47 = vadd.f32 %v8739_v17, %v8607_v59  ;;  %v8848_v22 = vpop.f32.mrf.mxu2  ;;  %v9394_v17 = vpop.permute.xlu2 %9393 }
 0x68f   : > { %v8828_v11 = vpop.f32.mrf.mxu1  ;;  %v8902_v34 = vadd.f32 %v8848_v22, %v8744_v56 }
 0x694   : > { %v8805_v53 = vpop.f32.mrf.mxu0 }
 0x695   : > { %v8871_v51 = vpop.f32.mrf.mxu3  ;;  %v8905_v50 = vadd.f32 %v8805_v53, %v8747_v2 }
 0x696   : > { %v8851_v46 = vpop.f32.mrf.mxu2  ;;  %v8903_v59 = vadd.f32 %v8871_v51, %v8745_v21 }
 0x697   : > { %v8960_v45 = vpop.f32.mrf.mxu1  ;;  %v8907_v32 = vadd.f32 %v8851_v46, %v8749_v60  ;;  %v8906_v60 = vadd.f32 %v8828_v11, %v14741_v38 }
 0x698   : > { %v9058_v39 = vadd.f32 %v8960_v45, %v8900_v36 }
 0x69c   : > { %v8894_v35 = vpop.f32.mrf.mxu0 }
 0x69d   : > { %v8874_v24 = vpop.f32.mrf.mxu3 }
 0x69e   : > { %v8983_v52 = vpop.f32.mrf.mxu2 }
 0x69f   : > { %v8963_v5 = vpop.f32.mrf.mxu1  ;;  %v9059_v57 = vadd.f32 %v8983_v52, %v8901_v12  ;;  %v8904_v52 = vadd.f32 %v8894_v35, %v14743_v29 }
 0x6a0   : > { %v9063_v56 = vadd.f32 %v8963_v5, %v8905_v50 }
 0x6a4   : > { %v14749_v4 = vpop.f32.mrf.mxu0 }
 0x6a5   : > { %v9006_v8 = vpop.f32.mrf.mxu3 }
 0x6a6   : > { %v8986_v10 = vpop.f32.mrf.mxu2  ;;  %v9060_v30 = vadd.f32 %v9006_v8, %v8902_v34 }
 0x6a7   : > { %v9052_v58 = vpop.f32.mrf.mxu1 }
 0x6ac   : > { %v9029_v41 = vpop.f32.mrf.mxu0 }
 0x6ad   : > { %v9009_v6 = vpop.f32.mrf.mxu3  ;;  %v9061_v20 = vadd.f32 %v9029_v41, %v8903_v59  ;;  %v8908_v41 = vadd.f32 %v8874_v24, %v14745_v27 }
 0x6ae   : > { %v9118_v15 = vpop.f32.mrf.mxu2  ;;  %v9065_v7 = vadd.f32 %v9009_v6, %v8907_v32  ;;  %v9064_v6 = vadd.f32 %v8986_v10, %v8906_v60  ;;  %v9601_v32 = vld [vmem:[%s15419_s5 + $0x178] sm:$0xff] }
 0x6af   : > { %v14751_v0 = vpop.f32.mrf.mxu1  ;;  %v9216_v16 = vadd.f32 %v9118_v15, %v9058_v39  ;;  %9678 = vmatpush.msrb.mxu2 %v9601_v32 }
 0x6b4   : > { %v9032_v48 = vpop.f32.mrf.mxu0 }
 0x6b5   : > { %v9141_v3 = vpop.f32.mrf.mxu3  ;;  %v9066_v11 = vadd.f32 %v9032_v48, %v8908_v41 }
 0x6b6   : > { %v9121_v31 = vpop.f32.mrf.mxu2  ;;  %v9217_v42 = vadd.f32 %v9141_v3, %v9059_v57 }
 0x6b7   : > { %v9187_v40 = vpop.f32.mrf.mxu1  ;;  %v9221_v37 = vadd.f32 %v9121_v31, %v9063_v56  ;;  %v9062_v31 = vadd.f32 %v9052_v58, %v8904_v52  ;;  %v9617_v56 = vld [vmem:[%s15419_s5 + $0x1f8] sm:$0xff] }
 0x6b8   : > { %v9219_v9 = vadd.f32 %v9187_v40, %v9061_v20  ;;  %v9600_v20 = vld [vmem:[%s15419_s5 + $0x170] sm:$0xff]  ;;  %9701 = vmatpush.msrb.mxu3 %v9617_v56  ;;  %v9587_v56 = vld [vmem:[%s15419_s5 + $0x108] sm:$0xff] }
 0x6b9   : > { %9679 = vmatpush.msrb.mxu2 %v9600_v20  ;;  %v9604_v20 = vld [vmem:[%s15419_s5 + $0x190] sm:$0xff] }
 0x6bc   : > { %v9164_v14 = vpop.f32.mrf.mxu0 }
 0x6bd   : > { %v9144_v28 = vpop.f32.mrf.mxu3  ;;  %v9218_v44 = vadd.f32 %v9164_v14, %v9060_v30 }
 0x6be   : > { %v9210_v26 = vpop.f32.mrf.mxu2  ;;  %v9222_v14 = vadd.f32 %v9144_v28, %v9064_v6 }
 0x6bf   : > { %v9190_v1 = vpop.f32.mrf.mxu1  ;;  %v9220_v27 = vadd.f32 %v9210_v26, %v9062_v31  ;;  %v8909_v26 = vadd.f32 %v14749_v4, %v14747_v47  ;;  %v9596_v31 = vld [vmem:[%s15419_s5 + $0x150] sm:$0xff] }
 0x6c0   : > { %v9224_v10 = vadd.f32 %v9190_v1, %v9066_v11  ;;  %v9612_v11 = vld [vmem:[%s15419_s5 + $0x1d0] sm:$0xff] }
 0x6c4   : > { %v9167_v13 = vpop.f32.mrf.mxu0 }
 0x6c5   : > { %v9276_v43 = vpop.f32.mrf.mxu3  ;;  %v9223_v22 = vadd.f32 %v9167_v13, %v9065_v7  ;;  %v9599_v7 = vld [vmem:[%s15419_s5 + $0x168] sm:$0xff] }
 0x6c6   : > { %v14753_v23 = vpop.f32.mrf.mxu2  ;;  %v9374_v18 = vadd.f32 %v9276_v43, %v9216_v16  ;;  %9680 = vmatpush.msrb.mxu2 %v9599_v7  ;;  %v9583_v7 = vld [vmem:[%s15419_s5 + $0xe8] sm:$0xff] }
 0x6c7   : > { %v9322_v61 = vpop.f32.mrf.mxu1 }
 0x6c8   : > { %v14755_v63 = vadd.f32 %v9389_v49, %v9374_v18  ;;  %v9376_v33 = vadd.f32 %v9322_v61, %v9218_v44  ;;  %v9067_v44 = vadd.f32 %v14751_v0, %v8909_v26 }
 0x6ca   : > { %v9406_v55 = vmax.f32 %v14755_v63, 0.0  ;;  %v14758_v54 = vadd.f32 %v9389_v49, %v9376_v33  ;;  %v9225_v50 = vadd.f32 %v14753_v23, %v9067_v44  ;;  %v9606_v44 = vld [vmem:[%s15419_s5 + $0x1a0] sm:$0xff] }
 0x6cc   : > { %v9408_v19 = vmax.f32 %v14758_v54, 0.0  ;;  %v9299_v62 = vpop.f32.mrf.mxu0  ;;  %v9595_v54 = vld [vmem:[%s15419_s5 + $0x148] sm:$0xff] }
 0x6cd   : > { %v9279_v2 = vpop.f32.mrf.mxu3  ;;  %v9375_v25 = vadd.f32 %v9299_v62, %v9217_v42  ;;  %v9616_v42 = vld [vmem:[%s15419_s5 + $0x1f0] sm:$0xff] }
 0x6ce   : > { %v9379_v21 = vadd.f32 %v9279_v2, %v9221_v37  ;;  %v9345_v53 = vpop.f32.mrf.mxu2  ;;  %v9615_v37 = vld [vmem:[%s15419_s5 + $0x1e8] sm:$0xff]  ;;  %9702 = vmatpush.msrb.mxu3 %v9616_v42 }
 0x6cf   : > { %v9377_v51 = vadd.f32 %v9345_v53, %v9219_v9  ;;  %v14762_v46 = vadd.f32 %v9389_v49, %v9375_v25  ;;  %v9325_v45 = vpop.f32.mrf.mxu1  ;;  %v9598_v25 = vld [vmem:[%s15419_s5 + $0x160] sm:$0xff]  ;;  %v9567_v42 = vld [vmem:[%s15419_s5 + $0x68] sm:$0xff] }
 0x6d0   : > { %v9381_v5 = vadd.f32 %v9325_v45, %v9223_v22  ;;  %v14765_v8 = vadd.f32 %v9394_v17, %v9379_v21  ;;  %9703 = vmatpush.msrb.mxu3 %v9615_v37  ;;  %v9613_v45 = vld [vmem:[%s15419_s5 + $0x1d8] sm:$0xff]  ;;  %9681 = vmatpush.msrb.mxu2 %v9598_v25  ;;  %v9586_v37 = vld [vmem:[%s15419_s5 + $0x100] sm:$0xff] }
 0x6d1   : > { %v14768_v15 = vadd.f32 %v9389_v49, %v9377_v51  ;;  %v9407_v3 = vmax.f32 %v14762_v46, 0.0  ;;  %v9597_v51 = vld [vmem:[%s15419_s5 + $0x158] sm:$0xff] }
 0x6d2   : > { %v14771_v40 = vadd.f32 %v9394_v17, %v9381_v5  ;;  %v9411_v38 = vmax.f32 %v14765_v8, 0.0  ;;  %9682 = vmatpush.msrb.mxu2 %v9597_v51  ;;  %v9608_v8 = vld [vmem:[%s15419_s5 + $0x1b0] sm:$0xff]  ;;  %v9581_v25 = vld [vmem:[%s15419_s5 + $0xd8] sm:$0xff]  ;;  %v9579_v51 = vld [vmem:[%s15419_s5 + $0xc8] sm:$0xff] }
 0x6d3   : > { %v9409_v36 = vmax.f32 %v14768_v15, 0.0  ;;  %v11345_v29 = vpack.i.bf16 %v9407_v3, %v9406_v55 }
 0x6d4   : > { %v9413_v35 = vmax.f32 %v14771_v40, 0.0  ;;  %v9302_v24 = vpop.f32.mrf.mxu0  ;;  %9683 = vmatpush.msrb.mxu2 %v9596_v31  ;;  %v9585_v40 = vld [vmem:[%s15419_s5 + $0xf8] sm:$0xff]  ;;  %v9560_v31 = vld [vmem:[%s15419_s5 + $0x30] sm:$0xff] }
 0x6d5   : > { %v9368_v34 = vpop.f32.mrf.mxu3  ;;  %v9380_v58 = vadd.f32 %v9302_v24, %v9222_v14  ;;  %v11350_v48 = vpack.i.bf16 %v9409_v36, %v9408_v19  ;;  %11346 = vrot.lane.b32.xlu0 %v11345_v29, %s11424_s27  ;;  %9655 = vmatpush.msra.mxu1 %v9585_v40 }
 0x6d6   : > { %v9348_v28 = vpop.f32.mrf.mxu2  ;;  %v9378_v39 = vadd.f32 %v9368_v34, %v9220_v27  ;;  %9684 = vmatpush.msrb.mxu2 %v9595_v54  ;;  %v9574_v54 = vld [vmem:[%s15419_s5 + $0xa0] sm:$0xff] }
 0x6d7   : > { %v9382_v30 = vadd.f32 %v9348_v28, %v9224_v10  ;;  %v14785_v16 = vadd.f32 %v9394_v17, %v9380_v58  ;;  %11351 = vrot.lane.b32.xlu1 %v11350_v48, %s11424_s27  ;;  %v9610_v10 = vld [vmem:[%s15419_s5 + $0x1c0] sm:$0xff] }
 0x6d8   : > { %v9400_v1 = vadd.f32 %v9389_v49, %v9378_v39  ;;  %v9593_v39 = vld [vmem:[%s15419_s5 + $0x138] sm:$0xff] }
 0x6d9   : > { %v14790_v13 = vadd.f32 %v9394_v17, %v9382_v30  ;;  %v9412_v43 = vmax.f32 %v14785_v16, 0.0  ;;  %v9609_v30 = vld [vmem:[%s15419_s5 + $0x1b8] sm:$0xff]  ;;  %v9592_v16 = vld [vmem:[%s15419_s5 + $0x130] sm:$0xff] }
 0x6da   : > { %v9410_v18 = vmax.f32 %v9400_v1, 0.0  ;;  %v9607_v1 = vld [vmem:[%s15419_s5 + $0x1a8] sm:$0xff] }
 0x6db   : > { %v9414_v12 = vmax.f32 %v14790_v13, 0.0  ;;  %v11355_v61 = vpack.i.bf16 %v9412_v43, %v9411_v38  ;;  %v9568_v13 = vld [vmem:[%s15419_s5 + $0x70] sm:$0xff] }
 0x6dc   : > { %9421 = vst.msk [vmem:[#allocation4 + $0x20] sm:$0xff] %vm9420_vm5, %v9410_v18  ;;  %v9589_v18 = vld [vmem:[%s15419_s5 + $0x118] sm:$0xff] }
 0x6dd   : > { %v9371_v47 = vpop.f32.mrf.mxu3  ;;  %11356 = vrot.lane.b32.xlu0 %v11355_v61, %s11424_s27  ;;  %v9605_v61 = vld [vmem:[%s15419_s5 + $0x198] sm:$0xff] }
 0x6de   : > { %v9383_v4 = vadd.f32 %v9371_v47, %v9225_v50 }
 0x6df   : > { %9461 = vrot.lane.b32.xlu1 %v9413_v35, %s11424_s27 }
 0x6e0   : > { %v9405_v0 = vadd.f32 %v9394_v17, %v9383_v4  ;;  %v9614_v17 = vld [vmem:[%s15419_s5 + $0x1e0] sm:$0xff] }
 0x6e1   : > { %9704 = vmatpush.msrb.mxu3 %v9614_v17  ;;  %v9603_v17 = vld [vmem:[%s15419_s5 + $0x188] sm:$0xff] }
 0x6e2   : > { %v9415_v49 = vmax.f32 %v9405_v0, 0.0 }
 0x6e3   : > { %v9431_v33 = vld [vmem:[#allocation4 + $0x20] sm:$0xff]  ;;  %9705 = vmatpush.msrb.mxu3 %v9613_v45  ;;  %v9562_v45 = vld [vmem:[%s15419_s5 + $0x40] sm:$0xff] }
 0x6e4   : > { %9426 = vst.msk [vmem:[#allocation4 + $0x48] sm:$0xff] %vm9420_vm5, %v9415_v49  ;;  %9455 = vrot.lane.b32.xlu2 %v9431_v33, %s11424_s27 }
 0x6e5   : > { %9706 = vmatpush.msrb.mxu3 %v9612_v11  ;;  %v9576_v11 = vld [vmem:[%s15419_s5 + $0xb0] sm:$0xff] }
 0x6eb   : > { %v14805_v59 = vld [vmem:[#allocation4 + $0x48] sm:$0xff] }
 0x6ec   : > { %9463 = vrot.lane.b32.xlu2 %v9414_v12, %s11424_s27  ;;  %9465 = vrot.lane.b32.xlu0 %v14805_v59, %s11424_s27 }
 0x73e   : > { %v9456_v23 = vpop.permute.xlu2 %9455 }
 0x73f   : > { %v14812_v57 = vmax.f32 %v9431_v33, %v9456_v23 }
 0x741   : > { %9513 = vrot.lane.b32.xlu0 %v14812_v57, %s11432_s16 }
 0x746   : > { %v9464_v50 = vpop.permute.xlu2 %9463 }
 0x747   : > { %v11347_v62 = vpop.permute.xlu0 %11346 }
 0x748   : > { %v11349_v9 = vunpack.i.h.bf16 %v11347_v62  ;;  %v11348_v2 = vunpack.i.l.bf16 %v11347_v62  ;;  %v9566_v62 = vld [vmem:[%s15419_s5 + $0x60] sm:$0xff] }
 0x749   : > { %v11352_v22 = vpop.permute.xlu1 %11351 }
 0x74a   : > { %v11354_v21 = vunpack.i.h.bf16 %v11352_v22  ;;  %v11353_v53 = vunpack.i.l.bf16 %v11352_v22  ;;  %v9467_v60 = vsel %vm474_vm3, %v11348_v2, %v11349_v9  ;;  %v9565_v2 = vld [vmem:[%s15419_s5 + $0x58] sm:$0xff]  ;;  %v9602_v22 = vld [vmem:[%s15419_s5 + $0x180] sm:$0xff] }
 0x74b   : > { %v14849_v52 = vmax.f32 %v9406_v55, %v9467_v60  ;;  %v9563_v60 = vld [vmem:[%s15419_s5 + $0x48] sm:$0xff] }
 0x74c   : > { %v9469_v5 = vsel %vm474_vm3, %v11353_v53, %v11354_v21  ;;  %v9470_v41 = vsel %vm474_vm3, %v11354_v21, %v9456_v23  ;;  %v9468_v6 = vsel %vm474_vm3, %v11349_v9, %v11353_v53  ;;  %v9582_v9 = vld [vmem:[%s15419_s5 + $0xe0] sm:$0xff]  ;;  %v9564_v21 = vld [vmem:[%s15419_s5 + $0x50] sm:$0xff] }
 0x74d   : > { %v14862_v63 = vmax.f32 %v9408_v19, %v9469_v5  ;;  %v14866_v55 = vmax.f32 %v9409_v36, %v9470_v41  ;;  %v14870_v14 = vmax.f32 %v9407_v3, %v9468_v6  ;;  %v9611_v19 = vld [vmem:[%s15419_s5 + $0x1c8] sm:$0xff]  ;;  %v9594_v36 = vld [vmem:[%s15419_s5 + $0x140] sm:$0xff]  ;;  %v9580_v53 = vld [vmem:[%s15419_s5 + $0xd0] sm:$0xff] }
 0x74e   : > { %9707 = vmatpush.msrb.mxu3 %v9611_v19  ;;  %9685 = vmatpush.msrb.mxu2 %v9594_v36  ;;  %v9578_v5 = vld [vmem:[%s15419_s5 + $0xc0] sm:$0xff]  ;;  %v9561_v41 = vld [vmem:[%s15419_s5 + $0x38] sm:$0xff]  ;;  %v9555_v36 = vld [vmem:[%s15419_s5 + $0x8] sm:$0xff] }
 0x74f   : > { %v11365_v29 = vpack.i.bf16 %v14866_v55, %v14862_v63  ;;  %v11360_v27 = vpack.i.bf16 %v14870_v14, %v14849_v52  ;;  %v11357_v24 = vpop.permute.xlu0 %11356  ;;  %v9577_v6 = vld [vmem:[%s15419_s5 + $0xb8] sm:$0xff] }
 0x750   : > { %v11359_v46 = vunpack.i.h.bf16 %v11357_v24  ;;  %v11358_v15 = vunpack.i.l.bf16 %v11357_v24  ;;  %9708 = vmatpush.msrb.mxu3 %v9610_v10  ;;  %9686 = vmatpush.msrb.mxu2 %v9593_v39  ;;  %v9558_v24 = vld [vmem:[%s15419_s5 + $0x20] sm:$0xff]  ;;  %v9557_v19 = vld [vmem:[%s15419_s5 + $0x18] sm:$0xff]  ;;  %v9571_v10 = vld [vmem:[%s15419_s5 + $0x88] sm:$0xff] }
 0x751   : > { %v9462_v3 = vpop.permute.xlu1 %9461  ;;  %11366 = vrot.lane.b32.xlu2 %v11365_v29, %s11432_s16  ;;  %11361 = vrot.lane.b32.xlu1 %v11360_v27, %s11432_s16  ;;  %v9559_v29 = vld [vmem:[%s15419_s5 + $0x28] sm:$0xff] }
 0x752   : > { %v9472_v34 = vsel %vm474_vm3, %v11359_v46, %v9462_v3  ;;  %v9471_v58 = vsel %vm474_vm3, %v11358_v15, %v11359_v46  ;;  %9709 = vmatpush.msrb.mxu3 %v9609_v30  ;;  %9687 = vmatpush.msrb.mxu2 %v9592_v16  ;;  %v9473_v47 = vsel %vm474_vm3, %v9462_v3, %v9464_v50  ;;  %v9575_v27 = vld [vmem:[%s15419_s5 + $0xa8] sm:$0xff]  ;;  %v9573_v46 = vld [vmem:[%s15419_s5 + $0x98] sm:$0xff]  ;;  %v9556_v15 = vld [vmem:[%s15419_s5 + $0x10] sm:$0xff] }
 0x753   : > { %v14894_v48 = vmax.f32 %v9412_v43, %v9472_v34  ;;  %v14898_v28 = vmax.f32 %v9411_v38, %v9471_v58  ;;  %v9591_v38 = vld [vmem:[%s15419_s5 + $0x128] sm:$0xff]  ;;  %v9590_v43 = vld [vmem:[%s15419_s5 + $0x120] sm:$0xff]  ;;  %v14940_v33 = vmax.f32 %v9413_v35, %v9473_v47  ;;  %v9588_v35 = vld [vmem:[%s15419_s5 + $0x110] sm:$0xff] }
 0x754   : > { %9710 = vmatpush.msrb.mxu3 %v9608_v8  ;;  %9688 = vmatpush.msrb.mxu2 %v9591_v38  ;;  %v9572_v3 = vld [vmem:[%s15419_s5 + $0x90] sm:$0xff]  ;;  %v9554_v34 = vld [vmem:[%s15419_s5] sm:$0xff] }
 0x755   : > { %v11370_v26 = vpack.i.bf16 %v14894_v48, %v14898_v28  ;;  %v9570_v58 = vld [vmem:[%s15419_s5 + $0x80] sm:$0xff] }
 0x756   : > { %9711 = vmatpush.msrb.mxu3 %v9607_v1  ;;  %9689 = vmatpush.msrb.mxu2 %v9590_v43 }
 0x758   : > { %9712 = vmatpush.msrb.mxu3 %v9606_v44  ;;  %9690 = vmatpush.msrb.mxu2 %v9589_v18  ;;  %v9620_v44 = vld [vmem:[%s15419_s5 + $0x210] sm:$0x1]  ;;  %v9619_v18 = vld [vmem:[%s15419_s5 + $0x208] sm:$0xff] }
 0x759   : > { %11371 = vrot.lane.b32.xlu1 %v11370_v26, %s11432_s16 }
 0x75a   : > { %9713 = vmatpush.msrb.mxu3 %v9605_v61  ;;  %9691 = vmatpush.msrb.mxu2 %v9588_v35 }
 0x75c   : > { %9714 = vmatpush.msrb.mxu3 %v9604_v20  ;;  %9692 = vmatpush.msrb.mxu2 %v9587_v56 }
 0x75e   : > { %v9466_v4 = vpop.permute.xlu0 %9465  ;;  %9693 = vmatpush.msrb.mxu2 %v9586_v37  ;;  %9715 = vmatpush.msrb.mxu3 %v9603_v17 }
 0x75f   : > { %v9474_v0 = vsel %vm474_vm3, %v9464_v50, %v9466_v4  ;;  %v14936_v49 = vmax.f32 %v14805_v59, %v9466_v4  ;;  %v9569_v59 = vld [vmem:[%s15419_s5 + $0x78] sm:$0xff]  ;;  %vm9628_vm3 = vcmask 1040384  }
 0x760   : > { %v14944_v23 = vmax.f32 %v9414_v12, %v9474_v0  ;;  %9632 = vmatpush.msra.mxu0 %v9569_v59  ;;  %v9584_v12 = vld [vmem:[%s15419_s5 + $0xf0] sm:$0xff]  ;;  %9716 = vmatpush.msrb.mxu3 %v9602_v22 }
 0x761   : > { %9523 = vrot.lane.b32.xlu0 %v14936_v49, %s11432_s16  ;;  %9656 = vmatpush.msra.mxu1 %v9584_v12 }
 0x762   : > { %v11375_v32 = vpack.i.bf16 %v14944_v23, %v14940_v33  ;;  %9633 = vmatpush.msra.mxu0 %v9568_v13 }
 0x763   : > { %9657 = vmatpush.msra.mxu1 %v9583_v7 }
 0x764   : > { %11376 = vrot.lane.b32.xlu2 %v11375_v32, %s11432_s16  ;;  %9634 = vmatpush.msra.mxu0 %v9567_v42 }
 0x765   : > { %9658 = vmatpush.msra.mxu1 %v9582_v9 }
 0x766   : > { %9635 = vmatpush.msra.mxu0 %v9566_v62 }
 0x767   : > { %9659 = vmatpush.msra.mxu1 %v9581_v25 }
 0x768   : > { %9636 = vmatpush.msra.mxu0 %v9565_v2 }
 0x769   : > { %9660 = vmatpush.msra.mxu1 %v9580_v53 }
 0x76a   : > { %9637 = vmatpush.msra.mxu0 %v9564_v21 }
 0x76b   : > { %9661 = vmatpush.msra.mxu1 %v9579_v51 }
 0x76c   : > { %9638 = vmatpush.msra.mxu0 %v9563_v60 }
 0x76d   : > { %9662 = vmatpush.msra.mxu1 %v9578_v5 }
 0x76e   : > { %9639 = vmatpush.msra.mxu0 %v9562_v45 }
 0x76f   : > { %9663 = vmatpush.msra.mxu1 %v9577_v6 }
 0x770   : > { %9640 = vmatpush.msra.mxu0 %v9561_v41 }
 0x771   : > { %9664 = vmatpush.msra.mxu1 %v9576_v11 }
 0x772   : > { %9641 = vmatpush.msra.mxu0 %v9560_v31 }
 0x773   : > { %9665 = vmatpush.msra.mxu1 %v9575_v27  ;;  %v11217_v27 = vld [vmem:[%s15420_s6 + $0x38] sm:$0x1] (%p44_p0) }
 0x774   : > { %9642 = vmatpush.msra.mxu0 %v9559_v29  ;;  %11218 = vmatpush.msk.msra.mxu2 (%p44_p0), %vm9628_vm3, %v11217_v27  ;;  %v11290_v27 = vld [vmem:[%s15420_s6 + $0x1b0] sm:$0xff] (%p44_p0) }
 0x775   : > { %9666 = vmatpush.msra.mxu1 %v9574_v54  ;;  %v11215_v54 = vld [vmem:[%s15420_s6 + $0x28] sm:$0xff] (%p44_p0) }
 0x776   : > { %9643 = vmatpush.msra.mxu0 %v9558_v24  ;;  %v11216_v24 = vld [vmem:[%s15420_s6 + $0x30] sm:$0xff] (%p44_p0) }
 0x777   : > { %9667 = vmatpush.msra.mxu1 %v9573_v46  ;;  %9784 = vmatpush.msra.mxu2 (%p44_p0), %v11216_v24  ;;  %v11230_v46 = vld [vmem:[%s15420_s6 + $0x70] sm:$0xff] (%p44_p0)  ;;  %v11270_v24 = vld [vmem:[%s15420_s6 + $0x140] sm:$0xff] (%p44_p0) }
 0x778   : > { %9644 = vmatpush.msra.mxu0 %v9557_v19  ;;  %v11231_v19 = vld [vmem:[%s15420_s6 + $0x78] sm:$0x1] (%p44_p0) }
 0x779   : > { %9668 = vmatpush.msra.mxu1 %v9572_v3  ;;  %11232 = vmatpush.msk.msra.mxu3 (%p44_p0), %vm9628_vm3, %v11231_v19  ;;  %v11229_v3 = vld [vmem:[%s15420_s6 + $0x68] sm:$0xff] (%p44_p0) }
 0x77a   : > { %9645 = vmatpush.msra.mxu0 %v9556_v15  ;;  %v11214_v15 = vld [vmem:[%s15420_s6 + $0x20] sm:$0xff] (%p44_p0)  ;;  %9785 = vmatpush.msra.mxu2 (%p44_p0), %v11215_v54  ;;  %v11301_v54 = vld [vmem:[%s15420_s6 + $0x1e8] sm:$0xff] (%p44_p0) }
 0x77b   : > { %9669 = vmatpush.msra.mxu1 %v9571_v10  ;;  %9877 = vmatpush.msra.mxu3 (%p44_p0), %v11230_v46  ;;  %v9755_v10 = vld [vmem:[%s15420_s6 + $0x18] sm:$0x1] (%p44_p0)  ;;  %v11282_v46 = vld [vmem:[%s15420_s6 + $0x180] sm:$0xff] (%p44_p0) }
 0x77c   : > { %9646 = vmatpush.msra.mxu0 %v9555_v36  ;;  %9786 = vmatpush.msra.mxu2 (%p44_p0), %v11214_v15  ;;  %v11297_v15 = vld [vmem:[%s15420_s6 + $0x1d8] sm:$0x1] (%p44_p0) }
 0x77d   : > { %9670 = vmatpush.msra.mxu1 %v9570_v58  ;;  %9878 = vmatpush.msra.mxu3 (%p44_p0), %v11229_v3  ;;  %v11289_v3 = vld [vmem:[%s15420_s6 + $0x1a8] sm:$0xff] (%p44_p0) }
 0x77e   : > { %9647 = vmatpush.msra.mxu0 %v9554_v34  ;;  %v11228_v34 = vld [vmem:[%s15420_s6 + $0x60] sm:$0xff] (%p44_p0) }
 0x77f   :  { %9879 = vmatpush.msra.mxu3 (%p44_p0), %v11228_v34  ;;  %v11296_v34 = vld [vmem:[%s15420_s6 + $0x1d0] sm:$0xff] (%p44_p0) }
 0x780   : > { %11211 = vmatpush.msk.msrb.mxu0 %vm9628_vm3, %v9620_v44 }
 0x782   : > { %9738 = vmatpush.msrb.mxu0 %v9619_v18  ;;  %v11241_v18 = vld [vmem:[%s15420_s6 + $0xa8] sm:$0xff] (%p44_p0) }
 0x7ab   : > { %v11367_v39 = vpop.permute.xlu2 %11366 }
 0x7ac   : > { %v11369_v30 = vunpack.i.h.bf16 %v11367_v39  ;;  %v11368_v26 = vunpack.i.l.bf16 %v11367_v39  ;;  %v9754_v39 = vld [vmem:[%s15420_s6 + $0x10] sm:$0xff] (%p44_p0) }
 0x7ae   : > { %v9527_v16 = vsel %vm2178_vm11, %v11368_v26, %v11369_v30 }
 0x7af   : > { %v9545_v8 = vmax.f32 %v14862_v63, %v9527_v16  ;;  %v9618_v63 = vld [vmem:[%s15419_s5 + $0x200] sm:$0xff]  ;;  %v11236_v16 = vld [vmem:[%s15420_s6 + $0x90] sm:$0xff] (%p44_p0)  ;;  %s11447_s5 = smov (%p44_p0), [#allocation6]  }
 0x7b0   : > { %9739 = vmatpush.msrb.mxu0 %v9618_v63  ;;  %v11225_v63 = vld [vmem:[%s15420_s6 + $0x58] sm:$0x1] (%p44_p0)  ;;  %s10392_s21 = sshll.u32 (%p44_p0), %s11447_s5, 4  ;;  %s10393_s21 = int_to_ptr.vmem [resolvable:$true] %s10392_s21 }
 0x7b1   : > { %9694 = vmatmul.f32.vlgmr.msrb.gmra.mxu2 %v9545_v8  ;;  %v11243_v8 = vld [vmem:[%s15420_s6 + $0xb8] sm:$0x1] (%p44_p0) }
 0x7b2   :  { %11220 = vmatpush.msk.msrb.mxu2 (%p44_p0), %vm9628_vm3, %v9755_v10 }
 0x7b3   : > { %v9514_v38 = vpop.permute.xlu0 %9513 }
 0x7b4   : > { %v9528_v1 = vsel %vm2178_vm11, %v11369_v30, %v9514_v38  ;;  %v9547_v2 = vmax.f32 %v14812_v57, %v9514_v38  ;;  %v11237_v30 = vld [vmem:[%s15420_s6 + $0x98] sm:$0x1] (%p44_p0)  ;;  %9810 = vmatpush.msrb.mxu2 (%p44_p0), %v9754_v39  ;;  %v11242_v38 = vld [vmem:[%s15420_s6 + $0xb0] sm:$0xff] (%p44_p0) }
 0x7b5   : > { %v9546_v43 = vmax.f32 %v14866_v55, %v9528_v1  ;;  %v9752_v1 = vld [vmem:[%s15420_s6] sm:$0xff] (%p44_p0) }
 0x7b7   : > { %9717 = vmatmul.f32.vlgmr.msrb.gmra.mxu3 %v9546_v43  ;;  %v11235_v43 = vld [vmem:[%s15420_s6 + $0x88] sm:$0xff] (%p44_p0) }
 0x7b8   :  { %11238 = vmatpush.msk.msrb.mxu3 (%p44_p0), %vm9628_vm3, %v11237_v30 }
 0x7ba   :  { %9911 = vmatpush.msrb.mxu3 (%p44_p0), %v11236_v16  ;;  %v11294_v16 = vld [vmem:[%s15420_s6 + $0x1c0] sm:$0xff] (%p44_p0) }
 0x7bc   :  { %9912 = vmatpush.msrb.mxu3 (%p44_p0), %v11235_v43  ;;  %v10311_v43 = vld [vmem:[%s15422_s8 + $0x60] sm:$0xff] (%p44_p0) }
 0x7be   : > { %v11377_v61 = vpop.permute.xlu2 %11376 }
 0x7bf   : > { %v11379_v55 = vunpack.i.h.bf16 %v11377_v61  ;;  %v11378_v50 = vunpack.i.l.bf16 %v11377_v61  ;;  %v11234_v61 = vld [vmem:[%s15420_s6 + $0x80] sm:$0xff] (%p44_p0) }
 0x7c0   :  { %9913 = vmatpush.msrb.mxu3 (%p44_p0), %v11234_v61  ;;  %v10307_v61 = vld [vmem:[%s15422_s8 + $0x40] sm:$0xff] (%p44_p0) }
 0x7c1   : > { %v9531_v47 = vsel %vm2178_vm11, %v11378_v50, %v11379_v55 }
 0x7c2   : > { %v9550_v4 = vmax.f32 %v14940_v33, %v9531_v47  ;;  %v11224_v47 = vld [vmem:[%s15420_s6 + $0x50] sm:$0xff] (%p44_p0) }
 0x7c3   : > { %v11362_v0 = vpop.permute.xlu1 %11361 }
 0x7c4   : > { %9697 = vmatmul.f32.gmra.mxu2 %v9550_v4  ;;  %v11364_v32 = vunpack.i.h.bf16 %v11362_v0  ;;  %v11363_v59 = vunpack.i.l.bf16 %v11362_v0  ;;  %v11255_v4 = vld [vmem:[%s15420_s6 + $0xf8] sm:$0x1] (%p44_p0) }
 0x7c5   :  { %v11261_v0 = vld [vmem:[%s15420_s6 + $0x118] sm:$0x1] (%p44_p0) }
 0x7c6   : > { %v9525_v40 = vsel %vm2178_vm11, %v11363_v59, %v11364_v32  ;;  %v9526_v35 = vsel %vm2178_vm11, %v11364_v32, %v11368_v26  ;;  %v9753_v26 = vld [vmem:[%s15420_s6 + $0x8] sm:$0xff] (%p44_p0) }
 0x7c7   : > { %v9543_v13 = vmax.f32 %v14849_v52, %v9525_v40  ;;  %v9544_v12 = vmax.f32 %v14870_v14, %v9526_v35  ;;  %9811 = vmatpush.msrb.mxu2 (%p44_p0), %v9753_v26  ;;  %v11223_v59 = vld [vmem:[%s15420_s6 + $0x48] sm:$0xff] (%p44_p0)  ;;  %v11254_v40 = vld [vmem:[%s15420_s6 + $0xf0] sm:$0xff] (%p44_p0)  ;;  %v11267_v35 = vld [vmem:[%s15420_s6 + $0x138] sm:$0x1] (%p44_p0) }
 0x7c8   :  { %v11295_v26 = vld [vmem:[%s15420_s6 + $0x1c8] sm:$0xff] (%p44_p0) }
 0x7c9   : > { %9648 = vmatmul.f32.vlgmr.msra.gmra.mxu0 %v9543_v13  ;;  %9671 = vmatmul.f32.vlgmr.msra.gmra.mxu1 %v9544_v12  ;;  %v11260_v13 = vld [vmem:[%s15420_s6 + $0x110] sm:$0xff] (%p44_p0)  ;;  %v11222_v12 = vld [vmem:[%s15420_s6 + $0x40] sm:$0xff] (%p44_p0) }
 0x7ca   :  { %11244 = vmatpush.msk.msra.mxu1 (%p44_p0), %vm9628_vm3, %v11243_v8  ;;  %9812 = vmatpush.msrb.mxu2 (%p44_p0), %v9752_v1  ;;  %v10312_v1 = vld [vmem:[%s15422_s8 + $0x68] sm:$0xff] (%p44_p0) }
 0x7cb   : > { %v11372_v56 = vpop.permute.xlu1 %11371  ;;  %11262 = vmatpush.msk.msra.mxu0 (%p44_p0), %vm9628_vm3, %v11261_v0  ;;  %v10304_v0 = vld [vmem:[%s15422_s8 + $0x28] sm:$0xff] (%p44_p0) }
 0x7cc   : > { %v11374_v20 = vunpack.i.h.bf16 %v11372_v56  ;;  %v11373_v42 = vunpack.i.l.bf16 %v11372_v56  ;;  %9945 = vmatpush.msra.mxu1 (%p44_p0), %v11242_v38  ;;  %v11253_v56 = vld [vmem:[%s15420_s6 + $0xe8] sm:$0xff] (%p44_p0)  ;;  %v10313_v38 = vld [vmem:[%s15422_s8 + $0x70] sm:$0xff] (%p44_p0) }
 0x7cd   :  { %10047 = vmatpush.msra.mxu0 (%p44_p0), %v11260_v13  ;;  %v10301_v13 = vld [vmem:[%s15422_s8 + $0x10] sm:$0xff] (%p44_p0) }
 0x7ce   : > { %v9529_v7 = vsel %vm2178_vm11, %v11373_v42, %v11374_v20  ;;  %v9530_v33 = vsel %vm2178_vm11, %v11374_v20, %v11378_v50  ;;  %v11240_v50 = vld [vmem:[%s15420_s6 + $0xa0] sm:$0xff] (%p44_p0)  ;;  %9946 = vmatpush.msra.mxu1 (%p44_p0), %v11241_v18  ;;  %v11266_v42 = vld [vmem:[%s15420_s6 + $0x130] sm:$0xff] (%p44_p0) }
 0x7cf   : > { %v9548_v37 = vmax.f32 %v14898_v28, %v9529_v7  ;;  %v9549_v62 = vmax.f32 %v14894_v48, %v9530_v33  ;;  %v11249_v7 = vld [vmem:[%s15420_s6 + $0xd8] sm:$0x1] (%p44_p0)  ;;  %v11252_v33 = vld [vmem:[%s15420_s6 + $0xe0] sm:$0xff] (%p44_p0)  ;;  %v10309_v18 = vld [vmem:[%s15422_s8 + $0x50] sm:$0xff] (%p44_p0) }
 0x7d0   :  { %9947 = vmatpush.msra.mxu1 (%p44_p0), %v11240_v50  ;;  %v10306_v50 = vld [vmem:[%s15422_s8 + $0x38] sm:$0xff] (%p44_p0) }
 0x7d1   : > { %9651 = vmatmul.f32.gmra.mxu0 %v9548_v37  ;;  %9674 = vmatmul.f32.gmra.mxu1 %v9549_v62  ;;  %v11259_v62 = vld [vmem:[%s15420_s6 + $0x108] sm:$0xff] (%p44_p0) }
 0x7d2   :  { %11268 = vmatpush.msk.msrb.mxu1 (%p44_p0), %vm9628_vm3, %v11267_v35  ;;  %10048 = vmatpush.msra.mxu0 (%p44_p0), %v11259_v62  ;;  %v10352_v62 = vld [vmem:[%s15424_s10 + $0x48] sm:$0xff] (%p44_p0) }
 0x7d3   : > { %v9524_v9 = vpop.permute.xlu0 %9523 }
 0x7d4   : > { %v9532_v52 = vsel %vm2178_vm11, %v11379_v55, %v9524_v9  ;;  %v9552_v25 = vmax.f32 %v14936_v49, %v9524_v9  ;;  %vm9748_vm11 = vcmask 203776   ;;  %v11248_v9 = vld [vmem:[%s15420_s6 + $0xd0] sm:$0xff] (%p44_p0)  ;;  %10081 = vmatpush.msrb.mxu1 (%p44_p0), %v11266_v42 }
 0x7d5   : > { %v9551_v14 = vmax.f32 %v14944_v23, %v9532_v52  ;;  %v11279_v52 = vld [vmem:[%s15420_s6 + $0x178] sm:$0x1] (%p44_p0) }
 0x7d7   : > { %9720 = vmatmul.f32.gmra.mxu3 %v9551_v14  ;;  %v11247_v14 = vld [vmem:[%s15420_s6 + $0xc8] sm:$0xff] (%p44_p0) }
 0x7d9   : > { %11212 = vmatmul.msk.f32.vlgmr.msrb.gmra.mxu0 %vm9621_vm13, %v9547_v2  ;;  %v11265_v2 = vld [vmem:[%s15420_s6 + $0x128] sm:$0xff] (%p44_p0) }
 0x7da   :  { %10082 = vmatpush.msrb.mxu1 (%p44_p0), %v11265_v2 }
 0x7e1   : > { %11213 = vmatmul.msk.f32.gmra.mxu0 %vm9621_vm13, %v9552_v25  ;;  %v11258_v25 = vld [vmem:[%s15420_s6 + $0x100] sm:$0xff] (%p44_p0) }
 0x7e2   :  { %10049 = vmatpush.msra.mxu0 (%p44_p0), %v11258_v25  ;;  %v10350_v25 = vld [vmem:[%s15424_s10 + $0x38] sm:$0xff] (%p44_p0) }
 0x834   : > { %v9695_v21 = vpop.f32.mrf.mxu2 }
 0x83a   : > { %v9718_v60 = vpop.f32.mrf.mxu3 }
 0x846   : > { %v9649_v17 = vpop.f32.mrf.mxu0  ;;  %v9672_v28 = vpop.f32.mrf.mxu1 }
 0x847   : > { %v9673_v22 = vadd.f32 %v9672_v28, %v9649_v17  ;;  %v9698_v57 = vpop.f32.mrf.mxu2  ;;  %v11278_v17 = vld [vmem:[%s15420_s6 + $0x170] sm:$0xff] (%p44_p0) }
 0x849   : > { %v9696_v53 = vadd.f32 %v9695_v21, %v9673_v22  ;;  %v11264_v22 = vld [vmem:[%s15420_s6 + $0x120] sm:$0xff] (%p44_p0)  ;;  %v11277_v21 = vld [vmem:[%s15420_s6 + $0x168] sm:$0xff] (%p44_p0) }
 0x84a   :  { %10083 = vmatpush.msrb.mxu1 (%p44_p0), %v11264_v22 }
 0x84b   : > { %v9719_v45 = vadd.f32 %v9718_v60, %v9696_v53  ;;  %v11285_v60 = vld [vmem:[%s15420_s6 + $0x198] sm:$0x1] (%p44_p0) }
 0x84c   :  { %11286 = vmatpush.msk.msrb.mxu0 (%p44_p0), %vm9628_vm3, %v11285_v60 }
 0x84e   : > { %v9652_v48 = vpop.f32.mrf.mxu0  ;;  %v9675_v51 = vpop.f32.mrf.mxu1 }
 0x84f   : > { %v9676_v23 = vadd.f32 %v9675_v51, %v9652_v48  ;;  %v11246_v48 = vld [vmem:[%s15420_s6 + $0xc0] sm:$0xff] (%p44_p0)  ;;  %v11273_v51 = vld [vmem:[%s15420_s6 + $0x158] sm:$0x1] (%p44_p0) }
 0x851   : > { %v9699_v6 = vadd.f32 %v9698_v57, %v9676_v23  ;;  %v11303_v57 = vld [vmem:[%s15420_s6 + $0x1f8] sm:$0x1] (%p44_p0) }
 0x856   : > { %v9741_v5 = vpop.f32.mrf.mxu0 }
 0x857   : > { %v9742_v41 = vadd.f32 %v9741_v5, %v9719_v45  ;;  %v11276_v45 = vld [vmem:[%s15420_s6 + $0x160] sm:$0xff] (%p44_p0) }
 0x859   : > { %9749 = vst.msk [vmem:[%s9747_s15] sm:$0xff] %vm9748_vm11, %v9742_v41  ;;  %v11272_v41 = vld [vmem:[%s15420_s6 + $0x150] sm:$0xff] (%p44_p0) }
 0x85a   : > { %v9721_v49 = vpop.f32.mrf.mxu3 }
 0x85b   : > { %v9722_v31 = vadd.f32 %v9721_v49, %v9699_v6  ;;  %v11284_v49 = vld [vmem:[%s15420_s6 + $0x190] sm:$0xff] (%p44_p0)  ;;  %v11291_v6 = vld [vmem:[%s15420_s6 + $0x1b8] sm:$0x1] (%p44_p0) }
 0x85c   :  { %10183 = vmatpush.msrb.mxu0 (%p44_p0), %v11284_v49 }
 0x85d   :  { %46 = sbr.rel (!%p44_p0) target bundleno = 1 (0x1), region = 230 }
 0x85e   : > { %v9744_v11 = vpop.f32.mrf.mxu0 }
 0x85f   : > { %v9745_v29 = vadd.f32 %v9744_v11, %v9722_v31  ;;  %v11271_v31 = vld [vmem:[%s15420_s6 + $0x148] sm:$0xff] (%p44_p0)  ;;  %v11302_v11 = vld [vmem:[%s15420_s6 + $0x1f0] sm:$0xff] (%p44_p0) }
 0x861   : > { %9750 = vst.msk [vmem:[%s9747_s15 + $0x8] sm:$0xff] %vm9748_vm11, %v9745_v29  ;;  %v11283_v29 = vld [vmem:[%s15420_s6 + $0x188] sm:$0xff] (%p44_p0) }
 0x862   :  { %10184 = vmatpush.msrb.mxu0 %v11283_v29 }
 0x864   :  { %10185 = vmatpush.msrb.mxu0 %v11282_v46 }
 0x868   :  { %v9757_v36 = vld [vmem:[#allocation5 + $0x1] ss:$16 sm:$0x3]  ;;  %v9852_v58 = vld [vmem:[#allocation5 + $0x3] ss:$16 sm:$0x3] }
 0x869   :  { %11219 = vmatmul.msk.f32.vlgmr.msra.gmra.mxu2 %vm9748_vm11, %v9757_v36  ;;  %11233 = vmatmul.msk.f32.vlgmr.msra.gmra.mxu3 %vm9748_vm11, %v9852_v58  ;;  %v9751_v44 = vld [vmem:[#allocation5] ss:$16 sm:$0x3]  ;;  %v9886_v55 = vld [vmem:[#allocation5 + $0x4] ss:$16 sm:$0x3] }
 0x86a   :  { %11226 = vmatpush.msk.msra.mxu2 %vm9628_vm3, %v11225_v63  ;;  %v9920_v32 = vld [vmem:[#allocation5 + $0x5] ss:$16 sm:$0x3]  ;;  %11256 = vmatpush.msk.msra.mxu3 %vm9628_vm3, %v11255_v4  ;;  %v9818_v20 = vld [vmem:[#allocation5 + $0x2] ss:$16 sm:$0x3] }
 0x86b   :  { %11245 = vmatmul.msk.f32.vlgmr.msra.gmra.mxu1 %vm9748_vm11, %v9920_v32  ;;  %v9988_v37 = vld [vmem:[#allocation5 + $0x7] ss:$16 sm:$0x3]  ;;  %v10022_v28 = vld [vmem:[#allocation5 + $0x8] ss:$16 sm:$0x3] }
 0x86c   :  { %9843 = vmatpush.msra.mxu2 %v11224_v47  ;;  %10013 = vmatpush.msra.mxu3 %v11254_v40  ;;  %v9954_v53 = vld [vmem:[#allocation5 + $0x6] ss:$16 sm:$0x3]  ;;  %v10124_v5 = vld [vmem:[#allocation5 + $0xb] ss:$16 sm:$0x3] }
 0x86d   :  { %11263 = vmatmul.msk.f32.vlgmr.msra.gmra.mxu0 %vm9748_vm11, %v10022_v28  ;;  %v10056_v23 = vld [vmem:[#allocation5 + $0x9] ss:$16 sm:$0x3]  ;;  %11292 = vmatpush.msk.msra.mxu1 %vm9628_vm3, %v11291_v6  ;;  %v10090_v19 = vld [vmem:[#allocation5 + $0xa] ss:$16 sm:$0x3] }
 0x86e   :  { %9844 = vmatpush.msra.mxu2 %v11223_v59  ;;  %10014 = vmatpush.msra.mxu3 %v11253_v56  ;;  %v11300_v36 = vld [vmem:[%s15420_s6 + $0x1e0] sm:$0xff]  ;;  %v10308_v63 = vld [vmem:[%s15422_s8 + $0x48] sm:$0xff]  ;;  %v10305_v4 = vld [vmem:[%s15422_s8 + $0x30] sm:$0xff] }
 0x86f   :  { %10217 = vmatpush.msra.mxu1 %v11290_v27  ;;  %v10158_v10 = vld [vmem:[#allocation5 + $0xc] ss:$16 sm:$0x3]  ;;  %v10260_v39 = vld [vmem:[#allocation5 + $0xf] ss:$16 sm:$0x3]  ;;  %10323 = vmatpush.msra.mxu0 %v10313_v38 }
 0x870   :  { %9845 = vmatpush.msra.mxu2 %v11222_v12  ;;  %10015 = vmatpush.msra.mxu3 %v11252_v33  ;;  %v11288_v58 = vld [vmem:[%s15420_s6 + $0x1a0] sm:$0xff]  ;;  %v10302_v40 = vld [vmem:[%s15422_s8 + $0x18] sm:$0xff]  ;;  %v10300_v12 = vld [vmem:[%s15422_s8 + $0x8] sm:$0xff] }
 0x871   :  { %11221 = vmatmul.msk.f32.vlgmr.msrb.gmra.mxu2 %vm9748_vm11, %v9751_v44  ;;  %11239 = vmatmul.msk.f32.vlgmr.msrb.gmra.mxu3 %vm9748_vm11, %v9886_v55  ;;  %v10192_v30 = vld [vmem:[#allocation5 + $0xd] ss:$16 sm:$0x3]  ;;  %v10226_v8 = vld [vmem:[#allocation5 + $0xe] ss:$16 sm:$0x3] }
 0x872   :  { %11250 = vmatpush.msk.msrb.mxu2 %vm9628_vm3, %v11249_v7  ;;  %11280 = vmatpush.msk.msrb.mxu3 %vm9628_vm3, %v11279_v52  ;;  %v10310_v44 = vld [vmem:[%s15422_s8 + $0x58] sm:$0xff]  ;;  %v10303_v32 = vld [vmem:[%s15422_s8 + $0x20] sm:$0xff]  ;;  %v10349_v28 = vld [vmem:[%s15424_s10 + $0x30] sm:$0xff] }
 0x873   :  { %11269 = vmatmul.msk.f32.vlgmr.msrb.gmra.mxu1 %vm9748_vm11, %v10056_v23  ;;  %10324 = vmatpush.msra.mxu0 %v10312_v1  ;;  %v10351_v52 = vld [vmem:[%s15424_s10 + $0x40] sm:$0xff]  ;;  %v10346_v23 = vld [vmem:[%s15424_s10 + $0x18] sm:$0xff] }
 0x874   :  { %9979 = vmatpush.msrb.mxu2 %v11248_v9  ;;  %10149 = vmatpush.msrb.mxu3 %v11278_v17  ;;  %v11388_v38 = vld [vmem:[%s15425_s11] ss:$0 sm:$0xff] }
 0x875   :  { %10218 = vmatpush.msra.mxu1 %v11289_v3  ;;  %11287 = vmatmul.msk.f32.vlgmr.msrb.gmra.mxu0 %vm9748_vm11, %v10158_v10 }
 0x876   :  { %9980 = vmatpush.msrb.mxu2 %v11247_v14  ;;  %10150 = vmatpush.msrb.mxu3 %v11277_v21 }
 0x877   :  { %10219 = vmatpush.msra.mxu1 %v11288_v58  ;;  %10325 = vmatpush.msra.mxu0 %v10311_v43  ;;  %v10344_v58 = vld [vmem:[%s15424_s10 + $0x8] sm:$0xff] }
 0x878   :  { %9981 = vmatpush.msrb.mxu2 %v11246_v48  ;;  %10151 = vmatpush.msrb.mxu3 %v11276_v45  ;;  %v10347_v45 = vld [vmem:[%s15424_s10 + $0x20] sm:$0xff] }
 0x879   :  { %11227 = vmatmul.msk.f32.vlgmr.msra.gmra.mxu2 %vm9748_vm11, %v9818_v20  ;;  %11257 = vmatmul.msk.f32.vlgmr.msra.gmra.mxu3 %vm9748_vm11, %v9988_v37  ;;  %v10299_v20 = vld [vmem:[%s15422_s8] sm:$0xff]  ;;  %v10353_v37 = vld [vmem:[%s15424_s10 + $0x50] sm:$0xf] }
 0x87a   :  { %11274 = vmatpush.msk.msra.mxu2 %vm9628_vm3, %v11273_v51  ;;  %11304 = vmatpush.msk.msra.mxu3 %vm9628_vm3, %v11303_v57 }
 0x87b   :  { %11293 = vmatmul.msk.f32.vlgmr.msra.gmra.mxu1 %vm9748_vm11, %v10192_v30  ;;  %10326 = vmatpush.msra.mxu0 %v10310_v44  ;;  %v11387_v30 = vld [vmem:[%s15423_s9] ss:$0 sm:$0xff] }
 0x87c   :  { %10115 = vmatpush.msra.mxu2 %v11272_v41  ;;  %10285 = vmatpush.msra.mxu3 %v11302_v11 }
 0x87d   :  { %10327 = vmatpush.msra.mxu0 %v10309_v18  ;;  %11307 = vmatpush.msk.msrb.mxu1 %vm10362_vm15, %v10353_v37 }
 0x87e   :  { %10116 = vmatpush.msra.mxu2 %v11271_v31  ;;  %10286 = vmatpush.msra.mxu3 %v11301_v54 }
 0x87f   :  { %10328 = vmatpush.msra.mxu0 %v10308_v63  ;;  %10372 = vmatpush.msrb.mxu1 %v10352_v62 }
 0x880   :  { %10117 = vmatpush.msra.mxu2 %v11270_v24  ;;  %10287 = vmatpush.msra.mxu3 %v11300_v36 }
 0x881   :  { %11251 = vmatmul.msk.f32.vlgmr.msrb.gmra.mxu2 %vm9748_vm11, %v9954_v53  ;;  %11281 = vmatmul.msk.f32.vlgmr.msrb.gmra.mxu3 %vm9748_vm11, %v10124_v5  ;;  %v10348_v53 = vld [vmem:[%s15424_s10 + $0x28] sm:$0xff] }
 0x882   :  { %11298 = vmatpush.msk.msrb.mxu2 %vm9628_vm3, %v11297_v15  ;;  %10329 = vmatpush.msra.mxu0 %v10307_v61  ;;  %v11386_v15 = vld [vmem:[%s15421_s7] ss:$0 sm:$0xff] }
 0x883   :  { %10373 = vmatpush.msrb.mxu1 %v10351_v52 }
 0x884   :  { %10251 = vmatpush.msrb.mxu2 %v11296_v34  ;;  %10330 = vmatpush.msra.mxu0 %v10306_v50  ;;  %v10345_v34 = vld [vmem:[%s15424_s10 + $0x10] sm:$0xff] }
 0x885   :  { %10374 = vmatpush.msrb.mxu1 %v10350_v25 }
 0x886   :  { %10252 = vmatpush.msrb.mxu2 %v11295_v26  ;;  %10331 = vmatpush.msra.mxu0 %v10305_v4 }
 0x887   :  { %10375 = vmatpush.msrb.mxu1 %v10349_v28 }
 0x888   :  { %10253 = vmatpush.msrb.mxu2 %v11294_v16  ;;  %10332 = vmatpush.msra.mxu0 %v10304_v0 }
 0x889   :  { %11275 = vmatmul.msk.f32.vlgmr.msra.gmra.mxu2 %vm9748_vm11, %v10090_v19  ;;  %11305 = vmatmul.msk.f32.vlgmr.msra.gmra.mxu3 %vm9748_vm11, %v10260_v39  ;;  %v10343_v39 = vld [vmem:[%s15424_s10] sm:$0xff]  ;;  %s10394_s10 = sshll.u32 %s15426_s12, 4  ;;  %s10395_s10 = int_to_ptr.hbm [resolvable:$true] %s10394_s10 }
 0x88a   :  { %10333 = vmatpush.msra.mxu0 %v10303_v32  ;;  %10376 = vmatpush.msrb.mxu1 %v10348_v53 }
 0x88c   :  { %10334 = vmatpush.msra.mxu0 %v10302_v40  ;;  %10377 = vmatpush.msrb.mxu1 %v10347_v45 }
 0x88e   :  { %10335 = vmatpush.msra.mxu0 %v10301_v13  ;;  %10378 = vmatpush.msrb.mxu1 %v10346_v23 }
 0x890   :  { %10336 = vmatpush.msra.mxu0 %v10300_v12  ;;  %10379 = vmatpush.msrb.mxu1 %v10345_v34 }
 0x891   :  { %11299 = vmatmul.msk.f32.vlgmr.msrb.gmra.mxu2 %vm9748_vm11, %v10226_v8 }
 0x892   :  { %10337 = vmatpush.msra.mxu0 %v10299_v20  ;;  %10380 = vmatpush.msrb.mxu1 %v10344_v58 }
 0x894   :  { %10381 = vmatpush.msrb.mxu1 %v10343_v39 }
 0x8e8   :  { %v9949_v7 = vpop.f32.mrf.mxu1 }
 0x8ea   :  { %v10051_v48 = vpop.f32.mrf.mxu0 }
 0x8ec   :  { %v9788_v55 = vpop.f32.mrf.mxu2  ;;  %v9881_v47 = vpop.f32.mrf.mxu3 }
 0x8f0   :  { %v10085_v60 = vpop.f32.mrf.mxu1 }
 0x8f2   :  { %v10187_v31 = vpop.f32.mrf.mxu0 }
 0x8f4   :  { %v9814_v59 = vpop.f32.mrf.mxu2  ;;  %v9915_v35 = vpop.f32.mrf.mxu3 }
 0x8f5   :  { %v9815_v56 = vadd.f32 %v9814_v59, %v9788_v55 }
 0x8f8   :  { %v10221_v29 = vpop.f32.mrf.mxu1 }
 0x8fc   :  { %v9847_v42 = vpop.f32.mrf.mxu2  ;;  %v10017_v14 = vpop.f32.mrf.mxu3 }
 0x8fd   :  { %v9850_v33 = vadd.f32 %v9847_v42, %v9815_v56 }
 0x8ff   :  { %v9884_v9 = vadd.f32 %v9881_v47, %v9850_v33 }
 0x901   :  { %v9918_v2 = vadd.f32 %v9915_v35, %v9884_v9 }
 0x903   :  { %v9952_v17 = vadd.f32 %v9949_v7, %v9918_v2 }
 0x904   :  { %v9983_v22 = vpop.f32.mrf.mxu2  ;;  %v10153_v41 = vpop.f32.mrf.mxu3 }
 0x905   :  { %v9986_v21 = vadd.f32 %v9983_v22, %v9952_v17 }
 0x907   :  { %v10020_v51 = vadd.f32 %v10017_v14, %v9986_v21 }
 0x909   :  { %v10054_v5 = vadd.f32 %v10051_v48, %v10020_v51 }
 0x90b   :  { %v10088_v57 = vadd.f32 %v10085_v60, %v10054_v5 }
 0x90c   :  { %v10119_v49 = vpop.f32.mrf.mxu2  ;;  %v10289_v19 = vpop.f32.mrf.mxu3 }
 0x90d   :  { %v10122_v6 = vadd.f32 %v10119_v49, %v10088_v57 }
 0x90f   :  { %v10156_v11 = vadd.f32 %v10153_v41, %v10122_v6 }
 0x911   :  { %v10190_v27 = vadd.f32 %v10187_v31, %v10156_v11 }
 0x913   :  { %v10224_v24 = vadd.f32 %v10221_v29, %v10190_v27 }
 0x914   :  { %v10255_v54 = vpop.f32.mrf.mxu2 }
 0x915   :  { %v10258_v46 = vadd.f32 %v10255_v54, %v10224_v24 }
 0x917   :  { %v10292_v3 = vadd.f32 %v10289_v19, %v10258_v46 }
 0x919   :  { %v10297_v36 = vadd.f32 %v11386_v15, %v10292_v3 }
 0x91b   :  { %v10298_v10 = vmax.f32 %v10297_v36, 0.0 }
 0x91d   :  { %11306 = vmatmul.msk.f32.vlgmr.msra.gmra.mxu0 %vm6050_vm6, %v10298_v10 }
 0x99a   :  { %v10339_v26 = vpop.f32.mrf.mxu0 }
 0x99b   :  { %v10340_v16 = vadd.f32 %v11387_v30, %v10339_v26 }
 0x99d   :  { %v10342_v8 = vmax.f32 %v10340_v16, 0.0 }
 0x99f   :  { %11308 = vmatmul.msk.f32.vlgmr.msrb.gmra.mxu1 %vm10358_vm8, %v10342_v8 }
 0xa1c   :  { %v10383_v1 = vpop.f32.mrf.mxu1 }
 0xa1d   :  { %v10384_v43 = vadd.f32 %v11388_v38, %v10383_v1 }
 0xa1f   :  { %10386 = vst [vmem:[#allocation6] sm:$0x3] %v10384_v43 }
 0xa20   :  { %10397 = dma.vmem_to_hbm [thread:$0]  %s10393_s21, 32, %s10395_s10, [#allocation7]  }
 0xa21   :  { %11417 = dma.done.wait [#allocation7], 32  }
 0xa22   :  { %11418 = vsyncadd [#allocation7], 4294967264 }
 0xa23   :  { %10402 = vsyncpa [#allocation7], 1 }

</bundles_post_ra>
